<compile_context>
chip_gen: v6e
topology: v6e:2x2x1
jax: 0.10.0
libtpu: 0.0.40
codegen_flags: <defaults>
</compile_context>

<pallas_src>
import jax
import jax.numpy as jnp
import numpy as np
from jax.experimental import pallas as pl
from jax.experimental.pallas import tpu as pltpu


def _round_up(x, m):
    return (x + m - 1) // m * m


def _default_batch_block(B):
    """Whole batch per grid point on single-TC chips; B/2 on v7x megacore."""
    try:
        kind = jax.devices()[0].device_kind.lower()
        two_cores = ("v7" in kind) or ("7x" in kind)
    except Exception:  # pragma: no cover - detection is best-effort
        two_cores = False
    if two_cores and B % 16 == 0:      # each half stays sublane-aligned (mult of 8)
        return B // 2
    return B


# ----------------------------------------------------------------------------
# Pallas GRU kernel: one grid point == one batch block, full sequence inside.
# ----------------------------------------------------------------------------
def _encoder_gru_kernel(emb_ref, wih_ref, whh_ref, bi_ref, bhhn_ref,
                        h_out_ref, gi_ref):
    """
    emb_ref  : (S, Bb, Ep)   bfloat16 embedded inputs for this batch block
    wih_ref  : (Ep, 3Hp)     bfloat16 W_ih^T   (gate order r, z, n — PyTorch)
    whh_ref  : (Hp, 3Hp)     bfloat16 W_hh^T
    bi_ref   : (1, 3Hp)      float32  b_ih + [b_hh_r, b_hh_z, 0]  (folded)
    bhhn_ref : (1, Hp)       float32  b_hh_n (stays inside the r * (.) term)
    h_out_ref: (1, Bb, Hp)   float32  final hidden state for this batch block
    gi_ref   : (S, Bb, 3Hp)  float32  VMEM scratch: precomputed input proj.
    """
    S, Bb, Ep = emb_ref.shape
    Hp = whh_ref.shape[0]

    # ---- Input projection: one big matmul, off the sequential critical path.
    emb2d = emb_ref[...].reshape(S * Bb, Ep)                    # bf16
    gi = jnp.dot(emb2d, wih_ref[...], preferred_element_type=jnp.float32)
    gi_ref[...] = (gi + bi_ref[...]).reshape(S, Bb, 3 * Hp)     # f32

    # Hoist the small (Bb, Hp) broadcast out of the unrolled loop
    # (broadcast_in_dim is not CSE'd across unrolled iterations).
    bhh_n = jnp.broadcast_to(bhhn_ref[...], (Bb, Hp)).astype(jnp.float32)

    # ---- Step 0: h0 == 0  =>  gh == 0, skip the hidden matmul entirely.
    gi0 = gi_ref[0]                                             # (Bb, 3Hp) f32
    r0 = jax.nn.sigmoid(gi0[:, :Hp])
    z0 = jax.nn.sigmoid(gi0[:, Hp:2 * Hp])
    n0 = jnp.tanh(gi0[:, 2 * Hp:] + r0 * bhh_n)
    h1 = (1.0 - z0) * n0                                        # (Bb, Hp) f32

    # ---- Sequential recurrence: one small (Bb,Hp)@(Hp,3Hp) matmul + f32 gates.
    def step(t, h):
        gi_t = gi_ref[t]                                        # (Bb, 3Hp) f32
        # Read W_hh^T inside the body so it is not a live value spanning the
        # unrolled loop (avoids vreg spills); vld slots are cheap.
        gh = jnp.dot(h.astype(jnp.bfloat16), whh_ref[...],
                     preferred_element_type=jnp.float32)        # (Bb, 3Hp) f32
        r = jax.nn.sigmoid(gi_t[:, :Hp] + gh[:, :Hp])
        z = jax.nn.sigmoid(gi_t[:, Hp:2 * Hp] + gh[:, Hp:2 * Hp])
        n = jnp.tanh(gi_t[:, 2 * Hp:] + r * (gh[:, 2 * Hp:] + bhh_n))
        return (1.0 - z) * n + z * h

    h_last = jax.lax.fori_loop(1, S, step, h1,
                               unroll=(True if S <= 16 else 4))
    h_out_ref[0] = h_last.astype(h_out_ref.dtype)


def gru_last_hidden(embedded, w_ih, w_hh, b_ih, b_hh, *, batch_block=None):
    """embedded: (S, B, E).  Returns final hidden (1, B, H) float32."""
    S, B, E = embedded.shape
    H = w_hh.shape[1]

    if S == 0:  # empty sequence: hidden stays at its zero init
        return jnp.zeros((1, B, H), jnp.float32)

    if batch_block is None:
        batch_block = _default_batch_block(B)
    assert B % batch_block == 0, "batch must be divisible by batch_block"
    nb = B // batch_block

    # Lane-align hidden / embed dims (per-gate zero padding; padded hidden
    # lanes provably stay zero through the recurrence).
    Hp = _round_up(H, 128)
    Ep = _round_up(E, 128)

    emb = embedded.astype(jnp.bfloat16)
    if Ep != E:
        emb = jnp.pad(emb, ((0, 0), (0, 0), (0, Ep - E)))

    def pad_gates(x, axis):
        if Hp == H:
            return x
        parts = jnp.split(x, 3, axis=axis)
        pads = [(0, 0)] * x.ndim
        pads[axis] = (0, Hp - H)
        return jnp.concatenate([jnp.pad(p, pads) for p in parts], axis=axis)

    w_ih_p = pad_gates(w_ih, 0)                                  # (3Hp, E)
    if Ep != E:
        w_ih_p = jnp.pad(w_ih_p, ((0, 0), (0, Ep - E)))          # (3Hp, Ep)
    w_hh_p = pad_gates(w_hh, 0)                                  # (3Hp, H)
    if Hp != H:
        w_hh_p = jnp.pad(w_hh_p, ((0, 0), (0, Hp - H)))          # (3Hp, Hp)
    b_ih_p = pad_gates(b_ih, 0)                                  # (3Hp,)
    b_hh_p = pad_gates(b_hh, 0)                                  # (3Hp,)

    # bf16 MXU operands, f32 accumulation / gate math.
    wih_t = w_ih_p.T.astype(jnp.bfloat16)                        # (Ep, 3Hp)
    whh_t = w_hh_p.T.astype(jnp.bfloat16)                        # (Hp, 3Hp)
    # Fold b_hh_r / b_hh_z into the precomputed input projection.
    bi = (b_ih_p + jnp.concatenate(
        [b_hh_p[:2 * Hp], jnp.zeros((Hp,), b_hh_p.dtype)])
          ).reshape(1, 3 * Hp).astype(jnp.float32)
    bhh_n = b_hh_p[2 * Hp:].reshape(1, Hp).astype(jnp.float32)

    # TODO(synk): for very long sequences, chunk the gi scratch (or store it
    # in bf16) and set vmem_limit_bytes to fit v7x's 64 MiB VMEM.
    hidden_p = pl.pallas_call(
        _encoder_gru_kernel,
        out_shape=jax.ShapeDtypeStruct((1, B, Hp), jnp.float32),
        grid_spec=pltpu.PrefetchScalarGridSpec(
            num_scalar_prefetch=0,
            grid=(nb,),                                # independent batch blocks
            in_specs=[
                pl.BlockSpec((S, batch_block, Ep), lambda b: (0, b, 0)),  # emb
                pl.BlockSpec((Ep, 3 * Hp), lambda b: (0, 0)),             # W_ih^T
                pl.BlockSpec((Hp, 3 * Hp), lambda b: (0, 0)),             # W_hh^T
                pl.BlockSpec((1, 3 * Hp), lambda b: (0, 0)),              # folded bias
                pl.BlockSpec((1, Hp), lambda b: (0, 0)),                  # b_hh_n
            ],
            out_specs=pl.BlockSpec((1, batch_block, Hp), lambda b: (0, b, 0)),
            scratch_shapes=[pltpu.VMEM((S, batch_block, 3 * Hp), jnp.float32)],
        ),
        compiler_params=pltpu.CompilerParams(
            # batch blocks are independent -> megacore can split them (v7x)
            dimension_semantics=("parallel",)),
    )(emb, wih_t, whh_t, bi, bhh_n)

    return hidden_p[:, :, :H]


# ----------------------------------------------------------------------------
# Encoder forward (Embedding -> Dropout(eval) -> GRU -> hidden)
# ----------------------------------------------------------------------------
def encoder_forward(src, params, *, batch_block=None):
    """src: (S, B) int32 token ids.  Returns hidden: (1, B, hidden_dim)."""
    # Gather from a bf16 table so the (S,B,E) HBM->VMEM DMA is half-width.
    emb = params["embedding"].astype(jnp.bfloat16)[src]   # plain-JAX glue
    # nn.Dropout in eval mode is identity (deterministic forward pass).
    # TODO(synk): stochastic dropout (training mode) not implemented.
    return gru_last_hidden(
        emb, params["w_ih"], params["w_hh"], params["b_ih"], params["b_hh"],
        batch_block=batch_block)


# Pure-JAX reference (lax.scan GRU) using the same bf16-operand / f32-accum math.
def encoder_forward_ref(src, params):
    emb = params["embedding"][src].astype(jnp.bfloat16)
    w_ih = params["w_ih"].astype(jnp.bfloat16)
    w_hh = params["w_hh"].astype(jnp.bfloat16)
    b_ih = params["b_ih"].astype(jnp.float32)
    b_hh = params["b_hh"].astype(jnp.float32)
    H = params["w_hh"].shape[1]
    B = src.shape[1]

    def step(h, x_t):
        gi = jnp.dot(x_t, w_ih.T, preferred_element_type=jnp.float32) + b_ih
        gh = jnp.dot(h.astype(jnp.bfloat16), w_hh.T,
                     preferred_element_type=jnp.float32) + b_hh
        r = jax.nn.sigmoid(gi[:, :H] + gh[:, :H])
        z = jax.nn.sigmoid(gi[:, H:2 * H] + gh[:, H:2 * H])
        n = jnp.tanh(gi[:, 2 * H:] + r * gh[:, 2 * H:])
        return (1.0 - z) * n + z * h, None

    h0 = jnp.zeros((B, H), jnp.float32)
    h_last, _ = jax.lax.scan(step, h0, emb)
    return h_last[None]


if __name__ == "__main__":
    # Small shapes consistent with the module's forward:
    #   src: (seq_len, batch) integer tokens; Embedding(input_dim, embed_dim);
    #   GRU(embed_dim, hidden_dim) -> hidden (1, batch, hidden_dim).
    INPUT_DIM = 50        # vocab size
    EMBED_DIM = 128       # matches module's embed_dim
    HIDDEN_DIM = 254      # matches module's hidden_dim (lane-padded internally)
    SEQ_LEN = 12
    BATCH = 16

    key = jax.random.PRNGKey(0)
    k_emb, k_wih, k_whh, k_bih, k_bhh, k_src = jax.random.split(key, 6)

    params = {
        "embedding": 0.1 * jax.random.normal(k_emb, (INPUT_DIM, EMBED_DIM), jnp.float32),
        "w_ih": 0.1 * jax.random.normal(k_wih, (3 * HIDDEN_DIM, EMBED_DIM), jnp.float32),
        "w_hh": 0.1 * jax.random.normal(k_whh, (3 * HIDDEN_DIM, HIDDEN_DIM), jnp.float32),
        "b_ih": 0.1 * jax.random.normal(k_bih, (3 * HIDDEN_DIM,), jnp.float32),
        "b_hh": 0.1 * jax.random.normal(k_bhh, (3 * HIDDEN_DIM,), jnp.float32),
    }

    src = jax.random.randint(k_src, (SEQ_LEN, BATCH), 0, INPUT_DIM, dtype=jnp.int32)

    hidden = jax.block_until_ready(encoder_forward(src, params))
    hidden_ref = jax.block_until_ready(encoder_forward_ref(src, params))

    assert hidden.shape == (1, BATCH, HIDDEN_DIM), hidden.shape
    np.testing.assert_allclose(np.asarray(hidden), np.asarray(hidden_ref),
                               rtol=1e-3, atol=1e-3)
    print("KERNEL_OK")
</pallas_src>

<mosaic_0001>
module attributes {stable_mosaic.version = 11 : i64} {
  func.func @_encoder_gru_kernel(%arg0: i32, %arg1: memref<12x16x128xbf16, #tpu.memory_space<vmem>>, %arg2: memref<128x768xbf16, #tpu.memory_space<vmem>>, %arg3: memref<256x768xbf16, #tpu.memory_space<vmem>>, %arg4: memref<1x768xf32, #tpu.memory_space<vmem>>, %arg5: memref<1x256xf32, #tpu.memory_space<vmem>>, %arg6: memref<1x16x256xf32, #tpu.memory_space<vmem>>, %arg7: memref<12x16x768xf32, #tpu.memory_space<vmem>>) attributes {dimension_semantics = [#tpu.dimension_semantics<parallel>], iteration_bounds = array<i64: 1>, scalar_prefetch = 0 : i64, scratch_operands = 1 : i64, tpu.core_type = #tpu.core_type<tc>, window_params = [{transform_indices = @transform_0, window_bounds = array<i64: 12, 16, 128>}, {pipeline_mode = #tpu.pipeline_mode<synchronous>, transform_indices = @transform_1, window_bounds = array<i64: 128, 768>}, {pipeline_mode = #tpu.pipeline_mode<synchronous>, transform_indices = @transform_2, window_bounds = array<i64: 256, 768>}, {pipeline_mode = #tpu.pipeline_mode<synchronous>, transform_indices = @transform_3, window_bounds = array<i64: 1, 768>}, {pipeline_mode = #tpu.pipeline_mode<synchronous>, transform_indices = @transform_4, window_bounds = array<i64: 1, 256>}, {transform_indices = @transform_5, window_bounds = array<i64: 1, 16, 256>}]} {
    %c0 = arith.constant 0 : index
    %c0_0 = arith.constant 0 : index
    %c0_1 = arith.constant 0 : index
    %0 = vector.load %arg1[%c0, %c0_0, %c0_1] : memref<12x16x128xbf16, #tpu.memory_space<vmem>>, vector<12x16x128xbf16>
    %1 = vector.shape_cast %0 : vector<12x16x128xbf16> to vector<192x128xbf16>
    %c0_2 = arith.constant 0 : index
    %c0_3 = arith.constant 0 : index
    %2 = vector.load %arg2[%c0_2, %c0_3] : memref<128x768xbf16, #tpu.memory_space<vmem>>, vector<128x768xbf16>
    %cst = arith.constant dense<0.000000e+00> : vector<192x768xf32>
    %3 = tpu.matmul %1, %2, %cst {dimension_numbers = #tpu.dot_dimension_numbers<[1], [0], [0], [1], [0, 0, 1, 1], [], []>} : vector<192x128xbf16>, vector<128x768xbf16>, vector<192x768xf32> -> vector<192x768xf32>
    %c0_4 = arith.constant 0 : index
    %c0_5 = arith.constant 0 : index
    %4 = vector.load %arg4[%c0_4, %c0_5] : memref<1x768xf32, #tpu.memory_space<vmem>>, vector<1x768xf32>
    %5 = vector.broadcast %4 : vector<1x768xf32> to vector<192x768xf32>
    %6 = arith.addf %3, %5 : vector<192x768xf32>
    %7 = vector.shape_cast %6 : vector<192x768xf32> to vector<12x16x768xf32>
    %c0_6 = arith.constant 0 : index
    %c0_7 = arith.constant 0 : index
    %c0_8 = arith.constant 0 : index
    %8 = vector.load %arg7[%c0_6, %c0_7, %c0_8] : memref<12x16x768xf32, #tpu.memory_space<vmem>>, vector<12x16x768xf32>
    tpu.vector_store %arg7[%c0_6, %c0_7, %c0_8], %7 {strides = array<i32>} : memref<12x16x768xf32, #tpu.memory_space<vmem>>, vector<12x16x768xf32>,
    %c0_9 = arith.constant 0 : index
    %c0_10 = arith.constant 0 : index
    %9 = vector.load %arg5[%c0_9, %c0_10] : memref<1x256xf32, #tpu.memory_space<vmem>>, vector<1x256xf32>
    %10 = vector.shape_cast %9 : vector<1x256xf32> to vector<1x256xf32>
    %11 = vector.broadcast %10 : vector<1x256xf32> to vector<16x256xf32>
    %c0_11 = arith.constant 0 : index
    %c0_12 = arith.constant 0 : index
    %c0_13 = arith.constant 0 : index
    %12 = vector.load %arg7[%c0_11, %c0_12, %c0_13] : memref<12x16x768xf32, #tpu.memory_space<vmem>>, vector<1x16x768xf32>
    %13 = vector.shape_cast %12 : vector<1x16x768xf32> to vector<16x768xf32>
    %14 = vector.extract_strided_slice %13 {offsets = [0, 0], sizes = [16, 256], strides = [1, 1]} : vector<16x768xf32> to vector<16x256xf32>
    %15 = arith.negf %14 : vector<16x256xf32>
    %16 = math.exp %15 : vector<16x256xf32>
    %cst_14 = arith.constant 1.000000e+00 : f32
    %17 = vector.broadcast %cst_14 : f32 to vector<16x256xf32>
    %18 = arith.addf %17, %16 : vector<16x256xf32>
    %19 = arith.divf %17, %18 : vector<16x256xf32>
    %20 = vector.extract_strided_slice %13 {offsets = [0, 256], sizes = [16, 256], strides = [1, 1]} : vector<16x768xf32> to vector<16x256xf32>
    %21 = arith.negf %20 : vector<16x256xf32>
    %22 = math.exp %21 : vector<16x256xf32>
    %cst_15 = arith.constant 1.000000e+00 : f32
    %23 = vector.broadcast %cst_15 : f32 to vector<16x256xf32>
    %24 = arith.addf %23, %22 : vector<16x256xf32>
    %25 = arith.divf %23, %24 : vector<16x256xf32>
    %26 = vector.extract_strided_slice %13 {offsets = [0, 512], sizes = [16, 256], strides = [1, 1]} : vector<16x768xf32> to vector<16x256xf32>
    %27 = arith.mulf %19, %11 : vector<16x256xf32>
    %28 = arith.addf %26, %27 : vector<16x256xf32>
    %29 = math.tanh %28 : vector<16x256xf32>
    %cst_16 = arith.constant 1.000000e+00 : f32
    %30 = vector.broadcast %cst_16 : f32 to vector<16x256xf32>
    %31 = arith.subf %30, %25 : vector<16x256xf32>
    %32 = arith.mulf %31, %29 : vector<16x256xf32>
    %c1_i32 = arith.constant 1 : i32
    %33 = arith.index_cast %c1_i32 : i32 to index
    %c0_17 = arith.constant 0 : index
    %c0_18 = arith.constant 0 : index
    %34 = vector.load %arg7[%33, %c0_17, %c0_18] : memref<12x16x768xf32, #tpu.memory_space<vmem>>, vector<1x16x768xf32>
    %35 = vector.shape_cast %34 : vector<1x16x768xf32> to vector<16x768xf32>
    %36 = arith.truncf %32 : vector<16x256xf32> to vector<16x256xbf16>
    %c0_19 = arith.constant 0 : index
    %c0_20 = arith.constant 0 : index
    %37 = vector.load %arg3[%c0_19, %c0_20] : memref<256x768xbf16, #tpu.memory_space<vmem>>, vector<256x768xbf16>
    %cst_21 = arith.constant dense<0.000000e+00> : vector<16x768xf32>
    %38 = tpu.matmul %36, %37, %cst_21 {dimension_numbers = #tpu.dot_dimension_numbers<[1], [0], [0], [1], [0, 0, 1, 1], [], []>} : vector<16x256xbf16>, vector<256x768xbf16>, vector<16x768xf32> -> vector<16x768xf32>
    %39 = vector.extract_strided_slice %35 {offsets = [0, 0], sizes = [16, 256], strides = [1, 1]} : vector<16x768xf32> to vector<16x256xf32>
    %40 = vector.extract_strided_slice %38 {offsets = [0, 0], sizes = [16, 256], strides = [1, 1]} : vector<16x768xf32> to vector<16x256xf32>
    %41 = arith.addf %39, %40 : vector<16x256xf32>
    %42 = arith.negf %41 : vector<16x256xf32>
    %43 = math.exp %42 : vector<16x256xf32>
    %cst_22 = arith.constant 1.000000e+00 : f32
    %44 = vector.broadcast %cst_22 : f32 to vector<16x256xf32>
    %45 = arith.addf %44, %43 : vector<16x256xf32>
    %46 = arith.divf %44, %45 : vector<16x256xf32>
    %47 = vector.extract_strided_slice %35 {offsets = [0, 256], sizes = [16, 256], strides = [1, 1]} : vector<16x768xf32> to vector<16x256xf32>
    %48 = vector.extract_strided_slice %38 {offsets = [0, 256], sizes = [16, 256], strides = [1, 1]} : vector<16x768xf32> to vector<16x256xf32>
    %49 = arith.addf %47, %48 : vector<16x256xf32>
    %50 = arith.negf %49 : vector<16x256xf32>
    %51 = math.exp %50 : vector<16x256xf32>
    %cst_23 = arith.constant 1.000000e+00 : f32
    %52 = vector.broadcast %cst_23 : f32 to vector<16x256xf32>
    %53 = arith.addf %52, %51 : vector<16x256xf32>
    %54 = arith.divf %52, %53 : vector<16x256xf32>
    %55 = vector.extract_strided_slice %35 {offsets = [0, 512], sizes = [16, 256], strides = [1, 1]} : vector<16x768xf32> to vector<16x256xf32>
    %56 = vector.extract_strided_slice %38 {offsets = [0, 512], sizes = [16, 256], strides = [1, 1]} : vector<16x768xf32> to vector<16x256xf32>
    %57 = arith.addf %56, %11 : vector<16x256xf32>
    %58 = arith.mulf %46, %57 : vector<16x256xf32>
    %59 = arith.addf %55, %58 : vector<16x256xf32>
    %60 = math.tanh %59 : vector<16x256xf32>
    %cst_24 = arith.constant 1.000000e+00 : f32
    %61 = vector.broadcast %cst_24 : f32 to vector<16x256xf32>
    %62 = arith.subf %61, %54 : vector<16x256xf32>
    %63 = arith.mulf %62, %60 : vector<16x256xf32>
    %64 = arith.mulf %54, %32 : vector<16x256xf32>
    %65 = arith.addf %63, %64 : vector<16x256xf32>
    %c2_i32 = arith.constant 2 : i32
    %66 = arith.index_cast %c2_i32 : i32 to index
    %c0_25 = arith.constant 0 : index
    %c0_26 = arith.constant 0 : index
    %67 = vector.load %arg7[%66, %c0_25, %c0_26] : memref<12x16x768xf32, #tpu.memory_space<vmem>>, vector<1x16x768xf32>
    %68 = vector.shape_cast %67 : vector<1x16x768xf32> to vector<16x768xf32>
    %69 = arith.truncf %65 : vector<16x256xf32> to vector<16x256xbf16>
    %c0_27 = arith.constant 0 : index
    %c0_28 = arith.constant 0 : index
    %70 = vector.load %arg3[%c0_27, %c0_28] : memref<256x768xbf16, #tpu.memory_space<vmem>>, vector<256x768xbf16>
    %cst_29 = arith.constant dense<0.000000e+00> : vector<16x768xf32>
    %71 = tpu.matmul %69, %70, %cst_29 {dimension_numbers = #tpu.dot_dimension_numbers<[1], [0], [0], [1], [0, 0, 1, 1], [], []>} : vector<16x256xbf16>, vector<256x768xbf16>, vector<16x768xf32> -> vector<16x768xf32>
    %72 = vector.extract_strided_slice %68 {offsets = [0, 0], sizes = [16, 256], strides = [1, 1]} : vector<16x768xf32> to vector<16x256xf32>
    %73 = vector.extract_strided_slice %71 {offsets = [0, 0], sizes = [16, 256], strides = [1, 1]} : vector<16x768xf32> to vector<16x256xf32>
    %74 = arith.addf %72, %73 : vector<16x256xf32>
    %75 = arith.negf %74 : vector<16x256xf32>
    %76 = math.exp %75 : vector<16x256xf32>
    %cst_30 = arith.constant 1.000000e+00 : f32
    %77 = vector.broadcast %cst_30 : f32 to vector<16x256xf32>
    %78 = arith.addf %77, %76 : vector<16x256xf32>
    %79 = arith.divf %77, %78 : vector<16x256xf32>
    %80 = vector.extract_strided_slice %68 {offsets = [0, 256], sizes = [16, 256], strides = [1, 1]} : vector<16x768xf32> to vector<16x256xf32>
    %81 = vector.extract_strided_slice %71 {offsets = [0, 256], sizes = [16, 256], strides = [1, 1]} : vector<16x768xf32> to vector<16x256xf32>
    %82 = arith.addf %80, %81 : vector<16x256xf32>
    %83 = arith.negf %82 : vector<16x256xf32>
    %84 = math.exp %83 : vector<16x256xf32>
    %cst_31 = arith.constant 1.000000e+00 : f32
    %85 = vector.broadcast %cst_31 : f32 to vector<16x256xf32>
    %86 = arith.addf %85, %84 : vector<16x256xf32>
    %87 = arith.divf %85, %86 : vector<16x256xf32>
    %88 = vector.extract_strided_slice %68 {offsets = [0, 512], sizes = [16, 256], strides = [1, 1]} : vector<16x768xf32> to vector<16x256xf32>
    %89 = vector.extract_strided_slice %71 {offsets = [0, 512], sizes = [16, 256], strides = [1, 1]} : vector<16x768xf32> to vector<16x256xf32>
    %90 = arith.addf %89, %11 : vector<16x256xf32>
    %91 = arith.mulf %79, %90 : vector<16x256xf32>
    %92 = arith.addf %88, %91 : vector<16x256xf32>
    %93 = math.tanh %92 : vector<16x256xf32>
    %cst_32 = arith.constant 1.000000e+00 : f32
    %94 = vector.broadcast %cst_32 : f32 to vector<16x256xf32>
    %95 = arith.subf %94, %87 : vector<16x256xf32>
    %96 = arith.mulf %95, %93 : vector<16x256xf32>
    %97 = arith.mulf %87, %65 : vector<16x256xf32>
    %98 = arith.addf %96, %97 : vector<16x256xf32>
    %c3_i32 = arith.constant 3 : i32
    %99 = arith.index_cast %c3_i32 : i32 to index
    %c0_33 = arith.constant 0 : index
    %c0_34 = arith.constant 0 : index
    %100 = vector.load %arg7[%99, %c0_33, %c0_34] : memref<12x16x768xf32, #tpu.memory_space<vmem>>, vector<1x16x768xf32>
    %101 = vector.shape_cast %100 : vector<1x16x768xf32> to vector<16x768xf32>
    %102 = arith.truncf %98 : vector<16x256xf32> to vector<16x256xbf16>
    %c0_35 = arith.constant 0 : index
    %c0_36 = arith.constant 0 : index
    %103 = vector.load %arg3[%c0_35, %c0_36] : memref<256x768xbf16, #tpu.memory_space<vmem>>, vector<256x768xbf16>
    %cst_37 = arith.constant dense<0.000000e+00> : vector<16x768xf32>
    %104 = tpu.matmul %102, %103, %cst_37 {dimension_numbers = #tpu.dot_dimension_numbers<[1], [0], [0], [1], [0, 0, 1, 1], [], []>} : vector<16x256xbf16>, vector<256x768xbf16>, vector<16x768xf32> -> vector<16x768xf32>
    %105 = vector.extract_strided_slice %101 {offsets = [0, 0], sizes = [16, 256], strides = [1, 1]} : vector<16x768xf32> to vector<16x256xf32>
    %106 = vector.extract_strided_slice %104 {offsets = [0, 0], sizes = [16, 256], strides = [1, 1]} : vector<16x768xf32> to vector<16x256xf32>
    %107 = arith.addf %105, %106 : vector<16x256xf32>
    %108 = arith.negf %107 : vector<16x256xf32>
    %109 = math.exp %108 : vector<16x256xf32>
    %cst_38 = arith.constant 1.000000e+00 : f32
    %110 = vector.broadcast %cst_38 : f32 to vector<16x256xf32>
    %111 = arith.addf %110, %109 : vector<16x256xf32>
    %112 = arith.divf %110, %111 : vector<16x256xf32>
    %113 = vector.extract_strided_slice %101 {offsets = [0, 256], sizes = [16, 256], strides = [1, 1]} : vector<16x768xf32> to vector<16x256xf32>
    %114 = vector.extract_strided_slice %104 {offsets = [0, 256], sizes = [16, 256], strides = [1, 1]} : vector<16x768xf32> to vector<16x256xf32>
    %115 = arith.addf %113, %114 : vector<16x256xf32>
    %116 = arith.negf %115 : vector<16x256xf32>
    %117 = math.exp %116 : vector<16x256xf32>
    %cst_39 = arith.constant 1.000000e+00 : f32
    %118 = vector.broadcast %cst_39 : f32 to vector<16x256xf32>
    %119 = arith.addf %118, %117 : vector<16x256xf32>
    %120 = arith.divf %118, %119 : vector<16x256xf32>
    %121 = vector.extract_strided_slice %101 {offsets = [0, 512], sizes = [16, 256], strides = [1, 1]} : vector<16x768xf32> to vector<16x256xf32>
    %122 = vector.extract_strided_slice %104 {offsets = [0, 512], sizes = [16, 256], strides = [1, 1]} : vector<16x768xf32> to vector<16x256xf32>
    %123 = arith.addf %122, %11 : vector<16x256xf32>
    %124 = arith.mulf %112, %123 : vector<16x256xf32>
    %125 = arith.addf %121, %124 : vector<16x256xf32>
    %126 = math.tanh %125 : vector<16x256xf32>
    %cst_40 = arith.constant 1.000000e+00 : f32
    %127 = vector.broadcast %cst_40 : f32 to vector<16x256xf32>
    %128 = arith.subf %127, %120 : vector<16x256xf32>
    %129 = arith.mulf %128, %126 : vector<16x256xf32>
    %130 = arith.mulf %120, %98 : vector<16x256xf32>
    %131 = arith.addf %129, %130 : vector<16x256xf32>
    %c4_i32 = arith.constant 4 : i32
    %132 = arith.index_cast %c4_i32 : i32 to index
    %c0_41 = arith.constant 0 : index
    %c0_42 = arith.constant 0 : index
    %133 = vector.load %arg7[%132, %c0_41, %c0_42] : memref<12x16x768xf32, #tpu.memory_space<vmem>>, vector<1x16x768xf32>
    %134 = vector.shape_cast %133 : vector<1x16x768xf32> to vector<16x768xf32>
    %135 = arith.truncf %131 : vector<16x256xf32> to vector<16x256xbf16>
    %c0_43 = arith.constant 0 : index
    %c0_44 = arith.constant 0 : index
    %136 = vector.load %arg3[%c0_43, %c0_44] : memref<256x768xbf16, #tpu.memory_space<vmem>>, vector<256x768xbf16>
    %cst_45 = arith.constant dense<0.000000e+00> : vector<16x768xf32>
    %137 = tpu.matmul %135, %136, %cst_45 {dimension_numbers = #tpu.dot_dimension_numbers<[1], [0], [0], [1], [0, 0, 1, 1], [], []>} : vector<16x256xbf16>, vector<256x768xbf16>, vector<16x768xf32> -> vector<16x768xf32>
    %138 = vector.extract_strided_slice %134 {offsets = [0, 0], sizes = [16, 256], strides = [1, 1]} : vector<16x768xf32> to vector<16x256xf32>
    %139 = vector.extract_strided_slice %137 {offsets = [0, 0], sizes = [16, 256], strides = [1, 1]} : vector<16x768xf32> to vector<16x256xf32>
    %140 = arith.addf %138, %139 : vector<16x256xf32>
    %141 = arith.negf %140 : vector<16x256xf32>
    %142 = math.exp %141 : vector<16x256xf32>
    %cst_46 = arith.constant 1.000000e+00 : f32
    %143 = vector.broadcast %cst_46 : f32 to vector<16x256xf32>
    %144 = arith.addf %143, %142 : vector<16x256xf32>
    %145 = arith.divf %143, %144 : vector<16x256xf32>
    %146 = vector.extract_strided_slice %134 {offsets = [0, 256], sizes = [16, 256], strides = [1, 1]} : vector<16x768xf32> to vector<16x256xf32>
    %147 = vector.extract_strided_slice %137 {offsets = [0, 256], sizes = [16, 256], strides = [1, 1]} : vector<16x768xf32> to vector<16x256xf32>
    %148 = arith.addf %146, %147 : vector<16x256xf32>
    %149 = arith.negf %148 : vector<16x256xf32>
    %150 = math.exp %149 : vector<16x256xf32>
    %cst_47 = arith.constant 1.000000e+00 : f32
    %151 = vector.broadcast %cst_47 : f32 to vector<16x256xf32>
    %152 = arith.addf %151, %150 : vector<16x256xf32>
    %153 = arith.divf %151, %152 : vector<16x256xf32>
    %154 = vector.extract_strided_slice %134 {offsets = [0, 512], sizes = [16, 256], strides = [1, 1]} : vector<16x768xf32> to vector<16x256xf32>
    %155 = vector.extract_strided_slice %137 {offsets = [0, 512], sizes = [16, 256], strides = [1, 1]} : vector<16x768xf32> to vector<16x256xf32>
    %156 = arith.addf %155, %11 : vector<16x256xf32>
    %157 = arith.mulf %145, %156 : vector<16x256xf32>
    %158 = arith.addf %154, %157 : vector<16x256xf32>
    %159 = math.tanh %158 : vector<16x256xf32>
    %cst_48 = arith.constant 1.000000e+00 : f32
    %160 = vector.broadcast %cst_48 : f32 to vector<16x256xf32>
    %161 = arith.subf %160, %153 : vector<16x256xf32>
    %162 = arith.mulf %161, %159 : vector<16x256xf32>
    %163 = arith.mulf %153, %131 : vector<16x256xf32>
    %164 = arith.addf %162, %163 : vector<16x256xf32>
    %c5_i32 = arith.constant 5 : i32
    %165 = arith.index_cast %c5_i32 : i32 to index
    %c0_49 = arith.constant 0 : index
    %c0_50 = arith.constant 0 : index
    %166 = vector.load %arg7[%165, %c0_49, %c0_50] : memref<12x16x768xf32, #tpu.memory_space<vmem>>, vector<1x16x768xf32>
    %167 = vector.shape_cast %166 : vector<1x16x768xf32> to vector<16x768xf32>
    %168 = arith.truncf %164 : vector<16x256xf32> to vector<16x256xbf16>
    %c0_51 = arith.constant 0 : index
    %c0_52 = arith.constant 0 : index
    %169 = vector.load %arg3[%c0_51, %c0_52] : memref<256x768xbf16, #tpu.memory_space<vmem>>, vector<256x768xbf16>
    %cst_53 = arith.constant dense<0.000000e+00> : vector<16x768xf32>
    %170 = tpu.matmul %168, %169, %cst_53 {dimension_numbers = #tpu.dot_dimension_numbers<[1], [0], [0], [1], [0, 0, 1, 1], [], []>} : vector<16x256xbf16>, vector<256x768xbf16>, vector<16x768xf32> -> vector<16x768xf32>
    %171 = vector.extract_strided_slice %167 {offsets = [0, 0], sizes = [16, 256], strides = [1, 1]} : vector<16x768xf32> to vector<16x256xf32>
    %172 = vector.extract_strided_slice %170 {offsets = [0, 0], sizes = [16, 256], strides = [1, 1]} : vector<16x768xf32> to vector<16x256xf32>
    %173 = arith.addf %171, %172 : vector<16x256xf32>
    %174 = arith.negf %173 : vector<16x256xf32>
    %175 = math.exp %174 : vector<16x256xf32>
    %cst_54 = arith.constant 1.000000e+00 : f32
    %176 = vector.broadcast %cst_54 : f32 to vector<16x256xf32>
    %177 = arith.addf %176, %175 : vector<16x256xf32>
    %178 = arith.divf %176, %177 : vector<16x256xf32>
    %179 = vector.extract_strided_slice %167 {offsets = [0, 256], sizes = [16, 256], strides = [1, 1]} : vector<16x768xf32> to vector<16x256xf32>
    %180 = vector.extract_strided_slice %170 {offsets = [0, 256], sizes = [16, 256], strides = [1, 1]} : vector<16x768xf32> to vector<16x256xf32>
    %181 = arith.addf %179, %180 : vector<16x256xf32>
    %182 = arith.negf %181 : vector<16x256xf32>
    %183 = math.exp %182 : vector<16x256xf32>
    %cst_55 = arith.constant 1.000000e+00 : f32
    %184 = vector.broadcast %cst_55 : f32 to vector<16x256xf32>
    %185 = arith.addf %184, %183 : vector<16x256xf32>
    %186 = arith.divf %184, %185 : vector<16x256xf32>
    %187 = vector.extract_strided_slice %167 {offsets = [0, 512], sizes = [16, 256], strides = [1, 1]} : vector<16x768xf32> to vector<16x256xf32>
    %188 = vector.extract_strided_slice %170 {offsets = [0, 512], sizes = [16, 256], strides = [1, 1]} : vector<16x768xf32> to vector<16x256xf32>
    %189 = arith.addf %188, %11 : vector<16x256xf32>
    %190 = arith.mulf %178, %189 : vector<16x256xf32>
    %191 = arith.addf %187, %190 : vector<16x256xf32>
    %192 = math.tanh %191 : vector<16x256xf32>
    %cst_56 = arith.constant 1.000000e+00 : f32
    %193 = vector.broadcast %cst_56 : f32 to vector<16x256xf32>
    %194 = arith.subf %193, %186 : vector<16x256xf32>
    %195 = arith.mulf %194, %192 : vector<16x256xf32>
    %196 = arith.mulf %186, %164 : vector<16x256xf32>
    %197 = arith.addf %195, %196 : vector<16x256xf32>
    %c6_i32 = arith.constant 6 : i32
    %198 = arith.index_cast %c6_i32 : i32 to index
    %c0_57 = arith.constant 0 : index
    %c0_58 = arith.constant 0 : index
    %199 = vector.load %arg7[%198, %c0_57, %c0_58] : memref<12x16x768xf32, #tpu.memory_space<vmem>>, vector<1x16x768xf32>
    %200 = vector.shape_cast %199 : vector<1x16x768xf32> to vector<16x768xf32>
    %201 = arith.truncf %197 : vector<16x256xf32> to vector<16x256xbf16>
    %c0_59 = arith.constant 0 : index
    %c0_60 = arith.constant 0 : index
    %202 = vector.load %arg3[%c0_59, %c0_60] : memref<256x768xbf16, #tpu.memory_space<vmem>>, vector<256x768xbf16>
    %cst_61 = arith.constant dense<0.000000e+00> : vector<16x768xf32>
    %203 = tpu.matmul %201, %202, %cst_61 {dimension_numbers = #tpu.dot_dimension_numbers<[1], [0], [0], [1], [0, 0, 1, 1], [], []>} : vector<16x256xbf16>, vector<256x768xbf16>, vector<16x768xf32> -> vector<16x768xf32>
    %204 = vector.extract_strided_slice %200 {offsets = [0, 0], sizes = [16, 256], strides = [1, 1]} : vector<16x768xf32> to vector<16x256xf32>
    %205 = vector.extract_strided_slice %203 {offsets = [0, 0], sizes = [16, 256], strides = [1, 1]} : vector<16x768xf32> to vector<16x256xf32>
    %206 = arith.addf %204, %205 : vector<16x256xf32>
    %207 = arith.negf %206 : vector<16x256xf32>
    %208 = math.exp %207 : vector<16x256xf32>
    %cst_62 = arith.constant 1.000000e+00 : f32
    %209 = vector.broadcast %cst_62 : f32 to vector<16x256xf32>
    %210 = arith.addf %209, %208 : vector<16x256xf32>
    %211 = arith.divf %209, %210 : vector<16x256xf32>
    %212 = vector.extract_strided_slice %200 {offsets = [0, 256], sizes = [16, 256], strides = [1, 1]} : vector<16x768xf32> to vector<16x256xf32>
    %213 = vector.extract_strided_slice %203 {offsets = [0, 256], sizes = [16, 256], strides = [1, 1]} : vector<16x768xf32> to vector<16x256xf32>
    %214 = arith.addf %212, %213 : vector<16x256xf32>
    %215 = arith.negf %214 : vector<16x256xf32>
    %216 = math.exp %215 : vector<16x256xf32>
    %cst_63 = arith.constant 1.000000e+00 : f32
    %217 = vector.broadcast %cst_63 : f32 to vector<16x256xf32>
    %218 = arith.addf %217, %216 : vector<16x256xf32>
    %219 = arith.divf %217, %218 : vector<16x256xf32>
    %220 = vector.extract_strided_slice %200 {offsets = [0, 512], sizes = [16, 256], strides = [1, 1]} : vector<16x768xf32> to vector<16x256xf32>
    %221 = vector.extract_strided_slice %203 {offsets = [0, 512], sizes = [16, 256], strides = [1, 1]} : vector<16x768xf32> to vector<16x256xf32>
    %222 = arith.addf %221, %11 : vector<16x256xf32>
    %223 = arith.mulf %211, %222 : vector<16x256xf32>
    %224 = arith.addf %220, %223 : vector<16x256xf32>
    %225 = math.tanh %224 : vector<16x256xf32>
    %cst_64 = arith.constant 1.000000e+00 : f32
    %226 = vector.broadcast %cst_64 : f32 to vector<16x256xf32>
    %227 = arith.subf %226, %219 : vector<16x256xf32>
    %228 = arith.mulf %227, %225 : vector<16x256xf32>
    %229 = arith.mulf %219, %197 : vector<16x256xf32>
    %230 = arith.addf %228, %229 : vector<16x256xf32>
    %c7_i32 = arith.constant 7 : i32
    %231 = arith.index_cast %c7_i32 : i32 to index
    %c0_65 = arith.constant 0 : index
    %c0_66 = arith.constant 0 : index
    %232 = vector.load %arg7[%231, %c0_65, %c0_66] : memref<12x16x768xf32, #tpu.memory_space<vmem>>, vector<1x16x768xf32>
    %233 = vector.shape_cast %232 : vector<1x16x768xf32> to vector<16x768xf32>
    %234 = arith.truncf %230 : vector<16x256xf32> to vector<16x256xbf16>
    %c0_67 = arith.constant 0 : index
    %c0_68 = arith.constant 0 : index
    %235 = vector.load %arg3[%c0_67, %c0_68] : memref<256x768xbf16, #tpu.memory_space<vmem>>, vector<256x768xbf16>
    %cst_69 = arith.constant dense<0.000000e+00> : vector<16x768xf32>
    %236 = tpu.matmul %234, %235, %cst_69 {dimension_numbers = #tpu.dot_dimension_numbers<[1], [0], [0], [1], [0, 0, 1, 1], [], []>} : vector<16x256xbf16>, vector<256x768xbf16>, vector<16x768xf32> -> vector<16x768xf32>
    %237 = vector.extract_strided_slice %233 {offsets = [0, 0], sizes = [16, 256], strides = [1, 1]} : vector<16x768xf32> to vector<16x256xf32>
    %238 = vector.extract_strided_slice %236 {offsets = [0, 0], sizes = [16, 256], strides = [1, 1]} : vector<16x768xf32> to vector<16x256xf32>
    %239 = arith.addf %237, %238 : vector<16x256xf32>
    %240 = arith.negf %239 : vector<16x256xf32>
    %241 = math.exp %240 : vector<16x256xf32>
    %cst_70 = arith.constant 1.000000e+00 : f32
    %242 = vector.broadcast %cst_70 : f32 to vector<16x256xf32>
    %243 = arith.addf %242, %241 : vector<16x256xf32>
    %244 = arith.divf %242, %243 : vector<16x256xf32>
    %245 = vector.extract_strided_slice %233 {offsets = [0, 256], sizes = [16, 256], strides = [1, 1]} : vector<16x768xf32> to vector<16x256xf32>
    %246 = vector.extract_strided_slice %236 {offsets = [0, 256], sizes = [16, 256], strides = [1, 1]} : vector<16x768xf32> to vector<16x256xf32>
    %247 = arith.addf %245, %246 : vector<16x256xf32>
    %248 = arith.negf %247 : vector<16x256xf32>
    %249 = math.exp %248 : vector<16x256xf32>
    %cst_71 = arith.constant 1.000000e+00 : f32
    %250 = vector.broadcast %cst_71 : f32 to vector<16x256xf32>
    %251 = arith.addf %250, %249 : vector<16x256xf32>
    %252 = arith.divf %250, %251 : vector<16x256xf32>
    %253 = vector.extract_strided_slice %233 {offsets = [0, 512], sizes = [16, 256], strides = [1, 1]} : vector<16x768xf32> to vector<16x256xf32>
    %254 = vector.extract_strided_slice %236 {offsets = [0, 512], sizes = [16, 256], strides = [1, 1]} : vector<16x768xf32> to vector<16x256xf32>
    %255 = arith.addf %254, %11 : vector<16x256xf32>
    %256 = arith.mulf %244, %255 : vector<16x256xf32>
    %257 = arith.addf %253, %256 : vector<16x256xf32>
    %258 = math.tanh %257 : vector<16x256xf32>
    %cst_72 = arith.constant 1.000000e+00 : f32
    %259 = vector.broadcast %cst_72 : f32 to vector<16x256xf32>
    %260 = arith.subf %259, %252 : vector<16x256xf32>
    %261 = arith.mulf %260, %258 : vector<16x256xf32>
    %262 = arith.mulf %252, %230 : vector<16x256xf32>
    %263 = arith.addf %261, %262 : vector<16x256xf32>
    %c8_i32 = arith.constant 8 : i32
    %264 = arith.index_cast %c8_i32 : i32 to index
    %c0_73 = arith.constant 0 : index
    %c0_74 = arith.constant 0 : index
    %265 = vector.load %arg7[%264, %c0_73, %c0_74] : memref<12x16x768xf32, #tpu.memory_space<vmem>>, vector<1x16x768xf32>
    %266 = vector.shape_cast %265 : vector<1x16x768xf32> to vector<16x768xf32>
    %267 = arith.truncf %263 : vector<16x256xf32> to vector<16x256xbf16>
    %c0_75 = arith.constant 0 : index
    %c0_76 = arith.constant 0 : index
    %268 = vector.load %arg3[%c0_75, %c0_76] : memref<256x768xbf16, #tpu.memory_space<vmem>>, vector<256x768xbf16>
    %cst_77 = arith.constant dense<0.000000e+00> : vector<16x768xf32>
    %269 = tpu.matmul %267, %268, %cst_77 {dimension_numbers = #tpu.dot_dimension_numbers<[1], [0], [0], [1], [0, 0, 1, 1], [], []>} : vector<16x256xbf16>, vector<256x768xbf16>, vector<16x768xf32> -> vector<16x768xf32>
    %270 = vector.extract_strided_slice %266 {offsets = [0, 0], sizes = [16, 256], strides = [1, 1]} : vector<16x768xf32> to vector<16x256xf32>
    %271 = vector.extract_strided_slice %269 {offsets = [0, 0], sizes = [16, 256], strides = [1, 1]} : vector<16x768xf32> to vector<16x256xf32>
    %272 = arith.addf %270, %271 : vector<16x256xf32>
    %273 = arith.negf %272 : vector<16x256xf32>
    %274 = math.exp %273 : vector<16x256xf32>
    %cst_78 = arith.constant 1.000000e+00 : f32
    %275 = vector.broadcast %cst_78 : f32 to vector<16x256xf32>
    %276 = arith.addf %275, %274 : vector<16x256xf32>
    %277 = arith.divf %275, %276 : vector<16x256xf32>
    %278 = vector.extract_strided_slice %266 {offsets = [0, 256], sizes = [16, 256], strides = [1, 1]} : vector<16x768xf32> to vector<16x256xf32>
    %279 = vector.extract_strided_slice %269 {offsets = [0, 256], sizes = [16, 256], strides = [1, 1]} : vector<16x768xf32> to vector<16x256xf32>
    %280 = arith.addf %278, %279 : vector<16x256xf32>
    %281 = arith.negf %280 : vector<16x256xf32>
    %282 = math.exp %281 : vector<16x256xf32>
    %cst_79 = arith.constant 1.000000e+00 : f32
    %283 = vector.broadcast %cst_79 : f32 to vector<16x256xf32>
    %284 = arith.addf %283, %282 : vector<16x256xf32>
    %285 = arith.divf %283, %284 : vector<16x256xf32>
    %286 = vector.extract_strided_slice %266 {offsets = [0, 512], sizes = [16, 256], strides = [1, 1]} : vector<16x768xf32> to vector<16x256xf32>
    %287 = vector.extract_strided_slice %269 {offsets = [0, 512], sizes = [16, 256], strides = [1, 1]} : vector<16x768xf32> to vector<16x256xf32>
    %288 = arith.addf %287, %11 : vector<16x256xf32>
    %289 = arith.mulf %277, %288 : vector<16x256xf32>
    %290 = arith.addf %286, %289 : vector<16x256xf32>
    %291 = math.tanh %290 : vector<16x256xf32>
    %cst_80 = arith.constant 1.000000e+00 : f32
    %292 = vector.broadcast %cst_80 : f32 to vector<16x256xf32>
    %293 = arith.subf %292, %285 : vector<16x256xf32>
    %294 = arith.mulf %293, %291 : vector<16x256xf32>
    %295 = arith.mulf %285, %263 : vector<16x256xf32>
    %296 = arith.addf %294, %295 : vector<16x256xf32>
    %c9_i32 = arith.constant 9 : i32
    %297 = arith.index_cast %c9_i32 : i32 to index
    %c0_81 = arith.constant 0 : index
    %c0_82 = arith.constant 0 : index
    %298 = vector.load %arg7[%297, %c0_81, %c0_82] : memref<12x16x768xf32, #tpu.memory_space<vmem>>, vector<1x16x768xf32>
    %299 = vector.shape_cast %298 : vector<1x16x768xf32> to vector<16x768xf32>
    %300 = arith.truncf %296 : vector<16x256xf32> to vector<16x256xbf16>
    %c0_83 = arith.constant 0 : index
    %c0_84 = arith.constant 0 : index
    %301 = vector.load %arg3[%c0_83, %c0_84] : memref<256x768xbf16, #tpu.memory_space<vmem>>, vector<256x768xbf16>
    %cst_85 = arith.constant dense<0.000000e+00> : vector<16x768xf32>
    %302 = tpu.matmul %300, %301, %cst_85 {dimension_numbers = #tpu.dot_dimension_numbers<[1], [0], [0], [1], [0, 0, 1, 1], [], []>} : vector<16x256xbf16>, vector<256x768xbf16>, vector<16x768xf32> -> vector<16x768xf32>
    %303 = vector.extract_strided_slice %299 {offsets = [0, 0], sizes = [16, 256], strides = [1, 1]} : vector<16x768xf32> to vector<16x256xf32>
    %304 = vector.extract_strided_slice %302 {offsets = [0, 0], sizes = [16, 256], strides = [1, 1]} : vector<16x768xf32> to vector<16x256xf32>
    %305 = arith.addf %303, %304 : vector<16x256xf32>
    %306 = arith.negf %305 : vector<16x256xf32>
    %307 = math.exp %306 : vector<16x256xf32>
    %cst_86 = arith.constant 1.000000e+00 : f32
    %308 = vector.broadcast %cst_86 : f32 to vector<16x256xf32>
    %309 = arith.addf %308, %307 : vector<16x256xf32>
    %310 = arith.divf %308, %309 : vector<16x256xf32>
    %311 = vector.extract_strided_slice %299 {offsets = [0, 256], sizes = [16, 256], strides = [1, 1]} : vector<16x768xf32> to vector<16x256xf32>
    %312 = vector.extract_strided_slice %302 {offsets = [0, 256], sizes = [16, 256], strides = [1, 1]} : vector<16x768xf32> to vector<16x256xf32>
    %313 = arith.addf %311, %312 : vector<16x256xf32>
    %314 = arith.negf %313 : vector<16x256xf32>
    %315 = math.exp %314 : vector<16x256xf32>
    %cst_87 = arith.constant 1.000000e+00 : f32
    %316 = vector.broadcast %cst_87 : f32 to vector<16x256xf32>
    %317 = arith.addf %316, %315 : vector<16x256xf32>
    %318 = arith.divf %316, %317 : vector<16x256xf32>
    %319 = vector.extract_strided_slice %299 {offsets = [0, 512], sizes = [16, 256], strides = [1, 1]} : vector<16x768xf32> to vector<16x256xf32>
    %320 = vector.extract_strided_slice %302 {offsets = [0, 512], sizes = [16, 256], strides = [1, 1]} : vector<16x768xf32> to vector<16x256xf32>
    %321 = arith.addf %320, %11 : vector<16x256xf32>
    %322 = arith.mulf %310, %321 : vector<16x256xf32>
    %323 = arith.addf %319, %322 : vector<16x256xf32>
    %324 = math.tanh %323 : vector<16x256xf32>
    %cst_88 = arith.constant 1.000000e+00 : f32
    %325 = vector.broadcast %cst_88 : f32 to vector<16x256xf32>
    %326 = arith.subf %325, %318 : vector<16x256xf32>
    %327 = arith.mulf %326, %324 : vector<16x256xf32>
    %328 = arith.mulf %318, %296 : vector<16x256xf32>
    %329 = arith.addf %327, %328 : vector<16x256xf32>
    %c10_i32 = arith.constant 10 : i32
    %330 = arith.index_cast %c10_i32 : i32 to index
    %c0_89 = arith.constant 0 : index
    %c0_90 = arith.constant 0 : index
    %331 = vector.load %arg7[%330, %c0_89, %c0_90] : memref<12x16x768xf32, #tpu.memory_space<vmem>>, vector<1x16x768xf32>
    %332 = vector.shape_cast %331 : vector<1x16x768xf32> to vector<16x768xf32>
    %333 = arith.truncf %329 : vector<16x256xf32> to vector<16x256xbf16>
    %c0_91 = arith.constant 0 : index
    %c0_92 = arith.constant 0 : index
    %334 = vector.load %arg3[%c0_91, %c0_92] : memref<256x768xbf16, #tpu.memory_space<vmem>>, vector<256x768xbf16>
    %cst_93 = arith.constant dense<0.000000e+00> : vector<16x768xf32>
    %335 = tpu.matmul %333, %334, %cst_93 {dimension_numbers = #tpu.dot_dimension_numbers<[1], [0], [0], [1], [0, 0, 1, 1], [], []>} : vector<16x256xbf16>, vector<256x768xbf16>, vector<16x768xf32> -> vector<16x768xf32>
    %336 = vector.extract_strided_slice %332 {offsets = [0, 0], sizes = [16, 256], strides = [1, 1]} : vector<16x768xf32> to vector<16x256xf32>
    %337 = vector.extract_strided_slice %335 {offsets = [0, 0], sizes = [16, 256], strides = [1, 1]} : vector<16x768xf32> to vector<16x256xf32>
    %338 = arith.addf %336, %337 : vector<16x256xf32>
    %339 = arith.negf %338 : vector<16x256xf32>
    %340 = math.exp %339 : vector<16x256xf32>
    %cst_94 = arith.constant 1.000000e+00 : f32
    %341 = vector.broadcast %cst_94 : f32 to vector<16x256xf32>
    %342 = arith.addf %341, %340 : vector<16x256xf32>
    %343 = arith.divf %341, %342 : vector<16x256xf32>
    %344 = vector.extract_strided_slice %332 {offsets = [0, 256], sizes = [16, 256], strides = [1, 1]} : vector<16x768xf32> to vector<16x256xf32>
    %345 = vector.extract_strided_slice %335 {offsets = [0, 256], sizes = [16, 256], strides = [1, 1]} : vector<16x768xf32> to vector<16x256xf32>
    %346 = arith.addf %344, %345 : vector<16x256xf32>
    %347 = arith.negf %346 : vector<16x256xf32>
    %348 = math.exp %347 : vector<16x256xf32>
    %cst_95 = arith.constant 1.000000e+00 : f32
    %349 = vector.broadcast %cst_95 : f32 to vector<16x256xf32>
    %350 = arith.addf %349, %348 : vector<16x256xf32>
    %351 = arith.divf %349, %350 : vector<16x256xf32>
    %352 = vector.extract_strided_slice %332 {offsets = [0, 512], sizes = [16, 256], strides = [1, 1]} : vector<16x768xf32> to vector<16x256xf32>
    %353 = vector.extract_strided_slice %335 {offsets = [0, 512], sizes = [16, 256], strides = [1, 1]} : vector<16x768xf32> to vector<16x256xf32>
    %354 = arith.addf %353, %11 : vector<16x256xf32>
    %355 = arith.mulf %343, %354 : vector<16x256xf32>
    %356 = arith.addf %352, %355 : vector<16x256xf32>
    %357 = math.tanh %356 : vector<16x256xf32>
    %cst_96 = arith.constant 1.000000e+00 : f32
    %358 = vector.broadcast %cst_96 : f32 to vector<16x256xf32>
    %359 = arith.subf %358, %351 : vector<16x256xf32>
    %360 = arith.mulf %359, %357 : vector<16x256xf32>
    %361 = arith.mulf %351, %329 : vector<16x256xf32>
    %362 = arith.addf %360, %361 : vector<16x256xf32>
    %c11_i32 = arith.constant 11 : i32
    %363 = arith.index_cast %c11_i32 : i32 to index
    %c0_97 = arith.constant 0 : index
    %c0_98 = arith.constant 0 : index
    %364 = vector.load %arg7[%363, %c0_97, %c0_98] : memref<12x16x768xf32, #tpu.memory_space<vmem>>, vector<1x16x768xf32>
    %365 = vector.shape_cast %364 : vector<1x16x768xf32> to vector<16x768xf32>
    %366 = arith.truncf %362 : vector<16x256xf32> to vector<16x256xbf16>
    %c0_99 = arith.constant 0 : index
    %c0_100 = arith.constant 0 : index
    %367 = vector.load %arg3[%c0_99, %c0_100] : memref<256x768xbf16, #tpu.memory_space<vmem>>, vector<256x768xbf16>
    %cst_101 = arith.constant dense<0.000000e+00> : vector<16x768xf32>
    %368 = tpu.matmul %366, %367, %cst_101 {dimension_numbers = #tpu.dot_dimension_numbers<[1], [0], [0], [1], [0, 0, 1, 1], [], []>} : vector<16x256xbf16>, vector<256x768xbf16>, vector<16x768xf32> -> vector<16x768xf32>
    %369 = vector.extract_strided_slice %365 {offsets = [0, 0], sizes = [16, 256], strides = [1, 1]} : vector<16x768xf32> to vector<16x256xf32>
    %370 = vector.extract_strided_slice %368 {offsets = [0, 0], sizes = [16, 256], strides = [1, 1]} : vector<16x768xf32> to vector<16x256xf32>
    %371 = arith.addf %369, %370 : vector<16x256xf32>
    %372 = arith.negf %371 : vector<16x256xf32>
    %373 = math.exp %372 : vector<16x256xf32>
    %cst_102 = arith.constant 1.000000e+00 : f32
    %374 = vector.broadcast %cst_102 : f32 to vector<16x256xf32>
    %375 = arith.addf %374, %373 : vector<16x256xf32>
    %376 = arith.divf %374, %375 : vector<16x256xf32>
    %377 = vector.extract_strided_slice %365 {offsets = [0, 256], sizes = [16, 256], strides = [1, 1]} : vector<16x768xf32> to vector<16x256xf32>
    %378 = vector.extract_strided_slice %368 {offsets = [0, 256], sizes = [16, 256], strides = [1, 1]} : vector<16x768xf32> to vector<16x256xf32>
    %379 = arith.addf %377, %378 : vector<16x256xf32>
    %380 = arith.negf %379 : vector<16x256xf32>
    %381 = math.exp %380 : vector<16x256xf32>
    %cst_103 = arith.constant 1.000000e+00 : f32
    %382 = vector.broadcast %cst_103 : f32 to vector<16x256xf32>
    %383 = arith.addf %382, %381 : vector<16x256xf32>
    %384 = arith.divf %382, %383 : vector<16x256xf32>
    %385 = vector.extract_strided_slice %365 {offsets = [0, 512], sizes = [16, 256], strides = [1, 1]} : vector<16x768xf32> to vector<16x256xf32>
    %386 = vector.extract_strided_slice %368 {offsets = [0, 512], sizes = [16, 256], strides = [1, 1]} : vector<16x768xf32> to vector<16x256xf32>
    %387 = arith.addf %386, %11 : vector<16x256xf32>
    %388 = arith.mulf %376, %387 : vector<16x256xf32>
    %389 = arith.addf %385, %388 : vector<16x256xf32>
    %390 = math.tanh %389 : vector<16x256xf32>
    %cst_104 = arith.constant 1.000000e+00 : f32
    %391 = vector.broadcast %cst_104 : f32 to vector<16x256xf32>
    %392 = arith.subf %391, %384 : vector<16x256xf32>
    %393 = arith.mulf %392, %390 : vector<16x256xf32>
    %394 = arith.mulf %384, %362 : vector<16x256xf32>
    %395 = arith.addf %393, %394 : vector<16x256xf32>
    %c11_i32_105 = arith.constant 11 : i32
    %c0_106 = arith.constant 0 : index
    %c0_107 = arith.constant 0 : index
    %c0_108 = arith.constant 0 : index
    %396 = vector.load %arg6[%c0_106, %c0_107, %c0_108] : memref<1x16x256xf32, #tpu.memory_space<vmem>>, vector<1x16x256xf32>
    %397 = vector.shape_cast %396 : vector<1x16x256xf32> to vector<16x256xf32>
    %398 = vector.shape_cast %395 : vector<16x256xf32> to vector<1x16x256xf32>
    tpu.vector_store %arg6[%c0_106, %c0_107, %c0_108], %398 {strides = array<i32>} : memref<1x16x256xf32, #tpu.memory_space<vmem>>, vector<1x16x256xf32>,
    return
  }
  func.func @transform_0(%arg0: i32) -> (i32, i32, i32) {
    %c0_i32 = arith.constant 0 : i32
    %c0_i32_0 = arith.constant 0 : i32
    %c0_i32_1 = arith.constant 0 : i32
    return %c0_i32, %arg0, %c0_i32_0 : i32, i32, i32
  }
  func.func @transform_1(%arg0: i32) -> (i32, i32) {
    %c0_i32 = arith.constant 0 : i32
    %c0_i32_0 = arith.constant 0 : i32
    %c0_i32_1 = arith.constant 0 : i32
    return %c0_i32, %c0_i32_0 : i32, i32
  }
  func.func @transform_2(%arg0: i32) -> (i32, i32) {
    %c0_i32 = arith.constant 0 : i32
    %c0_i32_0 = arith.constant 0 : i32
    %c0_i32_1 = arith.constant 0 : i32
    return %c0_i32, %c0_i32_0 : i32, i32
  }
  func.func @transform_3(%arg0: i32) -> (i32, i32) {
    %c0_i32 = arith.constant 0 : i32
    %c0_i32_0 = arith.constant 0 : i32
    %c0_i32_1 = arith.constant 0 : i32
    return %c0_i32, %c0_i32_0 : i32, i32
  }
  func.func @transform_4(%arg0: i32) -> (i32, i32) {
    %c0_i32 = arith.constant 0 : i32
    %c0_i32_0 = arith.constant 0 : i32
    %c0_i32_1 = arith.constant 0 : i32
    return %c0_i32, %c0_i32_0 : i32, i32
  }
  func.func @transform_5(%arg0: i32) -> (i32, i32, i32) {
    %c0_i32 = arith.constant 0 : i32
    %c0_i32_0 = arith.constant 0 : i32
    %c0_i32_1 = arith.constant 0 : i32
    return %c0_i32, %arg0, %c0_i32_0 : i32, i32, i32
  }
}

</mosaic_0001>

<bundles_post_ra>
// kernel: tpu_custom_call.1
= control target key start
LH: loop header
LB: loop body
LE: loop exit
PB: predicated region body
PF: predicated region fallthrough
CT: control target
= control target key end

     0   :  { %10 = vsyncpa [#allocation4], 0  ;;  %s8453_s0 = inlined_call_operand.hbm [shape: bf16[12,16,128], index: 0, kind: input, shape index: {}]   ;;  %s8454_s1 = inlined_call_operand.hbm [shape: bf16[128,768], index: 1, kind: input, shape index: {}]   ;;  %s8455_s2 = inlined_call_operand.hbm [shape: bf16[256,768], index: 2, kind: input, shape index: {}]   ;;  %s8456_s3 = inlined_call_operand.hbm [shape: f32[1,768], index: 3, kind: input, shape index: {}]   ;;  %s8457_s4 = inlined_call_operand.vmem [shape: f32[1,256], index: 4, kind: input, shape index: {}]   ;;  %s8458_s5 = inlined_call_operand.hbm [shape: f32[1,16,256], index: 5, kind: output, shape index: {}]  }
   0x1   :  { %11 = vsyncpa [#allocation7], 0 }
   0x2   :  { %12 = vsyncpa [#allocation10], 0 }
   0x3   :  { %13 = vsyncpa [#allocation5], 0  ;;  %s5736_s18 = smov [#allocation6]  }
   0x4   :  { %s31_s19 = sshll.u32 %s5736_s18, 4  ;;  %s32_s19 = int_to_ptr.vmem [resolvable:$true] %s31_s19 }
   0x5   :  { %s5636_s20 = scalar_lea.vmem %s32_s19, 6144  ;;  %p5641_p1 = scmp.lt.s32.totalorder %s32_s19, %s32_s19 }
   0x6   :  { %p5637_p0 = scmp.ne.s32.totalorder %s32_s19, %s5636_s20  ;;  %p5642_p2 = scmp.lt.s32.totalorder %s5636_s20, %s5636_s20 }
   0x8   :  { %p5643_p3 = por %p5642_p2, %p5641_p1 }
   0xa   :  { %p5644_p4 = pnand %p5643_p3, %p5637_p0 }
   0xc   :  { %5647 = shalt.err (!%p5644_p4)
}
   0xd   :  { %s5737_s21 = smov 384   ;;  %s5738_s22 = smov 24  }
   0xe   :  { %37 = dma.hbm_to_vmem [thread:$0]  %s8454_s1, 6144, %s32_s19, [#allocation7], %s5737_s21, %s5737_s21, %s5738_s22  }
   0xf   :  { %s5739_s25 = smov [#allocation3]  }
  0x10   :  { %s19_s26 = sshll.u32 %s5739_s25, 4  ;;  %s20_s26 = int_to_ptr.vmem [resolvable:$true] %s19_s26 }
  0x11   :  { %s5656_s27 = scalar_lea.vmem %s20_s26, 1536  ;;  %p5661_p6 = scmp.lt.s32.totalorder %s20_s26, %s20_s26 }
  0x12   :  { %p5657_p5 = scmp.ne.s32.totalorder %s20_s26, %s5656_s27  ;;  %p5662_p7 = scmp.lt.s32.totalorder %s5656_s27, %s5656_s27 }
  0x14   :  { %p5663_p8 = por %p5662_p7, %p5661_p6 }
  0x16   :  { %p5664_p9 = pnand %p5663_p8, %p5657_p5 }
  0x18   :  { %5667 = shalt.err (!%p5664_p9)
}
  0x19   :  { %s5740_s28 = smov 64   ;;  %s5741_s29 = smov 4  }
  0x1a   :  { %25 = dma.hbm_to_vmem [thread:$0]  %s8453_s0, 1536, %s20_s26, [#allocation4], %s5740_s28, %s5740_s28, %s5741_s29  }
  0x1b   :  { %s5742_s7 = smov [#allocation8]   ;;  %s5743_s9 = smov [#allocation9]  }
  0x1c   :  { %s43_s8 = sshll.u32 %s5742_s7, 4  ;;  %s56_s1 = sshll.u32 %s5743_s9, 4  ;;  %s44_s8 = int_to_ptr.vmem [resolvable:$true] %s43_s8  ;;  %s57_s1 = int_to_ptr.vmem [resolvable:$true] %s56_s1 }
  0x1d   :  { %s5676_s10 = scalar_lea.vmem %s44_s8, 12288  ;;  %p5681_p11 = scmp.lt.s32.totalorder %s44_s8, %s44_s8 }
  0x1e   :  { %p5677_p10 = scmp.ne.s32.totalorder %s44_s8, %s5676_s10  ;;  %p5682_p12 = scmp.lt.s32.totalorder %s5676_s10, %s5676_s10 }
  0x20   :  { %p5683_p13 = por %p5682_p12, %p5681_p11 }
  0x22   :  { %p5684_p0 = pnand %p5683_p13, %p5677_p10 }
  0x24   :  { %5687 = shalt.err (!%p5684_p0)
}
  0x25   :  { %49 = dma.hbm_to_vmem [thread:$0]  %s8455_s2, 12288, %s44_s8, [#allocation7], %s5737_s21, %s5737_s21, %s5738_s22  }
  0x26   :  { %s5696_s0 = scalar_lea.vmem %s57_s1, 96  ;;  %p5701_p2 = scmp.lt.s32.totalorder %s57_s1, %s57_s1 }
  0x27   :  { %p5697_p1 = scmp.ne.s32.totalorder %s57_s1, %s5696_s0  ;;  %p5702_p3 = scmp.lt.s32.totalorder %s5696_s0, %s5696_s0 }
  0x29   :  { %p5703_p4 = por %p5702_p3, %p5701_p2 }
  0x2b   :  { %p5704_p5 = pnand %p5703_p4, %p5697_p1 }
  0x2d   :  { %5707 = shalt.err (!%p5704_p5)
}
  0x2e   :  { %59 = dma.hbm_to_vmem [thread:$0]  %s8456_s3, 96, %s57_s1, [#allocation10]  }
  0x2f   :  { %5728 = dma.done.wait [#allocation4], 1536  }
  0x30   :  { %5729 = vsyncadd [#allocation4], 4294965760 }
  0x31   :  { %5730 = dma.done.wait [#allocation7], 18432  }
  0x32   :  { %5731 = vsyncadd [#allocation7], 4294948864 }
  0x33   :  { %5732 = dma.done.wait [#allocation10], 96  }
  0x34   :  { %5733 = vsyncadd [#allocation10], 4294967200  ;;  %v5744_v0 = vmov 0   ;;  %v4601_v1 = vld [vmem:[#allocation6 + $0x154] ss:$24 sps:$4 sm:$0xff]   ;;  %v5798_v23 = vld [vmem:[#allocation3] sm:$0xff]  }
  0x35   :  { %523 = vmatprep.mubr.bf16.mxu0 %v5744_v0  ;;  %676 = vmatprep.mubr.bf16.mxu1 %v5744_v0  ;;  %v4603_v2 = vld [vmem:[#allocation6 + $0x150] ss:$24 sps:$4 sm:$0xff]   ;;  %v4604_v3 = vld [vmem:[#allocation6 + $0x124] ss:$24 sps:$4 sm:$0xff]   ;;  %v4606_v4 = vld [vmem:[#allocation6 + $0x120] ss:$24 sps:$4 sm:$0xff]  }
  0x36   :  { %491 = vmatprep.subr.bf16.mxu0 %v4601_v1  ;;  %v4607_v5 = vld [vmem:[#allocation6 + $0xf4] ss:$24 sps:$4 sm:$0xff]   ;;  %v4609_v6 = vld [vmem:[#allocation6 + $0xf0] ss:$24 sps:$4 sm:$0xff]   ;;  %v4610_v7 = vld [vmem:[#allocation6 + $0xc4] ss:$24 sps:$4 sm:$0xff]  }
  0x37   :  { %492 = vmatpush1.bf16.msra.mxu0 %v4603_v2  ;;  %v4612_v8 = vld [vmem:[#allocation6 + $0xc0] ss:$24 sps:$4 sm:$0xff]   ;;  %v4613_v9 = vld [vmem:[#allocation6 + $0x94] ss:$24 sps:$4 sm:$0xff]   ;;  %v4615_v10 = vld [vmem:[#allocation6 + $0x90] ss:$24 sps:$4 sm:$0xff]  }
  0x38   :  { %493 = vmatprep.subr.bf16.mxu0 %v4604_v3  ;;  %v4616_v11 = vld [vmem:[#allocation6 + $0x64] ss:$24 sps:$4 sm:$0xff]   ;;  %v4618_v12 = vld [vmem:[#allocation6 + $0x60] ss:$24 sps:$4 sm:$0xff]   ;;  %v4619_v13 = vld [vmem:[#allocation6 + $0x34] ss:$24 sps:$4 sm:$0xff]  }
  0x39   :  { %v4621_v14 = vld [vmem:[#allocation6 + $0x30] ss:$24 sps:$4 sm:$0xff]   ;;  %v4643_v15 = vld [vmem:[#allocation6 + $0x15c] ss:$24 sps:$4 sm:$0xff]   ;;  %v4646_v18 = vld [vmem:[#allocation6 + $0x12c] ss:$24 sps:$4 sm:$0xff]  }
  0x3a   :  { %v4645_v16 = vld [vmem:[#allocation6 + $0x158] ss:$24 sps:$4 sm:$0xff]   ;;  %v4622_v17 = vld [vmem:[#allocation6 + $0x4] ss:$24 sps:$4 sm:$0xff]   ;;  %644 = vmatprep.subr.bf16.mxu1 %v4643_v15  ;;  %v4648_v19 = vld [vmem:[#allocation6 + $0x128] ss:$24 sps:$4 sm:$0xff]  }
  0x3b   :  { %494 = vmatpush1.bf16.msra.mxu0 %v4606_v4  ;;  %645 = vmatpush1.bf16.msra.mxu1 %v4645_v16  ;;  %v4624_v20 = vld [vmem:[#allocation6] ss:$24 sps:$4 sm:$0xff]   ;;  %v4653_v21 = vld [vmem:[#allocation6 + $0xfc] ss:$24 sps:$4 sm:$0xff]   ;;  %v4656_v25 = vld [vmem:[#allocation6 + $0xcc] ss:$24 sps:$4 sm:$0xff]  }
  0x3c   :  { %495 = vmatprep.subr.bf16.mxu0 %v4607_v5  ;;  %646 = vmatprep.subr.bf16.mxu1 %v4646_v18  ;;  %v4628_v22 = vld [vmem:[#allocation6 + $0x164] ss:$24 sps:$4 sm:$0xff]   ;;  %v4655_v24 = vld [vmem:[#allocation6 + $0xf8] ss:$24 sps:$4 sm:$0xff]   ;;  %v4632_v27 = vld [vmem:[#allocation6 + $0x134] ss:$24 sps:$4 sm:$0xff]  }
  0x3d   :  { %v4626_v26 = vld [vmem:[#allocation6 + $0x160] ss:$24 sps:$4 sm:$0xff]   ;;  %v4660_v29 = vld [vmem:[#allocation6 + $0x9c] ss:$24 sps:$4 sm:$0xff]   ;;  %v4630_v30 = vld [vmem:[#allocation6 + $0x130] ss:$24 sps:$4 sm:$0xff]  }
  0x3e   :  { %v4658_v28 = vld [vmem:[#allocation6 + $0xc8] ss:$24 sps:$4 sm:$0xff]   ;;  %v4637_v32 = vld [vmem:[#allocation6 + $0x104] ss:$24 sps:$4 sm:$0xff]   ;;  %v4662_v33 = vld [vmem:[#allocation6 + $0x98] ss:$24 sps:$4 sm:$0xff]  }
  0x3f   :  { %496 = vmatpush1.bf16.msra.mxu0 %v4609_v6  ;;  %647 = vmatpush1.bf16.msra.mxu1 %v4648_v19  ;;  %v5802_v31 = vld [vmem:[#allocation3 + $0x8] sm:$0xff]   ;;  %v4635_v35 = vld [vmem:[#allocation6 + $0x100] ss:$24 sps:$4 sm:$0xff]   ;;  %v4652_v39 = vld [vmem:[#allocation6 + $0xa4] ss:$24 sps:$4 sm:$0xff]  }
  0x40   :  { %497 = vmatprep.subr.bf16.mxu0 %v4610_v7  ;;  %648 = vmatprep.subr.bf16.mxu1 %v4653_v21  ;;  %v4666_v34 = vld [vmem:[#allocation6 + $0x6c] ss:$24 sps:$4 sm:$0xff]   ;;  %v4639_v37 = vld [vmem:[#allocation6 + $0xd0] ss:$24 sps:$4 sm:$0xff]   ;;  %v4670_v40 = vld [vmem:[#allocation6 + $0x3c] ss:$24 sps:$4 sm:$0xff]  }
  0x41   :  { %v4641_v36 = vld [vmem:[#allocation6 + $0xd4] ss:$24 sps:$4 sm:$0xff]   ;;  %v4668_v38 = vld [vmem:[#allocation6 + $0x68] ss:$24 sps:$4 sm:$0xff]   ;;  %v4672_v41 = vld [vmem:[#allocation6 + $0x38] ss:$24 sps:$4 sm:$0xff]  }
  0x42   :  { %v5806_v42 = vld [vmem:[#allocation3 + $0x10] sm:$0xff]   ;;  %v4673_v43 = vld [vmem:[#allocation6 + $0xc] ss:$24 sps:$4 sm:$0xff]   ;;  %v4650_v44 = vld [vmem:[#allocation6 + $0xa0] ss:$24 sps:$4 sm:$0xff]  }
  0x43   :  { %498 = vmatpush1.bf16.msra.mxu0 %v4612_v8  ;;  %649 = vmatpush1.bf16.msra.mxu1 %v4655_v24  ;;  %v4665_v45 = vld [vmem:[#allocation6 + $0x74] ss:$24 sps:$4 sm:$0xff]   ;;  %v4675_v46 = vld [vmem:[#allocation6 + $0x8] ss:$24 sps:$4 sm:$0xff]   ;;  %v4679_v48 = vld [vmem:[#allocation6 + $0x44] ss:$24 sps:$4 sm:$0xff]  }
  0x44   :  { %499 = vmatprep.subr.bf16.mxu0 %v4613_v9  ;;  %650 = vmatprep.subr.bf16.mxu1 %v4656_v25  ;;  %v4663_v47 = vld [vmem:[#allocation6 + $0x70] ss:$24 sps:$4 sm:$0xff]   ;;  %v5810_v49 = vld [vmem:[#allocation3 + $0x18] sm:$0xff]   ;;  %v4683_v51 = vld [vmem:[#allocation6 + $0x14] ss:$24 sps:$4 sm:$0xff]  }
  0x45   :  { %v4677_v50 = vld [vmem:[#allocation6 + $0x40] ss:$24 sps:$4 sm:$0xff]   ;;  %v4681_v52 = vld [vmem:[#allocation6 + $0x10] ss:$24 sps:$4 sm:$0xff]   ;;  %v5865_v61 = vld [vmem:[#allocation8 + $0x154] ss:$24 sps:$4 sm:$0xff]  }
  0x46   :  { %v5816_v53 = vld [vmem:[#allocation3 + $0x20] sm:$0xff]   ;;  %v5822_v54 = vld [vmem:[#allocation3 + $0x28] sm:$0xff]   ;;  %v5828_v55 = vld [vmem:[#allocation3 + $0x30] sm:$0xff]  }
  0x47   :  { %500 = vmatpush1.bf16.msra.mxu0 %v4615_v10  ;;  %651 = vmatpush1.bf16.msra.mxu1 %v4658_v28  ;;  %v5834_v56 = vld [vmem:[#allocation3 + $0x38] sm:$0xff]   ;;  %v5840_v57 = vld [vmem:[#allocation3 + $0x40] sm:$0xff]   ;;  %v5846_v58 = vld [vmem:[#allocation3 + $0x48] sm:$0xff]  }
  0x48   :  { %501 = vmatprep.subr.bf16.mxu0 %v4616_v11  ;;  %652 = vmatprep.subr.bf16.mxu1 %v4660_v29  ;;  %v5852_v59 = vld [vmem:[#allocation3 + $0x50] sm:$0xff]   ;;  %v5858_v60 = vld [vmem:[#allocation3 + $0x58] sm:$0xff]  }
  0x49   :  { %v5867_v62 = vld [vmem:[#allocation8 + $0x150] ss:$24 sps:$4 sm:$0xff]   ;;  %v5874_v63 = vld [vmem:[#allocation8 + $0x124] ss:$24 sps:$4 sm:$0xff]   ;;  %v5876_v1 = vld [vmem:[#allocation8 + $0x120] ss:$24 sps:$4 sm:$0xff]  }
  0x4a   :  { %v5884_v2 = vld [vmem:[#allocation8 + $0xf4] ss:$24 sps:$4 sm:$0xff]   ;;  %v5886_v3 = vld [vmem:[#allocation8 + $0xf0] ss:$24 sps:$4 sm:$0xff]   ;;  %v5892_v4 = vld [vmem:[#allocation8 + $0xc4] ss:$24 sps:$4 sm:$0xff]  }
  0x4b   :  { %502 = vmatpush1.bf16.msra.mxu0 %v4618_v12  ;;  %653 = vmatpush1.bf16.msra.mxu1 %v4662_v33  ;;  %v5894_v5 = vld [vmem:[#allocation8 + $0xc0] ss:$24 sps:$4 sm:$0xff]   ;;  %v5899_v6 = vld [vmem:[#allocation8 + $0x94] ss:$24 sps:$4 sm:$0xff]   ;;  %v5901_v7 = vld [vmem:[#allocation8 + $0x90] ss:$24 sps:$4 sm:$0xff]  }
  0x4c   :  { %503 = vmatprep.subr.bf16.mxu0 %v4619_v13  ;;  %654 = vmatprep.subr.bf16.mxu1 %v4666_v34  ;;  %v5907_v8 = vld [vmem:[#allocation8 + $0x164] ss:$24 sps:$4 sm:$0xff]   ;;  %v5911_v10 = vld [vmem:[#allocation8 + $0x60] ss:$24 sps:$4 sm:$0xff]   ;;  %v4708_v12 = vld [vmem:[#allocation8 + $0x134] ss:$24 sps:$4 sm:$0xff]  }
  0x4d   :  { %v5909_v9 = vld [vmem:[#allocation8 + $0x64] ss:$24 sps:$4 sm:$0xff]   ;;  %v4705_v11 = vld [vmem:[#allocation8 + $0x160] ss:$24 sps:$4 sm:$0xff]   ;;  %v4711_v13 = vld [vmem:[#allocation8 + $0x130] ss:$24 sps:$4 sm:$0xff]  }
  0x4e   :  { %v5920_v15 = vld [vmem:[#allocation8 + $0x30] ss:$24 sps:$4 sm:$0xff]   ;;  %v4712_v16 = vld [vmem:[#allocation8 + $0x104] ss:$24 sps:$4 sm:$0xff]   ;;  %v4718_v18 = vld [vmem:[#allocation8 + $0xd4] ss:$24 sps:$4 sm:$0xff]  }
  0x4f   :  { %504 = vmatpush1.bf16.msra.mxu0 %v4621_v14  ;;  %655 = vmatpush1.bf16.msra.mxu1 %v4668_v38  ;;  %v5918_v14 = vld [vmem:[#allocation8 + $0x34] ss:$24 sps:$4 sm:$0xff]   ;;  %v5925_v19 = vld [vmem:[#allocation8 + $0x4] ss:$24 sps:$4 sm:$0xff]   ;;  %v4720_v21 = vld [vmem:[#allocation8 + $0xd0] ss:$24 sps:$4 sm:$0xff]  }
  0x50   :  { %505 = vmatprep.subr.bf16.mxu0 %v4622_v17  ;;  %656 = vmatprep.subr.bf16.mxu1 %v4670_v40  ;;  %v4714_v17 = vld [vmem:[#allocation8 + $0x100] ss:$24 sps:$4 sm:$0xff]   ;;  %v5932_v24 = vld [vmem:[#allocation8 + $0x2d4] ss:$24 sps:$4 sm:$0xff]   ;;  %v5934_v25 = vld [vmem:[#allocation8 + $0x2d0] ss:$24 sps:$4 sm:$0xff]  }
  0x51   :  { %v4733_v28 = vld [vmem:[#allocation8 + $0x44] ss:$24 sps:$4 sm:$0xff]   ;;  %v4741_v33 = vld [vmem:[#allocation8 + $0x10] ss:$24 sps:$4 sm:$0xff]   ;;  %v5948_v34 = vld [vmem:[#allocation8 + $0x274] ss:$24 sps:$4 sm:$0xff]  }
  0x52   :  { %v5940_v29 = vld [vmem:[#allocation8 + $0x2a4] ss:$24 sps:$4 sm:$0xff]   ;;  %v4748_v38 = vld [vmem:[#allocation8 + $0x2b4] ss:$24 sps:$4 sm:$0xff]  }
  0x53   :  { %506 = vmatpush1.bf16.msra.mxu0 %v4624_v20  ;;  %657 = vmatpush1.bf16.msra.mxu1 %v4672_v41  ;;  %v5927_v20 = vld [vmem:[#allocation8] ss:$24 sps:$4 sm:$0xff]   ;;  %v4753_v40 = vld [vmem:[#allocation8 + $0x284] ss:$24 sps:$4 sm:$0xff]  }
  0x54   :  { %797 = vmatprep.subr.bf16.mxu0 %v4628_v22  ;;  %658 = vmatprep.subr.bf16.mxu1 %v4673_v43  ;;  %v4723_v22 = vld [vmem:[#allocation8 + $0xa4] ss:$24 sps:$4 sm:$0xff]   ;;  %v4756_v43 = vld [vmem:[#allocation8 + $0x280] ss:$24 sps:$4 sm:$0xff]  }
  0x55   :  { %v5956_v41 = vld [vmem:[#allocation8 + $0x244] ss:$24 sps:$4 sm:$0xff]  }
  0x56   :  { %524 = vmatmul.mubr.bf16.vlgmr.msra.gmra.mxu0 %v5798_v23 }
  0x57   :  { %798 = vmatpush1.bf16.msra.mxu0 %v4626_v26  ;;  %533 = vmatprep.mubr.bf16.mxu0 %v5744_v0  ;;  %v4727_v26 = vld [vmem:[#allocation8 + $0x74] ss:$24 sps:$4 sm:$0xff]  }
  0x58   :  { %799 = vmatprep.subr.bf16.mxu0 %v4632_v27  ;;  %659 = vmatpush1.bf16.msra.mxu1 %v4675_v46  ;;  %v4729_v27 = vld [vmem:[#allocation8 + $0x70] ss:$24 sps:$4 sm:$0xff]   ;;  %v5964_v46 = vld [vmem:[#allocation8 + $0x214] ss:$24 sps:$4 sm:$0xff]  }
  0x59   :  { %1777 = vmatprep.subr.bf16.mxu1 %v5865_v61 }
  0x5b   :  { %800 = vmatpush1.bf16.msra.mxu0 %v4630_v30  ;;  %677 = vmatmul.mubr.bf16.vlgmr.msra.gmra.mxu1 %v5798_v23  ;;  %v5942_v30 = vld [vmem:[#allocation8 + $0x2a0] ss:$24 sps:$4 sm:$0xff]  }
  0x5c   :  { %801 = vmatprep.subr.bf16.mxu0 %v4637_v32  ;;  %686 = vmatprep.mubr.bf16.mxu1 %v5744_v0  ;;  %v4738_v32 = vld [vmem:[#allocation8 + $0x14] ss:$24 sps:$4 sm:$0xff]  }
  0x5d   :  { %1778 = vmatpush1.bf16.msra.mxu1 %v5867_v62 }
  0x5e   :  { %534 = vmatmul.mubr.bf16.gmra.mxu0 %v5802_v31  ;;  %1779 = vmatprep.subr.bf16.mxu1 %v5874_v63 }
  0x5f   :  { %543 = vmatprep.mubr.bf16.mxu0 %v5744_v0  ;;  %802 = vmatpush1.bf16.msra.mxu0 %v4635_v35  ;;  %v5950_v35 = vld [vmem:[#allocation8 + $0x270] ss:$24 sps:$4 sm:$0xff]  }
  0x60   :  { %803 = vmatprep.subr.bf16.mxu0 %v4641_v36  ;;  %v4742_v36 = vld [vmem:[#allocation8 + $0x2e4] ss:$24 sps:$4 sm:$0xff]  }
  0x61   :  { %1780 = vmatpush1.bf16.msra.mxu1 %v5876_v1 }
  0x62   :  { %1781 = vmatprep.subr.bf16.mxu1 %v5884_v2 }
  0x63   :  { %804 = vmatpush1.bf16.msra.mxu0 %v4639_v37  ;;  %687 = vmatmul.mubr.bf16.gmra.mxu1 %v5802_v31  ;;  %v4744_v37 = vld [vmem:[#allocation8 + $0x2e0] ss:$24 sps:$4 sm:$0xff]  }
  0x64   :  { %805 = vmatprep.subr.bf16.mxu0 %v4652_v39  ;;  %696 = vmatprep.mubr.bf16.mxu1 %v5744_v0  ;;  %v4750_v39 = vld [vmem:[#allocation8 + $0x2b0] ss:$24 sps:$4 sm:$0xff]  }
  0x65   :  { %1782 = vmatpush1.bf16.msra.mxu1 %v5886_v3 }
  0x66   :  { %544 = vmatmul.mubr.bf16.gmra.mxu0 %v5806_v42  ;;  %1783 = vmatprep.subr.bf16.mxu1 %v5892_v4 }
  0x67   :  { %553 = vmatprep.mubr.bf16.mxu0 %v5744_v0  ;;  %806 = vmatpush1.bf16.msra.mxu0 %v4650_v44  ;;  %v4757_v44 = vld [vmem:[#allocation8 + $0x254] ss:$24 sps:$4 sm:$0xff]  }
  0x68   :  { %807 = vmatprep.subr.bf16.mxu0 %v4665_v45  ;;  %v4759_v45 = vld [vmem:[#allocation8 + $0x250] ss:$24 sps:$4 sm:$0xff]  }
  0x69   :  { %1784 = vmatpush1.bf16.msra.mxu1 %v5894_v5 }
  0x6a   :  { %1785 = vmatprep.subr.bf16.mxu1 %v5899_v6 }
  0x6b   :  { %808 = vmatpush1.bf16.msra.mxu0 %v4663_v47  ;;  %697 = vmatmul.mubr.bf16.gmra.mxu1 %v5806_v42  ;;  %v5966_v47 = vld [vmem:[#allocation8 + $0x210] ss:$24 sps:$4 sm:$0xff]  }
  0x6c   :  { %809 = vmatprep.subr.bf16.mxu0 %v4679_v48  ;;  %706 = vmatprep.mubr.bf16.mxu1 %v5744_v0  ;;  %v5968_v48 = vld [vmem:[#allocation8 + $0x1e4] ss:$24 sps:$4 sm:$0xff]  }
  0x6d   :  { %1786 = vmatpush1.bf16.msra.mxu1 %v5901_v7 }
  0x6e   :  { %554 = vmatmul.mubr.bf16.gmra.mxu0 %v5810_v49  ;;  %1787 = vmatprep.subr.bf16.mxu1 %v5909_v9 }
  0x6f   :  { %563 = vmatprep.mubr.bf16.mxu0 %v5744_v0  ;;  %810 = vmatpush1.bf16.msra.mxu0 %v4677_v50  ;;  %v4765_v50 = vld [vmem:[#allocation8 + $0x220] ss:$24 sps:$4 sm:$0xff]  }
  0x70   :  { %811 = vmatprep.subr.bf16.mxu0 %v4683_v51  ;;  %v5972_v51 = vld [vmem:[#allocation8 + $0x1e0] ss:$24 sps:$4 sm:$0xff]  }
  0x71   :  { %1788 = vmatpush1.bf16.msra.mxu1 %v5911_v10 }
  0x72   :  { %1789 = vmatprep.subr.bf16.mxu1 %v5918_v14 }
  0x73   :  { %812 = vmatpush1.bf16.msra.mxu0 %v4681_v52  ;;  %707 = vmatmul.mubr.bf16.gmra.mxu1 %v5810_v49  ;;  %v4768_v52 = vld [vmem:[#allocation8 + $0x1f4] ss:$24 sps:$4 sm:$0xff]  }
  0x74   :  { %716 = vmatprep.mubr.bf16.mxu1 %v5744_v0  ;;  %1863 = vmatprep.subr.bf16.mxu0 %v5907_v8 }
  0x75   :  { %1790 = vmatpush1.bf16.msra.mxu1 %v5920_v15 }
  0x76   :  { %564 = vmatmul.mubr.bf16.gmra.mxu0 %v5816_v53  ;;  %1791 = vmatprep.subr.bf16.mxu1 %v5925_v19 }
  0x77   :  { %573 = vmatprep.mubr.bf16.mxu0 %v5744_v0 }
  0x79   :  { %1792 = vmatpush1.bf16.msra.mxu1 %v5927_v20 }
  0x7a   :  { %1793 = vmatprep.subr.bf16.mxu1 %v5932_v24 }
  0x7b   :  { %717 = vmatmul.mubr.bf16.gmra.mxu1 %v5816_v53 }
  0x7c   :  { %726 = vmatprep.mubr.bf16.mxu1 %v5744_v0 }
  0x7d   :  { %1794 = vmatpush2.bf16.msra.mxu1 %v5934_v25 }
  0x7e   :  { %574 = vmatmul.mubr.bf16.gmra.mxu0 %v5822_v54  ;;  %1795 = vmatprep.subr.bf16.mxu1 %v5940_v29 }
  0x7f   :  { %583 = vmatprep.mubr.bf16.mxu0 %v5744_v0 }
  0x81   :  { %1796 = vmatpush2.bf16.msra.mxu1 %v5942_v30 }
  0x82   :  { %1797 = vmatprep.subr.bf16.mxu1 %v5948_v34 }
  0x83   :  { %727 = vmatmul.mubr.bf16.gmra.mxu1 %v5822_v54 }
  0x84   :  { %736 = vmatprep.mubr.bf16.mxu1 %v5744_v0 }
  0x85   :  { %1798 = vmatpush2.bf16.msra.mxu1 %v5950_v35 }
  0x86   :  { %584 = vmatmul.mubr.bf16.gmra.mxu0 %v5828_v55  ;;  %1799 = vmatprep.subr.bf16.mxu1 %v5956_v41 }
  0x87   :  { %593 = vmatprep.mubr.bf16.mxu0 %v5744_v0 }
  0x8b   :  { %737 = vmatmul.mubr.bf16.gmra.mxu1 %v5828_v55 }
  0x8c   :  { %746 = vmatprep.mubr.bf16.mxu1 %v5744_v0 }
  0x8e   :  { %594 = vmatmul.mubr.bf16.gmra.mxu0 %v5834_v56 }
  0x8f   :  { %603 = vmatprep.mubr.bf16.mxu0 %v5744_v0 }
  0x93   :  { %747 = vmatmul.mubr.bf16.gmra.mxu1 %v5834_v56 }
  0x94   :  { %756 = vmatprep.mubr.bf16.mxu1 %v5744_v0 }
  0x96   :  { %604 = vmatmul.mubr.bf16.gmra.mxu0 %v5840_v57 }
  0x97   :  { %613 = vmatprep.mubr.bf16.mxu0 %v5744_v0 }
  0x9b   :  { %757 = vmatmul.mubr.bf16.gmra.mxu1 %v5840_v57 }
  0x9c   :  { %766 = vmatprep.mubr.bf16.mxu1 %v5744_v0 }
  0x9e   :  { %614 = vmatmul.mubr.bf16.gmra.mxu0 %v5846_v58 }
  0x9f   :  { %623 = vmatprep.mubr.bf16.mxu0 %v5744_v0 }
  0xa3   :  { %767 = vmatmul.mubr.bf16.gmra.mxu1 %v5846_v58 }
  0xa4   :  { %776 = vmatprep.mubr.bf16.mxu1 %v5744_v0 }
  0xa6   :  { %624 = vmatmul.mubr.bf16.gmra.mxu0 %v5852_v59 }
  0xa7   :  { %633 = vmatprep.mubr.bf16.mxu0 %v5744_v0 }
  0xab   :  { %777 = vmatmul.mubr.bf16.gmra.mxu1 %v5852_v59 }
  0xac   :  { %786 = vmatprep.mubr.bf16.mxu1 %v5744_v0 }
  0xae   :  { %634 = vmatmul.mubr.bf16.gmra.mxu0 %v5858_v60 }
  0xaf   :  { %829 = vmatprep.mubr.bf16.mxu0 %v5744_v0 }
  0xb3   :  { %787 = vmatmul.mubr.bf16.gmra.mxu1 %v5858_v60 }
  0xb6   :  { %830 = vmatmul.mubr.bf16.vlgmr.msra.gmra.mxu0 %v5798_v23  ;;  %v4726_v23 = vld [vmem:[#allocation8 + $0xa0] ss:$24 sps:$4 sm:$0xff]  }
  0xb7   :  { %839 = vmatprep.mubr.bf16.mxu0 %v5744_v0  ;;  %1864 = vmatpush1.bf16.msra.mxu0 %v4705_v11  ;;  %v4778_v11 = vld [vmem:[#allocation8 + $0x194] ss:$24 sps:$4 sm:$0xff]  }
  0xb8   :  { %1865 = vmatprep.subr.bf16.mxu0 %v4708_v12  ;;  %v4781_v12 = vld [vmem:[#allocation8 + $0x15c] ss:$24 sps:$4 sm:$0xff]  }
  0xbb   :  { %1866 = vmatpush1.bf16.msra.mxu0 %v4711_v13 }
  0xbc   :  { %1867 = vmatprep.subr.bf16.mxu0 %v4712_v16 }
  0xbe   :  { %840 = vmatmul.mubr.bf16.gmra.mxu0 %v5802_v31  ;;  %v4735_v31 = vld [vmem:[#allocation8 + $0x40] ss:$24 sps:$4 sm:$0xff]  }
  0xbf   :  { %849 = vmatprep.mubr.bf16.mxu0 %v5744_v0  ;;  %1868 = vmatpush1.bf16.msra.mxu0 %v4714_v17 }
  0xc0   :  { %1869 = vmatprep.subr.bf16.mxu0 %v4718_v18 }
  0xc3   :  { %1870 = vmatpush1.bf16.msra.mxu0 %v4720_v21 }
  0xc4   :  { %1871 = vmatprep.subr.bf16.mxu0 %v4723_v22 }
  0xc6   :  { %850 = vmatmul.mubr.bf16.gmra.mxu0 %v5806_v42  ;;  %v5958_v42 = vld [vmem:[#allocation8 + $0x240] ss:$24 sps:$4 sm:$0xff]  }
  0xc7   :  { %859 = vmatprep.mubr.bf16.mxu0 %v5744_v0  ;;  %1872 = vmatpush1.bf16.msra.mxu0 %v4726_v23 }
  0xc8   :  { %1873 = vmatprep.subr.bf16.mxu0 %v4727_v26  ;;  %1800 = vmatpush2.bf16.msra.mxu1 %v5958_v42 }
  0xc9   :  { %1801 = vmatprep.subr.bf16.mxu1 %v5964_v46 }
  0xcb   :  { %1874 = vmatpush1.bf16.msra.mxu0 %v4729_v27 }
  0xcc   :  { %1875 = vmatprep.subr.bf16.mxu0 %v4733_v28  ;;  %1802 = vmatpush2.bf16.msra.mxu1 %v5966_v47 }
  0xcd   :  { %1803 = vmatprep.subr.bf16.mxu1 %v5968_v48 }
  0xce   :  { %860 = vmatmul.mubr.bf16.gmra.mxu0 %v5810_v49  ;;  %v4763_v49 = vld [vmem:[#allocation8 + $0x224] ss:$24 sps:$4 sm:$0xff]  }
  0xcf   :  { %869 = vmatprep.mubr.bf16.mxu0 %v5744_v0  ;;  %1876 = vmatpush1.bf16.msra.mxu0 %v4735_v31 }
  0xd0   :  { %1877 = vmatprep.subr.bf16.mxu0 %v4738_v32  ;;  %1804 = vmatpush2.bf16.msra.mxu1 %v5972_v51 }
  0xd3   :  { %1878 = vmatpush1.bf16.msra.mxu0 %v4741_v33 }
  0xd4   :  { %1879 = vmatprep.subr.bf16.mxu0 %v4742_v36 }
  0xd6   :  { %870 = vmatmul.mubr.bf16.gmra.mxu0 %v5816_v53  ;;  %v5975_v53 = vld [vmem:[#allocation8 + $0x1b4] ss:$24 sps:$4 sm:$0xff]  }
  0xd7   :  { %879 = vmatprep.mubr.bf16.mxu0 %v5744_v0  ;;  %1880 = vmatpush2.bf16.msra.mxu0 %v4744_v37 }
  0xd8   :  { %1881 = vmatprep.subr.bf16.mxu0 %v4748_v38  ;;  %1805 = vmatprep.subr.bf16.mxu1 %v5975_v53 }
  0xdb   :  { %1882 = vmatpush2.bf16.msra.mxu0 %v4750_v39 }
  0xdc   :  { %1883 = vmatprep.subr.bf16.mxu0 %v4753_v40 }
  0xde   :  { %880 = vmatmul.mubr.bf16.gmra.mxu0 %v5822_v54  ;;  %v4771_v54 = vld [vmem:[#allocation8 + $0x1f0] ss:$24 sps:$4 sm:$0xff]  }
  0xdf   :  { %889 = vmatprep.mubr.bf16.mxu0 %v5744_v0  ;;  %1884 = vmatpush2.bf16.msra.mxu0 %v4756_v43  ;;  %v149_v43 = vlaneseq }
  0xe0   :  { %1885 = vmatprep.subr.bf16.mxu0 %v4757_v44 }
  0xe3   :  { %1886 = vmatpush2.bf16.msra.mxu0 %v4759_v45 }
  0xe4   :  { %1887 = vmatprep.subr.bf16.mxu0 %v4763_v49  ;;  %v6025_v49 = vshrl.u32 %v149_v43, 7 }
  0xe6   :  { %890 = vmatmul.mubr.bf16.gmra.mxu0 %v5828_v55  ;;  %v5980_v55 = vld [vmem:[#allocation8 + $0x1b0] ss:$24 sps:$4 sm:$0xff]  }
  0xe7   :  { %899 = vmatprep.mubr.bf16.mxu0 %v5744_v0  ;;  %1888 = vmatpush2.bf16.msra.mxu0 %v4765_v50 }
  0xe8   :  { %1889 = vmatprep.subr.bf16.mxu0 %v4768_v52  ;;  %1806 = vmatpush2.bf16.msra.mxu1 %v5980_v55  ;;  %v8459_v52 = vsub.s32 1, %v6025_v49 }
  0xeb   :  { %1890 = vmatpush2.bf16.msra.mxu0 %v4771_v54 }
  0xee   :  { %900 = vmatmul.mubr.bf16.gmra.mxu0 %v5834_v56  ;;  %v4772_v56 = vld [vmem:[#allocation8 + $0x1c4] ss:$24 sps:$4 sm:$0xff]  }
  0xef   :  { %909 = vmatprep.mubr.bf16.mxu0 %v5744_v0  ;;  %1891 = vmatprep.subr.bf16.mxu0 %v4772_v56  ;;  %v6032_v56 = vld [vmem:[#allocation9] sm:$0x3f] }
  0xf6   :  { %910 = vmatmul.mubr.bf16.gmra.mxu0 %v5840_v57  ;;  %v5983_v57 = vld [vmem:[#allocation8 + $0x184] ss:$24 sps:$4 sm:$0xff]  }
  0xf7   :  { %919 = vmatprep.mubr.bf16.mxu0 %v5744_v0  ;;  %1807 = vmatprep.subr.bf16.mxu1 %v5983_v57 }
  0xfe   :  { %920 = vmatmul.mubr.bf16.gmra.mxu0 %v5846_v58  ;;  %v4774_v58 = vld [vmem:[#allocation8 + $0x1c0] ss:$24 sps:$4 sm:$0xff]  }
  0xff   :  { %929 = vmatprep.mubr.bf16.mxu0 %v5744_v0  ;;  %1892 = vmatpush2.bf16.msra.mxu0 %v4774_v58 }
 0x100   :  { %1893 = vmatprep.subr.bf16.mxu0 %v4778_v11  ;;  %v6039_v11 = vrot.slane %v6032_v56, %v8459_v52 }
 0x102   :  { %8927 = vst [vmem:[#allocation32_spill] sm:$0xff] %v6039_v11 }
 0x106   :  { %930 = vmatmul.mubr.bf16.gmra.mxu0 %v5852_v59  ;;  %v5986_v59 = vld [vmem:[#allocation8 + $0x180] ss:$24 sps:$4 sm:$0xff]  }
 0x107   :  { %939 = vmatprep.mubr.bf16.mxu0 %v5744_v0  ;;  %v4780_v0 = vld [vmem:[#allocation8 + $0x190] ss:$24 sps:$4 sm:$0xff]   ;;  %1808 = vmatpush2.bf16.msra.mxu1 %v5986_v59 }
 0x108   :  { %1894 = vmatpush2.bf16.msra.mxu0 %v4780_v0  ;;  %1820 = vmatprep.subr.bf16.mxu1 %v4781_v12  ;;  %v8460_v0 = vsub.s32 0, %v6025_v49 }
 0x109   :  { %2052 = vmatprep.subr.bf16.mxu0 %v4781_v12 }
 0x10e   :  { %940 = vmatmul.mubr.bf16.gmra.mxu0 %v5858_v60 }
 0x116   :  { %v525_v13 = vpop.f32.mrf.mxu0 }
 0x118   :  { %v527_v16 = vpop.f32.mrf.mxu0 }
 0x11a   :  { %v529_v17 = vpop.f32.mrf.mxu0 }
 0x11c   :  { %v531_v18 = vpop.f32.mrf.mxu0 }
 0x11e   :  { %v5991_v21 = vpop.f32.mrf.mxu0 }
 0x120   :  { %v5993_v22 = vpop.f32.mrf.mxu0 }
 0x122   :  { %v5995_v23 = vpop.f32.mrf.mxu0 }
 0x124   :  { %v5997_v60 = vpop.f32.mrf.mxu0 }
 0x126   :  { %v5999_v26 = vpop.f32.mrf.mxu0 }
 0x127   :  { %8911 = vst [vmem:[#allocation16_spill] sm:$0xff] %v5999_v26 }
 0x128   :  { %v6001_v27 = vpop.f32.mrf.mxu0 }
 0x129   :  { %8912 = vst [vmem:[#allocation17_spill] sm:$0xff] %v6001_v27 }
 0x12a   :  { %v6003_v28 = vpop.f32.mrf.mxu0 }
 0x12b   :  { %8913 = vst [vmem:[#allocation18_spill] sm:$0xff] %v6003_v28 }
 0x12c   :  { %v6005_v31 = vpop.f32.mrf.mxu0 }
 0x12d   :  { %8914 = vst [vmem:[#allocation19_spill] sm:$0xff] %v6005_v31 }
 0x12e   :  { %v6007_v32 = vpop.f32.mrf.mxu0 }
 0x12f   :  { %8915 = vst [vmem:[#allocation20_spill] sm:$0xff] %v6007_v32 }
 0x130   :  { %v6009_v33 = vpop.f32.mrf.mxu0 }
 0x131   :  { %8916 = vst [vmem:[#allocation21_spill] sm:$0xff] %v6009_v33 }
 0x132   :  { %v6011_v36 = vpop.f32.mrf.mxu0 }
 0x133   :  { %8917 = vst [vmem:[#allocation22_spill] sm:$0xff] %v6011_v36 }
 0x134   :  { %v6013_v37 = vpop.f32.mrf.mxu0 }
 0x135   :  { %8918 = vst [vmem:[#allocation23_spill] sm:$0xff] %v6013_v37 }
 0x136   :  { %v6015_v38 = vpop.f32.mrf.mxu0 }
 0x137   :  { %8919 = vst [vmem:[#allocation24_spill] sm:$0xff] %v6015_v38 }
 0x138   :  { %v6017_v39 = vpop.f32.mrf.mxu0 }
 0x139   :  { %8920 = vst [vmem:[#allocation25_spill] sm:$0xff] %v6017_v39 }
 0x13a   :  { %v6019_v40 = vpop.f32.mrf.mxu0 }
 0x13b   :  { %8921 = vst [vmem:[#allocation26_spill] sm:$0xff] %v6019_v40 }
 0x13c   :  { %v6021_v44 = vpop.f32.mrf.mxu0 }
 0x13d   :  { %8922 = vst [vmem:[#allocation27_spill] sm:$0xff] %v6021_v44 }
 0x13e   :  { %v6023_v45 = vpop.f32.mrf.mxu0 }
 0x13f   :  { %8923 = vst [vmem:[#allocation28_spill] sm:$0xff] %v6023_v45 }
 0x140   :  { %v6027_v50 = vpop.f32.mrf.mxu0 }
 0x141   :  { %8924 = vst [vmem:[#allocation29_spill] sm:$0xff] %v6027_v50  ;;  %v528_v50 = vadd.f32 %v527_v16, %v6039_v11  ;;  %v532_v16 = vadd.f32 %v531_v18, %v6039_v11 }
 0x142   :  { %v6030_v54 = vpop.f32.mrf.mxu0 }
 0x143   :  { %8925 = vst [vmem:[#allocation30_spill] sm:$0xff] %v6030_v54  ;;  %v6050_v54 = vrot.slane %v6032_v56, %v8460_v0  ;;  %v4398_v44 = vmul.f32 -1.442695, %v528_v50  ;;  %v678_v0 = vpop.f32.mrf.mxu1 }
 0x144   :  { %v6034_v58 = vpop.f32.mrf.mxu0 }
 0x145   :  { %8926 = vst [vmem:[#allocation31_spill] sm:$0xff] %v6034_v58  ;;  %v526_v52 = vadd.f32 %v525_v13, %v6050_v54  ;;  %4829 = vpow2.f32 %v4398_v44  ;;  %v159_v13 = vsub.s32 2, %v6025_v49 }
 0x146   :  { %v6042_v12 = vpop.f32.mrf.mxu0 }
 0x147   :  { %8928 = vst [vmem:[#allocation33_spill] sm:$0xff] %v6042_v12  ;;  %v530_v12 = vadd.f32 %v529_v17, %v6050_v54  ;;  %v163_v17 = vsub.s32 3, %v6025_v49 }
 0x148   :  { %v6044_v43 = vpop.f32.mrf.mxu0 }
 0x149   :  { %8929 = vst [vmem:[#allocation34_spill] sm:$0xff] %v6044_v43  ;;  %v4397_v43 = vmul.f32 -1.442695, %v526_v52  ;;  %v4399_v37 = vmul.f32 -1.442695, %v530_v12  ;;  %v6076_v52 = vrot.slane %v6032_v56, %v159_v13 }
 0x14a   :  { %v6052_v45 = vpop.f32.mrf.mxu0 }
 0x14b   :  { %8930 = vst [vmem:[#allocation35_spill] sm:$0xff] %v6052_v45  ;;  %4831 = vpow2.f32 %v4397_v43  ;;  %8939 = vst [vmem:[#allocation44_spill] sm:$0xff] %v6076_v52 }
 0x14c   :  { %v6054_v58 = vpop.f32.mrf.mxu0  ;;  %4833 = vpow2.f32 %v4399_v37  ;;  %v679_v37 = vadd.f32 %v678_v0, %v6076_v52 }
 0x14d   :  { %8931 = vst [vmem:[#allocation36_spill] sm:$0xff] %v6054_v58  ;;  %v4400_v58 = vmul.f32 -1.442695, %v532_v16  ;;  %v6079_v16 = vrot.slane %v6032_v56, %v163_v17 }
 0x14e   :  { %v6057_v40 = vpop.f32.mrf.mxu0  ;;  %v4401_v36 = vmul.f32 -1.442695, %v679_v37  ;;  %v1094_v37 = vld [vmem:[%s8457_s4] sm:$0x3]  ;;  %s5745_s4 = smov [#allocation11]  }
 0x14f   :  { %8932 = vst [vmem:[#allocation37_spill] sm:$0xff] %v6057_v40  ;;  %v680_v40 = vpop.f32.mrf.mxu1  ;;  %4835 = vpow2.f32 %v4400_v58  ;;  %8940 = vst [vmem:[#allocation45_spill] sm:$0xff] %v6079_v16  ;;  %s4323_s15 = sshll.u32 %s5745_s4, 4  ;;  %s4324_s15 = int_to_ptr.vmem [resolvable:$true] %s4323_s15 }
 0x150   :  { %v6060_v39 = vpop.f32.mrf.mxu0  ;;  %s5708_s16 = scalar_lea.vmem %s4324_s15, 512  ;;  %p5713_p7 = scmp.lt.s32.totalorder %s4324_s15, %s4324_s15 }
 0x151   :  { %8933 = vst [vmem:[#allocation38_spill] sm:$0xff] %v6060_v39  ;;  %v682_v12 = vpop.f32.mrf.mxu1  ;;  %p5709_p6 = scmp.ne.s32.totalorder %s4324_s15, %s5708_s16  ;;  %p5714_p8 = scmp.lt.s32.totalorder %s5708_s16, %s5708_s16 }
 0x152   :  { %v6063_v38 = vpop.f32.mrf.mxu0 }
 0x153   :  { %8934 = vst [vmem:[#allocation39_spill] sm:$0xff] %v6063_v38  ;;  %v684_v38 = vpop.f32.mrf.mxu1  ;;  %p5715_p9 = por %p5714_p8, %p5713_p7 }
 0x154   :  { %v6065_v45 = vpop.f32.mrf.mxu0  ;;  %v685_v39 = vadd.f32 %v684_v38, %v6079_v16 }
 0x155   :  { %8935 = vst [vmem:[#allocation40_spill] sm:$0xff] %v6065_v45  ;;  %p5716_p10 = pnand %p5715_p9, %p5709_p6 }
 0x156   :  { %v6067_v50 = vpop.f32.mrf.mxu0  ;;  %v4404_v0 = vmul.f32 -1.442695, %v685_v39 }
 0x157   :  { %8936 = vst [vmem:[#allocation41_spill] sm:$0xff] %v6067_v50  ;;  %v4830_v50 = vpop.eup %4829 }
 0x158   :  { %v6071_v44 = vpop.f32.mrf.mxu0  ;;  %v1131_v13 = vadd.f32 1.0, %v4830_v50  ;;  %v4832_v33 = vpop.eup %4831 }
 0x159   :  { %8937 = vst [vmem:[#allocation42_spill] sm:$0xff] %v6071_v44  ;;  %v681_v44 = vadd.f32 %v680_v40, %v6079_v16  ;;  %v4834_v32 = vpop.eup %4833  ;;  %v1130_v40 = vadd.f32 1.0, %v4832_v33 }
 0x15a   :  { %v6073_v18 = vpop.f32.mrf.mxu0  ;;  %4837 = vrcp.f32 %v1131_v13 }
 0x15b   :  { %8938 = vst [vmem:[#allocation43_spill] sm:$0xff] %v6073_v18  ;;  %v683_v18 = vadd.f32 %v682_v12, %v6076_v52  ;;  %4839 = vpow2.f32 %v4401_v36  ;;  %v1132_v12 = vadd.f32 1.0, %v4834_v32  ;;  %v167_v36 = vsub.s32 4, %v6025_v49 }
 0x15c   :  { %v6081_v43 = vpop.f32.mrf.mxu0  ;;  %v4836_v28 = vpop.eup %4835  ;;  %v171_v32 = vsub.s32 5, %v6025_v49 }
 0x15d   :  { %8941 = vst [vmem:[#allocation46_spill] sm:$0xff] %v6081_v43  ;;  %v4402_v43 = vmul.f32 -1.442695, %v681_v44  ;;  %v4403_v31 = vmul.f32 -1.442695, %v683_v18  ;;  %v1133_v50 = vadd.f32 1.0, %v4836_v28 }
 0x15e   :  { %v6083_v45 = vpop.f32.mrf.mxu0 }
 0x15f   :  { %8942 = vst [vmem:[#allocation47_spill] sm:$0xff] %v6083_v45  ;;  %4841 = vpow2.f32 %v4402_v43 }
 0x160   :  { %v6087_v58 = vpop.f32.mrf.mxu0  ;;  %4843 = vpow2.f32 %v4403_v31 }
 0x161   :  { %8943 = vst [vmem:[#allocation48_spill] sm:$0xff] %v6087_v58  ;;  %4845 = vpow2.f32 %v4404_v0 }
 0x162   :  { %v6091_v17 = vpop.f32.mrf.mxu0  ;;  %4847 = vrcp.f32 %v1130_v40  ;;  %v6117_v40 = vrot.slane %v6032_v56, %v167_v36 }
 0x163   :  { %8944 = vst [vmem:[#allocation49_spill] sm:$0xff] %v6091_v17  ;;  %4849 = vrcp.f32 %v1132_v12 }
 0x164   :  { %v6093_v45 = vpop.f32.mrf.mxu0  ;;  %4851 = vrcp.f32 %v1133_v50  ;;  %v6120_v50 = vrot.slane %v6032_v56, %v171_v32 }
 0x165   :  { %8945 = vst [vmem:[#allocation50_spill] sm:$0xff] %v6093_v45 }
 0x166   :  { %v6095_v58 = vpop.f32.mrf.mxu0 }
 0x167   :  { %8946 = vst [vmem:[#allocation51_spill] sm:$0xff] %v6095_v58  ;;  %v4838_v31 = vpop.eup %4837 }
 0x168   :  { %v6097_v38 = vpop.f32.mrf.mxu0  ;;  %v4840_v28 = vpop.eup %4839 }
 0x169   :  { %8947 = vst [vmem:[#allocation52_spill] sm:$0xff] %v6097_v38  ;;  %v8955_v38 = vsub.s32 0, %v6025_v49 }
 0x16a   :  { %v6099_v44 = vpop.f32.mrf.mxu0 }
 0x16b   :  { %8948 = vst [vmem:[#allocation53_spill] sm:$0xff] %v6099_v44  ;;  %v6128_v58 = vrot.slane %v1094_v37, %v8955_v38 }
 0x16c   :  { %v6101_v18 = vpop.f32.mrf.mxu0  ;;  %v4842_v13 = vpop.eup %4841 }
 0x16d   :  { %8949 = vst [vmem:[#allocation54_spill] sm:$0xff] %v6101_v18  ;;  %v4844_v12 = vpop.eup %4843  ;;  %v1154_v18 = vadd.f32 1.0, %v4840_v28 }
 0x16e   :  { %v6103_v39 = vpop.f32.mrf.mxu0  ;;  %v1156_v36 = vadd.f32 1.0, %v4844_v12 }
 0x16f   :  { %8950 = vst [vmem:[#allocation55_spill] sm:$0xff] %v6103_v39  ;;  %4853 = vrcp.f32 %v1154_v18 }
 0x170   :  { %v6105_v33 = vpop.f32.mrf.mxu0 }
 0x171   :  { %8951 = vst [vmem:[#allocation56_spill] sm:$0xff] %v6105_v33  ;;  %v8954_v33 = vsub.s32 1, %v6025_v49 }
 0x172   :  { %v6109_v43 = vpop.f32.mrf.mxu0 }
 0x173   :  { %8952 = vst [vmem:[#allocation57_spill] sm:$0xff] %v6109_v43  ;;  %v6124_v39 = vrot.slane %v1094_v37, %v8954_v33  ;;  %v4846_v43 = vpop.eup %4845 }
 0x174   :  { %v6114_v0 = vpop.f32.mrf.mxu0  ;;  %v4848_v45 = vpop.eup %4847  ;;  %v1157_v56 = vadd.f32 1.0, %v4846_v43 }
 0x175   :  { %8953 = vst [vmem:[#allocation58_spill] sm:$0xff] %v6114_v0  ;;  %v1155_v0 = vadd.f32 1.0, %v4842_v13  ;;  %v4850_v17 = vpop.eup %4849  ;;  %v1167_v33 = vmul.f32 %v4838_v31, %v6124_v39  ;;  %v1166_v28 = vmul.f32 %v4848_v45, %v6128_v58 }
 0x176   :  { %v831_v44 = vpop.f32.mrf.mxu0  ;;  %v4852_v16 = vpop.eup %4851  ;;  %v1168_v37 = vmul.f32 %v4850_v17, %v6128_v58 }
 0x177   :  { %v832_v27 = vadd.f32 %v831_v44, %v6117_v40  ;;  %4855 = vrcp.f32 %v1155_v0  ;;  %v1169_v31 = vmul.f32 %v4852_v16, %v6124_v39 }
 0x178   :  { %v833_v26 = vpop.f32.mrf.mxu0  ;;  %4857 = vrcp.f32 %v1156_v36 }
 0x179   :  { %v834_v32 = vadd.f32 %v833_v26, %v6120_v50  ;;  %v1170_v13 = vadd.f32 %v1166_v28, %v832_v27  ;;  %4859 = vrcp.f32 %v1157_v56 }
 0x17a   :  { %v835_v52 = vpop.f32.mrf.mxu0 }
 0x17b   :  { %v1171_v49 = vadd.f32 %v1167_v33, %v834_v32  ;;  %v836_v38 = vadd.f32 %v835_v52, %v6117_v40 }
 0x17c   :  { %v837_v44 = vpop.f32.mrf.mxu0  ;;  %v4854_v45 = vpop.eup %4853 }
 0x17d   :  { %v1172_v43 = vadd.f32 %v1168_v37, %v836_v38  ;;  %v838_v26 = vadd.f32 %v837_v44, %v6120_v50  ;;  %4861 = vtanh.f32 %v1171_v49  ;;  %v1178_v36 = vsub.f32 1.0, %v4854_v45  ;;  %v6162_v45 = vld [vmem:[#allocation8 + $0xfc] ss:$24 sps:$4 sm:$0xff]  }
 0x17e   :  { %8959 = vst [vmem:[#allocation62_spill] sm:$0xff] %v6162_v45 }
 0x17f   :  { %4863 = vtanh.f32 %v1172_v43  ;;  %v1173_v18 = vadd.f32 %v1169_v31, %v838_v26  ;;  %v6148_v43 = vld [vmem:[#allocation8 + $0x158] ss:$24 sps:$4 sm:$0xff]   ;;  %v6154_v31 = vld [vmem:[#allocation8 + $0x12c] ss:$24 sps:$4 sm:$0xff]  }
 0x180   :  { %4865 = vtanh.f32 %v1170_v13  ;;  %8956 = vst [vmem:[#allocation59_spill] sm:$0xff] %v6148_v43  ;;  %8957 = vst [vmem:[#allocation60_spill] sm:$0xff] %v6154_v31 }
 0x181   :  { %4867 = vtanh.f32 %v1173_v18  ;;  %v6159_v18 = vld [vmem:[#allocation8 + $0x128] ss:$24 sps:$4 sm:$0xff]  }
 0x182   :  { %8958 = vst [vmem:[#allocation61_spill] sm:$0xff] %v6159_v18 }
 0x184   :  { %v4856_v0 = vpop.eup %4855 }
 0x185   :  { %v4858_v12 = vpop.eup %4857  ;;  %v1179_v56 = vsub.f32 1.0, %v4856_v0  ;;  %v6167_v0 = vld [vmem:[#allocation8 + $0xf8] ss:$24 sps:$4 sm:$0xff]  }
 0x186   :  { %v4860_v52 = vpop.eup %4859  ;;  %v1180_v27 = vsub.f32 1.0, %v4858_v12  ;;  %8960 = vst [vmem:[#allocation63_spill] sm:$0xff] %v6167_v0  ;;  %v6170_v12 = vld [vmem:[#allocation8 + $0xcc] ss:$24 sps:$4 sm:$0xff]  }
 0x187   :  { %v1181_v28 = vsub.f32 1.0, %v4860_v52  ;;  %8961 = vst [vmem:[#allocation64_spill] sm:$0xff] %v6170_v12  ;;  %v6175_v52 = vld [vmem:[#allocation8 + $0xc8] ss:$24 sps:$4 sm:$0xff]  }
 0x188   :  { %8962 = vst [vmem:[#allocation65_spill] sm:$0xff] %v6175_v52 }
 0x18a   :  { %v4862_v32 = vpop.eup %4861 }
 0x18b   :  { %v6140_v16 = vmul.f32 %v4862_v32, %v1179_v56  ;;  %v6178_v32 = vld [vmem:[#allocation8 + $0x9c] ss:$24 sps:$4 sm:$0xff]   ;;  %v6196_v56 = vpop.f32.mrf.mxu1 }
 0x18c   :  { %v4864_v17 = vpop.eup %4863  ;;  %8963 = vst [vmem:[#allocation66_spill] sm:$0xff] %v6178_v32 }
 0x18d   :  { %v4866_v33 = vpop.eup %4865  ;;  %v6138_v37 = vmul.f32 %v4864_v17, %v1180_v27  ;;  %v6183_v17 = vld [vmem:[#allocation8 + $0x98] ss:$24 sps:$4 sm:$0xff]   ;;  %v6191_v27 = vld [vmem:[#allocation8 + $0x68] ss:$24 sps:$4 sm:$0xff]  }
 0x18e   :  { %v4868_v38 = vpop.eup %4867  ;;  %v6144_v13 = vmul.f32 %v4866_v33, %v1178_v36  ;;  %8964 = vst [vmem:[#allocation67_spill] sm:$0xff] %v6183_v17  ;;  %v6186_v36 = vld [vmem:[#allocation8 + $0x6c] ss:$24 sps:$4 sm:$0xff]   ;;  %8966 = vst [vmem:[#allocation69_spill] sm:$0xff] %v6191_v27  ;;  %v6194_v33 = vld [vmem:[#allocation8 + $0x3c] ss:$24 sps:$4 sm:$0xff]  }
 0x18f   :  { %v6142_v49 = vmul.f32 %v4868_v38, %v1181_v28  ;;  %8965 = vst [vmem:[#allocation68_spill] sm:$0xff] %v6186_v36  ;;  %8967 = vst [vmem:[#allocation70_spill] sm:$0xff] %v6194_v33  ;;  %v6201_v28 = vld [vmem:[#allocation8 + $0x38] ss:$24 sps:$4 sm:$0xff]   ;;  %v6204_v38 = vld [vmem:[#allocation8 + $0xc] ss:$24 sps:$4 sm:$0xff]  }
 0x190   :  { %v6152_v26 = vpack.c.bf16 %v6138_v37, %v6144_v13  ;;  %8968 = vst [vmem:[#allocation71_spill] sm:$0xff] %v6201_v28  ;;  %8969 = vst [vmem:[#allocation72_spill] sm:$0xff] %v6204_v38 }
 0x191   :  { %v1200_v44 = vpack.c.bf16 %v6142_v49, %v6140_v16 }
 0x193   :  { %1809 = vmatprep.mubr.bf16.mxu1 %v1200_v44  ;;  %1895 = vmatprep.mubr.bf16.mxu0 %v1200_v44 }
 0x194   :  { %1810 = vmatmul.mubr.bf16.vlgmr.msra.gmra.mxu1 %v6152_v26  ;;  %1896 = vmatmul.mubr.bf16.vlgmr.msra.gmra.mxu0 %v6152_v26 }
 0x195   :  { %1821 = vmatpush1.bf16.msra.mxu1 %v6148_v43  ;;  %1852 = vmatprep.mubr.bf16.mxu1 %v1200_v44  ;;  %v6206_v44 = vpop.f32.mrf.mxu1 }
 0x196   :  { %1822 = vmatprep.subr.bf16.mxu1 %v6154_v31  ;;  %2053 = vmatpush1.bf16.msra.mxu0 %v6148_v43 }
 0x197   :  { %2054 = vmatprep.subr.bf16.mxu0 %v6154_v31 }
 0x199   :  { %1823 = vmatpush1.bf16.msra.mxu1 %v6159_v18 }
 0x19a   :  { %1824 = vmatprep.subr.bf16.mxu1 %v6162_v45  ;;  %2055 = vmatpush1.bf16.msra.mxu0 %v6159_v18 }
 0x19b   :  { %2056 = vmatprep.subr.bf16.mxu0 %v6162_v45 }
 0x19d   :  { %1825 = vmatpush1.bf16.msra.mxu1 %v6167_v0 }
 0x19e   :  { %1826 = vmatprep.subr.bf16.mxu1 %v6170_v12  ;;  %2057 = vmatpush1.bf16.msra.mxu0 %v6167_v0  ;;  %v6241_v0 = vld [vmem:[#allocation8 + $0x278] ss:$24 sps:$4 sm:$0xff]  }
 0x19f   :  { %2058 = vmatprep.subr.bf16.mxu0 %v6170_v12  ;;  %v6231_v12 = vld [vmem:[#allocation8 + $0x2a8] ss:$24 sps:$4 sm:$0xff]   ;;  %8977 = vst [vmem:[#allocation80_spill] sm:$0xff] %v6241_v0 }
 0x1a0   :  { %8974 = vst [vmem:[#allocation77_spill] sm:$0xff] %v6231_v12 }
 0x1a1   :  { %1827 = vmatpush1.bf16.msra.mxu1 %v6175_v52 }
 0x1a2   :  { %1828 = vmatprep.subr.bf16.mxu1 %v6178_v32  ;;  %2059 = vmatpush1.bf16.msra.mxu0 %v6175_v52  ;;  %v6221_v52 = vld [vmem:[#allocation8 + $0x2d8] ss:$24 sps:$4 sm:$0xff]  }
 0x1a3   :  { %2060 = vmatprep.subr.bf16.mxu0 %v6178_v32  ;;  %v6211_v32 = vld [vmem:[#allocation8 + $0x8] ss:$24 sps:$4 sm:$0xff]   ;;  %8972 = vst [vmem:[#allocation75_spill] sm:$0xff] %v6221_v52 }
 0x1a4   :  { %8970 = vst [vmem:[#allocation73_spill] sm:$0xff] %v6211_v32 }
 0x1a5   :  { %1829 = vmatpush1.bf16.msra.mxu1 %v6183_v17 }
 0x1a6   :  { %1830 = vmatprep.subr.bf16.mxu1 %v6186_v36  ;;  %2061 = vmatpush1.bf16.msra.mxu0 %v6183_v17  ;;  %v6216_v17 = vpop.f32.mrf.mxu1 }
 0x1a7   :  { %2062 = vmatprep.subr.bf16.mxu0 %v6186_v36  ;;  %v6214_v36 = vld [vmem:[#allocation8 + $0x2dc] ss:$24 sps:$4 sm:$0xff]  }
 0x1a8   :  { %8971 = vst [vmem:[#allocation74_spill] sm:$0xff] %v6214_v36 }
 0x1a9   :  { %1831 = vmatpush1.bf16.msra.mxu1 %v6191_v27 }
 0x1aa   :  { %1832 = vmatprep.subr.bf16.mxu1 %v6194_v33  ;;  %2063 = vmatpush1.bf16.msra.mxu0 %v6191_v27  ;;  %v6226_v27 = vpop.f32.mrf.mxu1 }
 0x1ab   :  { %2064 = vmatprep.subr.bf16.mxu0 %v6194_v33  ;;  %v6224_v33 = vld [vmem:[#allocation8 + $0x2ac] ss:$24 sps:$4 sm:$0xff]  }
 0x1ac   :  { %8973 = vst [vmem:[#allocation76_spill] sm:$0xff] %v6224_v33 }
 0x1ad   :  { %1833 = vmatpush1.bf16.msra.mxu1 %v6201_v28 }
 0x1ae   :  { %1834 = vmatprep.subr.bf16.mxu1 %v6204_v38  ;;  %2065 = vmatpush1.bf16.msra.mxu0 %v6201_v28  ;;  %v6236_v28 = vpop.f32.mrf.mxu1 }
 0x1af   :  { %2066 = vmatprep.subr.bf16.mxu0 %v6204_v38  ;;  %v6234_v38 = vld [vmem:[#allocation8 + $0x27c] ss:$24 sps:$4 sm:$0xff]   ;;  %8976 = vst [vmem:[#allocation79_spill] sm:$0xff] %v6236_v28  ;;  %v6251_v28 = vld [vmem:[#allocation8 + $0x248] ss:$24 sps:$4 sm:$0xff]  }
 0x1b0   :  { %8975 = vst [vmem:[#allocation78_spill] sm:$0xff] %v6234_v38  ;;  %8980 = vst [vmem:[#allocation83_spill] sm:$0xff] %v6251_v28 }
 0x1b1   :  { %1835 = vmatpush1.bf16.msra.mxu1 %v6211_v32 }
 0x1b2   :  { %1836 = vmatprep.subr.bf16.mxu1 %v6214_v36  ;;  %2067 = vmatpush1.bf16.msra.mxu0 %v6211_v32  ;;  %v6246_v32 = vpop.f32.mrf.mxu1 }
 0x1b3   :  { %2068 = vmatprep.subr.bf16.mxu0 %v6214_v36  ;;  %v6244_v36 = vld [vmem:[#allocation8 + $0x24c] ss:$24 sps:$4 sm:$0xff]   ;;  %8979 = vst [vmem:[#allocation82_spill] sm:$0xff] %v6246_v32  ;;  %v6263_v32 = vld [vmem:[#allocation8 + $0x218] ss:$24 sps:$4 sm:$0xff]  }
 0x1b4   :  { %8978 = vst [vmem:[#allocation81_spill] sm:$0xff] %v6244_v36  ;;  %v6258_v45 = vpop.f32.mrf.mxu1  ;;  %8983 = vst [vmem:[#allocation86_spill] sm:$0xff] %v6263_v32 }
 0x1b5   :  { %1837 = vmatpush2.bf16.msra.mxu1 %v6221_v52  ;;  %8982 = vst [vmem:[#allocation85_spill] sm:$0xff] %v6258_v45  ;;  %v6275_v45 = vld [vmem:[#allocation8 + $0x1e8] ss:$24 sps:$4 sm:$0xff]  }
 0x1b6   :  { %1838 = vmatprep.subr.bf16.mxu1 %v6224_v33  ;;  %2069 = vmatpush2.bf16.msra.mxu0 %v6221_v52  ;;  %v6256_v52 = vpop.f32.mrf.mxu0  ;;  %v6270_v18 = vpop.f32.mrf.mxu1  ;;  %8986 = vst [vmem:[#allocation89_spill] sm:$0xff] %v6275_v45 }
 0x1b7   :  { %2070 = vmatprep.subr.bf16.mxu0 %v6224_v33  ;;  %v6254_v33 = vld [vmem:[#allocation8 + $0x21c] ss:$24 sps:$4 sm:$0xff]   ;;  %8985 = vst [vmem:[#allocation88_spill] sm:$0xff] %v6270_v18  ;;  %v6287_v18 = vld [vmem:[#allocation8 + $0x1b8] ss:$24 sps:$4 sm:$0xff]  }
 0x1b8   :  { %8981 = vst [vmem:[#allocation84_spill] sm:$0xff] %v6254_v33  ;;  %v6282_v31 = vpop.f32.mrf.mxu1 }
 0x1b9   :  { %1839 = vmatpush2.bf16.msra.mxu1 %v6231_v12  ;;  %8987 = vst [vmem:[#allocation90_spill] sm:$0xff] %v6282_v31  ;;  %v6299_v31 = vld [vmem:[#allocation8 + $0x188] ss:$24 sps:$4 sm:$0xff]  }
 0x1ba   :  { %1840 = vmatprep.subr.bf16.mxu1 %v6234_v38  ;;  %2071 = vmatpush2.bf16.msra.mxu0 %v6231_v12  ;;  %v6268_v12 = vpop.f32.mrf.mxu0  ;;  %v6294_v43 = vpop.f32.mrf.mxu1 }
 0x1bb   :  { %2072 = vmatprep.subr.bf16.mxu0 %v6234_v38  ;;  %v6266_v38 = vld [vmem:[#allocation8 + $0x1ec] ss:$24 sps:$4 sm:$0xff]   ;;  %8988 = vst [vmem:[#allocation91_spill] sm:$0xff] %v6294_v43 }
 0x1bc   :  { %8984 = vst [vmem:[#allocation87_spill] sm:$0xff] %v6266_v38 }
 0x1bd   :  { %1841 = vmatpush2.bf16.msra.mxu1 %v6241_v0 }
 0x1be   :  { %1842 = vmatprep.subr.bf16.mxu1 %v6244_v36  ;;  %2073 = vmatpush2.bf16.msra.mxu0 %v6241_v0  ;;  %v6280_v0 = vpop.f32.mrf.mxu0 }
 0x1bf   :  { %2074 = vmatprep.subr.bf16.mxu0 %v6244_v36  ;;  %v6278_v36 = vld [vmem:[#allocation8 + $0x1bc] ss:$24 sps:$4 sm:$0xff]  }
 0x1c1   :  { %1843 = vmatpush2.bf16.msra.mxu1 %v6251_v28 }
 0x1c2   :  { %1844 = vmatprep.subr.bf16.mxu1 %v6254_v33  ;;  %2075 = vmatpush2.bf16.msra.mxu0 %v6251_v28  ;;  %v6292_v28 = vpop.f32.mrf.mxu0 }
 0x1c3   :  { %2076 = vmatprep.subr.bf16.mxu0 %v6254_v33  ;;  %v6290_v33 = vld [vmem:[#allocation8 + $0x18c] ss:$24 sps:$4 sm:$0xff]  }
 0x1c5   :  { %1845 = vmatpush2.bf16.msra.mxu1 %v6263_v32 }
 0x1c6   :  { %1846 = vmatprep.subr.bf16.mxu1 %v6266_v38  ;;  %2077 = vmatpush2.bf16.msra.mxu0 %v6263_v32  ;;  %v6304_v32 = vpop.f32.mrf.mxu1 }
 0x1c7   :  { %2078 = vmatprep.subr.bf16.mxu0 %v6266_v38  ;;  %v6302_v38 = vpop.f32.mrf.mxu0  ;;  %8990 = vst [vmem:[#allocation93_spill] sm:$0xff] %v6304_v32 }
 0x1c8   :  { %8989 = vst [vmem:[#allocation92_spill] sm:$0xff] %v6302_v38 }
 0x1c9   :  { %1847 = vmatpush2.bf16.msra.mxu1 %v6275_v45  ;;  %v6309_v43 = vpop.f32.mrf.mxu0 }
 0x1ca   :  { %1848 = vmatprep.subr.bf16.mxu1 %v6278_v36  ;;  %2079 = vmatpush2.bf16.msra.mxu0 %v6275_v45  ;;  %8991 = vst [vmem:[#allocation94_spill] sm:$0xff] %v6309_v43  ;;  %v6311_v45 = vpop.f32.mrf.mxu1 }
 0x1cb   :  { %2080 = vmatprep.subr.bf16.mxu0 %v6278_v36  ;;  %8992 = vst [vmem:[#allocation95_spill] sm:$0xff] %v6311_v45  ;;  %v6318_v32 = vpop.f32.mrf.mxu0 }
 0x1cc   :  { %v6320_v38 = vpop.f32.mrf.mxu1 }
 0x1cd   :  { %1849 = vmatpush2.bf16.msra.mxu1 %v6287_v18  ;;  %8993 = vst [vmem:[#allocation96_spill] sm:$0xff] %v6320_v38  ;;  %v6324_v43 = vpop.f32.mrf.mxu0  ;;  %v6657_v38 = vld [vmem:[#allocation8 + $0x280] ss:$24 sps:$4 sm:$0xff]  }
 0x1ce   :  { %1850 = vmatprep.subr.bf16.mxu1 %v6290_v33  ;;  %2081 = vmatpush2.bf16.msra.mxu0 %v6287_v18  ;;  %v6326_v45 = vpop.f32.mrf.mxu1  ;;  %9074 = vst [vmem:[#allocation173_spill] sm:$0xff] %v6657_v38 }
 0x1cf   :  { %2082 = vmatprep.subr.bf16.mxu0 %v6290_v33  ;;  %8994 = vst [vmem:[#allocation97_spill] sm:$0xff] %v6326_v45  ;;  %v6654_v45 = vld [vmem:[#allocation8 + $0x274] ss:$24 sps:$4 sm:$0xff]  }
 0x1d0   :  { %9073 = vst [vmem:[#allocation172_spill] sm:$0xff] %v6654_v45 }
 0x1d1   :  { %1851 = vmatpush2.bf16.msra.mxu1 %v6299_v31 }
 0x1d2   :  { %2009 = vmatprep.subr.bf16.mxu1 %v5865_v61  ;;  %2083 = vmatpush2.bf16.msra.mxu0 %v6299_v31 }
 0x1d3   :  { %2241 = vmatprep.subr.bf16.mxu0 %v5865_v61  ;;  %v6330_v61 = vpop.f32.mrf.mxu0 }
 0x1d4   :  { %1853 = vmatmul.mubr.bf16.vlgmr.msra.gmra.mxu1 %v6152_v26  ;;  %8995 = vst [vmem:[#allocation98_spill] sm:$0xff] %v6330_v61  ;;  %v6332_v26 = vpop.f32.mrf.mxu1  ;;  %v6669_v61 = vld [vmem:[#allocation8 + $0x250] ss:$24 sps:$4 sm:$0xff]  }
 0x1d5   :  { %2010 = vmatpush1.bf16.msra.mxu1 %v5867_v62  ;;  %8996 = vst [vmem:[#allocation99_spill] sm:$0xff] %v6332_v26  ;;  %v6336_v62 = vpop.f32.mrf.mxu0  ;;  %v6651_v26 = vld [vmem:[#allocation8 + $0x2a0] ss:$24 sps:$4 sm:$0xff]   ;;  %9078 = vst [vmem:[#allocation177_spill] sm:$0xff] %v6669_v61 }
 0x1d6   :  { %2011 = vmatprep.subr.bf16.mxu1 %v5874_v63  ;;  %8997 = vst [vmem:[#allocation100_spill] sm:$0xff] %v6336_v62  ;;  %v6338_v63 = vpop.f32.mrf.mxu1  ;;  %9072 = vst [vmem:[#allocation171_spill] sm:$0xff] %v6651_v26  ;;  %v6666_v62 = vld [vmem:[#allocation8 + $0x244] ss:$24 sps:$4 sm:$0xff]  }
 0x1d7   :  { %8998 = vst [vmem:[#allocation101_spill] sm:$0xff] %v6338_v63  ;;  %v6648_v63 = vld [vmem:[#allocation8 + $0x284] ss:$24 sps:$4 sm:$0xff]   ;;  %9077 = vst [vmem:[#allocation176_spill] sm:$0xff] %v6666_v62 }
 0x1d8   :  { %9071 = vst [vmem:[#allocation170_spill] sm:$0xff] %v6648_v63 }
 0x1d9   :  { %2012 = vmatpush1.bf16.msra.mxu1 %v5876_v1  ;;  %v6342_v1 = vpop.f32.mrf.mxu0 }
 0x1da   :  { %2013 = vmatprep.subr.bf16.mxu1 %v5884_v2  ;;  %8999 = vst [vmem:[#allocation102_spill] sm:$0xff] %v6342_v1  ;;  %v6344_v2 = vpop.f32.mrf.mxu1  ;;  %v6663_v1 = vld [vmem:[#allocation8 + $0x270] ss:$24 sps:$4 sm:$0xff]  }
 0x1db   :  { %9000 = vst [vmem:[#allocation103_spill] sm:$0xff] %v6344_v2  ;;  %v6633_v2 = vld [vmem:[#allocation8 + $0x2e0] ss:$24 sps:$4 sm:$0xff]   ;;  %9076 = vst [vmem:[#allocation175_spill] sm:$0xff] %v6663_v1 }
 0x1dc   :  { %9066 = vst [vmem:[#allocation165_spill] sm:$0xff] %v6633_v2 }
 0x1dd   :  { %2014 = vmatpush1.bf16.msra.mxu1 %v5886_v3  ;;  %v6348_v3 = vpop.f32.mrf.mxu0 }
 0x1de   :  { %2015 = vmatprep.subr.bf16.mxu1 %v5892_v4  ;;  %9001 = vst [vmem:[#allocation104_spill] sm:$0xff] %v6348_v3  ;;  %v6350_v4 = vpop.f32.mrf.mxu1  ;;  %v6660_v3 = vld [vmem:[#allocation8 + $0x254] ss:$24 sps:$4 sm:$0xff]  }
 0x1df   :  { %9002 = vst [vmem:[#allocation105_spill] sm:$0xff] %v6350_v4  ;;  %v6630_v4 = vld [vmem:[#allocation8 + $0x2d4] ss:$24 sps:$4 sm:$0xff]   ;;  %9075 = vst [vmem:[#allocation174_spill] sm:$0xff] %v6660_v3 }
 0x1e0   :  { %9065 = vst [vmem:[#allocation164_spill] sm:$0xff] %v6630_v4 }
 0x1e1   :  { %2016 = vmatpush1.bf16.msra.mxu1 %v5894_v5  ;;  %v6354_v5 = vpop.f32.mrf.mxu0 }
 0x1e2   :  { %2017 = vmatprep.subr.bf16.mxu1 %v5899_v6  ;;  %9003 = vst [vmem:[#allocation106_spill] sm:$0xff] %v6354_v5  ;;  %v6356_v6 = vpop.f32.mrf.mxu1  ;;  %v6645_v5 = vld [vmem:[#allocation8 + $0x2b0] ss:$24 sps:$4 sm:$0xff]  }
 0x1e3   :  { %9004 = vst [vmem:[#allocation107_spill] sm:$0xff] %v6356_v6  ;;  %v6627_v6 = vld [vmem:[#allocation8] ss:$24 sps:$4 sm:$0xff]   ;;  %9070 = vst [vmem:[#allocation169_spill] sm:$0xff] %v6645_v5 }
 0x1e5   :  { %2018 = vmatpush1.bf16.msra.mxu1 %v5901_v7  ;;  %v6360_v7 = vpop.f32.mrf.mxu0 }
 0x1e6   :  { %2019 = vmatprep.subr.bf16.mxu1 %v5909_v9  ;;  %9005 = vst [vmem:[#allocation108_spill] sm:$0xff] %v6360_v7  ;;  %v6362_v9 = vpop.f32.mrf.mxu1  ;;  %v6642_v7 = vld [vmem:[#allocation8 + $0x2a4] ss:$24 sps:$4 sm:$0xff]  }
 0x1e7   :  { %9006 = vst [vmem:[#allocation109_spill] sm:$0xff] %v6362_v9  ;;  %v6624_v9 = vld [vmem:[#allocation8 + $0x2e4] ss:$24 sps:$4 sm:$0xff]   ;;  %9069 = vst [vmem:[#allocation168_spill] sm:$0xff] %v6642_v7 }
 0x1e9   :  { %2020 = vmatpush1.bf16.msra.mxu1 %v5911_v10  ;;  %v6366_v10 = vpop.f32.mrf.mxu0 }
 0x1ea   :  { %2021 = vmatprep.subr.bf16.mxu1 %v5918_v14  ;;  %9007 = vst [vmem:[#allocation110_spill] sm:$0xff] %v6366_v10  ;;  %v6368_v14 = vpop.f32.mrf.mxu1  ;;  %v6639_v10 = vld [vmem:[#allocation8 + $0x2d0] ss:$24 sps:$4 sm:$0xff]  }
 0x1eb   :  { %9008 = vst [vmem:[#allocation111_spill] sm:$0xff] %v6368_v14  ;;  %9068 = vst [vmem:[#allocation167_spill] sm:$0xff] %v6639_v10 }
 0x1ed   :  { %2022 = vmatpush1.bf16.msra.mxu1 %v5920_v15  ;;  %v6372_v15 = vpop.f32.mrf.mxu0 }
 0x1ee   :  { %2023 = vmatprep.subr.bf16.mxu1 %v5925_v19  ;;  %9009 = vst [vmem:[#allocation112_spill] sm:$0xff] %v6372_v15  ;;  %v6374_v19 = vpop.f32.mrf.mxu1  ;;  %v6636_v15 = vld [vmem:[#allocation8 + $0x2b4] ss:$24 sps:$4 sm:$0xff]  }
 0x1ef   :  { %9010 = vst [vmem:[#allocation113_spill] sm:$0xff] %v6374_v19  ;;  %9067 = vst [vmem:[#allocation166_spill] sm:$0xff] %v6636_v15 }
 0x1f1   :  { %2024 = vmatpush1.bf16.msra.mxu1 %v5927_v20  ;;  %v6378_v20 = vpop.f32.mrf.mxu0 }
 0x1f2   :  { %2025 = vmatprep.subr.bf16.mxu1 %v5932_v24  ;;  %9011 = vst [vmem:[#allocation114_spill] sm:$0xff] %v6378_v20  ;;  %v6380_v24 = vpop.f32.mrf.mxu1  ;;  %v6621_v20 = vld [vmem:[#allocation8 + $0x10] ss:$24 sps:$4 sm:$0xff]  }
 0x1f3   :  { %9012 = vst [vmem:[#allocation115_spill] sm:$0xff] %v6380_v24 }
 0x1f5   :  { %2026 = vmatpush2.bf16.msra.mxu1 %v5934_v25  ;;  %v6384_v25 = vpop.f32.mrf.mxu0 }
 0x1f6   :  { %2027 = vmatprep.subr.bf16.mxu1 %v5940_v29  ;;  %9013 = vst [vmem:[#allocation116_spill] sm:$0xff] %v6384_v25  ;;  %v6386_v29 = vpop.f32.mrf.mxu1  ;;  %v6618_v25 = vld [vmem:[#allocation8 + $0x4] ss:$24 sps:$4 sm:$0xff]  }
 0x1f7   :  { %9014 = vst [vmem:[#allocation117_spill] sm:$0xff] %v6386_v29 }
 0x1f9   :  { %2028 = vmatpush2.bf16.msra.mxu1 %v5942_v30  ;;  %v6390_v30 = vpop.f32.mrf.mxu0 }
 0x1fa   :  { %2029 = vmatprep.subr.bf16.mxu1 %v5948_v34  ;;  %9015 = vst [vmem:[#allocation118_spill] sm:$0xff] %v6390_v30  ;;  %v6392_v34 = vpop.f32.mrf.mxu1  ;;  %v6615_v30 = vld [vmem:[#allocation8 + $0x30] ss:$24 sps:$4 sm:$0xff]  }
 0x1fb   :  { %9016 = vst [vmem:[#allocation119_spill] sm:$0xff] %v6392_v34 }
 0x1fd   :  { %2030 = vmatpush2.bf16.msra.mxu1 %v5950_v35  ;;  %v6396_v35 = vpop.f32.mrf.mxu0 }
 0x1fe   :  { %2031 = vmatprep.subr.bf16.mxu1 %v5956_v41  ;;  %9017 = vst [vmem:[#allocation120_spill] sm:$0xff] %v6396_v35  ;;  %v6398_v41 = vpop.f32.mrf.mxu1  ;;  %v6612_v35 = vld [vmem:[#allocation8 + $0x14] ss:$24 sps:$4 sm:$0xff]  }
 0x1ff   :  { %9018 = vst [vmem:[#allocation121_spill] sm:$0xff] %v6398_v41 }
 0x201   :  { %2032 = vmatpush2.bf16.msra.mxu1 %v5958_v42  ;;  %v6402_v42 = vpop.f32.mrf.mxu0 }
 0x202   :  { %2033 = vmatprep.subr.bf16.mxu1 %v5964_v46  ;;  %9019 = vst [vmem:[#allocation122_spill] sm:$0xff] %v6402_v42  ;;  %v6404_v46 = vpop.f32.mrf.mxu1 }
 0x203   :  { %9020 = vst [vmem:[#allocation123_spill] sm:$0xff] %v6404_v46 }
 0x205   :  { %2034 = vmatpush2.bf16.msra.mxu1 %v5966_v47  ;;  %v6408_v47 = vpop.f32.mrf.mxu0 }
 0x206   :  { %2035 = vmatprep.subr.bf16.mxu1 %v5968_v48  ;;  %9021 = vst [vmem:[#allocation124_spill] sm:$0xff] %v6408_v47  ;;  %v6410_v48 = vpop.f32.mrf.mxu1 }
 0x207   :  { %9022 = vst [vmem:[#allocation125_spill] sm:$0xff] %v6410_v48 }
 0x208   :  { %v6415_v41 = vpop.f32.mrf.mxu1 }
 0x209   :  { %2036 = vmatpush2.bf16.msra.mxu1 %v5972_v51  ;;  %v6413_v51 = vpop.f32.mrf.mxu0  ;;  %9024 = vst [vmem:[#allocation127_spill] sm:$0xff] %v6415_v41 }
 0x20a   :  { %2037 = vmatprep.subr.bf16.mxu1 %v5975_v53  ;;  %9023 = vst [vmem:[#allocation126_spill] sm:$0xff] %v6413_v51 }
 0x20b   :  { %v6417_v53 = vpop.f32.mrf.mxu0 }
 0x20c   :  { %9025 = vst [vmem:[#allocation128_spill] sm:$0xff] %v6417_v53 }
 0x20d   :  { %2038 = vmatpush2.bf16.msra.mxu1 %v5980_v55  ;;  %v6419_v55 = vpop.f32.mrf.mxu1  ;;  %v6421_v34 = vpop.f32.mrf.mxu0 }
 0x20e   :  { %2039 = vmatprep.subr.bf16.mxu1 %v5983_v57  ;;  %9026 = vst [vmem:[#allocation129_spill] sm:$0xff] %v6419_v55  ;;  %9027 = vst [vmem:[#allocation130_spill] sm:$0xff] %v6421_v34 }
 0x20f   :  { %v6423_v46 = vpop.f32.mrf.mxu1  ;;  %v6425_v57 = vpop.f32.mrf.mxu0 }
 0x210   :  { %9028 = vst [vmem:[#allocation131_spill] sm:$0xff] %v6423_v46  ;;  %9029 = vst [vmem:[#allocation132_spill] sm:$0xff] %v6425_v57 }
 0x211   :  { %2040 = vmatpush2.bf16.msra.mxu1 %v5986_v59  ;;  %v6427_v59 = vpop.f32.mrf.mxu1  ;;  %v6429_v47 = vpop.f32.mrf.mxu0 }
 0x212   :  { %2095 = vmatprep.subr.bf16.mxu1 %v5907_v8  ;;  %9030 = vst [vmem:[#allocation133_spill] sm:$0xff] %v6427_v59  ;;  %9031 = vst [vmem:[#allocation134_spill] sm:$0xff] %v6429_v47 }
 0x213   :  { %v6431_v48 = vpop.f32.mrf.mxu1  ;;  %v6433_v8 = vpop.f32.mrf.mxu0 }
 0x214   :  { %9032 = vst [vmem:[#allocation135_spill] sm:$0xff] %v6431_v48  ;;  %9033 = vst [vmem:[#allocation136_spill] sm:$0xff] %v6433_v8 }
 0x215   :  { %v6435_v51 = vpop.f32.mrf.mxu1  ;;  %v6437_v41 = vpop.f32.mrf.mxu0 }
 0x216   :  { %9034 = vst [vmem:[#allocation137_spill] sm:$0xff] %v6435_v51  ;;  %9035 = vst [vmem:[#allocation138_spill] sm:$0xff] %v6437_v41 }
 0x217   :  { %v6439_v53 = vpop.f32.mrf.mxu1  ;;  %v6441_v55 = vpop.f32.mrf.mxu0 }
 0x218   :  { %9036 = vst [vmem:[#allocation139_spill] sm:$0xff] %v6439_v53  ;;  %9037 = vst [vmem:[#allocation140_spill] sm:$0xff] %v6441_v55 }
 0x219   :  { %v6443_v34 = vpop.f32.mrf.mxu1  ;;  %v6445_v46 = vpop.f32.mrf.mxu0 }
 0x21a   :  { %9038 = vst [vmem:[#allocation141_spill] sm:$0xff] %v6443_v34  ;;  %9039 = vst [vmem:[#allocation142_spill] sm:$0xff] %v6445_v46 }
 0x21b   :  { %v6447_v57 = vpop.f32.mrf.mxu1  ;;  %v6449_v59 = vpop.f32.mrf.mxu0 }
 0x21c   :  { %9040 = vst [vmem:[#allocation143_spill] sm:$0xff] %v6447_v57  ;;  %9041 = vst [vmem:[#allocation144_spill] sm:$0xff] %v6449_v59 }
 0x21d   :  { %v6451_v47 = vpop.f32.mrf.mxu1  ;;  %v6453_v48 = vpop.f32.mrf.mxu0 }
 0x21e   :  { %9042 = vst [vmem:[#allocation145_spill] sm:$0xff] %v6451_v47  ;;  %9043 = vst [vmem:[#allocation146_spill] sm:$0xff] %v6453_v48 }
 0x21f   :  { %v6455_v8 = vpop.f32.mrf.mxu1  ;;  %v6457_v51 = vpop.f32.mrf.mxu0 }
 0x220   :  { %9044 = vst [vmem:[#allocation147_spill] sm:$0xff] %v6455_v8  ;;  %9045 = vst [vmem:[#allocation148_spill] sm:$0xff] %v6457_v51  ;;  %v536_v8 = vadd.f32 %v5991_v21, %v6050_v54 }
 0x221   :  { %v6459_v41 = vpop.f32.mrf.mxu1  ;;  %v6461_v53 = vpop.f32.mrf.mxu0 }
 0x222   :  { %9046 = vst [vmem:[#allocation149_spill] sm:$0xff] %v6459_v41  ;;  %9047 = vst [vmem:[#allocation150_spill] sm:$0xff] %v6461_v53  ;;  %v538_v53 = vadd.f32 %v5993_v22, %v6039_v11 }
 0x223   :  { %v6463_v55 = vpop.f32.mrf.mxu1  ;;  %v6465_v34 = vpop.f32.mrf.mxu0 }
 0x224   :  { %9048 = vst [vmem:[#allocation151_spill] sm:$0xff] %v6463_v55  ;;  %9049 = vst [vmem:[#allocation152_spill] sm:$0xff] %v6465_v34 }
 0x225   :  { %v6467_v46 = vpop.f32.mrf.mxu1  ;;  %v6469_v57 = vpop.f32.mrf.mxu0 }
 0x226   :  { %9050 = vst [vmem:[#allocation153_spill] sm:$0xff] %v6467_v46  ;;  %9051 = vst [vmem:[#allocation154_spill] sm:$0xff] %v6469_v57  ;;  %v540_v46 = vadd.f32 %v5995_v23, %v6050_v54 }
 0x227   :  { %v6471_v59 = vpop.f32.mrf.mxu1  ;;  %v6473_v47 = vpop.f32.mrf.mxu0 }
 0x228   :  { %9052 = vst [vmem:[#allocation155_spill] sm:$0xff] %v6471_v59  ;;  %9053 = vst [vmem:[#allocation156_spill] sm:$0xff] %v6473_v47 }
 0x229   :  { %v6475_v48 = vpop.f32.mrf.mxu1  ;;  %v6481_v51 = vpop.f32.mrf.mxu0 }
 0x22a   :  { %9054 = vst [vmem:[#allocation157_spill] sm:$0xff] %v6475_v48  ;;  %9055 = vst [vmem:[#allocation158_spill] sm:$0xff] %v6481_v51 }
 0x22b   :  { %v6485_v29 = vpop.f32.mrf.mxu0 }
 0x22c   :  { %9056 = vst [vmem:[#allocation159_spill] sm:$0xff] %v6485_v29 }
 0x22d   :  { %v6487_v24 = vpop.f32.mrf.mxu0 }
 0x22e   :  { %9057 = vst [vmem:[#allocation160_spill] sm:$0xff] %v6487_v24  ;;  %v846_v24 = vadd.f32 %v6280_v0, %v6117_v40 }
 0x22f   :  { %v6489_v22 = vpop.f32.mrf.mxu0 }
 0x230   :  { %9058 = vst [vmem:[#allocation161_spill] sm:$0xff] %v6489_v22 }
 0x254   :  { %v1811_v41 = vpop.f32.mrf.mxu1 }
 0x255   :  { %v1906_v55 = vadd.f32 %v1811_v41, %v536_v8  ;;  %v6491_v8 = vpop.f32.mrf.mxu0 }
 0x256   :  { %v1813_v34 = vpop.f32.mrf.mxu1  ;;  %9059 = vst [vmem:[#allocation162_spill] sm:$0xff] %v6491_v8 }
 0x257   :  { %v4501_v57 = vmul.f32 -1.442695, %v1906_v55  ;;  %v1907_v59 = vadd.f32 %v1813_v34, %v538_v53  ;;  %v6493_v55 = vpop.f32.mrf.mxu0 }
 0x258   :  { %v1815_v42 = vpop.f32.mrf.mxu1  ;;  %9060 = vst [vmem:[#allocation163_spill] sm:$0xff] %v6493_v55 }
 0x259   :  { %4869 = vpow2.f32 %v4501_v57  ;;  %v4502_v47 = vmul.f32 -1.442695, %v1907_v59  ;;  %v1908_v48 = vadd.f32 %v1815_v42, %v540_v46  ;;  %v1897_v46 = vpop.f32.mrf.mxu0 }
 0x25b   :  { %4871 = vpow2.f32 %v4502_v47  ;;  %v4503_v21 = vmul.f32 -1.442695, %v1908_v48  ;;  %v1899_v47 = vpop.f32.mrf.mxu0  ;;  %v1962_v48 = vadd.f32 %v1897_v46, %v6128_v58  ;;  %v542_v46 = vadd.f32 %v5997_v60, %v6039_v11 }
 0x25d   :  { %4873 = vpow2.f32 %v4503_v21  ;;  %v1901_v59 = vpop.f32.mrf.mxu0  ;;  %v842_v21 = vadd.f32 %v6256_v52, %v6117_v40 }
 0x266   :  { %v4870_v41 = vpop.eup %4869 }
 0x267   :  { %v1922_v51 = vadd.f32 1.0, %v4870_v41  ;;  %v1963_v41 = vadd.f32 %v1899_v47, %v6124_v39 }
 0x268   :  { %v4872_v23 = vpop.eup %4871 }
 0x269   :  { %4875 = vrcp.f32 %v1922_v51  ;;  %v1923_v34 = vadd.f32 1.0, %v4872_v23  ;;  %v844_v23 = vadd.f32 %v6268_v12, %v6120_v50  ;;  %v9061_v12 = vld [vmem:[#allocation44_spill] sm:$0xff] }
 0x26a   :  { %v4874_v53 = vpop.eup %4873  ;;  %v693_v0 = vadd.f32 %v6216_v17, %v9061_v12  ;;  %9063 = vst [vmem:[#allocation44_spill] sm:$0xff] %v6624_v9 }
 0x26b   :  { %4877 = vrcp.f32 %v1923_v34  ;;  %v1924_v42 = vadd.f32 1.0, %v4874_v53  ;;  %v1964_v53 = vadd.f32 %v1901_v59, %v6128_v58 }
 0x26d   :  { %4879 = vrcp.f32 %v1924_v42  ;;  %v1817_v42 = vpop.f32.mrf.mxu1 }
 0x276   :  { %v4876_v57 = vpop.eup %4875 }
 0x277   :  { %v1966_v8 = vmul.f32 %v4876_v57, %v1962_v48  ;;  %v1909_v57 = vadd.f32 %v1817_v42, %v542_v46  ;;  %v1903_v46 = vpop.f32.mrf.mxu0 }
 0x278   :  { %v4878_v51 = vpop.eup %4877 }
 0x279   :  { %v1970_v55 = vadd.f32 %v1966_v8, %v842_v21  ;;  %v1967_v34 = vmul.f32 %v4878_v51, %v1963_v41  ;;  %v4504_v29 = vmul.f32 -1.442695, %v1909_v57  ;;  %v689_v8 = vadd.f32 %v6196_v56, %v9061_v12  ;;  %v9062_v41 = vld [vmem:[#allocation45_spill] sm:$0xff] }
 0x27a   :  { %v4880_v22 = vpop.eup %4879  ;;  %v691_v51 = vadd.f32 %v6206_v44, %v9062_v41  ;;  %9064 = vst [vmem:[#allocation45_spill] sm:$0xff] %v6627_v6 }
 0x27b   :  { %v1971_v52 = vadd.f32 %v1967_v34, %v844_v23  ;;  %v1968_v48 = vmul.f32 %v4880_v22, %v1964_v53  ;;  %4881 = vpow2.f32 %v4504_v29  ;;  %v695_v29 = vadd.f32 %v6226_v27, %v9062_v41 }
 0x27d   :  { %v1972_v47 = vadd.f32 %v1968_v48, %v846_v24 }
 0x288   :  { %v4882_v19 = vpop.eup %4881 }
 0x289   :  { %v1925_v21 = vadd.f32 1.0, %v4882_v19 }
 0x28b   :  { %4883 = vrcp.f32 %v1925_v21 }
 0x294   :  { %v1854_v59 = vpop.f32.mrf.mxu1 }
 0x295   :  { %v1934_v14 = vadd.f32 %v1854_v59, %v689_v8 }
 0x296   :  { %v1856_v60 = vpop.f32.mrf.mxu1 }
 0x297   :  { %v4505_v23 = vmul.f32 -1.442695, %v1934_v14  ;;  %v1935_v22 = vadd.f32 %v1856_v60, %v691_v51  ;;  %v1965_v14 = vadd.f32 %v1903_v46, %v6124_v39  ;;  %v848_v51 = vadd.f32 %v6292_v28, %v6120_v50 }
 0x298   :  { %v1858_v24 = vpop.f32.mrf.mxu1  ;;  %v4884_v48 = vpop.eup %4883 }
 0x299   :  { %4885 = vpow2.f32 %v4505_v23  ;;  %v4506_v34 = vmul.f32 -1.442695, %v1935_v22  ;;  %v1936_v56 = vadd.f32 %v1858_v24, %v693_v0  ;;  %v1969_v21 = vmul.f32 %v4884_v48, %v1965_v14 }
 0x29a   :  { %v1860_v19 = vpop.f32.mrf.mxu1 }
 0x29b   :  { %4887 = vpow2.f32 %v4506_v34  ;;  %v4507_v53 = vmul.f32 -1.442695, %v1936_v56  ;;  %v1937_v42 = vadd.f32 %v1860_v19, %v695_v29  ;;  %v1973_v23 = vadd.f32 %v1969_v21, %v848_v51 }
 0x29d   :  { %4889 = vpow2.f32 %v4507_v53  ;;  %v4508_v44 = vmul.f32 -1.442695, %v1937_v42 }
 0x29f   :  { %4891 = vpow2.f32 %v4508_v44 }
 0x2a6   :  { %v4886_v17 = vpop.eup %4885 }
 0x2a7   :  { %v1950_v57 = vadd.f32 1.0, %v4886_v17 }
 0x2a8   :  { %v4888_v8 = vpop.eup %4887 }
 0x2a9   :  { %4893 = vrcp.f32 %v1950_v57  ;;  %v1951_v27 = vadd.f32 1.0, %v4888_v8 }
 0x2aa   :  { %v4890_v59 = vpop.eup %4889  ;;  %4895 = vtanh.f32 %v1970_v55 }
 0x2ab   :  { %4897 = vrcp.f32 %v1951_v27  ;;  %v1952_v60 = vadd.f32 1.0, %v4890_v59 }
 0x2ac   :  { %v4892_v0 = vpop.eup %4891  ;;  %4899 = vtanh.f32 %v1971_v52 }
 0x2ad   :  { %4901 = vrcp.f32 %v1952_v60  ;;  %v1953_v22 = vadd.f32 1.0, %v4892_v0 }
 0x2ae   :  { %4903 = vtanh.f32 %v1972_v47 }
 0x2af   :  { %4905 = vrcp.f32 %v1953_v22  ;;  %v6546_v22 = vld [vmem:[#allocation8 + $0x124] ss:$24 sps:$4 sm:$0xff]  }
 0x2b0   :  { %4907 = vtanh.f32 %v1973_v23  ;;  %v6543_v23 = vld [vmem:[#allocation8 + $0x150] ss:$24 sps:$4 sm:$0xff]  }
 0x2b6   :  { %v4894_v24 = vpop.eup %4893 }
 0x2b7   :  { %v4896_v29 = vpop.eup %4895  ;;  %v1978_v34 = vsub.f32 1.0, %v4894_v24  ;;  %v1986_v42 = vmul.f32 %v4894_v24, %v6144_v13  ;;  %v6549_v24 = vld [vmem:[#allocation8 + $0x130] ss:$24 sps:$4 sm:$0xff]  }
 0x2b8   :  { %v4898_v56 = vpop.eup %4897 }
 0x2b9   :  { %v4900_v19 = vpop.eup %4899  ;;  %v1979_v53 = vsub.f32 1.0, %v4898_v56  ;;  %v1982_v55 = vmul.f32 %v4896_v29, %v1978_v34  ;;  %v1987_v52 = vmul.f32 %v4898_v56, %v6140_v16  ;;  %v6552_v29 = vld [vmem:[#allocation8 + $0x104] ss:$24 sps:$4 sm:$0xff]   ;;  %v6555_v34 = vld [vmem:[#allocation8 + $0x120] ss:$24 sps:$4 sm:$0xff]  }
 0x2ba   :  { %v4902_v28 = vpop.eup %4901  ;;  %v6558_v56 = vld [vmem:[#allocation8 + $0xf4] ss:$24 sps:$4 sm:$0xff]  }
 0x2bb   :  { %v4904_v44 = vpop.eup %4903  ;;  %v1983_v46 = vmul.f32 %v4900_v19, %v1979_v53  ;;  %v1980_v48 = vsub.f32 1.0, %v4902_v28  ;;  %v6519_v17 = vadd.f32 %v1986_v42, %v1982_v55  ;;  %v1988_v21 = vmul.f32 %v4902_v28, %v6138_v37  ;;  %v6537_v37 = vld [vmem:[#allocation8 + $0x160] ss:$24 sps:$4 sm:$0xff]   ;;  %v6564_v53 = vld [vmem:[#allocation8 + $0xd4] ss:$24 sps:$4 sm:$0xff]  }
 0x2bc   :  { %v4906_v47 = vpop.eup %4905  ;;  %v6561_v19 = vld [vmem:[#allocation8 + $0x100] ss:$24 sps:$4 sm:$0xff]   ;;  %v6567_v55 = vld [vmem:[#allocation8 + $0xf0] ss:$24 sps:$4 sm:$0xff]   ;;  %v6570_v42 = vld [vmem:[#allocation8 + $0xc4] ss:$24 sps:$4 sm:$0xff]  }
 0x2bd   :  { %v1981_v14 = vsub.f32 1.0, %v4906_v47  ;;  %v6521_v57 = vadd.f32 %v1987_v52, %v1983_v46  ;;  %v1984_v8 = vmul.f32 %v4904_v44, %v1980_v48  ;;  %v4908_v27 = vpop.eup %4907  ;;  %v1989_v51 = vmul.f32 %v4906_v47, %v6142_v49  ;;  %v6540_v49 = vld [vmem:[#allocation8 + $0x134] ss:$24 sps:$4 sm:$0xff]   ;;  %v6573_v28 = vld [vmem:[#allocation8 + $0xd0] ss:$24 sps:$4 sm:$0xff]  }
 0x2be   :  { %v6576_v44 = vld [vmem:[#allocation8 + $0xa4] ss:$24 sps:$4 sm:$0xff]   ;;  %v6579_v46 = vld [vmem:[#allocation8 + $0xc0] ss:$24 sps:$4 sm:$0xff]   ;;  %v6582_v52 = vld [vmem:[#allocation8 + $0x94] ss:$24 sps:$4 sm:$0xff]  }
 0x2bf   :  { %v1985_v59 = vmul.f32 %v4908_v27, %v1981_v14  ;;  %v6525_v13 = vadd.f32 %v1988_v21, %v1984_v8  ;;  %v6585_v48 = vld [vmem:[#allocation8 + $0xa0] ss:$24 sps:$4 sm:$0xff]   ;;  %v6588_v47 = vld [vmem:[#allocation8 + $0x74] ss:$24 sps:$4 sm:$0xff]   ;;  %v6591_v14 = vld [vmem:[#allocation8 + $0x90] ss:$24 sps:$4 sm:$0xff]  }
 0x2c0   :  { %v6594_v8 = vld [vmem:[#allocation8 + $0x64] ss:$24 sps:$4 sm:$0xff]   ;;  %v6597_v21 = vld [vmem:[#allocation8 + $0x70] ss:$24 sps:$4 sm:$0xff]  }
 0x2c1   :  { %v6527_v60 = vadd.f32 %v1989_v51, %v1985_v59  ;;  %v6533_v0 = vpack.c.bf16 %v6525_v13, %v6519_v17  ;;  %v6600_v27 = vld [vmem:[#allocation8 + $0x44] ss:$24 sps:$4 sm:$0xff]   ;;  %v6603_v59 = vld [vmem:[#allocation8 + $0x60] ss:$24 sps:$4 sm:$0xff]   ;;  %v6606_v51 = vld [vmem:[#allocation8 + $0x34] ss:$24 sps:$4 sm:$0xff]  }
 0x2c3   :  { %v2008_v16 = vpack.c.bf16 %v6527_v60, %v6521_v57 }
 0x2c5   :  { %2041 = vmatprep.mubr.bf16.mxu1 %v2008_v16  ;;  %2084 = vmatprep.mubr.bf16.mxu0 %v2008_v16 }
 0x2c6   :  { %2042 = vmatmul.mubr.bf16.vlgmr.msra.gmra.mxu1 %v6533_v0  ;;  %2085 = vmatmul.mubr.bf16.vlgmr.msra.gmra.mxu0 %v6533_v0 }
 0x2c7   :  { %2096 = vmatpush1.bf16.msra.mxu1 %v6537_v37  ;;  %2127 = vmatprep.mubr.bf16.mxu1 %v2008_v16  ;;  %v6609_v16 = vld [vmem:[#allocation8 + $0x40] ss:$24 sps:$4 sm:$0xff]  }
 0x2c8   :  { %2097 = vmatprep.subr.bf16.mxu1 %v6540_v49  ;;  %2242 = vmatpush1.bf16.msra.mxu0 %v6543_v23 }
 0x2c9   :  { %2243 = vmatprep.subr.bf16.mxu0 %v6546_v22 }
 0x2cb   :  { %2098 = vmatpush1.bf16.msra.mxu1 %v6549_v24 }
 0x2cc   :  { %2099 = vmatprep.subr.bf16.mxu1 %v6552_v29  ;;  %2244 = vmatpush1.bf16.msra.mxu0 %v6555_v34 }
 0x2cd   :  { %2245 = vmatprep.subr.bf16.mxu0 %v6558_v56 }
 0x2cf   :  { %2100 = vmatpush1.bf16.msra.mxu1 %v6561_v19 }
 0x2d0   :  { %2101 = vmatprep.subr.bf16.mxu1 %v6564_v53  ;;  %2246 = vmatpush1.bf16.msra.mxu0 %v6567_v55 }
 0x2d1   :  { %2247 = vmatprep.subr.bf16.mxu0 %v6570_v42 }
 0x2d3   :  { %2102 = vmatpush1.bf16.msra.mxu1 %v6573_v28 }
 0x2d4   :  { %2103 = vmatprep.subr.bf16.mxu1 %v6576_v44  ;;  %2248 = vmatpush1.bf16.msra.mxu0 %v6579_v46 }
 0x2d5   :  { %2249 = vmatprep.subr.bf16.mxu0 %v6582_v52 }
 0x2d7   :  { %2104 = vmatpush1.bf16.msra.mxu1 %v6585_v48 }
 0x2d8   :  { %2105 = vmatprep.subr.bf16.mxu1 %v6588_v47  ;;  %2250 = vmatpush1.bf16.msra.mxu0 %v6591_v14 }
 0x2d9   :  { %2251 = vmatprep.subr.bf16.mxu0 %v6594_v8 }
 0x2db   :  { %2106 = vmatpush1.bf16.msra.mxu1 %v6597_v21 }
 0x2dc   :  { %2107 = vmatprep.subr.bf16.mxu1 %v6600_v27  ;;  %2252 = vmatpush1.bf16.msra.mxu0 %v6603_v59 }
 0x2dd   :  { %2253 = vmatprep.subr.bf16.mxu0 %v6606_v51 }
 0x2df   :  { %2108 = vmatpush1.bf16.msra.mxu1 %v6609_v16 }
 0x2e0   :  { %2109 = vmatprep.subr.bf16.mxu1 %v6612_v35  ;;  %2254 = vmatpush1.bf16.msra.mxu0 %v6615_v30 }
 0x2e1   :  { %2255 = vmatprep.subr.bf16.mxu0 %v6618_v25 }
 0x2e3   :  { %2110 = vmatpush1.bf16.msra.mxu1 %v6621_v20 }
 0x2e4   :  { %2111 = vmatprep.subr.bf16.mxu1 %v6624_v9  ;;  %2256 = vmatpush1.bf16.msra.mxu0 %v6627_v6 }
 0x2e5   :  { %2257 = vmatprep.subr.bf16.mxu0 %v6630_v4 }
 0x2e7   :  { %2112 = vmatpush2.bf16.msra.mxu1 %v6633_v2 }
 0x2e8   :  { %2113 = vmatprep.subr.bf16.mxu1 %v6636_v15  ;;  %2258 = vmatpush2.bf16.msra.mxu0 %v6639_v10 }
 0x2e9   :  { %2259 = vmatprep.subr.bf16.mxu0 %v6642_v7  ;;  %v9106_v7 = vld [vmem:[#allocation67_spill] sm:$0xff] }
 0x2eb   :  { %2114 = vmatpush2.bf16.msra.mxu1 %v6645_v5  ;;  %v9104_v5 = vld [vmem:[#allocation65_spill] sm:$0xff] }
 0x2ec   :  { %2115 = vmatprep.subr.bf16.mxu1 %v6648_v63  ;;  %2260 = vmatpush2.bf16.msra.mxu0 %v6651_v26  ;;  %v9100_v26 = vld [vmem:[#allocation61_spill] sm:$0xff]  ;;  %v9102_v63 = vld [vmem:[#allocation63_spill] sm:$0xff] }
 0x2ed   :  { %2261 = vmatprep.subr.bf16.mxu0 %v6654_v45  ;;  %v6672_v45 = vld [vmem:[#allocation8 + $0x224] ss:$24 sps:$4 sm:$0xff]  }
 0x2ee   :  { %9079 = vst [vmem:[#allocation178_spill] sm:$0xff] %v6672_v45 }
 0x2ef   :  { %2116 = vmatpush2.bf16.msra.mxu1 %v6657_v38  ;;  %v6675_v38 = vld [vmem:[#allocation8 + $0x240] ss:$24 sps:$4 sm:$0xff]  }
 0x2f0   :  { %2117 = vmatprep.subr.bf16.mxu1 %v6660_v3  ;;  %2262 = vmatpush2.bf16.msra.mxu0 %v6663_v1  ;;  %9080 = vst [vmem:[#allocation179_spill] sm:$0xff] %v6675_v38  ;;  %v6678_v3 = vld [vmem:[#allocation8 + $0x214] ss:$24 sps:$4 sm:$0xff]   ;;  %v6681_v1 = vld [vmem:[#allocation8 + $0x220] ss:$24 sps:$4 sm:$0xff]  }
 0x2f1   :  { %2263 = vmatprep.subr.bf16.mxu0 %v6666_v62  ;;  %9081 = vst [vmem:[#allocation180_spill] sm:$0xff] %v6678_v3  ;;  %9082 = vst [vmem:[#allocation181_spill] sm:$0xff] %v6681_v1  ;;  %v6684_v62 = vld [vmem:[#allocation8 + $0x1f4] ss:$24 sps:$4 sm:$0xff]  }
 0x2f2   :  { %9083 = vst [vmem:[#allocation182_spill] sm:$0xff] %v6684_v62 }
 0x2f3   :  { %2118 = vmatpush2.bf16.msra.mxu1 %v6669_v61  ;;  %v6687_v61 = vld [vmem:[#allocation8 + $0x210] ss:$24 sps:$4 sm:$0xff]  }
 0x2f4   :  { %2119 = vmatprep.subr.bf16.mxu1 %v6672_v45  ;;  %2264 = vmatpush2.bf16.msra.mxu0 %v6675_v38  ;;  %9084 = vst [vmem:[#allocation183_spill] sm:$0xff] %v6687_v61  ;;  %v6690_v45 = vld [vmem:[#allocation8 + $0x1e4] ss:$24 sps:$4 sm:$0xff]   ;;  %v6693_v38 = vld [vmem:[#allocation8 + $0x1f0] ss:$24 sps:$4 sm:$0xff]  }
 0x2f5   :  { %2265 = vmatprep.subr.bf16.mxu0 %v6678_v3  ;;  %9085 = vst [vmem:[#allocation184_spill] sm:$0xff] %v6690_v45  ;;  %9086 = vst [vmem:[#allocation185_spill] sm:$0xff] %v6693_v38  ;;  %v6696_v3 = vld [vmem:[#allocation8 + $0x1c4] ss:$24 sps:$4 sm:$0xff]  }
 0x2f6   :  { %9087 = vst [vmem:[#allocation186_spill] sm:$0xff] %v6696_v3 }
 0x2f7   :  { %2120 = vmatpush2.bf16.msra.mxu1 %v6681_v1  ;;  %v6699_v1 = vld [vmem:[#allocation8 + $0x1e0] ss:$24 sps:$4 sm:$0xff]  }
 0x2f8   :  { %2121 = vmatprep.subr.bf16.mxu1 %v6684_v62  ;;  %2266 = vmatpush2.bf16.msra.mxu0 %v6687_v61  ;;  %9088 = vst [vmem:[#allocation187_spill] sm:$0xff] %v6699_v1  ;;  %v6702_v62 = vld [vmem:[#allocation8 + $0x1b4] ss:$24 sps:$4 sm:$0xff]   ;;  %v6705_v61 = vld [vmem:[#allocation8 + $0x1c0] ss:$24 sps:$4 sm:$0xff]  }
 0x2f9   :  { %2267 = vmatprep.subr.bf16.mxu0 %v6690_v45  ;;  %9089 = vst [vmem:[#allocation188_spill] sm:$0xff] %v6702_v62  ;;  %9090 = vst [vmem:[#allocation189_spill] sm:$0xff] %v6705_v61  ;;  %v6708_v45 = vld [vmem:[#allocation8 + $0x194] ss:$24 sps:$4 sm:$0xff]  }
 0x2fa   :  { %9091 = vst [vmem:[#allocation190_spill] sm:$0xff] %v6708_v45 }
 0x2fb   :  { %2122 = vmatpush2.bf16.msra.mxu1 %v6693_v38  ;;  %v6711_v38 = vld [vmem:[#allocation8 + $0x1b0] ss:$24 sps:$4 sm:$0xff]  }
 0x2fc   :  { %2123 = vmatprep.subr.bf16.mxu1 %v6696_v3  ;;  %2268 = vmatpush2.bf16.msra.mxu0 %v6699_v1  ;;  %9092 = vst [vmem:[#allocation191_spill] sm:$0xff] %v6711_v38  ;;  %v6714_v3 = vld [vmem:[#allocation8 + $0x184] ss:$24 sps:$4 sm:$0xff]   ;;  %v6717_v1 = vld [vmem:[#allocation8 + $0x190] ss:$24 sps:$4 sm:$0xff]  }
 0x2fd   :  { %2269 = vmatprep.subr.bf16.mxu0 %v6702_v62  ;;  %9093 = vst [vmem:[#allocation192_spill] sm:$0xff] %v6714_v3  ;;  %9094 = vst [vmem:[#allocation193_spill] sm:$0xff] %v6717_v1  ;;  %v6720_v62 = vld [vmem:[#allocation8 + $0x15c] ss:$24 sps:$4 sm:$0xff]  }
 0x2fe   :  { %9095 = vst [vmem:[#allocation194_spill] sm:$0xff] %v6720_v62 }
 0x2ff   :  { %2124 = vmatpush2.bf16.msra.mxu1 %v6705_v61  ;;  %v6723_v61 = vld [vmem:[#allocation8 + $0x180] ss:$24 sps:$4 sm:$0xff]  }
 0x300   :  { %2125 = vmatprep.subr.bf16.mxu1 %v6708_v45  ;;  %2270 = vmatpush2.bf16.msra.mxu0 %v6711_v38  ;;  %9096 = vst [vmem:[#allocation195_spill] sm:$0xff] %v6723_v61  ;;  %v6726_v45 = vld [vmem:[#allocation8 + $0x164] ss:$24 sps:$4 sm:$0xff]  }
 0x301   :  { %2271 = vmatprep.subr.bf16.mxu0 %v6714_v3  ;;  %9097 = vst [vmem:[#allocation196_spill] sm:$0xff] %v6726_v45  ;;  %v9098_v38 = vld [vmem:[#allocation59_spill] sm:$0xff]  ;;  %v9099_v3 = vld [vmem:[#allocation60_spill] sm:$0xff] }
 0x303   :  { %2126 = vmatpush2.bf16.msra.mxu1 %v6717_v1  ;;  %v9101_v1 = vld [vmem:[#allocation62_spill] sm:$0xff] }
 0x304   :  { %2284 = vmatprep.subr.bf16.mxu1 %v6720_v62  ;;  %2272 = vmatpush2.bf16.msra.mxu0 %v6723_v61  ;;  %v9103_v62 = vld [vmem:[#allocation64_spill] sm:$0xff]  ;;  %v9105_v61 = vld [vmem:[#allocation66_spill] sm:$0xff] }
 0x305   :  { %2327 = vmatprep.subr.bf16.mxu0 %v6726_v45  ;;  %v9107_v45 = vld [vmem:[#allocation68_spill] sm:$0xff] }
 0x306   :  { %2128 = vmatmul.mubr.bf16.vlgmr.msra.gmra.mxu1 %v6533_v0  ;;  %v9108_v0 = vld [vmem:[#allocation69_spill] sm:$0xff] }
 0x307   :  { %2285 = vmatpush1.bf16.msra.mxu1 %v9098_v38  ;;  %v9109_v38 = vld [vmem:[#allocation70_spill] sm:$0xff] }
 0x308   :  { %2286 = vmatprep.subr.bf16.mxu1 %v9099_v3  ;;  %v9110_v3 = vld [vmem:[#allocation71_spill] sm:$0xff] }
 0x30b   :  { %2287 = vmatpush1.bf16.msra.mxu1 %v9100_v26  ;;  %v9111_v26 = vld [vmem:[#allocation72_spill] sm:$0xff] }
 0x30c   :  { %2288 = vmatprep.subr.bf16.mxu1 %v9101_v1  ;;  %v9112_v1 = vld [vmem:[#allocation73_spill] sm:$0xff] }
 0x30f   :  { %2289 = vmatpush1.bf16.msra.mxu1 %v9102_v63  ;;  %v9113_v63 = vld [vmem:[#allocation74_spill] sm:$0xff] }
 0x310   :  { %2290 = vmatprep.subr.bf16.mxu1 %v9103_v62  ;;  %v9114_v62 = vld [vmem:[#allocation75_spill] sm:$0xff] }
 0x313   :  { %2291 = vmatpush1.bf16.msra.mxu1 %v9104_v5  ;;  %v9115_v5 = vld [vmem:[#allocation76_spill] sm:$0xff] }
 0x314   :  { %2292 = vmatprep.subr.bf16.mxu1 %v9105_v61  ;;  %v9116_v61 = vld [vmem:[#allocation77_spill] sm:$0xff] }
 0x317   :  { %2293 = vmatpush1.bf16.msra.mxu1 %v9106_v7  ;;  %v9117_v7 = vld [vmem:[#allocation78_spill] sm:$0xff] }
 0x318   :  { %2294 = vmatprep.subr.bf16.mxu1 %v9107_v45  ;;  %v9118_v45 = vld [vmem:[#allocation80_spill] sm:$0xff] }
 0x31b   :  { %2295 = vmatpush1.bf16.msra.mxu1 %v9108_v0  ;;  %v9119_v0 = vld [vmem:[#allocation81_spill] sm:$0xff] }
 0x31c   :  { %2296 = vmatprep.subr.bf16.mxu1 %v9109_v38  ;;  %v9120_v38 = vld [vmem:[#allocation83_spill] sm:$0xff] }
 0x31f   :  { %2297 = vmatpush1.bf16.msra.mxu1 %v9110_v3  ;;  %v9121_v3 = vld [vmem:[#allocation84_spill] sm:$0xff] }
 0x320   :  { %2298 = vmatprep.subr.bf16.mxu1 %v9111_v26  ;;  %v9122_v26 = vld [vmem:[#allocation86_spill] sm:$0xff] }
 0x323   :  { %2299 = vmatpush1.bf16.msra.mxu1 %v9112_v1  ;;  %v9123_v1 = vld [vmem:[#allocation87_spill] sm:$0xff] }
 0x324   :  { %2300 = vmatprep.subr.bf16.mxu1 %v9113_v63  ;;  %v9124_v63 = vld [vmem:[#allocation89_spill] sm:$0xff] }
 0x327   :  { %2301 = vmatpush2.bf16.msra.mxu1 %v9114_v62  ;;  %v6761_v62 = vld [vmem:[#allocation8 + $0x154] ss:$24 sps:$4 sm:$0xff]  }
 0x328   :  { %2302 = vmatprep.subr.bf16.mxu1 %v9115_v5  ;;  %9125 = vst [vmem:[#allocation59_spill] sm:$0xff] %v6761_v62 }
 0x32b   :  { %2303 = vmatpush2.bf16.msra.mxu1 %v9116_v61 }
 0x32c   :  { %2304 = vmatprep.subr.bf16.mxu1 %v9117_v7  ;;  %v9126_v7 = vld [vmem:[#allocation16_spill] sm:$0xff] }
 0x32f   :  { %2305 = vmatpush2.bf16.msra.mxu1 %v9118_v45  ;;  %v546_v45 = vadd.f32 %v9126_v7, %v6050_v54 }
 0x330   :  { %2306 = vmatprep.subr.bf16.mxu1 %v9119_v0 }
 0x333   :  { %2307 = vmatpush2.bf16.msra.mxu1 %v9120_v38  ;;  %v9127_v38 = vld [vmem:[#allocation17_spill] sm:$0xff] }
 0x334   :  { %2308 = vmatprep.subr.bf16.mxu1 %v9121_v3  ;;  %v548_v3 = vadd.f32 %v9127_v38, %v6039_v11 }
 0x337   :  { %2309 = vmatpush2.bf16.msra.mxu1 %v9122_v26 }
 0x338   :  { %2310 = vmatprep.subr.bf16.mxu1 %v9123_v1 }
 0x33b   :  { %2311 = vmatpush2.bf16.msra.mxu1 %v9124_v63 }
 0x33c   :  { %2312 = vmatprep.subr.bf16.mxu1 %v6278_v36 }
 0x33f   :  { %2313 = vmatpush2.bf16.msra.mxu1 %v6287_v18  ;;  %v9128_v18 = vld [vmem:[#allocation18_spill] sm:$0xff] }
 0x340   :  { %2314 = vmatprep.subr.bf16.mxu1 %v6290_v33  ;;  %v550_v26 = vadd.f32 %v9128_v18, %v6050_v54 }
 0x343   :  { %2315 = vmatpush2.bf16.msra.mxu1 %v6299_v31  ;;  %v9129_v31 = vld [vmem:[#allocation19_spill] sm:$0xff] }
 0x344   :  { %2473 = vmatprep.subr.bf16.mxu1 %v6761_v62  ;;  %v552_v63 = vadd.f32 %v9129_v31, %v6039_v11 }
 0x386   :  { %v2043_v5 = vpop.f32.mrf.mxu1  ;;  %v2086_v62 = vpop.f32.mrf.mxu0 }
 0x387   :  { %v2138_v36 = vadd.f32 %v2043_v5, %v546_v45  ;;  %v9130_v5 = vld [vmem:[#allocation79_spill] sm:$0xff] }
 0x388   :  { %v2045_v61 = vpop.f32.mrf.mxu1  ;;  %v2088_v7 = vpop.f32.mrf.mxu0  ;;  %v699_v45 = vadd.f32 %v9130_v5, %v9061_v12 }
 0x389   :  { %v2139_v33 = vadd.f32 %v2045_v61, %v548_v3  ;;  %v4509_v10 = vmul.f32 -1.442695, %v2138_v36  ;;  %v9131_v61 = vld [vmem:[#allocation82_spill] sm:$0xff]  ;;  %v9132_v36 = vld [vmem:[#allocation85_spill] sm:$0xff] }
 0x38a   :  { %v2047_v0 = vpop.f32.mrf.mxu1  ;;  %v2090_v38 = vpop.f32.mrf.mxu0  ;;  %v701_v3 = vadd.f32 %v9131_v61, %v9062_v41  ;;  %v2166_v18 = vadd.f32 %v2086_v62, %v699_v45 }
 0x38b   :  { %v2140_v15 = vadd.f32 %v2047_v0, %v550_v26  ;;  %v4510_v2 = vmul.f32 -1.442695, %v2139_v33  ;;  %4909 = vpow2.f32 %v4509_v10  ;;  %v703_v0 = vadd.f32 %v9132_v36, %v9061_v12  ;;  %v9133_v10 = vld [vmem:[#allocation88_spill] sm:$0xff] }
 0x38c   :  { %v2049_v1 = vpop.f32.mrf.mxu1  ;;  %v2167_v26 = vadd.f32 %v2088_v7, %v701_v3  ;;  %v2092_v33 = vpop.f32.mrf.mxu0 }
 0x38d   :  { %v2141_v4 = vadd.f32 %v2049_v1, %v552_v63  ;;  %v4511_v6 = vmul.f32 -1.442695, %v2140_v15  ;;  %4911 = vpow2.f32 %v4510_v2  ;;  %v705_v15 = vadd.f32 %v9133_v10, %v9062_v41 }
 0x38e   :  { %v2168_v2 = vadd.f32 %v2090_v38, %v703_v0  ;;  %v4514_v31 = vmul.f32 -1.442695, %v2167_v26 }
 0x38f   :  { %v4512_v9 = vmul.f32 -1.442695, %v2141_v4  ;;  %4913 = vpow2.f32 %v4511_v6  ;;  %v4513_v4 = vmul.f32 -1.442695, %v2166_v18  ;;  %v2169_v1 = vadd.f32 %v2092_v33, %v705_v15 }
 0x390   :  { %v4515_v6 = vmul.f32 -1.442695, %v2168_v2 }
 0x391   :  { %4915 = vpow2.f32 %v4512_v9  ;;  %v4516_v11 = vmul.f32 -1.442695, %v2169_v1 }
 0x392   :  { %4917 = vpow2.f32 %v4513_v4 }
 0x393   :  { %4919 = vpow2.f32 %v4514_v31 }
 0x394   :  { %4921 = vpow2.f32 %v4515_v6 }
 0x395   :  { %4923 = vpow2.f32 %v4516_v11  ;;  %v9134_v11 = vld [vmem:[#allocation92_spill] sm:$0xff] }
 0x396   :  { %v852_v31 = vadd.f32 %v9134_v11, %v6117_v40 }
 0x398   :  { %v4910_v63 = vpop.eup %4909 }
 0x399   :  { %v2154_v61 = vadd.f32 1.0, %v4910_v63 }
 0x39a   :  { %v4912_v5 = vpop.eup %4911 }
 0x39b   :  { %v2155_v62 = vadd.f32 1.0, %v4912_v5  ;;  %4925 = vrcp.f32 %v2154_v61  ;;  %v9135_v61 = vld [vmem:[#allocation94_spill] sm:$0xff] }
 0x39c   :  { %v4914_v9 = vpop.eup %4913 }
 0x39d   :  { %v2156_v7 = vadd.f32 1.0, %v4914_v9  ;;  %4927 = vrcp.f32 %v2155_v62  ;;  %v854_v9 = vadd.f32 %v9135_v61, %v6120_v50 }
 0x39e   :  { %v4916_v45 = vpop.eup %4915 }
 0x39f   :  { %v2157_v3 = vadd.f32 1.0, %v4916_v45  ;;  %4929 = vrcp.f32 %v2156_v7  ;;  %v4918_v38 = vpop.eup %4917 }
 0x3a0   :  { %v4920_v18 = vpop.eup %4919  ;;  %v2182_v0 = vadd.f32 1.0, %v4918_v38 }
 0x3a1   :  { %4931 = vrcp.f32 %v2157_v3  ;;  %v4922_v36 = vpop.eup %4921  ;;  %v2183_v10 = vadd.f32 1.0, %v4920_v18 }
 0x3a2   :  { %v4924_v33 = vpop.eup %4923  ;;  %v2184_v4 = vadd.f32 1.0, %v4922_v36  ;;  %4933 = vrcp.f32 %v2182_v0  ;;  %v856_v36 = vadd.f32 %v6318_v32, %v6117_v40 }
 0x3a3   :  { %v2185_v62 = vadd.f32 1.0, %v4924_v33  ;;  %4935 = vrcp.f32 %v2183_v10  ;;  %v858_v33 = vadd.f32 %v6324_v43, %v6120_v50 }
 0x3a4   :  { %4937 = vrcp.f32 %v2184_v4 }
 0x3a8   :  { %v4926_v2 = vpop.eup %4925 }
 0x3aa   :  { %v4928_v5 = vpop.eup %4927 }
 0x3ac   :  { %v4930_v18 = vpop.eup %4929 }
 0x3c6   :  { %v2129_v26 = vpop.f32.mrf.mxu1 }
 0x3c7   :  { %v2194_v15 = vadd.f32 %v2129_v26, %v6128_v58 }
 0x3c8   :  { %v2131_v1 = vpop.f32.mrf.mxu1 }
 0x3c9   :  { %v2198_v63 = vmul.f32 %v4926_v2, %v2194_v15  ;;  %v2195_v6 = vadd.f32 %v2131_v1, %v6124_v39  ;;  %v4932_v1 = vpop.eup %4931 }
 0x3ca   :  { %v2133_v45 = vpop.f32.mrf.mxu1 }
 0x3cb   :  { %v2202_v7 = vadd.f32 %v2198_v63, %v852_v31  ;;  %v2199_v3 = vmul.f32 %v4928_v5, %v2195_v6  ;;  %v2196_v38 = vadd.f32 %v2133_v45, %v6128_v58  ;;  %v4934_v63 = vpop.eup %4933 }
 0x3cc   :  { %v2135_v0 = vpop.f32.mrf.mxu1  ;;  %v4936_v32 = vpop.eup %4935  ;;  %v2210_v6 = vsub.f32 1.0, %v4934_v63 }
 0x3cd   :  { %4939 = vtanh.f32 %v2202_v7  ;;  %v2203_v26 = vadd.f32 %v2199_v3, %v854_v9  ;;  %v2200_v15 = vmul.f32 %v4930_v18, %v2196_v38  ;;  %v2197_v2 = vadd.f32 %v2135_v0, %v6124_v39  ;;  %v4938_v4 = vpop.eup %4937 }
 0x3ce   :  { %4941 = vrcp.f32 %v2185_v62  ;;  %v2211_v9 = vsub.f32 1.0, %v4936_v32  ;;  %v2218_v7 = vmul.f32 %v4934_v63, %v6519_v17  ;;  %v2219_v43 = vmul.f32 %v4936_v32, %v6521_v57  ;;  %v9138_v63 = vld [vmem:[#allocation164_spill] sm:$0xff]  ;;  %v9139_v32 = vld [vmem:[#allocation165_spill] sm:$0xff] }
 0x3cf   :  { %4943 = vtanh.f32 %v2203_v26  ;;  %v2204_v10 = vadd.f32 %v2200_v15, %v856_v36  ;;  %v2201_v11 = vmul.f32 %v4932_v1, %v2197_v2  ;;  %v2212_v38 = vsub.f32 1.0, %v4938_v4 }
 0x3d0   :  { %v2220_v2 = vmul.f32 %v4938_v4, %v6525_v13  ;;  %v9136_v13 = vld [vmem:[#allocation44_spill] sm:$0xff]  ;;  %v9140_v4 = vld [vmem:[#allocation166_spill] sm:$0xff] }
 0x3d1   :  { %4945 = vtanh.f32 %v2204_v10  ;;  %v2205_v31 = vadd.f32 %v2201_v11, %v858_v33 }
 0x3d3   :  { %4947 = vtanh.f32 %v2205_v31 }
 0x3da   :  { %v4940_v5 = vpop.eup %4939 }
 0x3db   :  { %v4942_v61 = vpop.eup %4941  ;;  %v2214_v45 = vmul.f32 %v4940_v5, %v2210_v6  ;;  %v9141_v6 = vld [vmem:[#allocation167_spill] sm:$0xff]  ;;  %v9142_v5 = vld [vmem:[#allocation168_spill] sm:$0xff] }
 0x3dc   :  { %v4944_v62 = vpop.eup %4943  ;;  %v2213_v0 = vsub.f32 1.0, %v4942_v61  ;;  %v2221_v10 = vmul.f32 %v4942_v61, %v6527_v60  ;;  %v9137_v60 = vld [vmem:[#allocation45_spill] sm:$0xff] }
 0x3dd   :  { %v2215_v3 = vmul.f32 %v4944_v62, %v2211_v9  ;;  %v6794_v18 = vadd.f32 %v2218_v7, %v2214_v45  ;;  %v9143_v61 = vld [vmem:[#allocation169_spill] sm:$0xff]  ;;  %v9144_v9 = vld [vmem:[#allocation170_spill] sm:$0xff]  ;;  %v9145_v45 = vld [vmem:[#allocation171_spill] sm:$0xff] }
 0x3de   :  { %v4946_v36 = vpop.eup %4945  ;;  %v9146_v7 = vld [vmem:[#allocation172_spill] sm:$0xff]  ;;  %v9147_v62 = vld [vmem:[#allocation173_spill] sm:$0xff] }
 0x3df   :  { %v6796_v26 = vadd.f32 %v2219_v43, %v2215_v3  ;;  %v2216_v15 = vmul.f32 %v4946_v36, %v2212_v38  ;;  %v9148_v3 = vld [vmem:[#allocation174_spill] sm:$0xff]  ;;  %v9149_v43 = vld [vmem:[#allocation175_spill] sm:$0xff]  ;;  %v9150_v38 = vld [vmem:[#allocation176_spill] sm:$0xff] }
 0x3e0   :  { %v4948_v1 = vpop.eup %4947  ;;  %v9151_v36 = vld [vmem:[#allocation177_spill] sm:$0xff] }
 0x3e1   :  { %v2217_v33 = vmul.f32 %v4948_v1, %v2213_v0  ;;  %v6800_v11 = vadd.f32 %v2220_v2, %v2216_v15  ;;  %v9152_v0 = vld [vmem:[#allocation178_spill] sm:$0xff]  ;;  %v9153_v15 = vld [vmem:[#allocation179_spill] sm:$0xff]  ;;  %v9154_v2 = vld [vmem:[#allocation180_spill] sm:$0xff] }
 0x3e2   :  { %v9155_v1 = vld [vmem:[#allocation181_spill] sm:$0xff] }
 0x3e3   :  { %v6802_v17 = vadd.f32 %v2221_v10, %v2217_v33  ;;  %v6808_v31 = vpack.c.bf16 %v6800_v11, %v6794_v18  ;;  %v9156_v33 = vld [vmem:[#allocation182_spill] sm:$0xff]  ;;  %v9157_v10 = vld [vmem:[#allocation183_spill] sm:$0xff] }
 0x3e5   :  { %v2240_v57 = vpack.c.bf16 %v6802_v17, %v6796_v26 }
 0x3e7   :  { %2273 = vmatprep.mubr.bf16.mxu0 %v2240_v57  ;;  %2316 = vmatprep.mubr.bf16.mxu1 %v2240_v57 }
 0x3e8   :  { %2274 = vmatmul.mubr.bf16.vlgmr.msra.gmra.mxu0 %v6808_v31  ;;  %2317 = vmatmul.mubr.bf16.vlgmr.msra.gmra.mxu1 %v6808_v31 }
 0x3e9   :  { %2328 = vmatpush1.bf16.msra.mxu0 %v6537_v37  ;;  %2359 = vmatprep.mubr.bf16.mxu0 %v2240_v57  ;;  %v9158_v57 = vld [vmem:[#allocation184_spill] sm:$0xff] }
 0x3ea   :  { %2329 = vmatprep.subr.bf16.mxu0 %v6540_v49  ;;  %2474 = vmatpush1.bf16.msra.mxu1 %v6543_v23 }
 0x3eb   :  { %2475 = vmatprep.subr.bf16.mxu1 %v6546_v22 }
 0x3ed   :  { %2330 = vmatpush1.bf16.msra.mxu0 %v6549_v24 }
 0x3ee   :  { %2331 = vmatprep.subr.bf16.mxu0 %v6552_v29  ;;  %2476 = vmatpush1.bf16.msra.mxu1 %v6555_v34 }
 0x3ef   :  { %2477 = vmatprep.subr.bf16.mxu1 %v6558_v56 }
 0x3f1   :  { %2332 = vmatpush1.bf16.msra.mxu0 %v6561_v19 }
 0x3f2   :  { %2333 = vmatprep.subr.bf16.mxu0 %v6564_v53  ;;  %2478 = vmatpush1.bf16.msra.mxu1 %v6567_v55 }
 0x3f3   :  { %2479 = vmatprep.subr.bf16.mxu1 %v6570_v42 }
 0x3f5   :  { %2334 = vmatpush1.bf16.msra.mxu0 %v6573_v28 }
 0x3f6   :  { %2335 = vmatprep.subr.bf16.mxu0 %v6576_v44  ;;  %2480 = vmatpush1.bf16.msra.mxu1 %v6579_v46 }
 0x3f7   :  { %2481 = vmatprep.subr.bf16.mxu1 %v6582_v52 }
 0x3f9   :  { %2336 = vmatpush1.bf16.msra.mxu0 %v6585_v48 }
 0x3fa   :  { %2337 = vmatprep.subr.bf16.mxu0 %v6588_v47  ;;  %2482 = vmatpush1.bf16.msra.mxu1 %v6591_v14 }
 0x3fb   :  { %2483 = vmatprep.subr.bf16.mxu1 %v6594_v8 }
 0x3fd   :  { %2338 = vmatpush1.bf16.msra.mxu0 %v6597_v21 }
 0x3fe   :  { %2339 = vmatprep.subr.bf16.mxu0 %v6600_v27  ;;  %2484 = vmatpush1.bf16.msra.mxu1 %v6603_v59 }
 0x3ff   :  { %2485 = vmatprep.subr.bf16.mxu1 %v6606_v51 }
 0x401   :  { %2340 = vmatpush1.bf16.msra.mxu0 %v6609_v16 }
 0x402   :  { %2341 = vmatprep.subr.bf16.mxu0 %v6612_v35  ;;  %2486 = vmatpush1.bf16.msra.mxu1 %v6615_v30 }
 0x403   :  { %2487 = vmatprep.subr.bf16.mxu1 %v6618_v25 }
 0x405   :  { %2342 = vmatpush1.bf16.msra.mxu0 %v6621_v20 }
 0x406   :  { %2343 = vmatprep.subr.bf16.mxu0 %v9136_v13  ;;  %2488 = vmatpush1.bf16.msra.mxu1 %v9137_v60 }
 0x407   :  { %2489 = vmatprep.subr.bf16.mxu1 %v9138_v63 }
 0x409   :  { %2344 = vmatpush2.bf16.msra.mxu0 %v9139_v32 }
 0x40a   :  { %2345 = vmatprep.subr.bf16.mxu0 %v9140_v4  ;;  %2490 = vmatpush2.bf16.msra.mxu1 %v9141_v6 }
 0x40b   :  { %2491 = vmatprep.subr.bf16.mxu1 %v9142_v5 }
 0x40d   :  { %2346 = vmatpush2.bf16.msra.mxu0 %v9143_v61 }
 0x40e   :  { %2347 = vmatprep.subr.bf16.mxu0 %v9144_v9  ;;  %2492 = vmatpush2.bf16.msra.mxu1 %v9145_v45  ;;  %v9207_v9 = vld [vmem:[#allocation23_spill] sm:$0xff] }
 0x40f   :  { %2493 = vmatprep.subr.bf16.mxu1 %v9146_v7 }
 0x411   :  { %2348 = vmatpush2.bf16.msra.mxu0 %v9147_v62  ;;  %v9206_v62 = vld [vmem:[#allocation22_spill] sm:$0xff] }
 0x412   :  { %2349 = vmatprep.subr.bf16.mxu0 %v9148_v3  ;;  %2494 = vmatpush2.bf16.msra.mxu1 %v9149_v43  ;;  %v9159_v3 = vld [vmem:[#allocation185_spill] sm:$0xff]  ;;  %v9160_v43 = vld [vmem:[#allocation186_spill] sm:$0xff]  ;;  %v560_v7 = vadd.f32 %v9206_v62, %v6050_v54 }
 0x413   :  { %2495 = vmatprep.subr.bf16.mxu1 %v9150_v38  ;;  %v9161_v38 = vld [vmem:[#allocation187_spill] sm:$0xff] }
 0x415   :  { %2350 = vmatpush2.bf16.msra.mxu0 %v9151_v36  ;;  %v9162_v36 = vld [vmem:[#allocation188_spill] sm:$0xff] }
 0x416   :  { %2351 = vmatprep.subr.bf16.mxu0 %v9152_v0  ;;  %2496 = vmatpush2.bf16.msra.mxu1 %v9153_v15  ;;  %v9163_v0 = vld [vmem:[#allocation189_spill] sm:$0xff]  ;;  %v9164_v15 = vld [vmem:[#allocation190_spill] sm:$0xff] }
 0x417   :  { %2497 = vmatprep.subr.bf16.mxu1 %v9154_v2  ;;  %v9165_v2 = vld [vmem:[#allocation191_spill] sm:$0xff] }
 0x419   :  { %2352 = vmatpush2.bf16.msra.mxu0 %v9155_v1  ;;  %v9166_v1 = vld [vmem:[#allocation192_spill] sm:$0xff] }
 0x41a   :  { %2353 = vmatprep.subr.bf16.mxu0 %v9156_v33  ;;  %2498 = vmatpush2.bf16.msra.mxu1 %v9157_v10  ;;  %v9167_v33 = vld [vmem:[#allocation193_spill] sm:$0xff]  ;;  %v9168_v10 = vld [vmem:[#allocation194_spill] sm:$0xff] }
 0x41b   :  { %2499 = vmatprep.subr.bf16.mxu1 %v9158_v57  ;;  %v9169_v57 = vld [vmem:[#allocation195_spill] sm:$0xff] }
 0x41d   :  { %2354 = vmatpush2.bf16.msra.mxu0 %v9159_v3  ;;  %v9170_v3 = vld [vmem:[#allocation196_spill] sm:$0xff] }
 0x41e   :  { %2355 = vmatprep.subr.bf16.mxu0 %v9160_v43  ;;  %2500 = vmatpush2.bf16.msra.mxu1 %v9161_v38  ;;  %v6877_v38 = vld [vmem:[#allocation8 + $0x158] ss:$24 sps:$4 sm:$0xff]  }
 0x41f   :  { %2501 = vmatprep.subr.bf16.mxu1 %v9162_v36  ;;  %9171 = vst [vmem:[#allocation60_spill] sm:$0xff] %v6877_v38  ;;  %v9205_v36 = vld [vmem:[#allocation21_spill] sm:$0xff] }
 0x421   :  { %2356 = vmatpush2.bf16.msra.mxu0 %v9163_v0  ;;  %v6880_v0 = vld [vmem:[#allocation8 + $0x12c] ss:$24 sps:$4 sm:$0xff]  }
 0x422   :  { %2357 = vmatprep.subr.bf16.mxu0 %v9164_v15  ;;  %2502 = vmatpush2.bf16.msra.mxu1 %v9165_v2  ;;  %9172 = vst [vmem:[#allocation61_spill] sm:$0xff] %v6880_v0  ;;  %v6883_v2 = vld [vmem:[#allocation8 + $0x128] ss:$24 sps:$4 sm:$0xff]  }
 0x423   :  { %2503 = vmatprep.subr.bf16.mxu1 %v9166_v1  ;;  %9173 = vst [vmem:[#allocation62_spill] sm:$0xff] %v6883_v2  ;;  %v9204_v15 = vld [vmem:[#allocation32_spill] sm:$0xff] }
 0x424   :  { %v558_v43 = vadd.f32 %v9205_v36, %v9204_v15 }
 0x425   :  { %2358 = vmatpush2.bf16.msra.mxu0 %v9167_v33  ;;  %v6886_v33 = vld [vmem:[#allocation8 + $0xfc] ss:$24 sps:$4 sm:$0xff]  }
 0x426   :  { %2516 = vmatprep.subr.bf16.mxu0 %v9168_v10  ;;  %2504 = vmatpush2.bf16.msra.mxu1 %v9169_v57  ;;  %9174 = vst [vmem:[#allocation63_spill] sm:$0xff] %v6886_v33  ;;  %v6889_v57 = vld [vmem:[#allocation8 + $0xf8] ss:$24 sps:$4 sm:$0xff]   ;;  %v9203_v10 = vld [vmem:[#allocation20_spill] sm:$0xff] }
 0x427   :  { %2559 = vmatprep.subr.bf16.mxu1 %v9170_v3  ;;  %9175 = vst [vmem:[#allocation64_spill] sm:$0xff] %v6889_v57  ;;  %v556_v1 = vadd.f32 %v9203_v10, %v6050_v54 }
 0x428   :  { %2360 = vmatmul.mubr.bf16.vlgmr.msra.gmra.mxu0 %v6808_v31  ;;  %v6892_v31 = vld [vmem:[#allocation8 + $0xcc] ss:$24 sps:$4 sm:$0xff]  }
 0x429   :  { %2517 = vmatpush1.bf16.msra.mxu0 %v6877_v38  ;;  %9176 = vst [vmem:[#allocation65_spill] sm:$0xff] %v6892_v31  ;;  %v6895_v38 = vld [vmem:[#allocation8 + $0xc8] ss:$24 sps:$4 sm:$0xff]  }
 0x42a   :  { %2518 = vmatprep.subr.bf16.mxu0 %v6880_v0  ;;  %9177 = vst [vmem:[#allocation66_spill] sm:$0xff] %v6895_v38  ;;  %v6898_v0 = vld [vmem:[#allocation8 + $0x9c] ss:$24 sps:$4 sm:$0xff]  }
 0x42b   :  { %9178 = vst [vmem:[#allocation67_spill] sm:$0xff] %v6898_v0 }
 0x42d   :  { %2519 = vmatpush1.bf16.msra.mxu0 %v6883_v2  ;;  %v6901_v2 = vld [vmem:[#allocation8 + $0x98] ss:$24 sps:$4 sm:$0xff]  }
 0x42e   :  { %2520 = vmatprep.subr.bf16.mxu0 %v6886_v33  ;;  %9179 = vst [vmem:[#allocation68_spill] sm:$0xff] %v6901_v2  ;;  %v6904_v33 = vld [vmem:[#allocation8 + $0x6c] ss:$24 sps:$4 sm:$0xff]  }
 0x42f   :  { %9180 = vst [vmem:[#allocation69_spill] sm:$0xff] %v6904_v33 }
 0x431   :  { %2521 = vmatpush1.bf16.msra.mxu0 %v6889_v57  ;;  %v6907_v57 = vld [vmem:[#allocation8 + $0x68] ss:$24 sps:$4 sm:$0xff]  }
 0x432   :  { %2522 = vmatprep.subr.bf16.mxu0 %v6892_v31  ;;  %9181 = vst [vmem:[#allocation70_spill] sm:$0xff] %v6907_v57  ;;  %v6910_v31 = vld [vmem:[#allocation8 + $0x3c] ss:$24 sps:$4 sm:$0xff]  }
 0x433   :  { %9182 = vst [vmem:[#allocation71_spill] sm:$0xff] %v6910_v31 }
 0x435   :  { %2523 = vmatpush1.bf16.msra.mxu0 %v6895_v38  ;;  %v6913_v38 = vld [vmem:[#allocation8 + $0x38] ss:$24 sps:$4 sm:$0xff]  }
 0x436   :  { %2524 = vmatprep.subr.bf16.mxu0 %v6898_v0  ;;  %9183 = vst [vmem:[#allocation72_spill] sm:$0xff] %v6913_v38  ;;  %v6916_v0 = vld [vmem:[#allocation8 + $0xc] ss:$24 sps:$4 sm:$0xff]  }
 0x437   :  { %9184 = vst [vmem:[#allocation73_spill] sm:$0xff] %v6916_v0 }
 0x439   :  { %2525 = vmatpush1.bf16.msra.mxu0 %v6901_v2  ;;  %v6919_v2 = vld [vmem:[#allocation8 + $0x8] ss:$24 sps:$4 sm:$0xff]  }
 0x43a   :  { %2526 = vmatprep.subr.bf16.mxu0 %v6904_v33  ;;  %9185 = vst [vmem:[#allocation74_spill] sm:$0xff] %v6919_v2  ;;  %v6922_v33 = vld [vmem:[#allocation8 + $0x2dc] ss:$24 sps:$4 sm:$0xff]  }
 0x43b   :  { %9186 = vst [vmem:[#allocation75_spill] sm:$0xff] %v6922_v33 }
 0x43d   :  { %2527 = vmatpush1.bf16.msra.mxu0 %v6907_v57  ;;  %v6925_v57 = vld [vmem:[#allocation8 + $0x2d8] ss:$24 sps:$4 sm:$0xff]  }
 0x43e   :  { %2528 = vmatprep.subr.bf16.mxu0 %v6910_v31  ;;  %9187 = vst [vmem:[#allocation76_spill] sm:$0xff] %v6925_v57  ;;  %v6928_v31 = vld [vmem:[#allocation8 + $0x2ac] ss:$24 sps:$4 sm:$0xff]  }
 0x43f   :  { %9188 = vst [vmem:[#allocation77_spill] sm:$0xff] %v6928_v31 }
 0x441   :  { %2529 = vmatpush1.bf16.msra.mxu0 %v6913_v38  ;;  %v6931_v38 = vld [vmem:[#allocation8 + $0x2a8] ss:$24 sps:$4 sm:$0xff]  }
 0x442   :  { %2530 = vmatprep.subr.bf16.mxu0 %v6916_v0  ;;  %9189 = vst [vmem:[#allocation78_spill] sm:$0xff] %v6931_v38  ;;  %v6934_v0 = vld [vmem:[#allocation8 + $0x27c] ss:$24 sps:$4 sm:$0xff]  }
 0x443   :  { %9190 = vst [vmem:[#allocation80_spill] sm:$0xff] %v6934_v0 }
 0x445   :  { %2531 = vmatpush1.bf16.msra.mxu0 %v6919_v2  ;;  %v6937_v2 = vld [vmem:[#allocation8 + $0x278] ss:$24 sps:$4 sm:$0xff]  }
 0x446   :  { %2532 = vmatprep.subr.bf16.mxu0 %v6922_v33  ;;  %9191 = vst [vmem:[#allocation81_spill] sm:$0xff] %v6937_v2  ;;  %v6940_v33 = vld [vmem:[#allocation8 + $0x24c] ss:$24 sps:$4 sm:$0xff]  }
 0x447   :  { %9192 = vst [vmem:[#allocation83_spill] sm:$0xff] %v6940_v33 }
 0x449   :  { %2533 = vmatpush2.bf16.msra.mxu0 %v6925_v57  ;;  %v6943_v57 = vld [vmem:[#allocation8 + $0x248] ss:$24 sps:$4 sm:$0xff]  }
 0x44a   :  { %2534 = vmatprep.subr.bf16.mxu0 %v6928_v31  ;;  %9193 = vst [vmem:[#allocation84_spill] sm:$0xff] %v6943_v57  ;;  %v6946_v31 = vld [vmem:[#allocation8 + $0x21c] ss:$24 sps:$4 sm:$0xff]  }
 0x44b   :  { %9194 = vst [vmem:[#allocation86_spill] sm:$0xff] %v6946_v31 }
 0x44d   :  { %2535 = vmatpush2.bf16.msra.mxu0 %v6931_v38  ;;  %v6949_v38 = vld [vmem:[#allocation8 + $0x218] ss:$24 sps:$4 sm:$0xff]  }
 0x44e   :  { %2536 = vmatprep.subr.bf16.mxu0 %v6934_v0  ;;  %9195 = vst [vmem:[#allocation87_spill] sm:$0xff] %v6949_v38  ;;  %v6952_v0 = vld [vmem:[#allocation8 + $0x1ec] ss:$24 sps:$4 sm:$0xff]  }
 0x44f   :  { %9196 = vst [vmem:[#allocation89_spill] sm:$0xff] %v6952_v0 }
 0x451   :  { %2537 = vmatpush2.bf16.msra.mxu0 %v6937_v2  ;;  %v6955_v2 = vld [vmem:[#allocation8 + $0x1e8] ss:$24 sps:$4 sm:$0xff]  }
 0x452   :  { %2538 = vmatprep.subr.bf16.mxu0 %v6940_v33  ;;  %9197 = vst [vmem:[#allocation16_spill] sm:$0xff] %v6955_v2  ;;  %v6958_v33 = vld [vmem:[#allocation8 + $0x1bc] ss:$24 sps:$4 sm:$0xff]  }
 0x453   :  { %9198 = vst [vmem:[#allocation17_spill] sm:$0xff] %v6958_v33 }
 0x455   :  { %2539 = vmatpush2.bf16.msra.mxu0 %v6943_v57  ;;  %v6961_v57 = vld [vmem:[#allocation8 + $0x1b8] ss:$24 sps:$4 sm:$0xff]  }
 0x456   :  { %2540 = vmatprep.subr.bf16.mxu0 %v6946_v31  ;;  %9199 = vst [vmem:[#allocation18_spill] sm:$0xff] %v6961_v57  ;;  %v6964_v31 = vld [vmem:[#allocation8 + $0x18c] ss:$24 sps:$4 sm:$0xff]  }
 0x457   :  { %9200 = vst [vmem:[#allocation19_spill] sm:$0xff] %v6964_v31 }
 0x459   :  { %2541 = vmatpush2.bf16.msra.mxu0 %v6949_v38  ;;  %v6967_v38 = vld [vmem:[#allocation8 + $0x188] ss:$24 sps:$4 sm:$0xff]  }
 0x45a   :  { %2542 = vmatprep.subr.bf16.mxu0 %v6952_v0  ;;  %9201 = vst [vmem:[#allocation79_spill] sm:$0xff] %v6967_v38  ;;  %v9202_v0 = vld [vmem:[#allocation59_spill] sm:$0xff] }
 0x45d   :  { %2543 = vmatpush2.bf16.msra.mxu0 %v6955_v2 }
 0x45e   :  { %2544 = vmatprep.subr.bf16.mxu0 %v6958_v33 }
 0x461   :  { %2545 = vmatpush2.bf16.msra.mxu0 %v6961_v57 }
 0x462   :  { %2546 = vmatprep.subr.bf16.mxu0 %v6964_v31 }
 0x465   :  { %2547 = vmatpush2.bf16.msra.mxu0 %v6967_v38  ;;  %v562_v38 = vadd.f32 %v9207_v9, %v9204_v15  ;;  %v9210_v9 = vld [vmem:[#allocation93_spill] sm:$0xff] }
 0x466   :  { %2705 = vmatprep.subr.bf16.mxu0 %v9202_v0 }
 0x4a8   :  { %v2275_v3 = vpop.f32.mrf.mxu0  ;;  %v2318_v0 = vpop.f32.mrf.mxu1 }
 0x4a9   :  { %v2370_v57 = vadd.f32 %v2275_v3, %v556_v1  ;;  %v9208_v3 = vld [vmem:[#allocation90_spill] sm:$0xff] }
 0x4aa   :  { %v2277_v2 = vpop.f32.mrf.mxu0  ;;  %v2320_v10 = vpop.f32.mrf.mxu1  ;;  %v709_v36 = vadd.f32 %v9208_v3, %v9061_v12 }
 0x4ab   :  { %v2371_v31 = vadd.f32 %v2277_v2, %v558_v43  ;;  %v4517_v61 = vmul.f32 -1.442695, %v2370_v57  ;;  %v9209_v43 = vld [vmem:[#allocation91_spill] sm:$0xff] }
 0x4ac   :  { %v2279_v33 = vpop.f32.mrf.mxu0  ;;  %v2322_v62 = vpop.f32.mrf.mxu1  ;;  %v711_v2 = vadd.f32 %v9209_v43, %v9062_v41  ;;  %v2398_v1 = vadd.f32 %v2318_v0, %v709_v36 }
 0x4ad   :  { %v2372_v5 = vadd.f32 %v2279_v33, %v560_v7  ;;  %v4518_v6 = vmul.f32 -1.442695, %v2371_v31  ;;  %4949 = vpow2.f32 %v4517_v61  ;;  %v713_v7 = vadd.f32 %v9210_v9, %v9061_v12  ;;  %v9211_v61 = vld [vmem:[#allocation95_spill] sm:$0xff] }
 0x4ae   :  { %v2281_v45 = vpop.f32.mrf.mxu0  ;;  %v2399_v33 = vadd.f32 %v2320_v10, %v711_v2 }
 0x4af   :  { %v2373_v4 = vadd.f32 %v2281_v45, %v562_v38  ;;  %v4519_v32 = vmul.f32 -1.442695, %v2372_v5  ;;  %4951 = vpow2.f32 %v4518_v6  ;;  %v2324_v45 = vpop.f32.mrf.mxu1  ;;  %v715_v5 = vadd.f32 %v9211_v61, %v9062_v41 }
 0x4b0   :  { %v2400_v6 = vadd.f32 %v2322_v62, %v713_v7  ;;  %v4522_v57 = vmul.f32 -1.442695, %v2399_v33 }
 0x4b1   :  { %v4520_v63 = vmul.f32 -1.442695, %v2373_v4  ;;  %4953 = vpow2.f32 %v4519_v32  ;;  %v4521_v4 = vmul.f32 -1.442695, %v2398_v1  ;;  %v2401_v38 = vadd.f32 %v2324_v45, %v715_v5 }
 0x4b2   :  { %v4523_v32 = vmul.f32 -1.442695, %v2400_v6 }
 0x4b3   :  { %4955 = vpow2.f32 %v4520_v63  ;;  %v4524_v15 = vmul.f32 -1.442695, %v2401_v38 }
 0x4b4   :  { %4957 = vpow2.f32 %v4521_v4 }
 0x4b5   :  { %4959 = vpow2.f32 %v4522_v57 }
 0x4b6   :  { %4961 = vpow2.f32 %v4523_v32 }
 0x4b7   :  { %4963 = vpow2.f32 %v4524_v15  ;;  %v9212_v15 = vld [vmem:[#allocation98_spill] sm:$0xff] }
 0x4b8   :  { %v862_v57 = vadd.f32 %v9212_v15, %v6117_v40 }
 0x4ba   :  { %v4950_v31 = vpop.eup %4949 }
 0x4bb   :  { %v2386_v43 = vadd.f32 1.0, %v4950_v31 }
 0x4bc   :  { %v4952_v3 = vpop.eup %4951 }
 0x4bd   :  { %v2387_v0 = vadd.f32 1.0, %v4952_v3  ;;  %4965 = vrcp.f32 %v2386_v43  ;;  %v9213_v43 = vld [vmem:[#allocation100_spill] sm:$0xff] }
 0x4be   :  { %v4954_v63 = vpop.eup %4953 }
 0x4bf   :  { %v2388_v10 = vadd.f32 1.0, %v4954_v63  ;;  %4967 = vrcp.f32 %v2387_v0  ;;  %v864_v63 = vadd.f32 %v9213_v43, %v6120_v50 }
 0x4c0   :  { %v4956_v36 = vpop.eup %4955 }
 0x4c1   :  { %v2389_v2 = vadd.f32 1.0, %v4956_v36  ;;  %4969 = vrcp.f32 %v2388_v10  ;;  %v4958_v62 = vpop.eup %4957 }
 0x4c2   :  { %v4960_v1 = vpop.eup %4959  ;;  %v2414_v7 = vadd.f32 1.0, %v4958_v62 }
 0x4c3   :  { %4971 = vrcp.f32 %v2389_v2  ;;  %v4962_v9 = vpop.eup %4961  ;;  %v2415_v61 = vadd.f32 1.0, %v4960_v1 }
 0x4c4   :  { %v4964_v45 = vpop.eup %4963  ;;  %v2416_v4 = vadd.f32 1.0, %v4962_v9  ;;  %4973 = vrcp.f32 %v2414_v7  ;;  %v9214_v9 = vld [vmem:[#allocation102_spill] sm:$0xff] }
 0x4c5   :  { %v2417_v0 = vadd.f32 1.0, %v4964_v45  ;;  %4975 = vrcp.f32 %v2415_v61  ;;  %v9215_v45 = vld [vmem:[#allocation104_spill] sm:$0xff] }
 0x4c6   :  { %4977 = vrcp.f32 %v2416_v4  ;;  %v868_v61 = vadd.f32 %v9215_v45, %v6120_v50 }
 0x4ca   :  { %v4966_v6 = vpop.eup %4965 }
 0x4cc   :  { %v4968_v3 = vpop.eup %4967 }
 0x4ce   :  { %v4970_v1 = vpop.eup %4969 }
 0x4d0   :  { %v4972_v15 = vpop.eup %4971 }
 0x4e8   :  { %v2361_v33 = vpop.f32.mrf.mxu0 }
 0x4e9   :  { %v2426_v5 = vadd.f32 %v2361_v33, %v6128_v58  ;;  %v866_v33 = vadd.f32 %v9214_v9, %v6117_v40 }
 0x4ea   :  { %v2363_v38 = vpop.f32.mrf.mxu0 }
 0x4eb   :  { %v2430_v31 = vmul.f32 %v4966_v6, %v2426_v5  ;;  %v2427_v32 = vadd.f32 %v2363_v38, %v6124_v39 }
 0x4ec   :  { %v2365_v36 = vpop.f32.mrf.mxu0 }
 0x4ed   :  { %v2434_v10 = vadd.f32 %v2430_v31, %v862_v57  ;;  %v2431_v2 = vmul.f32 %v4968_v3, %v2427_v32  ;;  %v2428_v62 = vadd.f32 %v2365_v36, %v6128_v58  ;;  %v4974_v3 = vpop.eup %4973 }
 0x4ee   :  { %v2367_v7 = vpop.f32.mrf.mxu0  ;;  %v4976_v43 = vpop.eup %4975  ;;  %v2442_v36 = vsub.f32 1.0, %v4974_v3 }
 0x4ef   :  { %4979 = vtanh.f32 %v2434_v10  ;;  %v2435_v5 = vadd.f32 %v2431_v2, %v864_v63  ;;  %v2432_v6 = vmul.f32 %v4970_v1, %v2428_v62  ;;  %v2429_v38 = vadd.f32 %v2367_v7, %v6124_v39  ;;  %v4978_v4 = vpop.eup %4977 }
 0x4f0   :  { %4981 = vrcp.f32 %v2417_v0  ;;  %v2443_v2 = vsub.f32 1.0, %v4976_v43  ;;  %v2450_v1 = vmul.f32 %v4974_v3, %v6794_v18  ;;  %v2451_v7 = vmul.f32 %v4976_v43, %v6796_v26  ;;  %v9249_v43 = vld [vmem:[#allocation60_spill] sm:$0xff] }
 0x4f1   :  { %4983 = vtanh.f32 %v2435_v5  ;;  %v2436_v57 = vadd.f32 %v2432_v6, %v866_v33  ;;  %v2433_v31 = vmul.f32 %v4972_v15, %v2429_v38  ;;  %v2444_v5 = vsub.f32 1.0, %v4978_v4 }
 0x4f3   :  { %4985 = vtanh.f32 %v2436_v57  ;;  %v2437_v32 = vadd.f32 %v2433_v31, %v868_v61  ;;  %v2452_v61 = vmul.f32 %v4978_v4, %v6800_v11  ;;  %v9245_v11 = vld [vmem:[#allocation193_spill] sm:$0xff] }
 0x4f4   :  { %v9250_v4 = vld [vmem:[#allocation61_spill] sm:$0xff] }
 0x4f5   :  { %4987 = vtanh.f32 %v2437_v32 }
 0x4fc   :  { %v4980_v10 = vpop.eup %4979 }
 0x4fd   :  { %v4982_v63 = vpop.eup %4981  ;;  %v2446_v62 = vmul.f32 %v4980_v10, %v2442_v36  ;;  %v9251_v10 = vld [vmem:[#allocation62_spill] sm:$0xff] }
 0x4fe   :  { %v4984_v0 = vpop.eup %4983  ;;  %v2445_v38 = vsub.f32 1.0, %v4982_v63  ;;  %v2453_v32 = vmul.f32 %v4982_v63, %v6802_v17  ;;  %v9246_v17 = vld [vmem:[#allocation194_spill] sm:$0xff]  ;;  %v9252_v63 = vld [vmem:[#allocation63_spill] sm:$0xff] }
 0x4ff   :  { %v2447_v9 = vmul.f32 %v4984_v0, %v2443_v2  ;;  %v7001_v33 = vadd.f32 %v2450_v1, %v2446_v62  ;;  %v9253_v2 = vld [vmem:[#allocation64_spill] sm:$0xff]  ;;  %v9254_v62 = vld [vmem:[#allocation65_spill] sm:$0xff]  ;;  %v9255_v1 = vld [vmem:[#allocation66_spill] sm:$0xff] }
 0x500   :  { %v4986_v6 = vpop.eup %4985  ;;  %v9256_v0 = vld [vmem:[#allocation67_spill] sm:$0xff] }
 0x501   :  { %v7003_v15 = vadd.f32 %v2451_v7, %v2447_v9  ;;  %v2448_v45 = vmul.f32 %v4986_v6, %v2444_v5  ;;  %v9257_v9 = vld [vmem:[#allocation68_spill] sm:$0xff]  ;;  %v9258_v7 = vld [vmem:[#allocation69_spill] sm:$0xff]  ;;  %v9259_v5 = vld [vmem:[#allocation70_spill] sm:$0xff] }
 0x502   :  { %v4988_v57 = vpop.eup %4987  ;;  %v9260_v6 = vld [vmem:[#allocation71_spill] sm:$0xff] }
 0x503   :  { %v2449_v31 = vmul.f32 %v4988_v57, %v2445_v38  ;;  %v7007_v36 = vadd.f32 %v2452_v61, %v2448_v45  ;;  %v9261_v38 = vld [vmem:[#allocation72_spill] sm:$0xff]  ;;  %v9262_v45 = vld [vmem:[#allocation73_spill] sm:$0xff]  ;;  %v9263_v61 = vld [vmem:[#allocation74_spill] sm:$0xff] }
 0x504   :  { %v9264_v57 = vld [vmem:[#allocation75_spill] sm:$0xff] }
 0x505   :  { %v7009_v18 = vadd.f32 %v2453_v32, %v2449_v31  ;;  %v7015_v3 = vpack.c.bf16 %v7007_v36, %v7001_v33  ;;  %v9265_v31 = vld [vmem:[#allocation76_spill] sm:$0xff]  ;;  %v9266_v32 = vld [vmem:[#allocation77_spill] sm:$0xff] }
 0x507   :  { %v2472_v26 = vpack.c.bf16 %v7009_v18, %v7003_v15 }
 0x509   :  { %2505 = vmatprep.mubr.bf16.mxu1 %v2472_v26  ;;  %2548 = vmatprep.mubr.bf16.mxu0 %v2472_v26 }
 0x50a   :  { %2506 = vmatmul.mubr.bf16.vlgmr.msra.gmra.mxu1 %v7015_v3  ;;  %2549 = vmatmul.mubr.bf16.vlgmr.msra.gmra.mxu0 %v7015_v3 }
 0x50b   :  { %2560 = vmatpush1.bf16.msra.mxu1 %v6537_v37  ;;  %2591 = vmatprep.mubr.bf16.mxu1 %v2472_v26  ;;  %v9216_v37 = vld [vmem:[#allocation164_spill] sm:$0xff]  ;;  %v9267_v26 = vld [vmem:[#allocation78_spill] sm:$0xff] }
 0x50c   :  { %2561 = vmatprep.subr.bf16.mxu1 %v6540_v49  ;;  %2706 = vmatpush1.bf16.msra.mxu0 %v6543_v23  ;;  %v9217_v49 = vld [vmem:[#allocation165_spill] sm:$0xff]  ;;  %v9218_v23 = vld [vmem:[#allocation166_spill] sm:$0xff] }
 0x50d   :  { %2707 = vmatprep.subr.bf16.mxu0 %v6546_v22  ;;  %v9219_v22 = vld [vmem:[#allocation167_spill] sm:$0xff] }
 0x50f   :  { %2562 = vmatpush1.bf16.msra.mxu1 %v6549_v24  ;;  %v9220_v24 = vld [vmem:[#allocation168_spill] sm:$0xff] }
 0x510   :  { %2563 = vmatprep.subr.bf16.mxu1 %v6552_v29  ;;  %2708 = vmatpush1.bf16.msra.mxu0 %v6555_v34  ;;  %v9225_v29 = vld [vmem:[#allocation173_spill] sm:$0xff]  ;;  %v9226_v34 = vld [vmem:[#allocation174_spill] sm:$0xff] }
 0x511   :  { %2709 = vmatprep.subr.bf16.mxu0 %v6558_v56  ;;  %v9227_v56 = vld [vmem:[#allocation175_spill] sm:$0xff] }
 0x513   :  { %2564 = vmatpush1.bf16.msra.mxu1 %v6561_v19  ;;  %v9228_v19 = vld [vmem:[#allocation176_spill] sm:$0xff] }
 0x514   :  { %2565 = vmatprep.subr.bf16.mxu1 %v6564_v53  ;;  %2710 = vmatpush1.bf16.msra.mxu0 %v6567_v55  ;;  %v9229_v53 = vld [vmem:[#allocation177_spill] sm:$0xff]  ;;  %v9230_v55 = vld [vmem:[#allocation178_spill] sm:$0xff] }
 0x515   :  { %2711 = vmatprep.subr.bf16.mxu0 %v6570_v42  ;;  %v9231_v42 = vld [vmem:[#allocation179_spill] sm:$0xff] }
 0x517   :  { %2566 = vmatpush1.bf16.msra.mxu1 %v6573_v28  ;;  %v9232_v28 = vld [vmem:[#allocation180_spill] sm:$0xff] }
 0x518   :  { %2567 = vmatprep.subr.bf16.mxu1 %v6576_v44  ;;  %2712 = vmatpush1.bf16.msra.mxu0 %v6579_v46  ;;  %v9233_v44 = vld [vmem:[#allocation181_spill] sm:$0xff]  ;;  %v9234_v46 = vld [vmem:[#allocation182_spill] sm:$0xff] }
 0x519   :  { %2713 = vmatprep.subr.bf16.mxu0 %v6582_v52  ;;  %v9235_v52 = vld [vmem:[#allocation183_spill] sm:$0xff] }
 0x51b   :  { %2568 = vmatpush1.bf16.msra.mxu1 %v6585_v48  ;;  %v9236_v48 = vld [vmem:[#allocation184_spill] sm:$0xff] }
 0x51c   :  { %2569 = vmatprep.subr.bf16.mxu1 %v6588_v47  ;;  %2714 = vmatpush1.bf16.msra.mxu0 %v6591_v14  ;;  %v9237_v47 = vld [vmem:[#allocation185_spill] sm:$0xff]  ;;  %v9238_v14 = vld [vmem:[#allocation186_spill] sm:$0xff] }
 0x51d   :  { %2715 = vmatprep.subr.bf16.mxu0 %v6594_v8  ;;  %v9239_v8 = vld [vmem:[#allocation187_spill] sm:$0xff] }
 0x51f   :  { %2570 = vmatpush1.bf16.msra.mxu1 %v6597_v21  ;;  %v9240_v21 = vld [vmem:[#allocation188_spill] sm:$0xff] }
 0x520   :  { %2571 = vmatprep.subr.bf16.mxu1 %v6600_v27  ;;  %2716 = vmatpush1.bf16.msra.mxu0 %v6603_v59  ;;  %v9241_v27 = vld [vmem:[#allocation189_spill] sm:$0xff]  ;;  %v9242_v59 = vld [vmem:[#allocation190_spill] sm:$0xff] }
 0x521   :  { %2717 = vmatprep.subr.bf16.mxu0 %v6606_v51  ;;  %v9243_v51 = vld [vmem:[#allocation191_spill] sm:$0xff] }
 0x523   :  { %2572 = vmatpush1.bf16.msra.mxu1 %v6609_v16  ;;  %v9244_v16 = vld [vmem:[#allocation192_spill] sm:$0xff] }
 0x524   :  { %2573 = vmatprep.subr.bf16.mxu1 %v6612_v35  ;;  %2718 = vmatpush1.bf16.msra.mxu0 %v6615_v30  ;;  %v9221_v35 = vld [vmem:[#allocation169_spill] sm:$0xff]  ;;  %v9222_v30 = vld [vmem:[#allocation170_spill] sm:$0xff] }
 0x525   :  { %2719 = vmatprep.subr.bf16.mxu0 %v6618_v25  ;;  %v9223_v25 = vld [vmem:[#allocation171_spill] sm:$0xff] }
 0x527   :  { %2574 = vmatpush1.bf16.msra.mxu1 %v6621_v20  ;;  %v9224_v20 = vld [vmem:[#allocation172_spill] sm:$0xff] }
 0x528   :  { %2575 = vmatprep.subr.bf16.mxu1 %v9136_v13  ;;  %2720 = vmatpush1.bf16.msra.mxu0 %v9137_v60  ;;  %v9247_v13 = vld [vmem:[#allocation195_spill] sm:$0xff]  ;;  %v9248_v60 = vld [vmem:[#allocation196_spill] sm:$0xff] }
 0x529   :  { %2721 = vmatprep.subr.bf16.mxu0 %v9216_v37  ;;  %v9269_v37 = vld [vmem:[#allocation81_spill] sm:$0xff] }
 0x52b   :  { %2576 = vmatpush2.bf16.msra.mxu1 %v9217_v49  ;;  %v9270_v49 = vld [vmem:[#allocation83_spill] sm:$0xff] }
 0x52c   :  { %2577 = vmatprep.subr.bf16.mxu1 %v9218_v23  ;;  %2722 = vmatpush2.bf16.msra.mxu0 %v9219_v22  ;;  %v9271_v23 = vld [vmem:[#allocation84_spill] sm:$0xff]  ;;  %v9272_v22 = vld [vmem:[#allocation86_spill] sm:$0xff] }
 0x52d   :  { %2723 = vmatprep.subr.bf16.mxu0 %v9220_v24  ;;  %v9273_v24 = vld [vmem:[#allocation87_spill] sm:$0xff] }
 0x52f   :  { %2578 = vmatpush2.bf16.msra.mxu1 %v9221_v35  ;;  %v9274_v35 = vld [vmem:[#allocation89_spill] sm:$0xff] }
 0x530   :  { %2579 = vmatprep.subr.bf16.mxu1 %v9222_v30  ;;  %2724 = vmatpush2.bf16.msra.mxu0 %v9223_v25  ;;  %v9275_v30 = vld [vmem:[#allocation16_spill] sm:$0xff]  ;;  %v9276_v25 = vld [vmem:[#allocation17_spill] sm:$0xff] }
 0x531   :  { %2725 = vmatprep.subr.bf16.mxu0 %v9224_v20  ;;  %v9277_v20 = vld [vmem:[#allocation18_spill] sm:$0xff] }
 0x533   :  { %2580 = vmatpush2.bf16.msra.mxu1 %v9225_v29  ;;  %v9278_v29 = vld [vmem:[#allocation19_spill] sm:$0xff] }
 0x534   :  { %2581 = vmatprep.subr.bf16.mxu1 %v9226_v34  ;;  %2726 = vmatpush2.bf16.msra.mxu0 %v9227_v56  ;;  %v9279_v34 = vld [vmem:[#allocation79_spill] sm:$0xff] }
 0x535   :  { %2727 = vmatprep.subr.bf16.mxu0 %v9228_v19  ;;  %v9280_v56 = vld [vmem:[#allocation59_spill] sm:$0xff] }
 0x537   :  { %2582 = vmatpush2.bf16.msra.mxu1 %v9229_v53 }
 0x538   :  { %2583 = vmatprep.subr.bf16.mxu1 %v9230_v55  ;;  %2728 = vmatpush2.bf16.msra.mxu0 %v9231_v42  ;;  %v9281_v55 = vld [vmem:[#allocation24_spill] sm:$0xff] }
 0x539   :  { %2729 = vmatprep.subr.bf16.mxu0 %v9232_v28  ;;  %v566_v42 = vadd.f32 %v9281_v55, %v6050_v54 }
 0x53b   :  { %2584 = vmatpush2.bf16.msra.mxu1 %v9233_v44  ;;  %v9282_v44 = vld [vmem:[#allocation32_spill] sm:$0xff] }
 0x53c   :  { %2585 = vmatprep.subr.bf16.mxu1 %v9234_v46  ;;  %2730 = vmatpush2.bf16.msra.mxu0 %v9235_v52  ;;  %v9283_v46 = vld [vmem:[#allocation25_spill] sm:$0xff] }
 0x53d   :  { %2731 = vmatprep.subr.bf16.mxu0 %v9236_v48  ;;  %v568_v52 = vadd.f32 %v9283_v46, %v9282_v44 }
 0x53f   :  { %2586 = vmatpush2.bf16.msra.mxu1 %v9237_v47  ;;  %v9284_v47 = vld [vmem:[#allocation26_spill] sm:$0xff] }
 0x540   :  { %2587 = vmatprep.subr.bf16.mxu1 %v9238_v14  ;;  %2732 = vmatpush2.bf16.msra.mxu0 %v9239_v8  ;;  %v570_v14 = vadd.f32 %v9284_v47, %v6050_v54 }
 0x541   :  { %2733 = vmatprep.subr.bf16.mxu0 %v9240_v21 }
 0x543   :  { %2588 = vmatpush2.bf16.msra.mxu1 %v9241_v27  ;;  %v9285_v27 = vld [vmem:[#allocation27_spill] sm:$0xff] }
 0x544   :  { %2589 = vmatprep.subr.bf16.mxu1 %v9242_v59  ;;  %2734 = vmatpush2.bf16.msra.mxu0 %v9243_v51  ;;  %v572_v59 = vadd.f32 %v9285_v27, %v9282_v44 }
 0x545   :  { %2735 = vmatprep.subr.bf16.mxu0 %v9244_v16 }
 0x547   :  { %2590 = vmatpush2.bf16.msra.mxu1 %v9245_v11 }
 0x548   :  { %2748 = vmatprep.subr.bf16.mxu1 %v9246_v17  ;;  %2736 = vmatpush2.bf16.msra.mxu0 %v9247_v13 }
 0x549   :  { %2791 = vmatprep.subr.bf16.mxu0 %v9248_v60 }
 0x54a   :  { %2592 = vmatmul.mubr.bf16.vlgmr.msra.gmra.mxu1 %v7015_v3  ;;  %v9268_v3 = vld [vmem:[#allocation80_spill] sm:$0xff] }
 0x54b   :  { %2749 = vmatpush1.bf16.msra.mxu1 %v9249_v43 }
 0x54c   :  { %2750 = vmatprep.subr.bf16.mxu1 %v9250_v4 }
 0x54f   :  { %2751 = vmatpush1.bf16.msra.mxu1 %v9251_v10 }
 0x550   :  { %2752 = vmatprep.subr.bf16.mxu1 %v9252_v63 }
 0x553   :  { %2753 = vmatpush1.bf16.msra.mxu1 %v9253_v2 }
 0x554   :  { %2754 = vmatprep.subr.bf16.mxu1 %v9254_v62 }
 0x557   :  { %2755 = vmatpush1.bf16.msra.mxu1 %v9255_v1 }
 0x558   :  { %2756 = vmatprep.subr.bf16.mxu1 %v9256_v0 }
 0x55b   :  { %2757 = vmatpush1.bf16.msra.mxu1 %v9257_v9 }
 0x55c   :  { %2758 = vmatprep.subr.bf16.mxu1 %v9258_v7 }
 0x55f   :  { %2759 = vmatpush1.bf16.msra.mxu1 %v9259_v5 }
 0x560   :  { %2760 = vmatprep.subr.bf16.mxu1 %v9260_v6 }
 0x563   :  { %2761 = vmatpush1.bf16.msra.mxu1 %v9261_v38 }
 0x564   :  { %2762 = vmatprep.subr.bf16.mxu1 %v9262_v45 }
 0x567   :  { %2763 = vmatpush1.bf16.msra.mxu1 %v9263_v61 }
 0x568   :  { %2764 = vmatprep.subr.bf16.mxu1 %v9264_v57 }
 0x56b   :  { %2765 = vmatpush2.bf16.msra.mxu1 %v9265_v31 }
 0x56c   :  { %2766 = vmatprep.subr.bf16.mxu1 %v9266_v32 }
 0x56f   :  { %2767 = vmatpush2.bf16.msra.mxu1 %v9267_v26 }
 0x570   :  { %2768 = vmatprep.subr.bf16.mxu1 %v9268_v3 }
 0x573   :  { %2769 = vmatpush2.bf16.msra.mxu1 %v9269_v37 }
 0x574   :  { %2770 = vmatprep.subr.bf16.mxu1 %v9270_v49 }
 0x577   :  { %2771 = vmatpush2.bf16.msra.mxu1 %v9271_v23 }
 0x578   :  { %2772 = vmatprep.subr.bf16.mxu1 %v9272_v22 }
 0x57b   :  { %2773 = vmatpush2.bf16.msra.mxu1 %v9273_v24 }
 0x57c   :  { %2774 = vmatprep.subr.bf16.mxu1 %v9274_v35 }
 0x57f   :  { %2775 = vmatpush2.bf16.msra.mxu1 %v9275_v30 }
 0x580   :  { %2776 = vmatprep.subr.bf16.mxu1 %v9276_v25 }
 0x583   :  { %2777 = vmatpush2.bf16.msra.mxu1 %v9277_v20 }
 0x584   :  { %2778 = vmatprep.subr.bf16.mxu1 %v9278_v29 }
 0x587   :  { %2779 = vmatpush2.bf16.msra.mxu1 %v9279_v34 }
 0x588   :  { %2937 = vmatprep.subr.bf16.mxu1 %v9280_v56 }
 0x5ca   :  { %v2507_v19 = vpop.f32.mrf.mxu1  ;;  %v2550_v16 = vpop.f32.mrf.mxu0 }
 0x5cb   :  { %v2602_v48 = vadd.f32 %v2507_v19, %v566_v42  ;;  %v9286_v19 = vld [vmem:[#allocation96_spill] sm:$0xff] }
 0x5cc   :  { %v2509_v53 = vpop.f32.mrf.mxu1  ;;  %v2552_v60 = vpop.f32.mrf.mxu0  ;;  %v719_v42 = vadd.f32 %v9286_v19, %v9061_v12 }
 0x5cd   :  { %v2603_v8 = vadd.f32 %v2509_v53, %v568_v52  ;;  %v4525_v51 = vmul.f32 -1.442695, %v2602_v48  ;;  %v9287_v53 = vld [vmem:[#allocation97_spill] sm:$0xff]  ;;  %v9288_v48 = vld [vmem:[#allocation99_spill] sm:$0xff] }
 0x5ce   :  { %v2511_v28 = vpop.f32.mrf.mxu1  ;;  %v2554_v46 = vpop.f32.mrf.mxu0  ;;  %v721_v52 = vadd.f32 %v9287_v53, %v9062_v41  ;;  %v2630_v47 = vadd.f32 %v2550_v16, %v719_v42 }
 0x5cf   :  { %v2604_v11 = vadd.f32 %v2511_v28, %v570_v14  ;;  %v4526_v17 = vmul.f32 -1.442695, %v2603_v8  ;;  %4989 = vpow2.f32 %v4525_v51  ;;  %v723_v28 = vadd.f32 %v9288_v48, %v9061_v12 }
 0x5d0   :  { %v2513_v21 = vpop.f32.mrf.mxu1  ;;  %v2631_v14 = vadd.f32 %v2552_v60, %v721_v52  ;;  %v2556_v8 = vpop.f32.mrf.mxu0  ;;  %v4529_v51 = vmul.f32 -1.442695, %v2630_v47 }
 0x5d1   :  { %v2605_v13 = vadd.f32 %v2513_v21, %v572_v59  ;;  %v4527_v56 = vmul.f32 -1.442695, %v2604_v11  ;;  %4991 = vpow2.f32 %v4526_v17  ;;  %v9289_v21 = vld [vmem:[#allocation101_spill] sm:$0xff]  ;;  %v2632_v59 = vadd.f32 %v2554_v46, %v723_v28 }
 0x5d2   :  { %v725_v27 = vadd.f32 %v9289_v21, %v9062_v41  ;;  %v4530_v17 = vmul.f32 -1.442695, %v2631_v14 }
 0x5d3   :  { %v4528_v55 = vmul.f32 -1.442695, %v2605_v13  ;;  %4993 = vpow2.f32 %v4527_v56  ;;  %v4531_v56 = vmul.f32 -1.442695, %v2632_v59 }
 0x5d4   :  { %v2633_v11 = vadd.f32 %v2556_v8, %v725_v27 }
 0x5d5   :  { %4995 = vpow2.f32 %v4528_v55 }
 0x5d6   :  { %4997 = vpow2.f32 %v4529_v51  ;;  %v4532_v44 = vmul.f32 -1.442695, %v2633_v11 }
 0x5d7   :  { %4999 = vpow2.f32 %v4530_v17 }
 0x5d8   :  { %5001 = vpow2.f32 %v4531_v56 }
 0x5d9   :  { %5003 = vpow2.f32 %v4532_v44  ;;  %v9290_v44 = vld [vmem:[#allocation106_spill] sm:$0xff] }
 0x5da   :  { %v872_v17 = vadd.f32 %v9290_v44, %v6117_v40 }
 0x5dc   :  { %v4990_v13 = vpop.eup %4989 }
 0x5dd   :  { %v2618_v53 = vadd.f32 1.0, %v4990_v13 }
 0x5de   :  { %v4992_v19 = vpop.eup %4991 }
 0x5df   :  { %v2619_v55 = vadd.f32 1.0, %v4992_v19  ;;  %5005 = vrcp.f32 %v2618_v53  ;;  %v9291_v53 = vld [vmem:[#allocation108_spill] sm:$0xff] }
 0x5e0   :  { %v4994_v16 = vpop.eup %4993 }
 0x5e1   :  { %v2620_v60 = vadd.f32 1.0, %v4994_v16  ;;  %5007 = vrcp.f32 %v2619_v55  ;;  %v874_v16 = vadd.f32 %v9291_v53, %v6120_v50 }
 0x5e2   :  { %v4996_v42 = vpop.eup %4995 }
 0x5e3   :  { %v2621_v52 = vadd.f32 1.0, %v4996_v42  ;;  %5009 = vrcp.f32 %v2620_v60  ;;  %v4998_v46 = vpop.eup %4997 }
 0x5e4   :  { %v5000_v47 = vpop.eup %4999  ;;  %v2646_v28 = vadd.f32 1.0, %v4998_v46 }
 0x5e5   :  { %5011 = vrcp.f32 %v2621_v52  ;;  %v5002_v48 = vpop.eup %5001  ;;  %v2647_v21 = vadd.f32 1.0, %v5000_v47 }
 0x5e6   :  { %v5004_v8 = vpop.eup %5003  ;;  %v2648_v51 = vadd.f32 1.0, %v5002_v48  ;;  %5013 = vrcp.f32 %v2646_v28  ;;  %v9292_v48 = vld [vmem:[#allocation110_spill] sm:$0xff] }
 0x5e7   :  { %v2649_v55 = vadd.f32 1.0, %v5004_v8  ;;  %5015 = vrcp.f32 %v2647_v21  ;;  %v9293_v8 = vld [vmem:[#allocation112_spill] sm:$0xff] }
 0x5e8   :  { %5017 = vrcp.f32 %v2648_v51  ;;  %v878_v21 = vadd.f32 %v9293_v8, %v6120_v50 }
 0x5ec   :  { %v5006_v59 = vpop.eup %5005 }
 0x5ee   :  { %v5008_v19 = vpop.eup %5007 }
 0x5f0   :  { %v5010_v47 = vpop.eup %5009 }
 0x5f2   :  { %v5012_v44 = vpop.eup %5011 }
 0x60a   :  { %v2593_v14 = vpop.f32.mrf.mxu1 }
 0x60b   :  { %v2658_v27 = vadd.f32 %v2593_v14, %v6128_v58  ;;  %v876_v14 = vadd.f32 %v9292_v48, %v6117_v40 }
 0x60c   :  { %v2595_v11 = vpop.f32.mrf.mxu1 }
 0x60d   :  { %v2662_v13 = vmul.f32 %v5006_v59, %v2658_v27  ;;  %v2659_v56 = vadd.f32 %v2595_v11, %v6124_v39 }
 0x60e   :  { %v2597_v42 = vpop.f32.mrf.mxu1 }
 0x60f   :  { %v2666_v60 = vadd.f32 %v2662_v13, %v872_v17  ;;  %v2663_v52 = vmul.f32 %v5008_v19, %v2659_v56  ;;  %v2660_v46 = vadd.f32 %v2597_v42, %v6128_v58  ;;  %v5014_v19 = vpop.eup %5013 }
 0x610   :  { %v2599_v28 = vpop.f32.mrf.mxu1  ;;  %v5016_v53 = vpop.eup %5015  ;;  %v2674_v42 = vsub.f32 1.0, %v5014_v19 }
 0x611   :  { %5019 = vtanh.f32 %v2666_v60  ;;  %v2667_v27 = vadd.f32 %v2663_v52, %v874_v16  ;;  %v2664_v59 = vmul.f32 %v5010_v47, %v2660_v46  ;;  %v2661_v11 = vadd.f32 %v2599_v28, %v6124_v39  ;;  %v5018_v51 = vpop.eup %5017 }
 0x612   :  { %5021 = vrcp.f32 %v2649_v55  ;;  %v2675_v52 = vsub.f32 1.0, %v5016_v53  ;;  %v2682_v47 = vmul.f32 %v5014_v19, %v7001_v33  ;;  %v2683_v28 = vmul.f32 %v5016_v53, %v7003_v15  ;;  %v7170_v53 = vld [vmem:[#allocation8 + $0x150] ss:$24 sps:$4 sm:$0xff]  }
 0x613   :  { %5023 = vtanh.f32 %v2667_v27  ;;  %v2668_v17 = vadd.f32 %v2664_v59, %v876_v14  ;;  %v2665_v13 = vmul.f32 %v5012_v44, %v2661_v11  ;;  %v2676_v27 = vsub.f32 1.0, %v5018_v51 }
 0x615   :  { %5025 = vtanh.f32 %v2668_v17  ;;  %v2669_v56 = vadd.f32 %v2665_v13, %v878_v21  ;;  %v2684_v21 = vmul.f32 %v5018_v51, %v7007_v36  ;;  %v7164_v36 = vld [vmem:[#allocation8 + $0x160] ss:$24 sps:$4 sm:$0xff]   ;;  %v7173_v51 = vld [vmem:[#allocation8 + $0x124] ss:$24 sps:$4 sm:$0xff]  }
 0x617   :  { %5027 = vtanh.f32 %v2669_v56 }
 0x61e   :  { %v5020_v60 = vpop.eup %5019 }
 0x61f   :  { %v5022_v16 = vpop.eup %5021  ;;  %v2678_v46 = vmul.f32 %v5020_v60, %v2674_v42  ;;  %v7176_v60 = vld [vmem:[#allocation8 + $0x130] ss:$24 sps:$4 sm:$0xff]  }
 0x620   :  { %v5024_v55 = vpop.eup %5023  ;;  %v2677_v11 = vsub.f32 1.0, %v5022_v16  ;;  %v2685_v56 = vmul.f32 %v5022_v16, %v7009_v18  ;;  %v7167_v18 = vld [vmem:[#allocation8 + $0x134] ss:$24 sps:$4 sm:$0xff]   ;;  %v7179_v16 = vld [vmem:[#allocation8 + $0x104] ss:$24 sps:$4 sm:$0xff]  }
 0x621   :  { %v2679_v48 = vmul.f32 %v5024_v55, %v2675_v52  ;;  %v7146_v14 = vadd.f32 %v2682_v47, %v2678_v46  ;;  %v7182_v52 = vld [vmem:[#allocation8 + $0x120] ss:$24 sps:$4 sm:$0xff]   ;;  %v7185_v46 = vld [vmem:[#allocation8 + $0xf4] ss:$24 sps:$4 sm:$0xff]  }
 0x622   :  { %v5026_v59 = vpop.eup %5025  ;;  %v7188_v47 = vld [vmem:[#allocation8 + $0x100] ss:$24 sps:$4 sm:$0xff]   ;;  %v7191_v55 = vld [vmem:[#allocation8 + $0xd4] ss:$24 sps:$4 sm:$0xff]  }
 0x623   :  { %v7148_v44 = vadd.f32 %v2683_v28, %v2679_v48  ;;  %v2680_v8 = vmul.f32 %v5026_v59, %v2676_v27  ;;  %v7194_v48 = vld [vmem:[#allocation8 + $0xf0] ss:$24 sps:$4 sm:$0xff]   ;;  %v7197_v28 = vld [vmem:[#allocation8 + $0xc4] ss:$24 sps:$4 sm:$0xff]  }
 0x624   :  { %v5028_v17 = vpop.eup %5027  ;;  %v7200_v27 = vld [vmem:[#allocation8 + $0xd0] ss:$24 sps:$4 sm:$0xff]   ;;  %v7203_v59 = vld [vmem:[#allocation8 + $0xa4] ss:$24 sps:$4 sm:$0xff]  }
 0x625   :  { %v2681_v13 = vmul.f32 %v5028_v17, %v2677_v11  ;;  %v7152_v42 = vadd.f32 %v2684_v21, %v2680_v8  ;;  %v7206_v11 = vld [vmem:[#allocation8 + $0xc0] ss:$24 sps:$4 sm:$0xff]   ;;  %v7209_v8 = vld [vmem:[#allocation8 + $0x94] ss:$24 sps:$4 sm:$0xff]  }
 0x626   :  { %9294 = vst [vmem:[#allocation82_spill] sm:$0xff] %v7209_v8  ;;  %v7212_v21 = vld [vmem:[#allocation8 + $0xa0] ss:$24 sps:$4 sm:$0xff]   ;;  %v7215_v17 = vld [vmem:[#allocation8 + $0x74] ss:$24 sps:$4 sm:$0xff]  }
 0x627   :  { %v7154_v33 = vadd.f32 %v2685_v56, %v2681_v13  ;;  %v7160_v19 = vpack.c.bf16 %v7152_v42, %v7146_v14  ;;  %9295 = vst [vmem:[#allocation85_spill] sm:$0xff] %v7212_v21  ;;  %9296 = vst [vmem:[#allocation88_spill] sm:$0xff] %v7215_v17  ;;  %v7218_v13 = vld [vmem:[#allocation8 + $0x90] ss:$24 sps:$4 sm:$0xff]   ;;  %v7221_v56 = vld [vmem:[#allocation8 + $0x64] ss:$24 sps:$4 sm:$0xff]  }
 0x628   :  { %9297 = vst [vmem:[#allocation92_spill] sm:$0xff] %v7218_v13  ;;  %9298 = vst [vmem:[#allocation94_spill] sm:$0xff] %v7221_v56 }
 0x629   :  { %v2704_v15 = vpack.c.bf16 %v7154_v33, %v7148_v44 }
 0x62b   :  { %2737 = vmatprep.mubr.bf16.mxu0 %v2704_v15  ;;  %2780 = vmatprep.mubr.bf16.mxu1 %v2704_v15 }
 0x62c   :  { %2738 = vmatmul.mubr.bf16.vlgmr.msra.gmra.mxu0 %v7160_v19  ;;  %2781 = vmatmul.mubr.bf16.vlgmr.msra.gmra.mxu1 %v7160_v19 }
 0x62d   :  { %2792 = vmatpush1.bf16.msra.mxu0 %v7164_v36  ;;  %2823 = vmatprep.mubr.bf16.mxu0 %v2704_v15  ;;  %v7224_v15 = vld [vmem:[#allocation8 + $0x70] ss:$24 sps:$4 sm:$0xff]  }
 0x62e   :  { %2793 = vmatprep.subr.bf16.mxu0 %v7167_v18  ;;  %2938 = vmatpush1.bf16.msra.mxu1 %v7170_v53  ;;  %9299 = vst [vmem:[#allocation44_spill] sm:$0xff] %v7224_v15 }
 0x62f   :  { %2939 = vmatprep.subr.bf16.mxu1 %v7173_v51 }
 0x631   :  { %2794 = vmatpush1.bf16.msra.mxu0 %v7176_v60 }
 0x632   :  { %2795 = vmatprep.subr.bf16.mxu0 %v7179_v16  ;;  %2940 = vmatpush1.bf16.msra.mxu1 %v7182_v52 }
 0x633   :  { %2941 = vmatprep.subr.bf16.mxu1 %v7185_v46 }
 0x635   :  { %2796 = vmatpush1.bf16.msra.mxu0 %v7188_v47 }
 0x636   :  { %2797 = vmatprep.subr.bf16.mxu0 %v7191_v55  ;;  %2942 = vmatpush1.bf16.msra.mxu1 %v7194_v48 }
 0x637   :  { %2943 = vmatprep.subr.bf16.mxu1 %v7197_v28 }
 0x639   :  { %2798 = vmatpush1.bf16.msra.mxu0 %v7200_v27 }
 0x63a   :  { %2799 = vmatprep.subr.bf16.mxu0 %v7203_v59  ;;  %2944 = vmatpush1.bf16.msra.mxu1 %v7206_v11 }
 0x63b   :  { %2945 = vmatprep.subr.bf16.mxu1 %v7209_v8  ;;  %v7227_v8 = vld [vmem:[#allocation8 + $0x44] ss:$24 sps:$4 sm:$0xff]  }
 0x63c   :  { %9300 = vst [vmem:[#allocation45_spill] sm:$0xff] %v7227_v8 }
 0x63d   :  { %2800 = vmatpush1.bf16.msra.mxu0 %v7212_v21  ;;  %v7230_v21 = vld [vmem:[#allocation8 + $0x60] ss:$24 sps:$4 sm:$0xff]  }
 0x63e   :  { %2801 = vmatprep.subr.bf16.mxu0 %v7215_v17  ;;  %2946 = vmatpush1.bf16.msra.mxu1 %v7218_v13  ;;  %9301 = vst [vmem:[#allocation20_spill] sm:$0xff] %v7230_v21  ;;  %v7233_v17 = vld [vmem:[#allocation8 + $0x34] ss:$24 sps:$4 sm:$0xff]   ;;  %v7236_v13 = vld [vmem:[#allocation8 + $0x40] ss:$24 sps:$4 sm:$0xff]  }
 0x63f   :  { %2947 = vmatprep.subr.bf16.mxu1 %v7221_v56  ;;  %9302 = vst [vmem:[#allocation21_spill] sm:$0xff] %v7233_v17  ;;  %9303 = vst [vmem:[#allocation22_spill] sm:$0xff] %v7236_v13  ;;  %v7239_v56 = vld [vmem:[#allocation8 + $0x14] ss:$24 sps:$4 sm:$0xff]  }
 0x640   :  { %9304 = vst [vmem:[#allocation23_spill] sm:$0xff] %v7239_v56 }
 0x641   :  { %2802 = vmatpush1.bf16.msra.mxu0 %v7224_v15  ;;  %v7242_v15 = vld [vmem:[#allocation8 + $0x30] ss:$24 sps:$4 sm:$0xff]  }
 0x642   :  { %2803 = vmatprep.subr.bf16.mxu0 %v7227_v8  ;;  %2948 = vmatpush1.bf16.msra.mxu1 %v7230_v21  ;;  %9305 = vst [vmem:[#allocation90_spill] sm:$0xff] %v7242_v15  ;;  %v7245_v8 = vld [vmem:[#allocation8 + $0x4] ss:$24 sps:$4 sm:$0xff]   ;;  %v7248_v21 = vld [vmem:[#allocation8 + $0x10] ss:$24 sps:$4 sm:$0xff]  }
 0x643   :  { %2949 = vmatprep.subr.bf16.mxu1 %v7233_v17  ;;  %9306 = vst [vmem:[#allocation91_spill] sm:$0xff] %v7245_v8  ;;  %9307 = vst [vmem:[#allocation93_spill] sm:$0xff] %v7248_v21  ;;  %v7251_v17 = vld [vmem:[#allocation8 + $0x2e4] ss:$24 sps:$4 sm:$0xff]  }
 0x644   :  { %9308 = vst [vmem:[#allocation95_spill] sm:$0xff] %v7251_v17 }
 0x645   :  { %2804 = vmatpush1.bf16.msra.mxu0 %v7236_v13  ;;  %v7254_v13 = vld [vmem:[#allocation8] ss:$24 sps:$4 sm:$0xff]  }
 0x646   :  { %2805 = vmatprep.subr.bf16.mxu0 %v7239_v56  ;;  %2950 = vmatpush1.bf16.msra.mxu1 %v7242_v15  ;;  %9309 = vst [vmem:[#allocation98_spill] sm:$0xff] %v7254_v13  ;;  %v7257_v56 = vld [vmem:[#allocation8 + $0x2d4] ss:$24 sps:$4 sm:$0xff]   ;;  %v7260_v15 = vld [vmem:[#allocation8 + $0x2e0] ss:$24 sps:$4 sm:$0xff]  }
 0x647   :  { %2951 = vmatprep.subr.bf16.mxu1 %v7245_v8  ;;  %9310 = vst [vmem:[#allocation100_spill] sm:$0xff] %v7257_v56  ;;  %9311 = vst [vmem:[#allocation102_spill] sm:$0xff] %v7260_v15  ;;  %v7263_v8 = vld [vmem:[#allocation8 + $0x2b4] ss:$24 sps:$4 sm:$0xff]  }
 0x648   :  { %9312 = vst [vmem:[#allocation104_spill] sm:$0xff] %v7263_v8 }
 0x649   :  { %2806 = vmatpush1.bf16.msra.mxu0 %v7248_v21  ;;  %v7266_v21 = vld [vmem:[#allocation8 + $0x2d0] ss:$24 sps:$4 sm:$0xff]  }
 0x64a   :  { %2807 = vmatprep.subr.bf16.mxu0 %v7251_v17  ;;  %2952 = vmatpush1.bf16.msra.mxu1 %v7254_v13  ;;  %9313 = vst [vmem:[#allocation164_spill] sm:$0xff] %v7266_v21  ;;  %v7269_v17 = vld [vmem:[#allocation8 + $0x2a4] ss:$24 sps:$4 sm:$0xff]   ;;  %v7272_v13 = vld [vmem:[#allocation8 + $0x2b0] ss:$24 sps:$4 sm:$0xff]  }
 0x64b   :  { %2953 = vmatprep.subr.bf16.mxu1 %v7257_v56  ;;  %9314 = vst [vmem:[#allocation165_spill] sm:$0xff] %v7269_v17  ;;  %9315 = vst [vmem:[#allocation166_spill] sm:$0xff] %v7272_v13  ;;  %v7275_v56 = vld [vmem:[#allocation8 + $0x284] ss:$24 sps:$4 sm:$0xff]  }
 0x64c   :  { %9316 = vst [vmem:[#allocation167_spill] sm:$0xff] %v7275_v56 }
 0x64d   :  { %2808 = vmatpush2.bf16.msra.mxu0 %v7260_v15  ;;  %v7278_v15 = vld [vmem:[#allocation8 + $0x2a0] ss:$24 sps:$4 sm:$0xff]  }
 0x64e   :  { %2809 = vmatprep.subr.bf16.mxu0 %v7263_v8  ;;  %2954 = vmatpush2.bf16.msra.mxu1 %v7266_v21  ;;  %9317 = vst [vmem:[#allocation168_spill] sm:$0xff] %v7278_v15  ;;  %v7281_v8 = vld [vmem:[#allocation8 + $0x274] ss:$24 sps:$4 sm:$0xff]   ;;  %v7284_v21 = vld [vmem:[#allocation8 + $0x280] ss:$24 sps:$4 sm:$0xff]  }
 0x64f   :  { %2955 = vmatprep.subr.bf16.mxu1 %v7269_v17  ;;  %9318 = vst [vmem:[#allocation169_spill] sm:$0xff] %v7281_v8  ;;  %9319 = vst [vmem:[#allocation170_spill] sm:$0xff] %v7284_v21  ;;  %v7287_v17 = vld [vmem:[#allocation8 + $0x254] ss:$24 sps:$4 sm:$0xff]  }
 0x650   :  { %9320 = vst [vmem:[#allocation171_spill] sm:$0xff] %v7287_v17 }
 0x651   :  { %2810 = vmatpush2.bf16.msra.mxu0 %v7272_v13  ;;  %v7290_v13 = vld [vmem:[#allocation8 + $0x270] ss:$24 sps:$4 sm:$0xff]  }
 0x652   :  { %2811 = vmatprep.subr.bf16.mxu0 %v7275_v56  ;;  %2956 = vmatpush2.bf16.msra.mxu1 %v7278_v15  ;;  %9321 = vst [vmem:[#allocation172_spill] sm:$0xff] %v7290_v13  ;;  %v7293_v56 = vld [vmem:[#allocation8 + $0x244] ss:$24 sps:$4 sm:$0xff]   ;;  %v7296_v15 = vld [vmem:[#allocation8 + $0x250] ss:$24 sps:$4 sm:$0xff]  }
 0x653   :  { %2957 = vmatprep.subr.bf16.mxu1 %v7281_v8  ;;  %9322 = vst [vmem:[#allocation173_spill] sm:$0xff] %v7293_v56  ;;  %9323 = vst [vmem:[#allocation174_spill] sm:$0xff] %v7296_v15  ;;  %v7299_v8 = vld [vmem:[#allocation8 + $0x224] ss:$24 sps:$4 sm:$0xff]  }
 0x654   :  { %9324 = vst [vmem:[#allocation175_spill] sm:$0xff] %v7299_v8 }
 0x655   :  { %2812 = vmatpush2.bf16.msra.mxu0 %v7284_v21  ;;  %v7302_v21 = vld [vmem:[#allocation8 + $0x240] ss:$24 sps:$4 sm:$0xff]  }
 0x656   :  { %2813 = vmatprep.subr.bf16.mxu0 %v7287_v17  ;;  %2958 = vmatpush2.bf16.msra.mxu1 %v7290_v13  ;;  %9325 = vst [vmem:[#allocation176_spill] sm:$0xff] %v7302_v21  ;;  %v7305_v17 = vld [vmem:[#allocation8 + $0x214] ss:$24 sps:$4 sm:$0xff]   ;;  %v7308_v13 = vld [vmem:[#allocation8 + $0x220] ss:$24 sps:$4 sm:$0xff]  }
 0x657   :  { %2959 = vmatprep.subr.bf16.mxu1 %v7293_v56  ;;  %9326 = vst [vmem:[#allocation177_spill] sm:$0xff] %v7305_v17  ;;  %9327 = vst [vmem:[#allocation178_spill] sm:$0xff] %v7308_v13  ;;  %v7311_v56 = vld [vmem:[#allocation8 + $0x1f4] ss:$24 sps:$4 sm:$0xff]  }
 0x658   :  { %9328 = vst [vmem:[#allocation179_spill] sm:$0xff] %v7311_v56 }
 0x659   :  { %2814 = vmatpush2.bf16.msra.mxu0 %v7296_v15  ;;  %v7314_v15 = vld [vmem:[#allocation8 + $0x210] ss:$24 sps:$4 sm:$0xff]  }
 0x65a   :  { %2815 = vmatprep.subr.bf16.mxu0 %v7299_v8  ;;  %2960 = vmatpush2.bf16.msra.mxu1 %v7302_v21  ;;  %9329 = vst [vmem:[#allocation180_spill] sm:$0xff] %v7314_v15  ;;  %v7317_v8 = vld [vmem:[#allocation8 + $0x1e4] ss:$24 sps:$4 sm:$0xff]   ;;  %v7320_v21 = vld [vmem:[#allocation8 + $0x1f0] ss:$24 sps:$4 sm:$0xff]  }
 0x65b   :  { %2961 = vmatprep.subr.bf16.mxu1 %v7305_v17  ;;  %9330 = vst [vmem:[#allocation181_spill] sm:$0xff] %v7317_v8  ;;  %9331 = vst [vmem:[#allocation182_spill] sm:$0xff] %v7320_v21  ;;  %v7323_v17 = vld [vmem:[#allocation8 + $0x1c4] ss:$24 sps:$4 sm:$0xff]  }
 0x65c   :  { %9332 = vst [vmem:[#allocation183_spill] sm:$0xff] %v7323_v17 }
 0x65d   :  { %2816 = vmatpush2.bf16.msra.mxu0 %v7308_v13  ;;  %v7326_v13 = vld [vmem:[#allocation8 + $0x1e0] ss:$24 sps:$4 sm:$0xff]  }
 0x65e   :  { %2817 = vmatprep.subr.bf16.mxu0 %v7311_v56  ;;  %2962 = vmatpush2.bf16.msra.mxu1 %v7314_v15  ;;  %9333 = vst [vmem:[#allocation184_spill] sm:$0xff] %v7326_v13  ;;  %v7329_v56 = vld [vmem:[#allocation8 + $0x1b4] ss:$24 sps:$4 sm:$0xff]   ;;  %v7332_v15 = vld [vmem:[#allocation8 + $0x1c0] ss:$24 sps:$4 sm:$0xff]  }
 0x65f   :  { %2963 = vmatprep.subr.bf16.mxu1 %v7317_v8  ;;  %9334 = vst [vmem:[#allocation185_spill] sm:$0xff] %v7329_v56  ;;  %9335 = vst [vmem:[#allocation186_spill] sm:$0xff] %v7332_v15  ;;  %v7335_v8 = vld [vmem:[#allocation8 + $0x194] ss:$24 sps:$4 sm:$0xff]  }
 0x660   :  { %9336 = vst [vmem:[#allocation187_spill] sm:$0xff] %v7335_v8 }
 0x661   :  { %2818 = vmatpush2.bf16.msra.mxu0 %v7320_v21  ;;  %v7338_v21 = vld [vmem:[#allocation8 + $0x1b0] ss:$24 sps:$4 sm:$0xff]  }
 0x662   :  { %2819 = vmatprep.subr.bf16.mxu0 %v7323_v17  ;;  %2964 = vmatpush2.bf16.msra.mxu1 %v7326_v13  ;;  %9337 = vst [vmem:[#allocation188_spill] sm:$0xff] %v7338_v21  ;;  %v7341_v17 = vld [vmem:[#allocation8 + $0x184] ss:$24 sps:$4 sm:$0xff]   ;;  %v7344_v13 = vld [vmem:[#allocation8 + $0x190] ss:$24 sps:$4 sm:$0xff]  }
 0x663   :  { %2965 = vmatprep.subr.bf16.mxu1 %v7329_v56  ;;  %9338 = vst [vmem:[#allocation189_spill] sm:$0xff] %v7341_v17  ;;  %9339 = vst [vmem:[#allocation190_spill] sm:$0xff] %v7344_v13  ;;  %v7347_v56 = vld [vmem:[#allocation8 + $0x15c] ss:$24 sps:$4 sm:$0xff]  }
 0x664   :  { %9340 = vst [vmem:[#allocation191_spill] sm:$0xff] %v7347_v56 }
 0x665   :  { %2820 = vmatpush2.bf16.msra.mxu0 %v7332_v15  ;;  %v7350_v15 = vld [vmem:[#allocation8 + $0x180] ss:$24 sps:$4 sm:$0xff]  }
 0x666   :  { %2821 = vmatprep.subr.bf16.mxu0 %v7335_v8  ;;  %2966 = vmatpush2.bf16.msra.mxu1 %v7338_v21  ;;  %9341 = vst [vmem:[#allocation192_spill] sm:$0xff] %v7350_v15  ;;  %v7353_v8 = vld [vmem:[#allocation8 + $0x164] ss:$24 sps:$4 sm:$0xff]  }
 0x667   :  { %2967 = vmatprep.subr.bf16.mxu1 %v7341_v17  ;;  %9342 = vst [vmem:[#allocation193_spill] sm:$0xff] %v7353_v8 }
 0x669   :  { %2822 = vmatpush2.bf16.msra.mxu0 %v7344_v13 }
 0x66a   :  { %2980 = vmatprep.subr.bf16.mxu0 %v7347_v56  ;;  %2968 = vmatpush2.bf16.msra.mxu1 %v7350_v15 }
 0x66b   :  { %3023 = vmatprep.subr.bf16.mxu1 %v7353_v8 }
 0x66c   :  { %2824 = vmatmul.mubr.bf16.vlgmr.msra.gmra.mxu0 %v7160_v19 }
 0x66d   :  { %2981 = vmatpush1.bf16.msra.mxu0 %v9249_v43  ;;  %v7388_v43 = vld [vmem:[#allocation8 + $0x154] ss:$24 sps:$4 sm:$0xff]  }
 0x66e   :  { %2982 = vmatprep.subr.bf16.mxu0 %v9250_v4  ;;  %9343 = vst [vmem:[#allocation194_spill] sm:$0xff] %v7388_v43 }
 0x671   :  { %2983 = vmatpush1.bf16.msra.mxu0 %v9251_v10 }
 0x672   :  { %2984 = vmatprep.subr.bf16.mxu0 %v9252_v63  ;;  %v9344_v63 = vld [vmem:[#allocation28_spill] sm:$0xff] }
 0x675   :  { %2985 = vmatpush1.bf16.msra.mxu0 %v9253_v2  ;;  %v576_v2 = vadd.f32 %v9344_v63, %v6050_v54  ;;  %v9352_v63 = vld [vmem:[#allocation109_spill] sm:$0xff] }
 0x676   :  { %2986 = vmatprep.subr.bf16.mxu0 %v9254_v62 }
 0x679   :  { %2987 = vmatpush1.bf16.msra.mxu0 %v9255_v1  ;;  %v9345_v1 = vld [vmem:[#allocation32_spill] sm:$0xff] }
 0x67a   :  { %2988 = vmatprep.subr.bf16.mxu0 %v9256_v0  ;;  %v9346_v0 = vld [vmem:[#allocation29_spill] sm:$0xff] }
 0x67d   :  { %2989 = vmatpush1.bf16.msra.mxu0 %v9257_v9  ;;  %v578_v9 = vadd.f32 %v9346_v0, %v9345_v1 }
 0x67e   :  { %2990 = vmatprep.subr.bf16.mxu0 %v9258_v7 }
 0x681   :  { %2991 = vmatpush1.bf16.msra.mxu0 %v9259_v5  ;;  %v9347_v5 = vld [vmem:[#allocation30_spill] sm:$0xff] }
 0x682   :  { %2992 = vmatprep.subr.bf16.mxu0 %v9260_v6  ;;  %v580_v6 = vadd.f32 %v9347_v5, %v6050_v54 }
 0x685   :  { %2993 = vmatpush1.bf16.msra.mxu0 %v9261_v38 }
 0x686   :  { %2994 = vmatprep.subr.bf16.mxu0 %v9262_v45 }
 0x689   :  { %2995 = vmatpush1.bf16.msra.mxu0 %v9263_v61  ;;  %v9348_v61 = vld [vmem:[#allocation31_spill] sm:$0xff] }
 0x68a   :  { %2996 = vmatprep.subr.bf16.mxu0 %v9264_v57  ;;  %v582_v57 = vadd.f32 %v9348_v61, %v9345_v1 }
 0x68d   :  { %2997 = vmatpush2.bf16.msra.mxu0 %v9265_v31 }
 0x68e   :  { %2998 = vmatprep.subr.bf16.mxu0 %v9266_v32 }
 0x691   :  { %2999 = vmatpush2.bf16.msra.mxu0 %v9267_v26 }
 0x692   :  { %3000 = vmatprep.subr.bf16.mxu0 %v9268_v3 }
 0x695   :  { %3001 = vmatpush2.bf16.msra.mxu0 %v9269_v37 }
 0x696   :  { %3002 = vmatprep.subr.bf16.mxu0 %v9270_v49 }
 0x699   :  { %3003 = vmatpush2.bf16.msra.mxu0 %v9271_v23 }
 0x69a   :  { %3004 = vmatprep.subr.bf16.mxu0 %v9272_v22 }
 0x69d   :  { %3005 = vmatpush2.bf16.msra.mxu0 %v9273_v24  ;;  %v9349_v24 = vld [vmem:[#allocation103_spill] sm:$0xff] }
 0x69e   :  { %3006 = vmatprep.subr.bf16.mxu0 %v9274_v35  ;;  %v729_v35 = vadd.f32 %v9349_v24, %v9061_v12 }
 0x6a1   :  { %3007 = vmatpush2.bf16.msra.mxu0 %v9275_v30 }
 0x6a2   :  { %3008 = vmatprep.subr.bf16.mxu0 %v9276_v25  ;;  %v9350_v25 = vld [vmem:[#allocation105_spill] sm:$0xff] }
 0x6a5   :  { %3009 = vmatpush2.bf16.msra.mxu0 %v9277_v20  ;;  %v731_v20 = vadd.f32 %v9350_v25, %v9062_v41 }
 0x6a6   :  { %3010 = vmatprep.subr.bf16.mxu0 %v9278_v29 }
 0x6a9   :  { %3011 = vmatpush2.bf16.msra.mxu0 %v9279_v34  ;;  %v9351_v34 = vld [vmem:[#allocation107_spill] sm:$0xff] }
 0x6aa   :  { %3169 = vmatprep.subr.bf16.mxu0 %v7388_v43  ;;  %v733_v19 = vadd.f32 %v9351_v34, %v9061_v12 }
 0x6ec   :  { %v2739_v4 = vpop.f32.mrf.mxu0  ;;  %v2782_v32 = vpop.f32.mrf.mxu1 }
 0x6ed   :  { %v2834_v7 = vadd.f32 %v2739_v4, %v576_v2  ;;  %v2862_v29 = vadd.f32 %v2782_v32, %v729_v35  ;;  %v735_v2 = vadd.f32 %v9352_v63, %v9062_v41 }
 0x6ee   :  { %v2741_v10 = vpop.f32.mrf.mxu0  ;;  %v2784_v49 = vpop.f32.mrf.mxu1 }
 0x6ef   :  { %v2835_v38 = vadd.f32 %v2741_v10, %v578_v9  ;;  %v4533_v31 = vmul.f32 -1.442695, %v2834_v7  ;;  %v2863_v4 = vadd.f32 %v2784_v49, %v731_v20  ;;  %v4537_v0 = vmul.f32 -1.442695, %v2862_v29 }
 0x6f0   :  { %v2743_v62 = vpop.f32.mrf.mxu0  ;;  %v2786_v30 = vpop.f32.mrf.mxu1 }
 0x6f1   :  { %v2836_v26 = vadd.f32 %v2743_v62, %v580_v6  ;;  %v4534_v3 = vmul.f32 -1.442695, %v2835_v38  ;;  %5029 = vpow2.f32 %v4533_v31  ;;  %v2864_v62 = vadd.f32 %v2786_v30, %v733_v19  ;;  %v9353_v19 = vld [vmem:[#allocation114_spill] sm:$0xff] }
 0x6f2   :  { %v2745_v45 = vpop.f32.mrf.mxu0  ;;  %v2788_v10 = vpop.f32.mrf.mxu1  ;;  %v4538_v7 = vmul.f32 -1.442695, %v2863_v4  ;;  %v882_v4 = vadd.f32 %v9353_v19, %v6117_v40 }
 0x6f3   :  { %v2837_v37 = vadd.f32 %v2745_v45, %v582_v57  ;;  %v4535_v23 = vmul.f32 -1.442695, %v2836_v26  ;;  %5031 = vpow2.f32 %v4534_v3  ;;  %v2865_v9 = vadd.f32 %v2788_v10, %v735_v2 }
 0x6f4   :  { %v4539_v6 = vmul.f32 -1.442695, %v2864_v62  ;;  %v9354_v62 = vld [vmem:[#allocation116_spill] sm:$0xff] }
 0x6f5   :  { %v4536_v22 = vmul.f32 -1.442695, %v2837_v37  ;;  %5033 = vpow2.f32 %v4535_v23  ;;  %v4540_v45 = vmul.f32 -1.442695, %v2865_v9 }
 0x6f7   :  { %5035 = vpow2.f32 %v4536_v22 }
 0x6f8   :  { %5037 = vpow2.f32 %v4537_v0  ;;  %v884_v0 = vadd.f32 %v9354_v62, %v6120_v50 }
 0x6f9   :  { %5039 = vpow2.f32 %v4538_v7 }
 0x6fa   :  { %5041 = vpow2.f32 %v4539_v6 }
 0x6fb   :  { %5043 = vpow2.f32 %v4540_v45 }
 0x6fe   :  { %v5030_v5 = vpop.eup %5029 }
 0x6ff   :  { %v2850_v61 = vadd.f32 1.0, %v5030_v5 }
 0x700   :  { %v5032_v38 = vpop.eup %5031 }
 0x701   :  { %v2851_v31 = vadd.f32 1.0, %v5032_v38  ;;  %5045 = vrcp.f32 %v2850_v61  ;;  %v9355_v61 = vld [vmem:[#allocation118_spill] sm:$0xff] }
 0x702   :  { %v5034_v57 = vpop.eup %5033 }
 0x703   :  { %v2852_v26 = vadd.f32 1.0, %v5034_v57  ;;  %5047 = vrcp.f32 %v2851_v31  ;;  %v886_v57 = vadd.f32 %v9355_v61, %v6117_v40 }
 0x704   :  { %v5036_v32 = vpop.eup %5035 }
 0x705   :  { %v2853_v3 = vadd.f32 1.0, %v5036_v32  ;;  %5049 = vrcp.f32 %v2852_v26  ;;  %v5038_v37 = vpop.eup %5037 }
 0x706   :  { %v5040_v49 = vpop.eup %5039  ;;  %v2878_v22 = vadd.f32 1.0, %v5038_v37 }
 0x707   :  { %5051 = vrcp.f32 %v2853_v3  ;;  %v5042_v23 = vpop.eup %5041  ;;  %v2879_v30 = vadd.f32 1.0, %v5040_v49  ;;  %v9356_v49 = vld [vmem:[#allocation120_spill] sm:$0xff] }
 0x708   :  { %v5044_v35 = vpop.eup %5043  ;;  %v2880_v29 = vadd.f32 1.0, %v5042_v23  ;;  %5053 = vrcp.f32 %v2878_v22  ;;  %v888_v23 = vadd.f32 %v9356_v49, %v6120_v50  ;;  %v9360_v49 = vld [vmem:[#allocation92_spill] sm:$0xff] }
 0x709   :  { %v2881_v9 = vadd.f32 1.0, %v5044_v35  ;;  %5055 = vrcp.f32 %v2879_v30 }
 0x70a   :  { %5057 = vrcp.f32 %v2880_v29 }
 0x70e   :  { %v5046_v20 = vpop.eup %5045 }
 0x710   :  { %v5048_v2 = vpop.eup %5047 }
 0x712   :  { %v5050_v45 = vpop.eup %5049 }
 0x714   :  { %v5052_v37 = vpop.eup %5051 }
 0x715   :  { %v5054_v30 = vpop.eup %5053 }
 0x716   :  { %v2906_v29 = vsub.f32 1.0, %v5054_v30 }
 0x72c   :  { %v2825_v24 = vpop.f32.mrf.mxu0 }
 0x72d   :  { %v2890_v25 = vadd.f32 %v2825_v24, %v6128_v58 }
 0x72e   :  { %v2827_v34 = vpop.f32.mrf.mxu0 }
 0x72f   :  { %v2894_v10 = vmul.f32 %v5046_v20, %v2890_v25  ;;  %v2891_v63 = vadd.f32 %v2827_v34, %v6124_v39  ;;  %v5056_v25 = vpop.eup %5055 }
 0x730   :  { %v2829_v7 = vpop.f32.mrf.mxu0  ;;  %v5058_v20 = vpop.eup %5057 }
 0x731   :  { %v2898_v5 = vadd.f32 %v2894_v10, %v882_v4  ;;  %v2895_v6 = vmul.f32 %v5048_v2, %v2891_v63  ;;  %v2892_v38 = vadd.f32 %v2829_v7, %v6128_v58  ;;  %v2907_v4 = vsub.f32 1.0, %v5056_v25 }
 0x732   :  { %v2831_v31 = vpop.f32.mrf.mxu0  ;;  %v2914_v63 = vmul.f32 %v5054_v30, %v7146_v14  ;;  %v2916_v61 = vmul.f32 %v5058_v20, %v7152_v42  ;;  %v9357_v42 = vld [vmem:[#allocation82_spill] sm:$0xff]  ;;  %v9365_v30 = vld [vmem:[#allocation21_spill] sm:$0xff] }
 0x733   :  { %5059 = vtanh.f32 %v2898_v5  ;;  %v2899_v32 = vadd.f32 %v2895_v6, %v884_v0  ;;  %v2896_v26 = vmul.f32 %v5050_v45, %v2892_v38  ;;  %v2893_v3 = vadd.f32 %v2831_v31, %v6124_v39 }
 0x734   :  { %5061 = vrcp.f32 %v2881_v9  ;;  %v2915_v0 = vmul.f32 %v5056_v25, %v7148_v44  ;;  %v2908_v9 = vsub.f32 1.0, %v5058_v20  ;;  %v9366_v25 = vld [vmem:[#allocation22_spill] sm:$0xff]  ;;  %v9367_v20 = vld [vmem:[#allocation23_spill] sm:$0xff] }
 0x735   :  { %5063 = vtanh.f32 %v2899_v32  ;;  %v2900_v22 = vadd.f32 %v2896_v26, %v886_v57  ;;  %v2897_v24 = vmul.f32 %v5052_v37, %v2893_v3  ;;  %v9359_v37 = vld [vmem:[#allocation88_spill] sm:$0xff] }
 0x737   :  { %5065 = vtanh.f32 %v2900_v22  ;;  %v2901_v35 = vadd.f32 %v2897_v24, %v888_v23  ;;  %v9361_v23 = vld [vmem:[#allocation94_spill] sm:$0xff]  ;;  %v9362_v22 = vld [vmem:[#allocation44_spill] sm:$0xff]  ;;  %v9363_v24 = vld [vmem:[#allocation45_spill] sm:$0xff] }
 0x739   :  { %5067 = vtanh.f32 %v2901_v35  ;;  %v9364_v35 = vld [vmem:[#allocation20_spill] sm:$0xff] }
 0x740   :  { %v5060_v34 = vpop.eup %5059 }
 0x741   :  { %v5062_v19 = vpop.eup %5061  ;;  %v2910_v10 = vmul.f32 %v5060_v34, %v2906_v29  ;;  %v9368_v29 = vld [vmem:[#allocation90_spill] sm:$0xff]  ;;  %v9369_v34 = vld [vmem:[#allocation91_spill] sm:$0xff] }
 0x742   :  { %v5064_v2 = vpop.eup %5063  ;;  %v2909_v6 = vsub.f32 1.0, %v5062_v19  ;;  %v2917_v32 = vmul.f32 %v5062_v19, %v7154_v33  ;;  %v9358_v33 = vld [vmem:[#allocation85_spill] sm:$0xff] }
 0x743   :  { %v2911_v62 = vmul.f32 %v5064_v2, %v2907_v4  ;;  %v7421_v7 = vadd.f32 %v2914_v63, %v2910_v10  ;;  %v9370_v19 = vld [vmem:[#allocation93_spill] sm:$0xff]  ;;  %v9371_v4 = vld [vmem:[#allocation95_spill] sm:$0xff]  ;;  %v9372_v10 = vld [vmem:[#allocation98_spill] sm:$0xff] }
 0x744   :  { %v5066_v5 = vpop.eup %5065  ;;  %v9373_v63 = vld [vmem:[#allocation100_spill] sm:$0xff]  ;;  %v9374_v2 = vld [vmem:[#allocation102_spill] sm:$0xff] }
 0x745   :  { %v7423_v38 = vadd.f32 %v2915_v0, %v2911_v62  ;;  %v2912_v45 = vmul.f32 %v5066_v5, %v2908_v9  ;;  %v9375_v62 = vld [vmem:[#allocation104_spill] sm:$0xff]  ;;  %v9377_v9 = vld [vmem:[#allocation165_spill] sm:$0xff]  ;;  %v9378_v5 = vld [vmem:[#allocation166_spill] sm:$0xff] }
 0x746   :  { %v5068_v57 = vpop.eup %5067  ;;  %v9376_v0 = vld [vmem:[#allocation164_spill] sm:$0xff] }
 0x747   :  { %v2913_v31 = vmul.f32 %v5068_v57, %v2909_v6  ;;  %v7427_v26 = vadd.f32 %v2916_v61, %v2912_v45  ;;  %v9379_v6 = vld [vmem:[#allocation167_spill] sm:$0xff]  ;;  %v9380_v45 = vld [vmem:[#allocation168_spill] sm:$0xff]  ;;  %v9381_v61 = vld [vmem:[#allocation169_spill] sm:$0xff] }
 0x748   :  { %v9382_v57 = vld [vmem:[#allocation170_spill] sm:$0xff] }
 0x749   :  { %v7429_v14 = vadd.f32 %v2917_v32, %v2913_v31  ;;  %v7435_v3 = vpack.c.bf16 %v7427_v26, %v7421_v7  ;;  %v9383_v31 = vld [vmem:[#allocation171_spill] sm:$0xff]  ;;  %v9384_v32 = vld [vmem:[#allocation172_spill] sm:$0xff] }
 0x74b   :  { %v2936_v44 = vpack.c.bf16 %v7429_v14, %v7423_v38 }
 0x74d   :  { %2969 = vmatprep.mubr.bf16.mxu1 %v2936_v44  ;;  %3012 = vmatprep.mubr.bf16.mxu0 %v2936_v44 }
 0x74e   :  { %2970 = vmatmul.mubr.bf16.vlgmr.msra.gmra.mxu1 %v7435_v3  ;;  %3013 = vmatmul.mubr.bf16.vlgmr.msra.gmra.mxu0 %v7435_v3 }
 0x74f   :  { %3024 = vmatpush1.bf16.msra.mxu1 %v7164_v36  ;;  %3055 = vmatprep.mubr.bf16.mxu1 %v2936_v44  ;;  %v9385_v44 = vld [vmem:[#allocation173_spill] sm:$0xff] }
 0x750   :  { %3025 = vmatprep.subr.bf16.mxu1 %v7167_v18  ;;  %3170 = vmatpush1.bf16.msra.mxu0 %v7170_v53 }
 0x751   :  { %3171 = vmatprep.subr.bf16.mxu0 %v7173_v51 }
 0x753   :  { %3026 = vmatpush1.bf16.msra.mxu1 %v7176_v60 }
 0x754   :  { %3027 = vmatprep.subr.bf16.mxu1 %v7179_v16  ;;  %3172 = vmatpush1.bf16.msra.mxu0 %v7182_v52 }
 0x755   :  { %3173 = vmatprep.subr.bf16.mxu0 %v7185_v46 }
 0x757   :  { %3028 = vmatpush1.bf16.msra.mxu1 %v7188_v47 }
 0x758   :  { %3029 = vmatprep.subr.bf16.mxu1 %v7191_v55  ;;  %3174 = vmatpush1.bf16.msra.mxu0 %v7194_v48 }
 0x759   :  { %3175 = vmatprep.subr.bf16.mxu0 %v7197_v28 }
 0x75b   :  { %3030 = vmatpush1.bf16.msra.mxu1 %v7200_v27 }
 0x75c   :  { %3031 = vmatprep.subr.bf16.mxu1 %v7203_v59  ;;  %3176 = vmatpush1.bf16.msra.mxu0 %v7206_v11 }
 0x75d   :  { %3177 = vmatprep.subr.bf16.mxu0 %v9357_v42 }
 0x75f   :  { %3032 = vmatpush1.bf16.msra.mxu1 %v9358_v33 }
 0x760   :  { %3033 = vmatprep.subr.bf16.mxu1 %v9359_v37  ;;  %3178 = vmatpush1.bf16.msra.mxu0 %v9360_v49 }
 0x761   :  { %3179 = vmatprep.subr.bf16.mxu0 %v9361_v23 }
 0x763   :  { %3034 = vmatpush1.bf16.msra.mxu1 %v9362_v22 }
 0x764   :  { %3035 = vmatprep.subr.bf16.mxu1 %v9363_v24  ;;  %3180 = vmatpush1.bf16.msra.mxu0 %v9364_v35 }
 0x765   :  { %3181 = vmatprep.subr.bf16.mxu0 %v9365_v30 }
 0x767   :  { %3036 = vmatpush1.bf16.msra.mxu1 %v9366_v25 }
 0x768   :  { %3037 = vmatprep.subr.bf16.mxu1 %v9367_v20  ;;  %3182 = vmatpush1.bf16.msra.mxu0 %v9368_v29 }
 0x769   :  { %3183 = vmatprep.subr.bf16.mxu0 %v9369_v34 }
 0x76b   :  { %3038 = vmatpush1.bf16.msra.mxu1 %v9370_v19 }
 0x76c   :  { %3039 = vmatprep.subr.bf16.mxu1 %v9371_v4  ;;  %3184 = vmatpush1.bf16.msra.mxu0 %v9372_v10 }
 0x76d   :  { %3185 = vmatprep.subr.bf16.mxu0 %v9373_v63 }
 0x76f   :  { %3040 = vmatpush2.bf16.msra.mxu1 %v9374_v2 }
 0x770   :  { %3041 = vmatprep.subr.bf16.mxu1 %v9375_v62  ;;  %3186 = vmatpush2.bf16.msra.mxu0 %v9376_v0  ;;  %v9386_v62 = vld [vmem:[#allocation174_spill] sm:$0xff]  ;;  %v9387_v0 = vld [vmem:[#allocation175_spill] sm:$0xff] }
 0x771   :  { %3187 = vmatprep.subr.bf16.mxu0 %v9377_v9  ;;  %v9388_v9 = vld [vmem:[#allocation176_spill] sm:$0xff] }
 0x773   :  { %3042 = vmatpush2.bf16.msra.mxu1 %v9378_v5  ;;  %v9389_v5 = vld [vmem:[#allocation177_spill] sm:$0xff] }
 0x774   :  { %3043 = vmatprep.subr.bf16.mxu1 %v9379_v6  ;;  %3188 = vmatpush2.bf16.msra.mxu0 %v9380_v45  ;;  %v9390_v6 = vld [vmem:[#allocation178_spill] sm:$0xff]  ;;  %v9391_v45 = vld [vmem:[#allocation179_spill] sm:$0xff] }
 0x775   :  { %3189 = vmatprep.subr.bf16.mxu0 %v9381_v61  ;;  %v9392_v61 = vld [vmem:[#allocation180_spill] sm:$0xff] }
 0x777   :  { %3044 = vmatpush2.bf16.msra.mxu1 %v9382_v57  ;;  %v9393_v57 = vld [vmem:[#allocation181_spill] sm:$0xff] }
 0x778   :  { %3045 = vmatprep.subr.bf16.mxu1 %v9383_v31  ;;  %3190 = vmatpush2.bf16.msra.mxu0 %v9384_v32  ;;  %v9394_v31 = vld [vmem:[#allocation182_spill] sm:$0xff]  ;;  %v9395_v32 = vld [vmem:[#allocation183_spill] sm:$0xff] }
 0x779   :  { %3191 = vmatprep.subr.bf16.mxu0 %v9385_v44  ;;  %v9396_v44 = vld [vmem:[#allocation184_spill] sm:$0xff] }
 0x77b   :  { %3046 = vmatpush2.bf16.msra.mxu1 %v9386_v62  ;;  %v9397_v62 = vld [vmem:[#allocation185_spill] sm:$0xff] }
 0x77c   :  { %3047 = vmatprep.subr.bf16.mxu1 %v9387_v0  ;;  %3192 = vmatpush2.bf16.msra.mxu0 %v9388_v9  ;;  %v9398_v0 = vld [vmem:[#allocation186_spill] sm:$0xff]  ;;  %v9399_v9 = vld [vmem:[#allocation187_spill] sm:$0xff] }
 0x77d   :  { %3193 = vmatprep.subr.bf16.mxu0 %v9389_v5 }
 0x77f   :  { %3048 = vmatpush2.bf16.msra.mxu1 %v9390_v6 }
 0x780   :  { %3049 = vmatprep.subr.bf16.mxu1 %v9391_v45  ;;  %3194 = vmatpush2.bf16.msra.mxu0 %v9392_v61 }
 0x781   :  { %3195 = vmatprep.subr.bf16.mxu0 %v9393_v57  ;;  %v9434_v57 = vld [vmem:[#allocation36_spill] sm:$0xff] }
 0x783   :  { %3050 = vmatpush2.bf16.msra.mxu1 %v9394_v31 }
 0x784   :  { %3051 = vmatprep.subr.bf16.mxu1 %v9395_v32  ;;  %3196 = vmatpush2.bf16.msra.mxu0 %v9396_v44  ;;  %v7504_v44 = vld [vmem:[#allocation8 + $0x158] ss:$24 sps:$4 sm:$0xff]  }
 0x785   :  { %3197 = vmatprep.subr.bf16.mxu0 %v9397_v62  ;;  %9400 = vst [vmem:[#allocation195_spill] sm:$0xff] %v7504_v44  ;;  %v9433_v62 = vld [vmem:[#allocation35_spill] sm:$0xff] }
 0x786   :  { %v590_v32 = vadd.f32 %v9433_v62, %v6050_v54 }
 0x787   :  { %3052 = vmatpush2.bf16.msra.mxu1 %v9398_v0  ;;  %v7507_v0 = vld [vmem:[#allocation8 + $0x12c] ss:$24 sps:$4 sm:$0xff]  }
 0x788   :  { %3053 = vmatprep.subr.bf16.mxu1 %v9399_v9  ;;  %3198 = vmatpush2.bf16.msra.mxu0 %v7338_v21  ;;  %9401 = vst [vmem:[#allocation196_spill] sm:$0xff] %v7507_v0  ;;  %v7510_v21 = vld [vmem:[#allocation8 + $0x128] ss:$24 sps:$4 sm:$0xff]  }
 0x789   :  { %3199 = vmatprep.subr.bf16.mxu0 %v7341_v17  ;;  %9402 = vst [vmem:[#allocation60_spill] sm:$0xff] %v7510_v21  ;;  %v9432_v17 = vld [vmem:[#allocation34_spill] sm:$0xff] }
 0x78a   :  { %v588_v9 = vadd.f32 %v9432_v17, %v9345_v1  ;;  %v9435_v17 = vld [vmem:[#allocation111_spill] sm:$0xff] }
 0x78b   :  { %3054 = vmatpush2.bf16.msra.mxu1 %v7344_v13  ;;  %v7513_v13 = vld [vmem:[#allocation8 + $0xfc] ss:$24 sps:$4 sm:$0xff]  }
 0x78c   :  { %3212 = vmatprep.subr.bf16.mxu1 %v7347_v56  ;;  %3200 = vmatpush2.bf16.msra.mxu0 %v7350_v15  ;;  %9403 = vst [vmem:[#allocation61_spill] sm:$0xff] %v7513_v13  ;;  %v7516_v15 = vld [vmem:[#allocation8 + $0xf8] ss:$24 sps:$4 sm:$0xff]  }
 0x78d   :  { %3255 = vmatprep.subr.bf16.mxu0 %v7353_v8  ;;  %9404 = vst [vmem:[#allocation62_spill] sm:$0xff] %v7516_v15  ;;  %v9431_v8 = vld [vmem:[#allocation33_spill] sm:$0xff] }
 0x78e   :  { %3056 = vmatmul.mubr.bf16.vlgmr.msra.gmra.mxu1 %v7435_v3  ;;  %v7519_v3 = vld [vmem:[#allocation8 + $0xcc] ss:$24 sps:$4 sm:$0xff]   ;;  %v586_v56 = vadd.f32 %v9431_v8, %v6050_v54 }
 0x78f   :  { %3213 = vmatpush1.bf16.msra.mxu1 %v7504_v44  ;;  %9405 = vst [vmem:[#allocation63_spill] sm:$0xff] %v7519_v3  ;;  %v7522_v44 = vld [vmem:[#allocation8 + $0xc8] ss:$24 sps:$4 sm:$0xff]  }
 0x790   :  { %3214 = vmatprep.subr.bf16.mxu1 %v7507_v0  ;;  %9406 = vst [vmem:[#allocation64_spill] sm:$0xff] %v7522_v44  ;;  %v7525_v0 = vld [vmem:[#allocation8 + $0x9c] ss:$24 sps:$4 sm:$0xff]  }
 0x791   :  { %9407 = vst [vmem:[#allocation65_spill] sm:$0xff] %v7525_v0 }
 0x793   :  { %3215 = vmatpush1.bf16.msra.mxu1 %v7510_v21  ;;  %v7528_v21 = vld [vmem:[#allocation8 + $0x98] ss:$24 sps:$4 sm:$0xff]  }
 0x794   :  { %3216 = vmatprep.subr.bf16.mxu1 %v7513_v13  ;;  %9408 = vst [vmem:[#allocation66_spill] sm:$0xff] %v7528_v21  ;;  %v7531_v13 = vld [vmem:[#allocation8 + $0x6c] ss:$24 sps:$4 sm:$0xff]  }
 0x795   :  { %9409 = vst [vmem:[#allocation67_spill] sm:$0xff] %v7531_v13 }
 0x797   :  { %3217 = vmatpush1.bf16.msra.mxu1 %v7516_v15  ;;  %v7534_v15 = vld [vmem:[#allocation8 + $0x68] ss:$24 sps:$4 sm:$0xff]  }
 0x798   :  { %3218 = vmatprep.subr.bf16.mxu1 %v7519_v3  ;;  %9410 = vst [vmem:[#allocation68_spill] sm:$0xff] %v7534_v15  ;;  %v7537_v3 = vld [vmem:[#allocation8 + $0x3c] ss:$24 sps:$4 sm:$0xff]  }
 0x799   :  { %9411 = vst [vmem:[#allocation69_spill] sm:$0xff] %v7537_v3 }
 0x79b   :  { %3219 = vmatpush1.bf16.msra.mxu1 %v7522_v44  ;;  %v7540_v44 = vld [vmem:[#allocation8 + $0x38] ss:$24 sps:$4 sm:$0xff]  }
 0x79c   :  { %3220 = vmatprep.subr.bf16.mxu1 %v7525_v0  ;;  %9412 = vst [vmem:[#allocation70_spill] sm:$0xff] %v7540_v44  ;;  %v7543_v0 = vld [vmem:[#allocation8 + $0xc] ss:$24 sps:$4 sm:$0xff]  }
 0x79d   :  { %9413 = vst [vmem:[#allocation71_spill] sm:$0xff] %v7543_v0 }
 0x79f   :  { %3221 = vmatpush1.bf16.msra.mxu1 %v7528_v21  ;;  %v7546_v21 = vld [vmem:[#allocation8 + $0x8] ss:$24 sps:$4 sm:$0xff]  }
 0x7a0   :  { %3222 = vmatprep.subr.bf16.mxu1 %v7531_v13  ;;  %9414 = vst [vmem:[#allocation72_spill] sm:$0xff] %v7546_v21  ;;  %v7549_v13 = vld [vmem:[#allocation8 + $0x2dc] ss:$24 sps:$4 sm:$0xff]  }
 0x7a1   :  { %9415 = vst [vmem:[#allocation73_spill] sm:$0xff] %v7549_v13 }
 0x7a3   :  { %3223 = vmatpush1.bf16.msra.mxu1 %v7534_v15  ;;  %v7552_v15 = vld [vmem:[#allocation8 + $0x2d8] ss:$24 sps:$4 sm:$0xff]  }
 0x7a4   :  { %3224 = vmatprep.subr.bf16.mxu1 %v7537_v3  ;;  %9416 = vst [vmem:[#allocation74_spill] sm:$0xff] %v7552_v15  ;;  %v7555_v3 = vld [vmem:[#allocation8 + $0x2ac] ss:$24 sps:$4 sm:$0xff]  }
 0x7a5   :  { %9417 = vst [vmem:[#allocation75_spill] sm:$0xff] %v7555_v3 }
 0x7a7   :  { %3225 = vmatpush1.bf16.msra.mxu1 %v7540_v44  ;;  %v7558_v44 = vld [vmem:[#allocation8 + $0x2a8] ss:$24 sps:$4 sm:$0xff]  }
 0x7a8   :  { %3226 = vmatprep.subr.bf16.mxu1 %v7543_v0  ;;  %9418 = vst [vmem:[#allocation76_spill] sm:$0xff] %v7558_v44  ;;  %v7561_v0 = vld [vmem:[#allocation8 + $0x27c] ss:$24 sps:$4 sm:$0xff]  }
 0x7a9   :  { %9419 = vst [vmem:[#allocation77_spill] sm:$0xff] %v7561_v0 }
 0x7ab   :  { %3227 = vmatpush1.bf16.msra.mxu1 %v7546_v21  ;;  %v7564_v21 = vld [vmem:[#allocation8 + $0x278] ss:$24 sps:$4 sm:$0xff]  }
 0x7ac   :  { %3228 = vmatprep.subr.bf16.mxu1 %v7549_v13  ;;  %9420 = vst [vmem:[#allocation78_spill] sm:$0xff] %v7564_v21  ;;  %v7567_v13 = vld [vmem:[#allocation8 + $0x24c] ss:$24 sps:$4 sm:$0xff]  }
 0x7ad   :  { %9421 = vst [vmem:[#allocation80_spill] sm:$0xff] %v7567_v13 }
 0x7af   :  { %3229 = vmatpush2.bf16.msra.mxu1 %v7552_v15  ;;  %v7570_v15 = vld [vmem:[#allocation8 + $0x248] ss:$24 sps:$4 sm:$0xff]  }
 0x7b0   :  { %3230 = vmatprep.subr.bf16.mxu1 %v7555_v3  ;;  %9422 = vst [vmem:[#allocation81_spill] sm:$0xff] %v7570_v15  ;;  %v7573_v3 = vld [vmem:[#allocation8 + $0x21c] ss:$24 sps:$4 sm:$0xff]  }
 0x7b1   :  { %9423 = vst [vmem:[#allocation83_spill] sm:$0xff] %v7573_v3 }
 0x7b3   :  { %3231 = vmatpush2.bf16.msra.mxu1 %v7558_v44  ;;  %v7576_v44 = vld [vmem:[#allocation8 + $0x218] ss:$24 sps:$4 sm:$0xff]  }
 0x7b4   :  { %3232 = vmatprep.subr.bf16.mxu1 %v7561_v0  ;;  %9424 = vst [vmem:[#allocation84_spill] sm:$0xff] %v7576_v44  ;;  %v7579_v0 = vld [vmem:[#allocation8 + $0x1ec] ss:$24 sps:$4 sm:$0xff]  }
 0x7b5   :  { %9425 = vst [vmem:[#allocation86_spill] sm:$0xff] %v7579_v0 }
 0x7b7   :  { %3233 = vmatpush2.bf16.msra.mxu1 %v7564_v21  ;;  %v7582_v21 = vld [vmem:[#allocation8 + $0x1e8] ss:$24 sps:$4 sm:$0xff]  }
 0x7b8   :  { %3234 = vmatprep.subr.bf16.mxu1 %v7567_v13  ;;  %9426 = vst [vmem:[#allocation87_spill] sm:$0xff] %v7582_v21  ;;  %v7585_v13 = vld [vmem:[#allocation8 + $0x1bc] ss:$24 sps:$4 sm:$0xff]  }
 0x7b9   :  { %9427 = vst [vmem:[#allocation89_spill] sm:$0xff] %v7585_v13 }
 0x7bb   :  { %3235 = vmatpush2.bf16.msra.mxu1 %v7570_v15  ;;  %v7588_v15 = vld [vmem:[#allocation8 + $0x1b8] ss:$24 sps:$4 sm:$0xff]  }
 0x7bc   :  { %3236 = vmatprep.subr.bf16.mxu1 %v7573_v3  ;;  %9428 = vst [vmem:[#allocation16_spill] sm:$0xff] %v7588_v15  ;;  %v7591_v3 = vld [vmem:[#allocation8 + $0x18c] ss:$24 sps:$4 sm:$0xff]  }
 0x7bd   :  { %9429 = vst [vmem:[#allocation17_spill] sm:$0xff] %v7591_v3 }
 0x7bf   :  { %3237 = vmatpush2.bf16.msra.mxu1 %v7576_v44  ;;  %v7594_v44 = vld [vmem:[#allocation8 + $0x188] ss:$24 sps:$4 sm:$0xff]  }
 0x7c0   :  { %3238 = vmatprep.subr.bf16.mxu1 %v7579_v0  ;;  %9430 = vst [vmem:[#allocation18_spill] sm:$0xff] %v7594_v44 }
 0x7c3   :  { %3239 = vmatpush2.bf16.msra.mxu1 %v7582_v21 }
 0x7c4   :  { %3240 = vmatprep.subr.bf16.mxu1 %v7585_v13 }
 0x7c7   :  { %3241 = vmatpush2.bf16.msra.mxu1 %v7588_v15 }
 0x7c8   :  { %3242 = vmatprep.subr.bf16.mxu1 %v7591_v3 }
 0x7cb   :  { %3243 = vmatpush2.bf16.msra.mxu1 %v7594_v44  ;;  %v592_v44 = vadd.f32 %v9434_v57, %v9345_v1 }
 0x7cc   :  { %3401 = vmatprep.subr.bf16.mxu1 %v7388_v43 }
 0x80e   :  { %v2971_v0 = vpop.f32.mrf.mxu1  ;;  %v3014_v43 = vpop.f32.mrf.mxu0 }
 0x80f   :  { %v3066_v15 = vadd.f32 %v2971_v0, %v586_v56  ;;  %v739_v56 = vadd.f32 %v9435_v17, %v9061_v12 }
 0x810   :  { %v2973_v21 = vpop.f32.mrf.mxu1  ;;  %v3016_v8 = vpop.f32.mrf.mxu0 }
 0x811   :  { %v3067_v3 = vadd.f32 %v2973_v21, %v588_v9  ;;  %v4541_v61 = vmul.f32 -1.442695, %v3066_v15  ;;  %v9436_v21 = vld [vmem:[#allocation113_spill] sm:$0xff]  ;;  %v3094_v9 = vadd.f32 %v3014_v43, %v739_v56  ;;  %v9437_v15 = vld [vmem:[#allocation115_spill] sm:$0xff] }
 0x812   :  { %v2975_v13 = vpop.f32.mrf.mxu1  ;;  %v3018_v62 = vpop.f32.mrf.mxu0  ;;  %v741_v0 = vadd.f32 %v9436_v21, %v9062_v41 }
 0x813   :  { %v3068_v45 = vadd.f32 %v2975_v13, %v590_v32  ;;  %v4542_v6 = vmul.f32 -1.442695, %v3067_v3  ;;  %5069 = vpow2.f32 %v4541_v61  ;;  %v743_v13 = vadd.f32 %v9437_v15, %v9061_v12  ;;  %v9438_v61 = vld [vmem:[#allocation117_spill] sm:$0xff] }
 0x814   :  { %v2977_v31 = vpop.f32.mrf.mxu1  ;;  %v3095_v57 = vadd.f32 %v3016_v8, %v741_v0 }
 0x815   :  { %v3069_v5 = vadd.f32 %v2977_v31, %v592_v44  ;;  %v4543_v2 = vmul.f32 -1.442695, %v3068_v45  ;;  %5071 = vpow2.f32 %v4542_v6  ;;  %v3020_v31 = vpop.f32.mrf.mxu0  ;;  %v745_v45 = vadd.f32 %v9438_v61, %v9062_v41 }
 0x816   :  { %v3096_v6 = vadd.f32 %v3018_v62, %v743_v13  ;;  %v4546_v44 = vmul.f32 -1.442695, %v3095_v57 }
 0x817   :  { %v4544_v63 = vmul.f32 -1.442695, %v3069_v5  ;;  %5073 = vpow2.f32 %v4543_v2  ;;  %v4545_v5 = vmul.f32 -1.442695, %v3094_v9  ;;  %v3097_v32 = vadd.f32 %v3020_v31, %v745_v45 }
 0x818   :  { %v4547_v2 = vmul.f32 -1.442695, %v3096_v6 }
 0x819   :  { %5075 = vpow2.f32 %v4544_v63  ;;  %v4548_v1 = vmul.f32 -1.442695, %v3097_v32 }
 0x81a   :  { %5077 = vpow2.f32 %v4545_v5 }
 0x81b   :  { %5079 = vpow2.f32 %v4546_v44 }
 0x81c   :  { %5081 = vpow2.f32 %v4547_v2 }
 0x81d   :  { %5083 = vpow2.f32 %v4548_v1  ;;  %v9439_v1 = vld [vmem:[#allocation122_spill] sm:$0xff] }
 0x81e   :  { %v892_v44 = vadd.f32 %v9439_v1, %v6117_v40 }
 0x820   :  { %v5070_v3 = vpop.eup %5069 }
 0x821   :  { %v3082_v21 = vadd.f32 1.0, %v5070_v3 }
 0x822   :  { %v5072_v17 = vpop.eup %5071 }
 0x823   :  { %v3083_v63 = vadd.f32 1.0, %v5072_v17  ;;  %5085 = vrcp.f32 %v3082_v21  ;;  %v9440_v21 = vld [vmem:[#allocation124_spill] sm:$0xff] }
 0x824   :  { %v5074_v43 = vpop.eup %5073 }
 0x825   :  { %v3084_v8 = vadd.f32 1.0, %v5074_v43  ;;  %5087 = vrcp.f32 %v3083_v63  ;;  %v894_v43 = vadd.f32 %v9440_v21, %v6120_v50 }
 0x826   :  { %v5076_v56 = vpop.eup %5075 }
 0x827   :  { %v3085_v0 = vadd.f32 1.0, %v5076_v56  ;;  %5089 = vrcp.f32 %v3084_v8  ;;  %v5078_v62 = vpop.eup %5077 }
 0x828   :  { %v5080_v9 = vpop.eup %5079  ;;  %v3110_v13 = vadd.f32 1.0, %v5078_v62 }
 0x829   :  { %5091 = vrcp.f32 %v3085_v0  ;;  %v5082_v15 = vpop.eup %5081  ;;  %v3111_v61 = vadd.f32 1.0, %v5080_v9 }
 0x82a   :  { %v5084_v31 = vpop.eup %5083  ;;  %v3112_v5 = vadd.f32 1.0, %v5082_v15  ;;  %5093 = vrcp.f32 %v3110_v13  ;;  %v9441_v15 = vld [vmem:[#allocation126_spill] sm:$0xff] }
 0x82b   :  { %v3113_v63 = vadd.f32 1.0, %v5084_v31  ;;  %5095 = vrcp.f32 %v3111_v61  ;;  %v9442_v31 = vld [vmem:[#allocation128_spill] sm:$0xff] }
 0x82c   :  { %5097 = vrcp.f32 %v3112_v5  ;;  %v898_v61 = vadd.f32 %v9442_v31, %v6120_v50 }
 0x830   :  { %v5086_v6 = vpop.eup %5085 }
 0x832   :  { %v5088_v17 = vpop.eup %5087 }
 0x834   :  { %v5090_v9 = vpop.eup %5089 }
 0x836   :  { %v5092_v1 = vpop.eup %5091 }
 0x84e   :  { %v3057_v57 = vpop.f32.mrf.mxu1 }
 0x84f   :  { %v3122_v45 = vadd.f32 %v3057_v57, %v6128_v58  ;;  %v896_v57 = vadd.f32 %v9441_v15, %v6117_v40 }
 0x850   :  { %v3059_v32 = vpop.f32.mrf.mxu1 }
 0x851   :  { %v3126_v3 = vmul.f32 %v5086_v6, %v3122_v45  ;;  %v3123_v2 = vadd.f32 %v3059_v32, %v6124_v39 }
 0x852   :  { %v3061_v56 = vpop.f32.mrf.mxu1 }
 0x853   :  { %v3130_v8 = vadd.f32 %v3126_v3, %v892_v44  ;;  %v3127_v0 = vmul.f32 %v5088_v17, %v3123_v2  ;;  %v3124_v62 = vadd.f32 %v3061_v56, %v6128_v58  ;;  %v5094_v17 = vpop.eup %5093 }
 0x854   :  { %v3063_v13 = vpop.f32.mrf.mxu1  ;;  %v5096_v21 = vpop.eup %5095  ;;  %v3138_v56 = vsub.f32 1.0, %v5094_v17 }
 0x855   :  { %5099 = vtanh.f32 %v3130_v8  ;;  %v3131_v45 = vadd.f32 %v3127_v0, %v894_v43  ;;  %v3128_v6 = vmul.f32 %v5090_v9, %v3124_v62  ;;  %v3125_v32 = vadd.f32 %v3063_v13, %v6124_v39  ;;  %v5098_v5 = vpop.eup %5097 }
 0x856   :  { %5101 = vrcp.f32 %v3113_v63  ;;  %v3139_v0 = vsub.f32 1.0, %v5096_v21  ;;  %v3146_v9 = vmul.f32 %v5094_v17, %v7421_v7  ;;  %v3147_v13 = vmul.f32 %v5096_v21, %v7423_v38  ;;  %v9476_v21 = vld [vmem:[#allocation195_spill] sm:$0xff] }
 0x857   :  { %5103 = vtanh.f32 %v3131_v45  ;;  %v3132_v44 = vadd.f32 %v3128_v6, %v896_v57  ;;  %v3129_v3 = vmul.f32 %v5092_v1, %v3125_v32  ;;  %v3140_v45 = vsub.f32 1.0, %v5098_v5 }
 0x859   :  { %5105 = vtanh.f32 %v3132_v44  ;;  %v3133_v2 = vadd.f32 %v3129_v3, %v898_v61  ;;  %v3148_v61 = vmul.f32 %v5098_v5, %v7427_v26  ;;  %v9458_v26 = vld [vmem:[#allocation176_spill] sm:$0xff] }
 0x85a   :  { %v9477_v5 = vld [vmem:[#allocation196_spill] sm:$0xff] }
 0x85b   :  { %5107 = vtanh.f32 %v3133_v2 }
 0x862   :  { %v5100_v8 = vpop.eup %5099 }
 0x863   :  { %v5102_v43 = vpop.eup %5101  ;;  %v3142_v62 = vmul.f32 %v5100_v8, %v3138_v56  ;;  %v9478_v8 = vld [vmem:[#allocation60_spill] sm:$0xff] }
 0x864   :  { %v5104_v63 = vpop.eup %5103  ;;  %v3141_v32 = vsub.f32 1.0, %v5102_v43  ;;  %v3149_v2 = vmul.f32 %v5102_v43, %v7429_v14  ;;  %v9459_v14 = vld [vmem:[#allocation177_spill] sm:$0xff] }
 0x865   :  { %v3143_v15 = vmul.f32 %v5104_v63, %v3139_v0  ;;  %v7628_v57 = vadd.f32 %v3146_v9, %v3142_v62  ;;  %v9479_v43 = vld [vmem:[#allocation61_spill] sm:$0xff]  ;;  %v9480_v0 = vld [vmem:[#allocation62_spill] sm:$0xff]  ;;  %v9481_v62 = vld [vmem:[#allocation63_spill] sm:$0xff] }
 0x866   :  { %v5106_v6 = vpop.eup %5105  ;;  %v9482_v9 = vld [vmem:[#allocation64_spill] sm:$0xff]  ;;  %v9483_v63 = vld [vmem:[#allocation65_spill] sm:$0xff] }
 0x867   :  { %v7630_v1 = vadd.f32 %v3147_v13, %v3143_v15  ;;  %v3144_v31 = vmul.f32 %v5106_v6, %v3140_v45  ;;  %v9484_v15 = vld [vmem:[#allocation66_spill] sm:$0xff]  ;;  %v9485_v13 = vld [vmem:[#allocation67_spill] sm:$0xff]  ;;  %v9486_v45 = vld [vmem:[#allocation68_spill] sm:$0xff] }
 0x868   :  { %v5108_v44 = vpop.eup %5107  ;;  %v9487_v6 = vld [vmem:[#allocation69_spill] sm:$0xff] }
 0x869   :  { %v3145_v3 = vmul.f32 %v5108_v44, %v3141_v32  ;;  %v7634_v56 = vadd.f32 %v3148_v61, %v3144_v31  ;;  %v9488_v32 = vld [vmem:[#allocation70_spill] sm:$0xff]  ;;  %v9489_v31 = vld [vmem:[#allocation71_spill] sm:$0xff]  ;;  %v9490_v61 = vld [vmem:[#allocation72_spill] sm:$0xff] }
 0x86a   :  { %v9491_v44 = vld [vmem:[#allocation73_spill] sm:$0xff] }
 0x86b   :  { %v7636_v7 = vadd.f32 %v3149_v2, %v3145_v3  ;;  %v7642_v17 = vpack.c.bf16 %v7634_v56, %v7628_v57  ;;  %v9492_v3 = vld [vmem:[#allocation74_spill] sm:$0xff]  ;;  %v9493_v2 = vld [vmem:[#allocation75_spill] sm:$0xff] }
 0x86d   :  { %v3168_v38 = vpack.c.bf16 %v7636_v7, %v7630_v1 }
 0x86f   :  { %3201 = vmatprep.mubr.bf16.mxu0 %v3168_v38  ;;  %3244 = vmatprep.mubr.bf16.mxu1 %v3168_v38 }
 0x870   :  { %3202 = vmatmul.mubr.bf16.vlgmr.msra.gmra.mxu0 %v7642_v17  ;;  %3245 = vmatmul.mubr.bf16.vlgmr.msra.gmra.mxu1 %v7642_v17 }
 0x871   :  { %3256 = vmatpush1.bf16.msra.mxu0 %v7164_v36  ;;  %3287 = vmatprep.mubr.bf16.mxu0 %v3168_v38  ;;  %v9443_v36 = vld [vmem:[#allocation100_spill] sm:$0xff] }
 0x872   :  { %3257 = vmatprep.subr.bf16.mxu0 %v7167_v18  ;;  %3402 = vmatpush1.bf16.msra.mxu1 %v7170_v53  ;;  %v9444_v18 = vld [vmem:[#allocation102_spill] sm:$0xff]  ;;  %v9445_v53 = vld [vmem:[#allocation104_spill] sm:$0xff] }
 0x873   :  { %3403 = vmatprep.subr.bf16.mxu1 %v7173_v51  ;;  %v9446_v51 = vld [vmem:[#allocation164_spill] sm:$0xff] }
 0x874   :  { %v9494_v38 = vld [vmem:[#allocation76_spill] sm:$0xff] }
 0x875   :  { %3258 = vmatpush1.bf16.msra.mxu0 %v7176_v60  ;;  %v9447_v60 = vld [vmem:[#allocation165_spill] sm:$0xff] }
 0x876   :  { %3259 = vmatprep.subr.bf16.mxu0 %v7179_v16  ;;  %3404 = vmatpush1.bf16.msra.mxu1 %v7182_v52  ;;  %v9448_v16 = vld [vmem:[#allocation166_spill] sm:$0xff]  ;;  %v9449_v52 = vld [vmem:[#allocation167_spill] sm:$0xff] }
 0x877   :  { %3405 = vmatprep.subr.bf16.mxu1 %v7185_v46  ;;  %v9450_v46 = vld [vmem:[#allocation168_spill] sm:$0xff] }
 0x879   :  { %3260 = vmatpush1.bf16.msra.mxu0 %v7188_v47  ;;  %v9451_v47 = vld [vmem:[#allocation169_spill] sm:$0xff] }
 0x87a   :  { %3261 = vmatprep.subr.bf16.mxu0 %v7191_v55  ;;  %3406 = vmatpush1.bf16.msra.mxu1 %v7194_v48  ;;  %v9452_v55 = vld [vmem:[#allocation170_spill] sm:$0xff]  ;;  %v9453_v48 = vld [vmem:[#allocation171_spill] sm:$0xff] }
 0x87b   :  { %3407 = vmatprep.subr.bf16.mxu1 %v7197_v28  ;;  %v9454_v28 = vld [vmem:[#allocation172_spill] sm:$0xff] }
 0x87d   :  { %3262 = vmatpush1.bf16.msra.mxu0 %v7200_v27  ;;  %v9455_v27 = vld [vmem:[#allocation173_spill] sm:$0xff] }
 0x87e   :  { %3263 = vmatprep.subr.bf16.mxu0 %v7203_v59  ;;  %3408 = vmatpush1.bf16.msra.mxu1 %v7206_v11  ;;  %v9456_v59 = vld [vmem:[#allocation174_spill] sm:$0xff]  ;;  %v9457_v11 = vld [vmem:[#allocation175_spill] sm:$0xff] }
 0x87f   :  { %3409 = vmatprep.subr.bf16.mxu1 %v9357_v42  ;;  %v9460_v42 = vld [vmem:[#allocation178_spill] sm:$0xff] }
 0x881   :  { %3264 = vmatpush1.bf16.msra.mxu0 %v9358_v33  ;;  %v9461_v33 = vld [vmem:[#allocation179_spill] sm:$0xff] }
 0x882   :  { %3265 = vmatprep.subr.bf16.mxu0 %v9359_v37  ;;  %3410 = vmatpush1.bf16.msra.mxu1 %v9360_v49  ;;  %v9462_v37 = vld [vmem:[#allocation180_spill] sm:$0xff]  ;;  %v9463_v49 = vld [vmem:[#allocation181_spill] sm:$0xff] }
 0x883   :  { %3411 = vmatprep.subr.bf16.mxu1 %v9361_v23  ;;  %v9464_v23 = vld [vmem:[#allocation182_spill] sm:$0xff] }
 0x885   :  { %3266 = vmatpush1.bf16.msra.mxu0 %v9362_v22  ;;  %v9465_v22 = vld [vmem:[#allocation183_spill] sm:$0xff] }
 0x886   :  { %3267 = vmatprep.subr.bf16.mxu0 %v9363_v24  ;;  %3412 = vmatpush1.bf16.msra.mxu1 %v9364_v35  ;;  %v9466_v24 = vld [vmem:[#allocation184_spill] sm:$0xff]  ;;  %v9467_v35 = vld [vmem:[#allocation185_spill] sm:$0xff] }
 0x887   :  { %3413 = vmatprep.subr.bf16.mxu1 %v9365_v30  ;;  %v9468_v30 = vld [vmem:[#allocation186_spill] sm:$0xff] }
 0x889   :  { %3268 = vmatpush1.bf16.msra.mxu0 %v9366_v25  ;;  %v9469_v25 = vld [vmem:[#allocation187_spill] sm:$0xff] }
 0x88a   :  { %3269 = vmatprep.subr.bf16.mxu0 %v9367_v20  ;;  %3414 = vmatpush1.bf16.msra.mxu1 %v9368_v29  ;;  %v9470_v20 = vld [vmem:[#allocation188_spill] sm:$0xff]  ;;  %v9471_v29 = vld [vmem:[#allocation189_spill] sm:$0xff] }
 0x88b   :  { %3415 = vmatprep.subr.bf16.mxu1 %v9369_v34  ;;  %v9472_v34 = vld [vmem:[#allocation190_spill] sm:$0xff] }
 0x88d   :  { %3270 = vmatpush1.bf16.msra.mxu0 %v9370_v19  ;;  %v9473_v19 = vld [vmem:[#allocation191_spill] sm:$0xff] }
 0x88e   :  { %3271 = vmatprep.subr.bf16.mxu0 %v9371_v4  ;;  %3416 = vmatpush1.bf16.msra.mxu1 %v9372_v10  ;;  %v9474_v4 = vld [vmem:[#allocation192_spill] sm:$0xff]  ;;  %v9475_v10 = vld [vmem:[#allocation193_spill] sm:$0xff] }
 0x88f   :  { %3417 = vmatprep.subr.bf16.mxu1 %v9443_v36  ;;  %v9496_v36 = vld [vmem:[#allocation78_spill] sm:$0xff] }
 0x891   :  { %3272 = vmatpush2.bf16.msra.mxu0 %v9444_v18  ;;  %v9497_v18 = vld [vmem:[#allocation80_spill] sm:$0xff] }
 0x892   :  { %3273 = vmatprep.subr.bf16.mxu0 %v9445_v53  ;;  %3418 = vmatpush2.bf16.msra.mxu1 %v9446_v51  ;;  %v9498_v53 = vld [vmem:[#allocation81_spill] sm:$0xff]  ;;  %v9499_v51 = vld [vmem:[#allocation83_spill] sm:$0xff] }
 0x893   :  { %3419 = vmatprep.subr.bf16.mxu1 %v9447_v60  ;;  %v9500_v60 = vld [vmem:[#allocation84_spill] sm:$0xff] }
 0x895   :  { %3274 = vmatpush2.bf16.msra.mxu0 %v9448_v16  ;;  %v9501_v16 = vld [vmem:[#allocation86_spill] sm:$0xff] }
 0x896   :  { %3275 = vmatprep.subr.bf16.mxu0 %v9449_v52  ;;  %3420 = vmatpush2.bf16.msra.mxu1 %v9450_v46  ;;  %v9502_v52 = vld [vmem:[#allocation87_spill] sm:$0xff]  ;;  %v9503_v46 = vld [vmem:[#allocation89_spill] sm:$0xff] }
 0x897   :  { %3421 = vmatprep.subr.bf16.mxu1 %v9451_v47  ;;  %v9504_v47 = vld [vmem:[#allocation16_spill] sm:$0xff] }
 0x899   :  { %3276 = vmatpush2.bf16.msra.mxu0 %v9452_v55  ;;  %v9505_v55 = vld [vmem:[#allocation17_spill] sm:$0xff] }
 0x89a   :  { %3277 = vmatprep.subr.bf16.mxu0 %v9453_v48  ;;  %3422 = vmatpush2.bf16.msra.mxu1 %v9454_v28  ;;  %v9506_v48 = vld [vmem:[#allocation18_spill] sm:$0xff] }
 0x89b   :  { %3423 = vmatprep.subr.bf16.mxu1 %v9455_v27  ;;  %v9507_v28 = vld [vmem:[#allocation194_spill] sm:$0xff] }
 0x89d   :  { %3278 = vmatpush2.bf16.msra.mxu0 %v9456_v59 }
 0x89e   :  { %3279 = vmatprep.subr.bf16.mxu0 %v9457_v11  ;;  %3424 = vmatpush2.bf16.msra.mxu1 %v9458_v26  ;;  %v9508_v11 = vld [vmem:[#allocation37_spill] sm:$0xff] }
 0x89f   :  { %3425 = vmatprep.subr.bf16.mxu1 %v9459_v14  ;;  %v596_v26 = vadd.f32 %v9508_v11, %v6050_v54 }
 0x8a1   :  { %3280 = vmatpush2.bf16.msra.mxu0 %v9460_v42  ;;  %v9509_v42 = vld [vmem:[#allocation32_spill] sm:$0xff] }
 0x8a2   :  { %3281 = vmatprep.subr.bf16.mxu0 %v9461_v33  ;;  %3426 = vmatpush2.bf16.msra.mxu1 %v9462_v37  ;;  %v9510_v33 = vld [vmem:[#allocation38_spill] sm:$0xff] }
 0x8a3   :  { %3427 = vmatprep.subr.bf16.mxu1 %v9463_v49  ;;  %v598_v37 = vadd.f32 %v9510_v33, %v9509_v42 }
 0x8a5   :  { %3282 = vmatpush2.bf16.msra.mxu0 %v9464_v23  ;;  %v9511_v23 = vld [vmem:[#allocation39_spill] sm:$0xff] }
 0x8a6   :  { %3283 = vmatprep.subr.bf16.mxu0 %v9465_v22  ;;  %3428 = vmatpush2.bf16.msra.mxu1 %v9466_v24  ;;  %v600_v22 = vadd.f32 %v9511_v23, %v6050_v54 }
 0x8a7   :  { %3429 = vmatprep.subr.bf16.mxu1 %v9467_v35 }
 0x8a9   :  { %3284 = vmatpush2.bf16.msra.mxu0 %v9468_v30  ;;  %v9512_v30 = vld [vmem:[#allocation40_spill] sm:$0xff] }
 0x8aa   :  { %3285 = vmatprep.subr.bf16.mxu0 %v9469_v25  ;;  %3430 = vmatpush2.bf16.msra.mxu1 %v9470_v20  ;;  %v602_v25 = vadd.f32 %v9512_v30, %v9509_v42 }
 0x8ab   :  { %3431 = vmatprep.subr.bf16.mxu1 %v9471_v29 }
 0x8ad   :  { %3286 = vmatpush2.bf16.msra.mxu0 %v9472_v34 }
 0x8ae   :  { %3444 = vmatprep.subr.bf16.mxu0 %v9473_v19  ;;  %3432 = vmatpush2.bf16.msra.mxu1 %v9474_v4 }
 0x8af   :  { %3487 = vmatprep.subr.bf16.mxu1 %v9475_v10 }
 0x8b0   :  { %3288 = vmatmul.mubr.bf16.vlgmr.msra.gmra.mxu0 %v7642_v17  ;;  %v9495_v17 = vld [vmem:[#allocation77_spill] sm:$0xff] }
 0x8b1   :  { %3445 = vmatpush1.bf16.msra.mxu0 %v9476_v21 }
 0x8b2   :  { %3446 = vmatprep.subr.bf16.mxu0 %v9477_v5 }
 0x8b5   :  { %3447 = vmatpush1.bf16.msra.mxu0 %v9478_v8 }
 0x8b6   :  { %3448 = vmatprep.subr.bf16.mxu0 %v9479_v43 }
 0x8b9   :  { %3449 = vmatpush1.bf16.msra.mxu0 %v9480_v0 }
 0x8ba   :  { %3450 = vmatprep.subr.bf16.mxu0 %v9481_v62 }
 0x8bd   :  { %3451 = vmatpush1.bf16.msra.mxu0 %v9482_v9 }
 0x8be   :  { %3452 = vmatprep.subr.bf16.mxu0 %v9483_v63 }
 0x8c1   :  { %3453 = vmatpush1.bf16.msra.mxu0 %v9484_v15 }
 0x8c2   :  { %3454 = vmatprep.subr.bf16.mxu0 %v9485_v13 }
 0x8c5   :  { %3455 = vmatpush1.bf16.msra.mxu0 %v9486_v45 }
 0x8c6   :  { %3456 = vmatprep.subr.bf16.mxu0 %v9487_v6 }
 0x8c9   :  { %3457 = vmatpush1.bf16.msra.mxu0 %v9488_v32 }
 0x8ca   :  { %3458 = vmatprep.subr.bf16.mxu0 %v9489_v31 }
 0x8cd   :  { %3459 = vmatpush1.bf16.msra.mxu0 %v9490_v61 }
 0x8ce   :  { %3460 = vmatprep.subr.bf16.mxu0 %v9491_v44 }
 0x8d1   :  { %3461 = vmatpush2.bf16.msra.mxu0 %v9492_v3 }
 0x8d2   :  { %3462 = vmatprep.subr.bf16.mxu0 %v9493_v2 }
 0x8d5   :  { %3463 = vmatpush2.bf16.msra.mxu0 %v9494_v38 }
 0x8d6   :  { %3464 = vmatprep.subr.bf16.mxu0 %v9495_v17 }
 0x8d9   :  { %3465 = vmatpush2.bf16.msra.mxu0 %v9496_v36 }
 0x8da   :  { %3466 = vmatprep.subr.bf16.mxu0 %v9497_v18 }
 0x8dd   :  { %3467 = vmatpush2.bf16.msra.mxu0 %v9498_v53 }
 0x8de   :  { %3468 = vmatprep.subr.bf16.mxu0 %v9499_v51 }
 0x8e1   :  { %3469 = vmatpush2.bf16.msra.mxu0 %v9500_v60 }
 0x8e2   :  { %3470 = vmatprep.subr.bf16.mxu0 %v9501_v16 }
 0x8e5   :  { %3471 = vmatpush2.bf16.msra.mxu0 %v9502_v52 }
 0x8e6   :  { %3472 = vmatprep.subr.bf16.mxu0 %v9503_v46 }
 0x8e9   :  { %3473 = vmatpush2.bf16.msra.mxu0 %v9504_v47 }
 0x8ea   :  { %3474 = vmatprep.subr.bf16.mxu0 %v9505_v55 }
 0x8ed   :  { %3475 = vmatpush2.bf16.msra.mxu0 %v9506_v48 }
 0x8ee   :  { %3633 = vmatprep.subr.bf16.mxu0 %v9507_v28 }
 0x930   :  { %v3203_v27 = vpop.f32.mrf.mxu0  ;;  %v3246_v29 = vpop.f32.mrf.mxu1 }
 0x931   :  { %v3298_v49 = vadd.f32 %v3203_v27, %v596_v26  ;;  %v9513_v27 = vld [vmem:[#allocation119_spill] sm:$0xff] }
 0x932   :  { %v3205_v59 = vpop.f32.mrf.mxu0  ;;  %v3248_v10 = vpop.f32.mrf.mxu1  ;;  %v749_v26 = vadd.f32 %v9513_v27, %v9061_v12 }
 0x933   :  { %v3299_v24 = vadd.f32 %v3205_v59, %v598_v37  ;;  %v4549_v20 = vmul.f32 -1.442695, %v3298_v49  ;;  %v9514_v59 = vld [vmem:[#allocation121_spill] sm:$0xff]  ;;  %v9515_v49 = vld [vmem:[#allocation123_spill] sm:$0xff] }
 0x934   :  { %v3207_v14 = vpop.f32.mrf.mxu0  ;;  %v3250_v33 = vpop.f32.mrf.mxu1  ;;  %v751_v37 = vadd.f32 %v9514_v59, %v9062_v41  ;;  %v3326_v23 = vadd.f32 %v3246_v29, %v749_v26 }
 0x935   :  { %v3300_v34 = vadd.f32 %v3207_v14, %v600_v22  ;;  %v4550_v19 = vmul.f32 -1.442695, %v3299_v24  ;;  %5109 = vpow2.f32 %v4549_v20  ;;  %v753_v14 = vadd.f32 %v9515_v49, %v9061_v12 }
 0x936   :  { %v3209_v35 = vpop.f32.mrf.mxu0  ;;  %v3327_v22 = vadd.f32 %v3248_v10, %v751_v37  ;;  %v3252_v24 = vpop.f32.mrf.mxu1  ;;  %v4553_v20 = vmul.f32 -1.442695, %v3326_v23 }
 0x937   :  { %v3301_v4 = vadd.f32 %v3209_v35, %v602_v25  ;;  %v4551_v28 = vmul.f32 -1.442695, %v3300_v34  ;;  %5111 = vpow2.f32 %v4550_v19  ;;  %v9516_v35 = vld [vmem:[#allocation125_spill] sm:$0xff]  ;;  %v3328_v25 = vadd.f32 %v3250_v33, %v753_v14 }
 0x938   :  { %v755_v30 = vadd.f32 %v9516_v35, %v9062_v41  ;;  %v4554_v19 = vmul.f32 -1.442695, %v3327_v22 }
 0x939   :  { %v4552_v11 = vmul.f32 -1.442695, %v3301_v4  ;;  %5113 = vpow2.f32 %v4551_v28  ;;  %v4555_v28 = vmul.f32 -1.442695, %v3328_v25 }
 0x93a   :  { %v3329_v34 = vadd.f32 %v3252_v24, %v755_v30 }
 0x93b   :  { %5115 = vpow2.f32 %v4552_v11 }
 0x93c   :  { %5117 = vpow2.f32 %v4553_v20  ;;  %v4556_v42 = vmul.f32 -1.442695, %v3329_v34 }
 0x93d   :  { %5119 = vpow2.f32 %v4554_v19 }
 0x93e   :  { %5121 = vpow2.f32 %v4555_v28 }
 0x93f   :  { %5123 = vpow2.f32 %v4556_v42  ;;  %v9517_v42 = vld [vmem:[#allocation130_spill] sm:$0xff] }
 0x940   :  { %v902_v19 = vadd.f32 %v9517_v42, %v6117_v40 }
 0x942   :  { %v5110_v4 = vpop.eup %5109 }
 0x943   :  { %v3314_v59 = vadd.f32 1.0, %v5110_v4 }
 0x944   :  { %v5112_v27 = vpop.eup %5111 }
 0x945   :  { %v3315_v11 = vadd.f32 1.0, %v5112_v27  ;;  %5125 = vrcp.f32 %v3314_v59  ;;  %v9518_v59 = vld [vmem:[#allocation132_spill] sm:$0xff] }
 0x946   :  { %v5114_v29 = vpop.eup %5113 }
 0x947   :  { %v3316_v10 = vadd.f32 1.0, %v5114_v29  ;;  %5127 = vrcp.f32 %v3315_v11  ;;  %v904_v29 = vadd.f32 %v9518_v59, %v6120_v50 }
 0x948   :  { %v5116_v26 = vpop.eup %5115 }
 0x949   :  { %v3317_v37 = vadd.f32 1.0, %v5116_v26  ;;  %5129 = vrcp.f32 %v3316_v10  ;;  %v5118_v33 = vpop.eup %5117 }
 0x94a   :  { %v5120_v23 = vpop.eup %5119  ;;  %v3342_v14 = vadd.f32 1.0, %v5118_v33 }
 0x94b   :  { %5131 = vrcp.f32 %v3317_v37  ;;  %v5122_v49 = vpop.eup %5121  ;;  %v3343_v35 = vadd.f32 1.0, %v5120_v23 }
 0x94c   :  { %v5124_v24 = vpop.eup %5123  ;;  %v3344_v20 = vadd.f32 1.0, %v5122_v49  ;;  %5133 = vrcp.f32 %v3342_v14  ;;  %v9519_v49 = vld [vmem:[#allocation134_spill] sm:$0xff] }
 0x94d   :  { %v3345_v11 = vadd.f32 1.0, %v5124_v24  ;;  %5135 = vrcp.f32 %v3343_v35  ;;  %v9520_v24 = vld [vmem:[#allocation136_spill] sm:$0xff] }
 0x94e   :  { %5137 = vrcp.f32 %v3344_v20  ;;  %v908_v35 = vadd.f32 %v9520_v24, %v6120_v50 }
 0x952   :  { %v5126_v25 = vpop.eup %5125 }
 0x954   :  { %v5128_v27 = vpop.eup %5127 }
 0x956   :  { %v5130_v23 = vpop.eup %5129 }
 0x958   :  { %v5132_v42 = vpop.eup %5131 }
 0x970   :  { %v3289_v22 = vpop.f32.mrf.mxu0 }
 0x971   :  { %v3354_v30 = vadd.f32 %v3289_v22, %v6128_v58  ;;  %v906_v22 = vadd.f32 %v9519_v49, %v6117_v40 }
 0x972   :  { %v3291_v34 = vpop.f32.mrf.mxu0 }
 0x973   :  { %v3358_v4 = vmul.f32 %v5126_v25, %v3354_v30  ;;  %v3355_v28 = vadd.f32 %v3291_v34, %v6124_v39 }
 0x974   :  { %v3293_v26 = vpop.f32.mrf.mxu0 }
 0x975   :  { %v3362_v10 = vadd.f32 %v3358_v4, %v902_v19  ;;  %v3359_v37 = vmul.f32 %v5128_v27, %v3355_v28  ;;  %v3356_v33 = vadd.f32 %v3293_v26, %v6128_v58  ;;  %v5134_v27 = vpop.eup %5133 }
 0x976   :  { %v3295_v14 = vpop.f32.mrf.mxu0  ;;  %v5136_v59 = vpop.eup %5135  ;;  %v3370_v26 = vsub.f32 1.0, %v5134_v27 }
 0x977   :  { %5139 = vtanh.f32 %v3362_v10  ;;  %v3363_v30 = vadd.f32 %v3359_v37, %v904_v29  ;;  %v3360_v25 = vmul.f32 %v5130_v23, %v3356_v33  ;;  %v3357_v34 = vadd.f32 %v3295_v14, %v6124_v39  ;;  %v5138_v20 = vpop.eup %5137 }
 0x978   :  { %5141 = vrcp.f32 %v3345_v11  ;;  %v3371_v37 = vsub.f32 1.0, %v5136_v59  ;;  %v3378_v23 = vmul.f32 %v5134_v27, %v7628_v57  ;;  %v3379_v14 = vmul.f32 %v5136_v59, %v7630_v1  ;;  %v7797_v59 = vld [vmem:[#allocation8 + $0x150] ss:$24 sps:$4 sm:$0xff]  }
 0x979   :  { %5143 = vtanh.f32 %v3363_v30  ;;  %v3364_v19 = vadd.f32 %v3360_v25, %v906_v22  ;;  %v3361_v4 = vmul.f32 %v5132_v42, %v3357_v34  ;;  %v3372_v30 = vsub.f32 1.0, %v5138_v20 }
 0x97b   :  { %5145 = vtanh.f32 %v3364_v19  ;;  %v3365_v28 = vadd.f32 %v3361_v4, %v908_v35  ;;  %v3380_v35 = vmul.f32 %v5138_v20, %v7634_v56  ;;  %v7791_v56 = vld [vmem:[#allocation8 + $0x160] ss:$24 sps:$4 sm:$0xff]   ;;  %v7800_v20 = vld [vmem:[#allocation8 + $0x124] ss:$24 sps:$4 sm:$0xff]  }
 0x97d   :  { %5147 = vtanh.f32 %v3365_v28 }
 0x984   :  { %v5140_v10 = vpop.eup %5139 }
 0x985   :  { %v5142_v29 = vpop.eup %5141  ;;  %v3374_v33 = vmul.f32 %v5140_v10, %v3370_v26  ;;  %v7803_v10 = vld [vmem:[#allocation8 + $0x130] ss:$24 sps:$4 sm:$0xff]  }
 0x986   :  { %v5144_v11 = vpop.eup %5143  ;;  %v3373_v34 = vsub.f32 1.0, %v5142_v29  ;;  %v3381_v28 = vmul.f32 %v5142_v29, %v7636_v7  ;;  %v7794_v7 = vld [vmem:[#allocation8 + $0x134] ss:$24 sps:$4 sm:$0xff]   ;;  %v7806_v29 = vld [vmem:[#allocation8 + $0x104] ss:$24 sps:$4 sm:$0xff]  }
 0x987   :  { %v3375_v49 = vmul.f32 %v5144_v11, %v3371_v37  ;;  %v7773_v22 = vadd.f32 %v3378_v23, %v3374_v33  ;;  %v7809_v37 = vld [vmem:[#allocation8 + $0x120] ss:$24 sps:$4 sm:$0xff]   ;;  %v7812_v33 = vld [vmem:[#allocation8 + $0xf4] ss:$24 sps:$4 sm:$0xff]  }
 0x988   :  { %v5146_v25 = vpop.eup %5145  ;;  %v7815_v23 = vld [vmem:[#allocation8 + $0x100] ss:$24 sps:$4 sm:$0xff]   ;;  %v7818_v11 = vld [vmem:[#allocation8 + $0xd4] ss:$24 sps:$4 sm:$0xff]  }
 0x989   :  { %v7775_v42 = vadd.f32 %v3379_v14, %v3375_v49  ;;  %v3376_v24 = vmul.f32 %v5146_v25, %v3372_v30  ;;  %v7821_v49 = vld [vmem:[#allocation8 + $0xf0] ss:$24 sps:$4 sm:$0xff]   ;;  %v7824_v14 = vld [vmem:[#allocation8 + $0xc4] ss:$24 sps:$4 sm:$0xff]  }
 0x98a   :  { %v5148_v19 = vpop.eup %5147  ;;  %v7827_v30 = vld [vmem:[#allocation8 + $0xd0] ss:$24 sps:$4 sm:$0xff]   ;;  %v7830_v25 = vld [vmem:[#allocation8 + $0xa4] ss:$24 sps:$4 sm:$0xff]  }
 0x98b   :  { %v3377_v4 = vmul.f32 %v5148_v19, %v3373_v34  ;;  %v7779_v26 = vadd.f32 %v3380_v35, %v3376_v24  ;;  %v7833_v34 = vld [vmem:[#allocation8 + $0xc0] ss:$24 sps:$4 sm:$0xff]   ;;  %v7836_v24 = vld [vmem:[#allocation8 + $0x94] ss:$24 sps:$4 sm:$0xff]  }
 0x98c   :  { %9521 = vst [vmem:[#allocation19_spill] sm:$0xff] %v7836_v24  ;;  %v7839_v35 = vld [vmem:[#allocation8 + $0xa0] ss:$24 sps:$4 sm:$0xff]   ;;  %v7842_v19 = vld [vmem:[#allocation8 + $0x74] ss:$24 sps:$4 sm:$0xff]  }
 0x98d   :  { %v7781_v57 = vadd.f32 %v3381_v28, %v3377_v4  ;;  %v7787_v27 = vpack.c.bf16 %v7779_v26, %v7773_v22  ;;  %9522 = vst [vmem:[#allocation79_spill] sm:$0xff] %v7839_v35  ;;  %9523 = vst [vmem:[#allocation59_spill] sm:$0xff] %v7842_v19  ;;  %v7845_v4 = vld [vmem:[#allocation8 + $0x90] ss:$24 sps:$4 sm:$0xff]   ;;  %v7848_v28 = vld [vmem:[#allocation8 + $0x64] ss:$24 sps:$4 sm:$0xff]  }
 0x98e   :  { %9524 = vst [vmem:[#allocation24_spill] sm:$0xff] %v7845_v4  ;;  %9525 = vst [vmem:[#allocation25_spill] sm:$0xff] %v7848_v28 }
 0x98f   :  { %v3400_v1 = vpack.c.bf16 %v7781_v57, %v7775_v42 }
 0x991   :  { %3433 = vmatprep.mubr.bf16.mxu1 %v3400_v1  ;;  %3476 = vmatprep.mubr.bf16.mxu0 %v3400_v1 }
 0x992   :  { %3434 = vmatmul.mubr.bf16.vlgmr.msra.gmra.mxu1 %v7787_v27  ;;  %3477 = vmatmul.mubr.bf16.vlgmr.msra.gmra.mxu0 %v7787_v27 }
 0x993   :  { %3488 = vmatpush1.bf16.msra.mxu1 %v7791_v56  ;;  %3519 = vmatprep.mubr.bf16.mxu1 %v3400_v1  ;;  %v7851_v1 = vld [vmem:[#allocation8 + $0x70] ss:$24 sps:$4 sm:$0xff]  }
 0x994   :  { %3489 = vmatprep.subr.bf16.mxu1 %v7794_v7  ;;  %3634 = vmatpush1.bf16.msra.mxu0 %v7797_v59  ;;  %9526 = vst [vmem:[#allocation26_spill] sm:$0xff] %v7851_v1 }
 0x995   :  { %3635 = vmatprep.subr.bf16.mxu0 %v7800_v20 }
 0x997   :  { %3490 = vmatpush1.bf16.msra.mxu1 %v7803_v10 }
 0x998   :  { %3491 = vmatprep.subr.bf16.mxu1 %v7806_v29  ;;  %3636 = vmatpush1.bf16.msra.mxu0 %v7809_v37 }
 0x999   :  { %3637 = vmatprep.subr.bf16.mxu0 %v7812_v33 }
 0x99b   :  { %3492 = vmatpush1.bf16.msra.mxu1 %v7815_v23 }
 0x99c   :  { %3493 = vmatprep.subr.bf16.mxu1 %v7818_v11  ;;  %3638 = vmatpush1.bf16.msra.mxu0 %v7821_v49 }
 0x99d   :  { %3639 = vmatprep.subr.bf16.mxu0 %v7824_v14 }
 0x99f   :  { %3494 = vmatpush1.bf16.msra.mxu1 %v7827_v30 }
 0x9a0   :  { %3495 = vmatprep.subr.bf16.mxu1 %v7830_v25  ;;  %3640 = vmatpush1.bf16.msra.mxu0 %v7833_v34 }
 0x9a1   :  { %3641 = vmatprep.subr.bf16.mxu0 %v7836_v24  ;;  %v7854_v24 = vld [vmem:[#allocation8 + $0x44] ss:$24 sps:$4 sm:$0xff]  }
 0x9a2   :  { %9527 = vst [vmem:[#allocation27_spill] sm:$0xff] %v7854_v24 }
 0x9a3   :  { %3496 = vmatpush1.bf16.msra.mxu1 %v7839_v35  ;;  %v7857_v35 = vld [vmem:[#allocation8 + $0x60] ss:$24 sps:$4 sm:$0xff]  }
 0x9a4   :  { %3497 = vmatprep.subr.bf16.mxu1 %v7842_v19  ;;  %3642 = vmatpush1.bf16.msra.mxu0 %v7845_v4  ;;  %9528 = vst [vmem:[#allocation96_spill] sm:$0xff] %v7857_v35  ;;  %v7860_v19 = vld [vmem:[#allocation8 + $0x34] ss:$24 sps:$4 sm:$0xff]   ;;  %v7863_v4 = vld [vmem:[#allocation8 + $0x40] ss:$24 sps:$4 sm:$0xff]  }
 0x9a5   :  { %3643 = vmatprep.subr.bf16.mxu0 %v7848_v28  ;;  %9529 = vst [vmem:[#allocation97_spill] sm:$0xff] %v7860_v19  ;;  %9530 = vst [vmem:[#allocation99_spill] sm:$0xff] %v7863_v4  ;;  %v7866_v28 = vld [vmem:[#allocation8 + $0x14] ss:$24 sps:$4 sm:$0xff]  }
 0x9a6   :  { %9531 = vst [vmem:[#allocation101_spill] sm:$0xff] %v7866_v28 }
 0x9a7   :  { %3498 = vmatpush1.bf16.msra.mxu1 %v7851_v1  ;;  %v7869_v1 = vld [vmem:[#allocation8 + $0x30] ss:$24 sps:$4 sm:$0xff]  }
 0x9a8   :  { %3499 = vmatprep.subr.bf16.mxu1 %v7854_v24  ;;  %3644 = vmatpush1.bf16.msra.mxu0 %v7857_v35  ;;  %9532 = vst [vmem:[#allocation106_spill] sm:$0xff] %v7869_v1  ;;  %v7872_v24 = vld [vmem:[#allocation8 + $0x4] ss:$24 sps:$4 sm:$0xff]   ;;  %v7875_v35 = vld [vmem:[#allocation8 + $0x10] ss:$24 sps:$4 sm:$0xff]  }
 0x9a9   :  { %3645 = vmatprep.subr.bf16.mxu0 %v7860_v19  ;;  %9533 = vst [vmem:[#allocation108_spill] sm:$0xff] %v7872_v24  ;;  %9534 = vst [vmem:[#allocation110_spill] sm:$0xff] %v7875_v35  ;;  %v7878_v19 = vld [vmem:[#allocation8 + $0x2e4] ss:$24 sps:$4 sm:$0xff]  }
 0x9aa   :  { %9535 = vst [vmem:[#allocation112_spill] sm:$0xff] %v7878_v19 }
 0x9ab   :  { %3500 = vmatpush1.bf16.msra.mxu1 %v7863_v4  ;;  %v7881_v4 = vld [vmem:[#allocation8] ss:$24 sps:$4 sm:$0xff]  }
 0x9ac   :  { %3501 = vmatprep.subr.bf16.mxu1 %v7866_v28  ;;  %3646 = vmatpush1.bf16.msra.mxu0 %v7869_v1  ;;  %9536 = vst [vmem:[#allocation28_spill] sm:$0xff] %v7881_v4  ;;  %v7884_v28 = vld [vmem:[#allocation8 + $0x2d4] ss:$24 sps:$4 sm:$0xff]   ;;  %v7887_v1 = vld [vmem:[#allocation8 + $0x2e0] ss:$24 sps:$4 sm:$0xff]  }
 0x9ad   :  { %3647 = vmatprep.subr.bf16.mxu0 %v7872_v24  ;;  %9537 = vst [vmem:[#allocation29_spill] sm:$0xff] %v7884_v28  ;;  %9538 = vst [vmem:[#allocation30_spill] sm:$0xff] %v7887_v1  ;;  %v7890_v24 = vld [vmem:[#allocation8 + $0x2b4] ss:$24 sps:$4 sm:$0xff]  }
 0x9ae   :  { %9539 = vst [vmem:[#allocation31_spill] sm:$0xff] %v7890_v24 }
 0x9af   :  { %3502 = vmatpush1.bf16.msra.mxu1 %v7875_v35  ;;  %v7893_v35 = vld [vmem:[#allocation8 + $0x2d0] ss:$24 sps:$4 sm:$0xff]  }
 0x9b0   :  { %3503 = vmatprep.subr.bf16.mxu1 %v7878_v19  ;;  %3648 = vmatpush1.bf16.msra.mxu0 %v7881_v4  ;;  %9540 = vst [vmem:[#allocation103_spill] sm:$0xff] %v7893_v35  ;;  %v7896_v19 = vld [vmem:[#allocation8 + $0x2a4] ss:$24 sps:$4 sm:$0xff]   ;;  %v7899_v4 = vld [vmem:[#allocation8 + $0x2b0] ss:$24 sps:$4 sm:$0xff]  }
 0x9b1   :  { %3649 = vmatprep.subr.bf16.mxu0 %v7884_v28  ;;  %9541 = vst [vmem:[#allocation105_spill] sm:$0xff] %v7896_v19  ;;  %9542 = vst [vmem:[#allocation107_spill] sm:$0xff] %v7899_v4  ;;  %v7902_v28 = vld [vmem:[#allocation8 + $0x284] ss:$24 sps:$4 sm:$0xff]  }
 0x9b2   :  { %9543 = vst [vmem:[#allocation109_spill] sm:$0xff] %v7902_v28 }
 0x9b3   :  { %3504 = vmatpush2.bf16.msra.mxu1 %v7887_v1  ;;  %v7905_v1 = vld [vmem:[#allocation8 + $0x2a0] ss:$24 sps:$4 sm:$0xff]  }
 0x9b4   :  { %3505 = vmatprep.subr.bf16.mxu1 %v7890_v24  ;;  %3650 = vmatpush2.bf16.msra.mxu0 %v7893_v35  ;;  %9544 = vst [vmem:[#allocation114_spill] sm:$0xff] %v7905_v1  ;;  %v7908_v24 = vld [vmem:[#allocation8 + $0x274] ss:$24 sps:$4 sm:$0xff]   ;;  %v7911_v35 = vld [vmem:[#allocation8 + $0x280] ss:$24 sps:$4 sm:$0xff]  }
 0x9b5   :  { %3651 = vmatprep.subr.bf16.mxu0 %v7896_v19  ;;  %9545 = vst [vmem:[#allocation116_spill] sm:$0xff] %v7908_v24  ;;  %9546 = vst [vmem:[#allocation118_spill] sm:$0xff] %v7911_v35  ;;  %v7914_v19 = vld [vmem:[#allocation8 + $0x254] ss:$24 sps:$4 sm:$0xff]  }
 0x9b6   :  { %9547 = vst [vmem:[#allocation120_spill] sm:$0xff] %v7914_v19 }
 0x9b7   :  { %3506 = vmatpush2.bf16.msra.mxu1 %v7899_v4  ;;  %v7917_v4 = vld [vmem:[#allocation8 + $0x270] ss:$24 sps:$4 sm:$0xff]  }
 0x9b8   :  { %3507 = vmatprep.subr.bf16.mxu1 %v7902_v28  ;;  %3652 = vmatpush2.bf16.msra.mxu0 %v7905_v1  ;;  %9548 = vst [vmem:[#allocation82_spill] sm:$0xff] %v7917_v4  ;;  %v7920_v28 = vld [vmem:[#allocation8 + $0x244] ss:$24 sps:$4 sm:$0xff]   ;;  %v7923_v1 = vld [vmem:[#allocation8 + $0x250] ss:$24 sps:$4 sm:$0xff]  }
 0x9b9   :  { %3653 = vmatprep.subr.bf16.mxu0 %v7908_v24  ;;  %9549 = vst [vmem:[#allocation85_spill] sm:$0xff] %v7920_v28  ;;  %9550 = vst [vmem:[#allocation88_spill] sm:$0xff] %v7923_v1  ;;  %v7926_v24 = vld [vmem:[#allocation8 + $0x224] ss:$24 sps:$4 sm:$0xff]  }
 0x9ba   :  { %9551 = vst [vmem:[#allocation92_spill] sm:$0xff] %v7926_v24 }
 0x9bb   :  { %3508 = vmatpush2.bf16.msra.mxu1 %v7911_v35  ;;  %v7929_v35 = vld [vmem:[#allocation8 + $0x240] ss:$24 sps:$4 sm:$0xff]  }
 0x9bc   :  { %3509 = vmatprep.subr.bf16.mxu1 %v7914_v19  ;;  %3654 = vmatpush2.bf16.msra.mxu0 %v7917_v4  ;;  %9552 = vst [vmem:[#allocation94_spill] sm:$0xff] %v7929_v35  ;;  %v7932_v19 = vld [vmem:[#allocation8 + $0x214] ss:$24 sps:$4 sm:$0xff]   ;;  %v7935_v4 = vld [vmem:[#allocation8 + $0x220] ss:$24 sps:$4 sm:$0xff]  }
 0x9bd   :  { %3655 = vmatprep.subr.bf16.mxu0 %v7920_v28  ;;  %9553 = vst [vmem:[#allocation44_spill] sm:$0xff] %v7932_v19  ;;  %9554 = vst [vmem:[#allocation45_spill] sm:$0xff] %v7935_v4  ;;  %v7938_v28 = vld [vmem:[#allocation8 + $0x1f4] ss:$24 sps:$4 sm:$0xff]  }
 0x9be   :  { %9555 = vst [vmem:[#allocation20_spill] sm:$0xff] %v7938_v28 }
 0x9bf   :  { %3510 = vmatpush2.bf16.msra.mxu1 %v7923_v1  ;;  %v7941_v1 = vld [vmem:[#allocation8 + $0x210] ss:$24 sps:$4 sm:$0xff]  }
 0x9c0   :  { %3511 = vmatprep.subr.bf16.mxu1 %v7926_v24  ;;  %3656 = vmatpush2.bf16.msra.mxu0 %v7929_v35  ;;  %9556 = vst [vmem:[#allocation21_spill] sm:$0xff] %v7941_v1  ;;  %v7944_v24 = vld [vmem:[#allocation8 + $0x1e4] ss:$24 sps:$4 sm:$0xff]   ;;  %v7947_v35 = vld [vmem:[#allocation8 + $0x1f0] ss:$24 sps:$4 sm:$0xff]  }
 0x9c1   :  { %3657 = vmatprep.subr.bf16.mxu0 %v7932_v19  ;;  %9557 = vst [vmem:[#allocation22_spill] sm:$0xff] %v7944_v24  ;;  %9558 = vst [vmem:[#allocation23_spill] sm:$0xff] %v7947_v35  ;;  %v7950_v19 = vld [vmem:[#allocation8 + $0x1c4] ss:$24 sps:$4 sm:$0xff]  }
 0x9c2   :  { %9559 = vst [vmem:[#allocation90_spill] sm:$0xff] %v7950_v19 }
 0x9c3   :  { %3512 = vmatpush2.bf16.msra.mxu1 %v7935_v4  ;;  %v7953_v4 = vld [vmem:[#allocation8 + $0x1e0] ss:$24 sps:$4 sm:$0xff]  }
 0x9c4   :  { %3513 = vmatprep.subr.bf16.mxu1 %v7938_v28  ;;  %3658 = vmatpush2.bf16.msra.mxu0 %v7941_v1  ;;  %9560 = vst [vmem:[#allocation91_spill] sm:$0xff] %v7953_v4  ;;  %v7956_v28 = vld [vmem:[#allocation8 + $0x1b4] ss:$24 sps:$4 sm:$0xff]   ;;  %v7959_v1 = vld [vmem:[#allocation8 + $0x1c0] ss:$24 sps:$4 sm:$0xff]  }
 0x9c5   :  { %3659 = vmatprep.subr.bf16.mxu0 %v7944_v24  ;;  %9561 = vst [vmem:[#allocation93_spill] sm:$0xff] %v7956_v28  ;;  %9562 = vst [vmem:[#allocation95_spill] sm:$0xff] %v7959_v1  ;;  %v7962_v24 = vld [vmem:[#allocation8 + $0x194] ss:$24 sps:$4 sm:$0xff]  }
 0x9c6   :  { %9563 = vst [vmem:[#allocation98_spill] sm:$0xff] %v7962_v24 }
 0x9c7   :  { %3514 = vmatpush2.bf16.msra.mxu1 %v7947_v35  ;;  %v7965_v35 = vld [vmem:[#allocation8 + $0x1b0] ss:$24 sps:$4 sm:$0xff]  }
 0x9c8   :  { %3515 = vmatprep.subr.bf16.mxu1 %v7950_v19  ;;  %3660 = vmatpush2.bf16.msra.mxu0 %v7953_v4  ;;  %9564 = vst [vmem:[#allocation33_spill] sm:$0xff] %v7965_v35  ;;  %v7968_v19 = vld [vmem:[#allocation8 + $0x184] ss:$24 sps:$4 sm:$0xff]   ;;  %v7971_v4 = vld [vmem:[#allocation8 + $0x190] ss:$24 sps:$4 sm:$0xff]  }
 0x9c9   :  { %3661 = vmatprep.subr.bf16.mxu0 %v7956_v28  ;;  %9565 = vst [vmem:[#allocation34_spill] sm:$0xff] %v7968_v19  ;;  %9566 = vst [vmem:[#allocation35_spill] sm:$0xff] %v7971_v4  ;;  %v7974_v28 = vld [vmem:[#allocation8 + $0x15c] ss:$24 sps:$4 sm:$0xff]  }
 0x9ca   :  { %9567 = vst [vmem:[#allocation36_spill] sm:$0xff] %v7974_v28 }
 0x9cb   :  { %3516 = vmatpush2.bf16.msra.mxu1 %v7959_v1  ;;  %v7977_v1 = vld [vmem:[#allocation8 + $0x180] ss:$24 sps:$4 sm:$0xff]  }
 0x9cc   :  { %3517 = vmatprep.subr.bf16.mxu1 %v7962_v24  ;;  %3662 = vmatpush2.bf16.msra.mxu0 %v7965_v35  ;;  %9568 = vst [vmem:[#allocation111_spill] sm:$0xff] %v7977_v1  ;;  %v7980_v24 = vld [vmem:[#allocation8 + $0x164] ss:$24 sps:$4 sm:$0xff]  }
 0x9cd   :  { %3663 = vmatprep.subr.bf16.mxu0 %v7968_v19  ;;  %9569 = vst [vmem:[#allocation113_spill] sm:$0xff] %v7980_v24 }
 0x9cf   :  { %3518 = vmatpush2.bf16.msra.mxu1 %v7971_v4 }
 0x9d0   :  { %3676 = vmatprep.subr.bf16.mxu1 %v7974_v28  ;;  %3664 = vmatpush2.bf16.msra.mxu0 %v7977_v1 }
 0x9d1   :  { %3719 = vmatprep.subr.bf16.mxu0 %v7980_v24 }
 0x9d2   :  { %3520 = vmatmul.mubr.bf16.vlgmr.msra.gmra.mxu1 %v7787_v27 }
 0x9d3   :  { %3677 = vmatpush1.bf16.msra.mxu1 %v9476_v21  ;;  %v8015_v21 = vld [vmem:[#allocation8 + $0x154] ss:$24 sps:$4 sm:$0xff]  }
 0x9d4   :  { %3678 = vmatprep.subr.bf16.mxu1 %v9477_v5 }
 0x9d7   :  { %3679 = vmatpush1.bf16.msra.mxu1 %v9478_v8 }
 0x9d8   :  { %3680 = vmatprep.subr.bf16.mxu1 %v9479_v43  ;;  %v9570_v43 = vld [vmem:[#allocation41_spill] sm:$0xff] }
 0x9db   :  { %3681 = vmatpush1.bf16.msra.mxu1 %v9480_v0  ;;  %v606_v0 = vadd.f32 %v9570_v43, %v6050_v54  ;;  %v9578_v43 = vld [vmem:[#allocation133_spill] sm:$0xff] }
 0x9dc   :  { %3682 = vmatprep.subr.bf16.mxu1 %v9481_v62 }
 0x9df   :  { %3683 = vmatpush1.bf16.msra.mxu1 %v9482_v9  ;;  %v9571_v9 = vld [vmem:[#allocation32_spill] sm:$0xff] }
 0x9e0   :  { %3684 = vmatprep.subr.bf16.mxu1 %v9483_v63  ;;  %v9572_v63 = vld [vmem:[#allocation42_spill] sm:$0xff] }
 0x9e3   :  { %3685 = vmatpush1.bf16.msra.mxu1 %v9484_v15  ;;  %v608_v15 = vadd.f32 %v9572_v63, %v9571_v9 }
 0x9e4   :  { %3686 = vmatprep.subr.bf16.mxu1 %v9485_v13 }
 0x9e7   :  { %3687 = vmatpush1.bf16.msra.mxu1 %v9486_v45  ;;  %v9573_v45 = vld [vmem:[#allocation43_spill] sm:$0xff] }
 0x9e8   :  { %3688 = vmatprep.subr.bf16.mxu1 %v9487_v6  ;;  %v610_v6 = vadd.f32 %v9573_v45, %v6050_v54 }
 0x9eb   :  { %3689 = vmatpush1.bf16.msra.mxu1 %v9488_v32 }
 0x9ec   :  { %3690 = vmatprep.subr.bf16.mxu1 %v9489_v31 }
 0x9ef   :  { %3691 = vmatpush1.bf16.msra.mxu1 %v9490_v61  ;;  %v9574_v61 = vld [vmem:[#allocation46_spill] sm:$0xff] }
 0x9f0   :  { %3692 = vmatprep.subr.bf16.mxu1 %v9491_v44  ;;  %v612_v44 = vadd.f32 %v9574_v61, %v9571_v9 }
 0x9f3   :  { %3693 = vmatpush2.bf16.msra.mxu1 %v9492_v3 }
 0x9f4   :  { %3694 = vmatprep.subr.bf16.mxu1 %v9493_v2 }
 0x9f7   :  { %3695 = vmatpush2.bf16.msra.mxu1 %v9494_v38 }
 0x9f8   :  { %3696 = vmatprep.subr.bf16.mxu1 %v9495_v17 }
 0x9fb   :  { %3697 = vmatpush2.bf16.msra.mxu1 %v9496_v36 }
 0x9fc   :  { %3698 = vmatprep.subr.bf16.mxu1 %v9497_v18 }
 0x9ff   :  { %3699 = vmatpush2.bf16.msra.mxu1 %v9498_v53 }
 0xa00   :  { %3700 = vmatprep.subr.bf16.mxu1 %v9499_v51 }
 0xa03   :  { %3701 = vmatpush2.bf16.msra.mxu1 %v9500_v60  ;;  %v9575_v60 = vld [vmem:[#allocation127_spill] sm:$0xff] }
 0xa04   :  { %3702 = vmatprep.subr.bf16.mxu1 %v9501_v16  ;;  %v759_v16 = vadd.f32 %v9575_v60, %v9061_v12 }
 0xa07   :  { %3703 = vmatpush2.bf16.msra.mxu1 %v9502_v52 }
 0xa08   :  { %3704 = vmatprep.subr.bf16.mxu1 %v9503_v46  ;;  %v9576_v46 = vld [vmem:[#allocation129_spill] sm:$0xff] }
 0xa0b   :  { %3705 = vmatpush2.bf16.msra.mxu1 %v9504_v47  ;;  %v761_v47 = vadd.f32 %v9576_v46, %v9062_v41 }
 0xa0c   :  { %3706 = vmatprep.subr.bf16.mxu1 %v9505_v55 }
 0xa0f   :  { %3707 = vmatpush2.bf16.msra.mxu1 %v9506_v48  ;;  %v9577_v48 = vld [vmem:[#allocation131_spill] sm:$0xff] }
 0xa10   :  { %3865 = vmatprep.subr.bf16.mxu1 %v8015_v21  ;;  %v763_v27 = vadd.f32 %v9577_v48, %v9061_v12 }
 0xa52   :  { %v3435_v5 = vpop.f32.mrf.mxu1  ;;  %v3478_v2 = vpop.f32.mrf.mxu0 }
 0xa53   :  { %v3530_v13 = vadd.f32 %v3435_v5, %v606_v0  ;;  %v3558_v55 = vadd.f32 %v3478_v2, %v759_v16  ;;  %v765_v0 = vadd.f32 %v9578_v43, %v9062_v41 }
 0xa54   :  { %v3437_v8 = vpop.f32.mrf.mxu1  ;;  %v3480_v18 = vpop.f32.mrf.mxu0 }
 0xa55   :  { %v3531_v32 = vadd.f32 %v3437_v8, %v608_v15  ;;  %v4557_v3 = vmul.f32 -1.442695, %v3530_v13  ;;  %v3559_v5 = vadd.f32 %v3480_v18, %v761_v47  ;;  %v4561_v63 = vmul.f32 -1.442695, %v3558_v55 }
 0xa56   :  { %v3439_v62 = vpop.f32.mrf.mxu1  ;;  %v3482_v52 = vpop.f32.mrf.mxu0 }
 0xa57   :  { %v3532_v38 = vadd.f32 %v3439_v62, %v610_v6  ;;  %v4558_v17 = vmul.f32 -1.442695, %v3531_v32  ;;  %5149 = vpow2.f32 %v4557_v3  ;;  %v3560_v62 = vadd.f32 %v3482_v52, %v763_v27  ;;  %v9579_v27 = vld [vmem:[#allocation138_spill] sm:$0xff] }
 0xa58   :  { %v3441_v31 = vpop.f32.mrf.mxu1  ;;  %v3484_v8 = vpop.f32.mrf.mxu0  ;;  %v4562_v13 = vmul.f32 -1.442695, %v3559_v5  ;;  %v912_v5 = vadd.f32 %v9579_v27, %v6117_v40 }
 0xa59   :  { %v3533_v36 = vadd.f32 %v3441_v31, %v612_v44  ;;  %v4559_v53 = vmul.f32 -1.442695, %v3532_v38  ;;  %5151 = vpow2.f32 %v4558_v17  ;;  %v3561_v15 = vadd.f32 %v3484_v8, %v765_v0 }
 0xa5a   :  { %v4563_v6 = vmul.f32 -1.442695, %v3560_v62  ;;  %v9580_v62 = vld [vmem:[#allocation140_spill] sm:$0xff] }
 0xa5b   :  { %v4560_v51 = vmul.f32 -1.442695, %v3533_v36  ;;  %5153 = vpow2.f32 %v4559_v53  ;;  %v4564_v31 = vmul.f32 -1.442695, %v3561_v15 }
 0xa5d   :  { %5155 = vpow2.f32 %v4560_v51 }
 0xa5e   :  { %5157 = vpow2.f32 %v4561_v63  ;;  %v914_v63 = vadd.f32 %v9580_v62, %v6120_v50 }
 0xa5f   :  { %5159 = vpow2.f32 %v4562_v13 }
 0xa60   :  { %5161 = vpow2.f32 %v4563_v6 }
 0xa61   :  { %5163 = vpow2.f32 %v4564_v31 }
 0xa64   :  { %v5150_v45 = vpop.eup %5149 }
 0xa65   :  { %v3546_v61 = vadd.f32 1.0, %v5150_v45 }
 0xa66   :  { %v5152_v32 = vpop.eup %5151 }
 0xa67   :  { %v3547_v3 = vadd.f32 1.0, %v5152_v32  ;;  %5165 = vrcp.f32 %v3546_v61  ;;  %v9581_v61 = vld [vmem:[#allocation142_spill] sm:$0xff] }
 0xa68   :  { %v5154_v44 = vpop.eup %5153 }
 0xa69   :  { %v3548_v38 = vadd.f32 1.0, %v5154_v44  ;;  %5167 = vrcp.f32 %v3547_v3  ;;  %v916_v44 = vadd.f32 %v9581_v61, %v6117_v40 }
 0xa6a   :  { %v5156_v2 = vpop.eup %5155 }
 0xa6b   :  { %v3549_v17 = vadd.f32 1.0, %v5156_v2  ;;  %5169 = vrcp.f32 %v3548_v38  ;;  %v5158_v36 = vpop.eup %5157 }
 0xa6c   :  { %v5160_v18 = vpop.eup %5159  ;;  %v3574_v51 = vadd.f32 1.0, %v5158_v36 }
 0xa6d   :  { %5171 = vrcp.f32 %v3549_v17  ;;  %v5162_v53 = vpop.eup %5161  ;;  %v3575_v52 = vadd.f32 1.0, %v5160_v18  ;;  %v9582_v18 = vld [vmem:[#allocation144_spill] sm:$0xff] }
 0xa6e   :  { %v5164_v16 = vpop.eup %5163  ;;  %v3576_v55 = vadd.f32 1.0, %v5162_v53  ;;  %5173 = vrcp.f32 %v3574_v51  ;;  %v918_v53 = vadd.f32 %v9582_v18, %v6120_v50  ;;  %v9586_v18 = vld [vmem:[#allocation24_spill] sm:$0xff] }
 0xa6f   :  { %v3577_v15 = vadd.f32 1.0, %v5164_v16  ;;  %5175 = vrcp.f32 %v3575_v52 }
 0xa70   :  { %5177 = vrcp.f32 %v3576_v55 }
 0xa74   :  { %v5166_v47 = vpop.eup %5165 }
 0xa76   :  { %v5168_v0 = vpop.eup %5167 }
 0xa78   :  { %v5170_v31 = vpop.eup %5169 }
 0xa7a   :  { %v5172_v36 = vpop.eup %5171 }
 0xa7b   :  { %v5174_v52 = vpop.eup %5173 }
 0xa7c   :  { %v3602_v55 = vsub.f32 1.0, %v5174_v52 }
 0xa92   :  { %v3521_v60 = vpop.f32.mrf.mxu1 }
 0xa93   :  { %v3586_v46 = vadd.f32 %v3521_v60, %v6128_v58 }
 0xa94   :  { %v3523_v48 = vpop.f32.mrf.mxu1 }
 0xa95   :  { %v3590_v8 = vmul.f32 %v5166_v47, %v3586_v46  ;;  %v3587_v43 = vadd.f32 %v3523_v48, %v6124_v39  ;;  %v5176_v46 = vpop.eup %5175 }
 0xa96   :  { %v3525_v13 = vpop.f32.mrf.mxu1  ;;  %v5178_v47 = vpop.eup %5177 }
 0xa97   :  { %v3594_v45 = vadd.f32 %v3590_v8, %v912_v5  ;;  %v3591_v6 = vmul.f32 %v5168_v0, %v3587_v43  ;;  %v3588_v32 = vadd.f32 %v3525_v13, %v6128_v58  ;;  %v3603_v5 = vsub.f32 1.0, %v5176_v46 }
 0xa98   :  { %v3527_v3 = vpop.f32.mrf.mxu1  ;;  %v3610_v43 = vmul.f32 %v5174_v52, %v7773_v22  ;;  %v3612_v61 = vmul.f32 %v5178_v47, %v7779_v26  ;;  %v9583_v26 = vld [vmem:[#allocation19_spill] sm:$0xff]  ;;  %v9591_v52 = vld [vmem:[#allocation97_spill] sm:$0xff] }
 0xa99   :  { %5179 = vtanh.f32 %v3594_v45  ;;  %v3595_v2 = vadd.f32 %v3591_v6, %v914_v63  ;;  %v3592_v38 = vmul.f32 %v5170_v31, %v3588_v32  ;;  %v3589_v17 = vadd.f32 %v3527_v3, %v6124_v39 }
 0xa9a   :  { %5181 = vrcp.f32 %v3577_v15  ;;  %v3611_v63 = vmul.f32 %v5176_v46, %v7775_v42  ;;  %v3604_v15 = vsub.f32 1.0, %v5178_v47  ;;  %v9592_v46 = vld [vmem:[#allocation99_spill] sm:$0xff]  ;;  %v9593_v47 = vld [vmem:[#allocation101_spill] sm:$0xff] }
 0xa9b   :  { %5183 = vtanh.f32 %v3595_v2  ;;  %v3596_v51 = vadd.f32 %v3592_v38, %v916_v44  ;;  %v3593_v60 = vmul.f32 %v5172_v36, %v3589_v17  ;;  %v9585_v36 = vld [vmem:[#allocation59_spill] sm:$0xff] }
 0xa9d   :  { %5185 = vtanh.f32 %v3596_v51  ;;  %v3597_v16 = vadd.f32 %v3593_v60, %v918_v53  ;;  %v9587_v53 = vld [vmem:[#allocation25_spill] sm:$0xff]  ;;  %v9588_v51 = vld [vmem:[#allocation26_spill] sm:$0xff]  ;;  %v9589_v60 = vld [vmem:[#allocation27_spill] sm:$0xff] }
 0xa9f   :  { %5187 = vtanh.f32 %v3597_v16  ;;  %v9590_v16 = vld [vmem:[#allocation96_spill] sm:$0xff] }
 0xaa6   :  { %v5180_v48 = vpop.eup %5179 }
 0xaa7   :  { %v5182_v27 = vpop.eup %5181  ;;  %v3606_v8 = vmul.f32 %v5180_v48, %v3602_v55  ;;  %v9594_v55 = vld [vmem:[#allocation106_spill] sm:$0xff]  ;;  %v9595_v48 = vld [vmem:[#allocation108_spill] sm:$0xff] }
 0xaa8   :  { %v5184_v0 = vpop.eup %5183  ;;  %v3605_v6 = vsub.f32 1.0, %v5182_v27  ;;  %v3613_v2 = vmul.f32 %v5182_v27, %v7781_v57  ;;  %v9584_v57 = vld [vmem:[#allocation79_spill] sm:$0xff]  ;;  %v9596_v27 = vld [vmem:[#allocation110_spill] sm:$0xff] }
 0xaa9   :  { %v3607_v62 = vmul.f32 %v5184_v0, %v3603_v5  ;;  %v8048_v13 = vadd.f32 %v3610_v43, %v3606_v8  ;;  %v9597_v5 = vld [vmem:[#allocation112_spill] sm:$0xff]  ;;  %v9599_v43 = vld [vmem:[#allocation29_spill] sm:$0xff]  ;;  %v9600_v0 = vld [vmem:[#allocation30_spill] sm:$0xff] }
 0xaaa   :  { %v5186_v45 = vpop.eup %5185  ;;  %v9598_v8 = vld [vmem:[#allocation28_spill] sm:$0xff] }
 0xaab   :  { %v8050_v32 = vadd.f32 %v3611_v63, %v3607_v62  ;;  %v3608_v31 = vmul.f32 %v5186_v45, %v3604_v15  ;;  %v9601_v62 = vld [vmem:[#allocation31_spill] sm:$0xff]  ;;  %v9603_v15 = vld [vmem:[#allocation105_spill] sm:$0xff] }
 0xaac   :  { %v5188_v44 = vpop.eup %5187  ;;  %v9602_v63 = vld [vmem:[#allocation103_spill] sm:$0xff] }
 0xaad   :  { %v3609_v3 = vmul.f32 %v5188_v44, %v3605_v6  ;;  %v8054_v38 = vadd.f32 %v3612_v61, %v3608_v31  ;;  %v9604_v45 = vld [vmem:[#allocation107_spill] sm:$0xff]  ;;  %v9605_v6 = vld [vmem:[#allocation109_spill] sm:$0xff]  ;;  %v9606_v31 = vld [vmem:[#allocation114_spill] sm:$0xff] }
 0xaae   :  { %v9607_v61 = vld [vmem:[#allocation116_spill] sm:$0xff]  ;;  %v9608_v44 = vld [vmem:[#allocation118_spill] sm:$0xff] }
 0xaaf   :  { %v8056_v22 = vadd.f32 %v3613_v2, %v3609_v3  ;;  %v8062_v17 = vpack.c.bf16 %v8054_v38, %v8048_v13  ;;  %v9609_v3 = vld [vmem:[#allocation120_spill] sm:$0xff]  ;;  %v9610_v2 = vld [vmem:[#allocation82_spill] sm:$0xff] }
 0xab1   :  { %v3632_v42 = vpack.c.bf16 %v8056_v22, %v8050_v32 }
 0xab3   :  { %3665 = vmatprep.mubr.bf16.mxu0 %v3632_v42  ;;  %3708 = vmatprep.mubr.bf16.mxu1 %v3632_v42 }
 0xab4   :  { %3666 = vmatmul.mubr.bf16.vlgmr.msra.gmra.mxu0 %v8062_v17  ;;  %3709 = vmatmul.mubr.bf16.vlgmr.msra.gmra.mxu1 %v8062_v17 }
 0xab5   :  { %3720 = vmatpush1.bf16.msra.mxu0 %v7791_v56  ;;  %3751 = vmatprep.mubr.bf16.mxu0 %v3632_v42  ;;  %v9611_v42 = vld [vmem:[#allocation85_spill] sm:$0xff] }
 0xab6   :  { %3721 = vmatprep.subr.bf16.mxu0 %v7794_v7  ;;  %3866 = vmatpush1.bf16.msra.mxu1 %v7797_v59 }
 0xab7   :  { %3867 = vmatprep.subr.bf16.mxu1 %v7800_v20 }
 0xab9   :  { %3722 = vmatpush1.bf16.msra.mxu0 %v7803_v10 }
 0xaba   :  { %3723 = vmatprep.subr.bf16.mxu0 %v7806_v29  ;;  %3868 = vmatpush1.bf16.msra.mxu1 %v7809_v37 }
 0xabb   :  { %3869 = vmatprep.subr.bf16.mxu1 %v7812_v33 }
 0xabd   :  { %3724 = vmatpush1.bf16.msra.mxu0 %v7815_v23 }
 0xabe   :  { %3725 = vmatprep.subr.bf16.mxu0 %v7818_v11  ;;  %3870 = vmatpush1.bf16.msra.mxu1 %v7821_v49 }
 0xabf   :  { %3871 = vmatprep.subr.bf16.mxu1 %v7824_v14 }
 0xac1   :  { %3726 = vmatpush1.bf16.msra.mxu0 %v7827_v30 }
 0xac2   :  { %3727 = vmatprep.subr.bf16.mxu0 %v7830_v25  ;;  %3872 = vmatpush1.bf16.msra.mxu1 %v7833_v34 }
 0xac3   :  { %3873 = vmatprep.subr.bf16.mxu1 %v9583_v26 }
 0xac5   :  { %3728 = vmatpush1.bf16.msra.mxu0 %v9584_v57 }
 0xac6   :  { %3729 = vmatprep.subr.bf16.mxu0 %v9585_v36  ;;  %3874 = vmatpush1.bf16.msra.mxu1 %v9586_v18 }
 0xac7   :  { %3875 = vmatprep.subr.bf16.mxu1 %v9587_v53 }
 0xac9   :  { %3730 = vmatpush1.bf16.msra.mxu0 %v9588_v51 }
 0xaca   :  { %3731 = vmatprep.subr.bf16.mxu0 %v9589_v60  ;;  %3876 = vmatpush1.bf16.msra.mxu1 %v9590_v16 }
 0xacb   :  { %3877 = vmatprep.subr.bf16.mxu1 %v9591_v52 }
 0xacd   :  { %3732 = vmatpush1.bf16.msra.mxu0 %v9592_v46 }
 0xace   :  { %3733 = vmatprep.subr.bf16.mxu0 %v9593_v47  ;;  %3878 = vmatpush1.bf16.msra.mxu1 %v9594_v55 }
 0xacf   :  { %3879 = vmatprep.subr.bf16.mxu1 %v9595_v48 }
 0xad1   :  { %3734 = vmatpush1.bf16.msra.mxu0 %v9596_v27 }
 0xad2   :  { %3735 = vmatprep.subr.bf16.mxu0 %v9597_v5  ;;  %3880 = vmatpush1.bf16.msra.mxu1 %v9598_v8 }
 0xad3   :  { %3881 = vmatprep.subr.bf16.mxu1 %v9599_v43 }
 0xad5   :  { %3736 = vmatpush2.bf16.msra.mxu0 %v9600_v0 }
 0xad6   :  { %3737 = vmatprep.subr.bf16.mxu0 %v9601_v62  ;;  %3882 = vmatpush2.bf16.msra.mxu1 %v9602_v63  ;;  %v9612_v62 = vld [vmem:[#allocation88_spill] sm:$0xff] }
 0xad7   :  { %3883 = vmatprep.subr.bf16.mxu1 %v9603_v15  ;;  %v9613_v63 = vld [vmem:[#allocation92_spill] sm:$0xff]  ;;  %v9614_v15 = vld [vmem:[#allocation94_spill] sm:$0xff] }
 0xad9   :  { %3738 = vmatpush2.bf16.msra.mxu0 %v9604_v45  ;;  %v9615_v45 = vld [vmem:[#allocation44_spill] sm:$0xff] }
 0xada   :  { %3739 = vmatprep.subr.bf16.mxu0 %v9605_v6  ;;  %3884 = vmatpush2.bf16.msra.mxu1 %v9606_v31  ;;  %v9616_v6 = vld [vmem:[#allocation45_spill] sm:$0xff]  ;;  %v9617_v31 = vld [vmem:[#allocation20_spill] sm:$0xff] }
 0xadb   :  { %3885 = vmatprep.subr.bf16.mxu1 %v9607_v61  ;;  %v9618_v61 = vld [vmem:[#allocation21_spill] sm:$0xff] }
 0xadd   :  { %3740 = vmatpush2.bf16.msra.mxu0 %v9608_v44  ;;  %v9619_v44 = vld [vmem:[#allocation22_spill] sm:$0xff] }
 0xade   :  { %3741 = vmatprep.subr.bf16.mxu0 %v9609_v3  ;;  %3886 = vmatpush2.bf16.msra.mxu1 %v9610_v2  ;;  %v9620_v3 = vld [vmem:[#allocation23_spill] sm:$0xff]  ;;  %v9621_v2 = vld [vmem:[#allocation90_spill] sm:$0xff] }
 0xadf   :  { %3887 = vmatprep.subr.bf16.mxu1 %v9611_v42  ;;  %v9622_v42 = vld [vmem:[#allocation91_spill] sm:$0xff] }
 0xae1   :  { %3742 = vmatpush2.bf16.msra.mxu0 %v9612_v62  ;;  %v9623_v62 = vld [vmem:[#allocation93_spill] sm:$0xff] }
 0xae2   :  { %3743 = vmatprep.subr.bf16.mxu0 %v9613_v63  ;;  %3888 = vmatpush2.bf16.msra.mxu1 %v9614_v15  ;;  %v9624_v63 = vld [vmem:[#allocation95_spill] sm:$0xff]  ;;  %v9625_v15 = vld [vmem:[#allocation98_spill] sm:$0xff] }
 0xae3   :  { %3889 = vmatprep.subr.bf16.mxu1 %v9615_v45 }
 0xae5   :  { %3744 = vmatpush2.bf16.msra.mxu0 %v9616_v6 }
 0xae6   :  { %3745 = vmatprep.subr.bf16.mxu0 %v9617_v31  ;;  %3890 = vmatpush2.bf16.msra.mxu1 %v9618_v61 }
 0xae7   :  { %3891 = vmatprep.subr.bf16.mxu1 %v9619_v44  ;;  %v9660_v44 = vld [vmem:[#allocation50_spill] sm:$0xff] }
 0xae9   :  { %3746 = vmatpush2.bf16.msra.mxu0 %v9620_v3 }
 0xaea   :  { %3747 = vmatprep.subr.bf16.mxu0 %v9621_v2  ;;  %3892 = vmatpush2.bf16.msra.mxu1 %v9622_v42  ;;  %v8131_v42 = vld [vmem:[#allocation8 + $0x158] ss:$24 sps:$4 sm:$0xff]  }
 0xaeb   :  { %3893 = vmatprep.subr.bf16.mxu1 %v9623_v62  ;;  %9626 = vst [vmem:[#allocation115_spill] sm:$0xff] %v8131_v42  ;;  %v9659_v62 = vld [vmem:[#allocation49_spill] sm:$0xff] }
 0xaec   :  { %v620_v2 = vadd.f32 %v9659_v62, %v6050_v54 }
 0xaed   :  { %3748 = vmatpush2.bf16.msra.mxu0 %v9624_v63  ;;  %v8134_v63 = vld [vmem:[#allocation8 + $0x12c] ss:$24 sps:$4 sm:$0xff]  }
 0xaee   :  { %3749 = vmatprep.subr.bf16.mxu0 %v9625_v15  ;;  %3894 = vmatpush2.bf16.msra.mxu1 %v7965_v35  ;;  %9627 = vst [vmem:[#allocation117_spill] sm:$0xff] %v8134_v63  ;;  %v8137_v35 = vld [vmem:[#allocation8 + $0x128] ss:$24 sps:$4 sm:$0xff]  }
 0xaef   :  { %3895 = vmatprep.subr.bf16.mxu1 %v7968_v19  ;;  %9628 = vst [vmem:[#allocation122_spill] sm:$0xff] %v8137_v35  ;;  %v9658_v19 = vld [vmem:[#allocation48_spill] sm:$0xff] }
 0xaf0   :  { %v618_v15 = vadd.f32 %v9658_v19, %v9571_v9  ;;  %v9661_v19 = vld [vmem:[#allocation135_spill] sm:$0xff] }
 0xaf1   :  { %3750 = vmatpush2.bf16.msra.mxu0 %v7971_v4  ;;  %v8140_v4 = vld [vmem:[#allocation8 + $0xfc] ss:$24 sps:$4 sm:$0xff]  }
 0xaf2   :  { %3908 = vmatprep.subr.bf16.mxu0 %v7974_v28  ;;  %3896 = vmatpush2.bf16.msra.mxu1 %v7977_v1  ;;  %9629 = vst [vmem:[#allocation124_spill] sm:$0xff] %v8140_v4  ;;  %v8143_v1 = vld [vmem:[#allocation8 + $0xf8] ss:$24 sps:$4 sm:$0xff]  }
 0xaf3   :  { %3951 = vmatprep.subr.bf16.mxu1 %v7980_v24  ;;  %9630 = vst [vmem:[#allocation126_spill] sm:$0xff] %v8143_v1  ;;  %v9657_v24 = vld [vmem:[#allocation47_spill] sm:$0xff] }
 0xaf4   :  { %3752 = vmatmul.mubr.bf16.vlgmr.msra.gmra.mxu0 %v8062_v17  ;;  %v8146_v17 = vld [vmem:[#allocation8 + $0xcc] ss:$24 sps:$4 sm:$0xff]   ;;  %v616_v28 = vadd.f32 %v9657_v24, %v6050_v54 }
 0xaf5   :  { %3909 = vmatpush1.bf16.msra.mxu0 %v8131_v42  ;;  %9631 = vst [vmem:[#allocation128_spill] sm:$0xff] %v8146_v17  ;;  %v8149_v42 = vld [vmem:[#allocation8 + $0xc8] ss:$24 sps:$4 sm:$0xff]  }
 0xaf6   :  { %3910 = vmatprep.subr.bf16.mxu0 %v8134_v63  ;;  %9632 = vst [vmem:[#allocation100_spill] sm:$0xff] %v8149_v42  ;;  %v8152_v63 = vld [vmem:[#allocation8 + $0x9c] ss:$24 sps:$4 sm:$0xff]  }
 0xaf7   :  { %9633 = vst [vmem:[#allocation102_spill] sm:$0xff] %v8152_v63 }
 0xaf9   :  { %3911 = vmatpush1.bf16.msra.mxu0 %v8137_v35  ;;  %v8155_v35 = vld [vmem:[#allocation8 + $0x98] ss:$24 sps:$4 sm:$0xff]  }
 0xafa   :  { %3912 = vmatprep.subr.bf16.mxu0 %v8140_v4  ;;  %9634 = vst [vmem:[#allocation104_spill] sm:$0xff] %v8155_v35  ;;  %v8158_v4 = vld [vmem:[#allocation8 + $0x6c] ss:$24 sps:$4 sm:$0xff]  }
 0xafb   :  { %9635 = vst [vmem:[#allocation164_spill] sm:$0xff] %v8158_v4 }
 0xafd   :  { %3913 = vmatpush1.bf16.msra.mxu0 %v8143_v1  ;;  %v8161_v1 = vld [vmem:[#allocation8 + $0x68] ss:$24 sps:$4 sm:$0xff]  }
 0xafe   :  { %3914 = vmatprep.subr.bf16.mxu0 %v8146_v17  ;;  %9636 = vst [vmem:[#allocation165_spill] sm:$0xff] %v8161_v1  ;;  %v8164_v17 = vld [vmem:[#allocation8 + $0x3c] ss:$24 sps:$4 sm:$0xff]  }
 0xaff   :  { %9637 = vst [vmem:[#allocation166_spill] sm:$0xff] %v8164_v17 }
 0xb01   :  { %3915 = vmatpush1.bf16.msra.mxu0 %v8149_v42  ;;  %v8167_v42 = vld [vmem:[#allocation8 + $0x38] ss:$24 sps:$4 sm:$0xff]  }
 0xb02   :  { %3916 = vmatprep.subr.bf16.mxu0 %v8152_v63  ;;  %9638 = vst [vmem:[#allocation167_spill] sm:$0xff] %v8167_v42  ;;  %v8170_v63 = vld [vmem:[#allocation8 + $0xc] ss:$24 sps:$4 sm:$0xff]  }
 0xb03   :  { %9639 = vst [vmem:[#allocation168_spill] sm:$0xff] %v8170_v63 }
 0xb05   :  { %3917 = vmatpush1.bf16.msra.mxu0 %v8155_v35  ;;  %v8173_v35 = vld [vmem:[#allocation8 + $0x8] ss:$24 sps:$4 sm:$0xff]  }
 0xb06   :  { %3918 = vmatprep.subr.bf16.mxu0 %v8158_v4  ;;  %9640 = vst [vmem:[#allocation169_spill] sm:$0xff] %v8173_v35  ;;  %v8176_v4 = vld [vmem:[#allocation8 + $0x2dc] ss:$24 sps:$4 sm:$0xff]  }
 0xb07   :  { %9641 = vst [vmem:[#allocation170_spill] sm:$0xff] %v8176_v4 }
 0xb09   :  { %3919 = vmatpush1.bf16.msra.mxu0 %v8161_v1  ;;  %v8179_v1 = vld [vmem:[#allocation8 + $0x2d8] ss:$24 sps:$4 sm:$0xff]  }
 0xb0a   :  { %3920 = vmatprep.subr.bf16.mxu0 %v8164_v17  ;;  %9642 = vst [vmem:[#allocation171_spill] sm:$0xff] %v8179_v1  ;;  %v8182_v17 = vld [vmem:[#allocation8 + $0x2ac] ss:$24 sps:$4 sm:$0xff]  }
 0xb0b   :  { %9643 = vst [vmem:[#allocation172_spill] sm:$0xff] %v8182_v17 }
 0xb0d   :  { %3921 = vmatpush1.bf16.msra.mxu0 %v8167_v42  ;;  %v8185_v42 = vld [vmem:[#allocation8 + $0x2a8] ss:$24 sps:$4 sm:$0xff]  }
 0xb0e   :  { %3922 = vmatprep.subr.bf16.mxu0 %v8170_v63  ;;  %9644 = vst [vmem:[#allocation173_spill] sm:$0xff] %v8185_v42  ;;  %v8188_v63 = vld [vmem:[#allocation8 + $0x27c] ss:$24 sps:$4 sm:$0xff]  }
 0xb0f   :  { %9645 = vst [vmem:[#allocation174_spill] sm:$0xff] %v8188_v63 }
 0xb11   :  { %3923 = vmatpush1.bf16.msra.mxu0 %v8173_v35  ;;  %v8191_v35 = vld [vmem:[#allocation8 + $0x278] ss:$24 sps:$4 sm:$0xff]  }
 0xb12   :  { %3924 = vmatprep.subr.bf16.mxu0 %v8176_v4  ;;  %9646 = vst [vmem:[#allocation175_spill] sm:$0xff] %v8191_v35  ;;  %v8194_v4 = vld [vmem:[#allocation8 + $0x24c] ss:$24 sps:$4 sm:$0xff]  }
 0xb13   :  { %9647 = vst [vmem:[#allocation176_spill] sm:$0xff] %v8194_v4 }
 0xb15   :  { %3925 = vmatpush2.bf16.msra.mxu0 %v8179_v1  ;;  %v8197_v1 = vld [vmem:[#allocation8 + $0x248] ss:$24 sps:$4 sm:$0xff]  }
 0xb16   :  { %3926 = vmatprep.subr.bf16.mxu0 %v8182_v17  ;;  %9648 = vst [vmem:[#allocation177_spill] sm:$0xff] %v8197_v1  ;;  %v8200_v17 = vld [vmem:[#allocation8 + $0x21c] ss:$24 sps:$4 sm:$0xff]  }
 0xb17   :  { %9649 = vst [vmem:[#allocation178_spill] sm:$0xff] %v8200_v17 }
 0xb19   :  { %3927 = vmatpush2.bf16.msra.mxu0 %v8185_v42  ;;  %v8203_v42 = vld [vmem:[#allocation8 + $0x218] ss:$24 sps:$4 sm:$0xff]  }
 0xb1a   :  { %3928 = vmatprep.subr.bf16.mxu0 %v8188_v63  ;;  %9650 = vst [vmem:[#allocation179_spill] sm:$0xff] %v8203_v42  ;;  %v8206_v63 = vld [vmem:[#allocation8 + $0x1ec] ss:$24 sps:$4 sm:$0xff]  }
 0xb1b   :  { %9651 = vst [vmem:[#allocation180_spill] sm:$0xff] %v8206_v63 }
 0xb1d   :  { %3929 = vmatpush2.bf16.msra.mxu0 %v8191_v35  ;;  %v8209_v35 = vld [vmem:[#allocation8 + $0x1e8] ss:$24 sps:$4 sm:$0xff]  }
 0xb1e   :  { %3930 = vmatprep.subr.bf16.mxu0 %v8194_v4  ;;  %9652 = vst [vmem:[#allocation181_spill] sm:$0xff] %v8209_v35  ;;  %v8212_v4 = vld [vmem:[#allocation8 + $0x1bc] ss:$24 sps:$4 sm:$0xff]  }
 0xb1f   :  { %9653 = vst [vmem:[#allocation182_spill] sm:$0xff] %v8212_v4 }
 0xb21   :  { %3931 = vmatpush2.bf16.msra.mxu0 %v8197_v1  ;;  %v8215_v1 = vld [vmem:[#allocation8 + $0x1b8] ss:$24 sps:$4 sm:$0xff]  }
 0xb22   :  { %3932 = vmatprep.subr.bf16.mxu0 %v8200_v17  ;;  %9654 = vst [vmem:[#allocation183_spill] sm:$0xff] %v8215_v1  ;;  %v8218_v17 = vld [vmem:[#allocation8 + $0x18c] ss:$24 sps:$4 sm:$0xff]  }
 0xb23   :  { %9655 = vst [vmem:[#allocation184_spill] sm:$0xff] %v8218_v17 }
 0xb25   :  { %3933 = vmatpush2.bf16.msra.mxu0 %v8203_v42  ;;  %v8221_v42 = vld [vmem:[#allocation8 + $0x188] ss:$24 sps:$4 sm:$0xff]  }
 0xb26   :  { %3934 = vmatprep.subr.bf16.mxu0 %v8206_v63  ;;  %9656 = vst [vmem:[#allocation185_spill] sm:$0xff] %v8221_v42 }
 0xb29   :  { %3935 = vmatpush2.bf16.msra.mxu0 %v8209_v35 }
 0xb2a   :  { %3936 = vmatprep.subr.bf16.mxu0 %v8212_v4 }
 0xb2d   :  { %3937 = vmatpush2.bf16.msra.mxu0 %v8215_v1 }
 0xb2e   :  { %3938 = vmatprep.subr.bf16.mxu0 %v8218_v17 }
 0xb31   :  { %3939 = vmatpush2.bf16.msra.mxu0 %v8221_v42  ;;  %v622_v42 = vadd.f32 %v9660_v44, %v9571_v9 }
 0xb32   :  { %4097 = vmatprep.subr.bf16.mxu0 %v8015_v21 }
 0xb74   :  { %v3667_v63 = vpop.f32.mrf.mxu0  ;;  %v3710_v21 = vpop.f32.mrf.mxu1 }
 0xb75   :  { %v3762_v1 = vadd.f32 %v3667_v63, %v616_v28  ;;  %v769_v28 = vadd.f32 %v9661_v19, %v9061_v12 }
 0xb76   :  { %v3669_v35 = vpop.f32.mrf.mxu0  ;;  %v3712_v24 = vpop.f32.mrf.mxu1 }
 0xb77   :  { %v3763_v17 = vadd.f32 %v3669_v35, %v618_v15  ;;  %v4565_v61 = vmul.f32 -1.442695, %v3762_v1  ;;  %v9662_v35 = vld [vmem:[#allocation137_spill] sm:$0xff]  ;;  %v3790_v15 = vadd.f32 %v3710_v21, %v769_v28  ;;  %v9663_v1 = vld [vmem:[#allocation139_spill] sm:$0xff] }
 0xb78   :  { %v3671_v4 = vpop.f32.mrf.mxu0  ;;  %v3714_v62 = vpop.f32.mrf.mxu1  ;;  %v771_v63 = vadd.f32 %v9662_v35, %v9062_v41 }
 0xb79   :  { %v3764_v31 = vadd.f32 %v3671_v4, %v620_v2  ;;  %v4566_v6 = vmul.f32 -1.442695, %v3763_v17  ;;  %5189 = vpow2.f32 %v4565_v61  ;;  %v773_v4 = vadd.f32 %v9663_v1, %v9061_v12  ;;  %v9664_v61 = vld [vmem:[#allocation141_spill] sm:$0xff] }
 0xb7a   :  { %v3673_v3 = vpop.f32.mrf.mxu0  ;;  %v3791_v44 = vadd.f32 %v3712_v24, %v771_v63 }
 0xb7b   :  { %v3765_v45 = vadd.f32 %v3673_v3, %v622_v42  ;;  %v4567_v0 = vmul.f32 -1.442695, %v3764_v31  ;;  %5191 = vpow2.f32 %v4566_v6  ;;  %v3716_v3 = vpop.f32.mrf.mxu1  ;;  %v775_v31 = vadd.f32 %v9664_v61, %v9062_v41 }
 0xb7c   :  { %v3792_v6 = vadd.f32 %v3714_v62, %v773_v4  ;;  %v4570_v42 = vmul.f32 -1.442695, %v3791_v44 }
 0xb7d   :  { %v4568_v43 = vmul.f32 -1.442695, %v3765_v45  ;;  %5193 = vpow2.f32 %v4567_v0  ;;  %v4569_v45 = vmul.f32 -1.442695, %v3790_v15  ;;  %v3793_v2 = vadd.f32 %v3716_v3, %v775_v31 }
 0xb7e   :  { %v4571_v0 = vmul.f32 -1.442695, %v3792_v6 }
 0xb7f   :  { %5195 = vpow2.f32 %v4568_v43  ;;  %v4572_v9 = vmul.f32 -1.442695, %v3793_v2 }
 0xb80   :  { %5197 = vpow2.f32 %v4569_v45 }
 0xb81   :  { %5199 = vpow2.f32 %v4570_v42 }
 0xb82   :  { %5201 = vpow2.f32 %v4571_v0 }
 0xb83   :  { %5203 = vpow2.f32 %v4572_v9  ;;  %v9665_v9 = vld [vmem:[#allocation146_spill] sm:$0xff] }
 0xb84   :  { %v922_v42 = vadd.f32 %v9665_v9, %v6117_v40 }
 0xb86   :  { %v5190_v17 = vpop.eup %5189 }
 0xb87   :  { %v3778_v35 = vadd.f32 1.0, %v5190_v17 }
 0xb88   :  { %v5192_v19 = vpop.eup %5191 }
 0xb89   :  { %v3779_v21 = vadd.f32 1.0, %v5192_v19  ;;  %5205 = vrcp.f32 %v3778_v35  ;;  %v9666_v35 = vld [vmem:[#allocation148_spill] sm:$0xff] }
 0xb8a   :  { %v5194_v43 = vpop.eup %5193 }
 0xb8b   :  { %v3780_v24 = vadd.f32 1.0, %v5194_v43  ;;  %5207 = vrcp.f32 %v3779_v21  ;;  %v924_v43 = vadd.f32 %v9666_v35, %v6120_v50 }
 0xb8c   :  { %v5196_v28 = vpop.eup %5195 }
 0xb8d   :  { %v3781_v63 = vadd.f32 1.0, %v5196_v28  ;;  %5209 = vrcp.f32 %v3780_v24  ;;  %v5198_v62 = vpop.eup %5197 }
 0xb8e   :  { %v5200_v15 = vpop.eup %5199  ;;  %v3806_v4 = vadd.f32 1.0, %v5198_v62 }
 0xb8f   :  { %5211 = vrcp.f32 %v3781_v63  ;;  %v5202_v1 = vpop.eup %5201  ;;  %v3807_v61 = vadd.f32 1.0, %v5200_v15 }
 0xb90   :  { %v5204_v3 = vpop.eup %5203  ;;  %v3808_v45 = vadd.f32 1.0, %v5202_v1  ;;  %5213 = vrcp.f32 %v3806_v4  ;;  %v9667_v1 = vld [vmem:[#allocation150_spill] sm:$0xff] }
 0xb91   :  { %v3809_v21 = vadd.f32 1.0, %v5204_v3  ;;  %5215 = vrcp.f32 %v3807_v61  ;;  %v9668_v3 = vld [vmem:[#allocation152_spill] sm:$0xff] }
 0xb92   :  { %5217 = vrcp.f32 %v3808_v45  ;;  %v928_v61 = vadd.f32 %v9668_v3, %v6120_v50 }
 0xb96   :  { %v5206_v6 = vpop.eup %5205 }
 0xb98   :  { %v5208_v19 = vpop.eup %5207 }
 0xb9a   :  { %v5210_v15 = vpop.eup %5209 }
 0xb9c   :  { %v5212_v9 = vpop.eup %5211 }
 0xbb4   :  { %v3753_v44 = vpop.f32.mrf.mxu0 }
 0xbb5   :  { %v3818_v31 = vadd.f32 %v3753_v44, %v6128_v58  ;;  %v926_v44 = vadd.f32 %v9667_v1, %v6117_v40 }
 0xbb6   :  { %v3755_v2 = vpop.f32.mrf.mxu0 }
 0xbb7   :  { %v3822_v17 = vmul.f32 %v5206_v6, %v3818_v31  ;;  %v3819_v0 = vadd.f32 %v3755_v2, %v6124_v39 }
 0xbb8   :  { %v3757_v28 = vpop.f32.mrf.mxu0 }
 0xbb9   :  { %v3826_v24 = vadd.f32 %v3822_v17, %v922_v42  ;;  %v3823_v63 = vmul.f32 %v5208_v19, %v3819_v0  ;;  %v3820_v62 = vadd.f32 %v3757_v28, %v6128_v58  ;;  %v5214_v19 = vpop.eup %5213 }
 0xbba   :  { %v3759_v4 = vpop.f32.mrf.mxu0  ;;  %v5216_v35 = vpop.eup %5215  ;;  %v3834_v28 = vsub.f32 1.0, %v5214_v19 }
 0xbbb   :  { %5219 = vtanh.f32 %v3826_v24  ;;  %v3827_v31 = vadd.f32 %v3823_v63, %v924_v43  ;;  %v3824_v6 = vmul.f32 %v5210_v15, %v3820_v62  ;;  %v3821_v2 = vadd.f32 %v3759_v4, %v6124_v39  ;;  %v5218_v45 = vpop.eup %5217 }
 0xbbc   :  { %5221 = vrcp.f32 %v3809_v21  ;;  %v3835_v63 = vsub.f32 1.0, %v5216_v35  ;;  %v3842_v15 = vmul.f32 %v5214_v19, %v8048_v13  ;;  %v3843_v4 = vmul.f32 %v5216_v35, %v8050_v32  ;;  %v9702_v35 = vld [vmem:[#allocation115_spill] sm:$0xff] }
 0xbbd   :  { %5223 = vtanh.f32 %v3827_v31  ;;  %v3828_v42 = vadd.f32 %v3824_v6, %v926_v44  ;;  %v3825_v17 = vmul.f32 %v5212_v9, %v3821_v2  ;;  %v3836_v31 = vsub.f32 1.0, %v5218_v45 }
 0xbbf   :  { %5225 = vtanh.f32 %v3828_v42  ;;  %v3829_v0 = vadd.f32 %v3825_v17, %v928_v61  ;;  %v3844_v61 = vmul.f32 %v5218_v45, %v8054_v38  ;;  %v9684_v38 = vld [vmem:[#allocation94_spill] sm:$0xff]  ;;  %v9703_v45 = vld [vmem:[#allocation117_spill] sm:$0xff] }
 0xbc1   :  { %5227 = vtanh.f32 %v3829_v0 }
 0xbc8   :  { %v5220_v24 = vpop.eup %5219 }
 0xbc9   :  { %v5222_v43 = vpop.eup %5221  ;;  %v3838_v62 = vmul.f32 %v5220_v24, %v3834_v28  ;;  %v9704_v24 = vld [vmem:[#allocation122_spill] sm:$0xff] }
 0xbca   :  { %v5224_v21 = vpop.eup %5223  ;;  %v3837_v2 = vsub.f32 1.0, %v5222_v43  ;;  %v3845_v0 = vmul.f32 %v5222_v43, %v8056_v22  ;;  %v9685_v22 = vld [vmem:[#allocation44_spill] sm:$0xff] }
 0xbcb   :  { %v3839_v1 = vmul.f32 %v5224_v21, %v3835_v63  ;;  %v8255_v44 = vadd.f32 %v3842_v15, %v3838_v62  ;;  %v9705_v43 = vld [vmem:[#allocation124_spill] sm:$0xff]  ;;  %v9706_v63 = vld [vmem:[#allocation126_spill] sm:$0xff] }
 0xbcc   :  { %v5226_v6 = vpop.eup %5225  ;;  %v9707_v62 = vld [vmem:[#allocation128_spill] sm:$0xff]  ;;  %v9709_v21 = vld [vmem:[#allocation102_spill] sm:$0xff] }
 0xbcd   :  { %v8257_v9 = vadd.f32 %v3843_v4, %v3839_v1  ;;  %v3840_v3 = vmul.f32 %v5226_v6, %v3836_v31  ;;  %v9708_v15 = vld [vmem:[#allocation100_spill] sm:$0xff]  ;;  %v9712_v31 = vld [vmem:[#allocation165_spill] sm:$0xff]  ;;  %v9713_v6 = vld [vmem:[#allocation166_spill] sm:$0xff] }
 0xbce   :  { %v5228_v42 = vpop.eup %5227  ;;  %v9710_v1 = vld [vmem:[#allocation104_spill] sm:$0xff] }
 0xbcf   :  { %v3841_v17 = vmul.f32 %v5228_v42, %v3837_v2  ;;  %v8261_v28 = vadd.f32 %v3844_v61, %v3840_v3  ;;  %v9711_v4 = vld [vmem:[#allocation164_spill] sm:$0xff]  ;;  %v9714_v2 = vld [vmem:[#allocation167_spill] sm:$0xff]  ;;  %v9716_v61 = vld [vmem:[#allocation169_spill] sm:$0xff] }
 0xbd0   :  { %v9715_v3 = vld [vmem:[#allocation168_spill] sm:$0xff]  ;;  %v9717_v42 = vld [vmem:[#allocation170_spill] sm:$0xff] }
 0xbd1   :  { %v8263_v13 = vadd.f32 %v3845_v0, %v3841_v17  ;;  %v8269_v19 = vpack.c.bf16 %v8261_v28, %v8255_v44  ;;  %v9718_v17 = vld [vmem:[#allocation171_spill] sm:$0xff]  ;;  %v9719_v0 = vld [vmem:[#allocation172_spill] sm:$0xff] }
 0xbd3   :  { %v3864_v32 = vpack.c.bf16 %v8263_v13, %v8257_v9 }
 0xbd5   :  { %3897 = vmatprep.mubr.bf16.mxu1 %v3864_v32  ;;  %3940 = vmatprep.mubr.bf16.mxu0 %v3864_v32 }
 0xbd6   :  { %3898 = vmatmul.mubr.bf16.vlgmr.msra.gmra.mxu1 %v8269_v19  ;;  %3941 = vmatmul.mubr.bf16.vlgmr.msra.gmra.mxu0 %v8269_v19 }
 0xbd7   :  { %3952 = vmatpush1.bf16.msra.mxu1 %v7791_v56  ;;  %3983 = vmatprep.mubr.bf16.mxu1 %v3864_v32  ;;  %v9669_v56 = vld [vmem:[#allocation29_spill] sm:$0xff] }
 0xbd8   :  { %3953 = vmatprep.subr.bf16.mxu1 %v7794_v7  ;;  %4098 = vmatpush1.bf16.msra.mxu0 %v7797_v59  ;;  %v9670_v7 = vld [vmem:[#allocation30_spill] sm:$0xff]  ;;  %v9671_v59 = vld [vmem:[#allocation31_spill] sm:$0xff]  ;;  %v9720_v32 = vld [vmem:[#allocation173_spill] sm:$0xff] }
 0xbd9   :  { %4099 = vmatprep.subr.bf16.mxu0 %v7800_v20  ;;  %v9672_v20 = vld [vmem:[#allocation103_spill] sm:$0xff] }
 0xbdb   :  { %3954 = vmatpush1.bf16.msra.mxu1 %v7803_v10  ;;  %v9673_v10 = vld [vmem:[#allocation105_spill] sm:$0xff] }
 0xbdc   :  { %3955 = vmatprep.subr.bf16.mxu1 %v7806_v29  ;;  %4100 = vmatpush1.bf16.msra.mxu0 %v7809_v37  ;;  %v9674_v29 = vld [vmem:[#allocation107_spill] sm:$0xff]  ;;  %v9675_v37 = vld [vmem:[#allocation109_spill] sm:$0xff] }
 0xbdd   :  { %4101 = vmatprep.subr.bf16.mxu0 %v7812_v33  ;;  %v9676_v33 = vld [vmem:[#allocation114_spill] sm:$0xff] }
 0xbdf   :  { %3956 = vmatpush1.bf16.msra.mxu1 %v7815_v23  ;;  %v9677_v23 = vld [vmem:[#allocation116_spill] sm:$0xff] }
 0xbe0   :  { %3957 = vmatprep.subr.bf16.mxu1 %v7818_v11  ;;  %4102 = vmatpush1.bf16.msra.mxu0 %v7821_v49  ;;  %v9678_v11 = vld [vmem:[#allocation118_spill] sm:$0xff]  ;;  %v9679_v49 = vld [vmem:[#allocation120_spill] sm:$0xff] }
 0xbe1   :  { %4103 = vmatprep.subr.bf16.mxu0 %v7824_v14  ;;  %v9680_v14 = vld [vmem:[#allocation82_spill] sm:$0xff] }
 0xbe3   :  { %3958 = vmatpush1.bf16.msra.mxu1 %v7827_v30  ;;  %v9681_v30 = vld [vmem:[#allocation85_spill] sm:$0xff] }
 0xbe4   :  { %3959 = vmatprep.subr.bf16.mxu1 %v7830_v25  ;;  %4104 = vmatpush1.bf16.msra.mxu0 %v7833_v34  ;;  %v9682_v25 = vld [vmem:[#allocation88_spill] sm:$0xff] }
 0xbe5   :  { %4105 = vmatprep.subr.bf16.mxu0 %v9583_v26  ;;  %v9683_v34 = vld [vmem:[#allocation92_spill] sm:$0xff]  ;;  %v9686_v26 = vld [vmem:[#allocation45_spill] sm:$0xff] }
 0xbe7   :  { %3960 = vmatpush1.bf16.msra.mxu1 %v9584_v57  ;;  %v9687_v57 = vld [vmem:[#allocation20_spill] sm:$0xff] }
 0xbe8   :  { %3961 = vmatprep.subr.bf16.mxu1 %v9585_v36  ;;  %4106 = vmatpush1.bf16.msra.mxu0 %v9586_v18  ;;  %v9688_v36 = vld [vmem:[#allocation21_spill] sm:$0xff]  ;;  %v9689_v18 = vld [vmem:[#allocation22_spill] sm:$0xff] }
 0xbe9   :  { %4107 = vmatprep.subr.bf16.mxu0 %v9587_v53  ;;  %v9690_v53 = vld [vmem:[#allocation23_spill] sm:$0xff] }
 0xbeb   :  { %3962 = vmatpush1.bf16.msra.mxu1 %v9588_v51  ;;  %v9691_v51 = vld [vmem:[#allocation90_spill] sm:$0xff] }
 0xbec   :  { %3963 = vmatprep.subr.bf16.mxu1 %v9589_v60  ;;  %4108 = vmatpush1.bf16.msra.mxu0 %v9590_v16  ;;  %v9692_v60 = vld [vmem:[#allocation91_spill] sm:$0xff]  ;;  %v9693_v16 = vld [vmem:[#allocation93_spill] sm:$0xff] }
 0xbed   :  { %4109 = vmatprep.subr.bf16.mxu0 %v9591_v52  ;;  %v9694_v52 = vld [vmem:[#allocation95_spill] sm:$0xff] }
 0xbef   :  { %3964 = vmatpush1.bf16.msra.mxu1 %v9592_v46  ;;  %v9695_v46 = vld [vmem:[#allocation98_spill] sm:$0xff] }
 0xbf0   :  { %3965 = vmatprep.subr.bf16.mxu1 %v9593_v47  ;;  %4110 = vmatpush1.bf16.msra.mxu0 %v9594_v55  ;;  %v9696_v47 = vld [vmem:[#allocation33_spill] sm:$0xff]  ;;  %v9697_v55 = vld [vmem:[#allocation34_spill] sm:$0xff] }
 0xbf1   :  { %4111 = vmatprep.subr.bf16.mxu0 %v9595_v48  ;;  %v9698_v48 = vld [vmem:[#allocation35_spill] sm:$0xff] }
 0xbf3   :  { %3966 = vmatpush1.bf16.msra.mxu1 %v9596_v27  ;;  %v9699_v27 = vld [vmem:[#allocation36_spill] sm:$0xff] }
 0xbf4   :  { %3967 = vmatprep.subr.bf16.mxu1 %v9597_v5  ;;  %4112 = vmatpush1.bf16.msra.mxu0 %v9598_v8  ;;  %v9700_v5 = vld [vmem:[#allocation111_spill] sm:$0xff]  ;;  %v9701_v8 = vld [vmem:[#allocation113_spill] sm:$0xff] }
 0xbf5   :  { %4113 = vmatprep.subr.bf16.mxu0 %v9669_v56  ;;  %v9722_v56 = vld [vmem:[#allocation175_spill] sm:$0xff] }
 0xbf7   :  { %3968 = vmatpush2.bf16.msra.mxu1 %v9670_v7  ;;  %v9723_v7 = vld [vmem:[#allocation176_spill] sm:$0xff] }
 0xbf8   :  { %3969 = vmatprep.subr.bf16.mxu1 %v9671_v59  ;;  %4114 = vmatpush2.bf16.msra.mxu0 %v9672_v20  ;;  %v9724_v59 = vld [vmem:[#allocation177_spill] sm:$0xff]  ;;  %v9725_v20 = vld [vmem:[#allocation178_spill] sm:$0xff] }
 0xbf9   :  { %4115 = vmatprep.subr.bf16.mxu0 %v9673_v10  ;;  %v9726_v10 = vld [vmem:[#allocation179_spill] sm:$0xff] }
 0xbfb   :  { %3970 = vmatpush2.bf16.msra.mxu1 %v9674_v29  ;;  %v9727_v29 = vld [vmem:[#allocation180_spill] sm:$0xff] }
 0xbfc   :  { %3971 = vmatprep.subr.bf16.mxu1 %v9675_v37  ;;  %4116 = vmatpush2.bf16.msra.mxu0 %v9676_v33  ;;  %v9728_v37 = vld [vmem:[#allocation181_spill] sm:$0xff]  ;;  %v9729_v33 = vld [vmem:[#allocation182_spill] sm:$0xff] }
 0xbfd   :  { %4117 = vmatprep.subr.bf16.mxu0 %v9677_v23  ;;  %v9730_v23 = vld [vmem:[#allocation183_spill] sm:$0xff] }
 0xbff   :  { %3972 = vmatpush2.bf16.msra.mxu1 %v9678_v11  ;;  %v9731_v11 = vld [vmem:[#allocation184_spill] sm:$0xff] }
 0xc00   :  { %3973 = vmatprep.subr.bf16.mxu1 %v9679_v49  ;;  %4118 = vmatpush2.bf16.msra.mxu0 %v9680_v14  ;;  %v9732_v49 = vld [vmem:[#allocation185_spill] sm:$0xff] }
 0xc01   :  { %4119 = vmatprep.subr.bf16.mxu0 %v9681_v30 }
 0xc03   :  { %3974 = vmatpush2.bf16.msra.mxu1 %v9682_v25  ;;  %v9733_v25 = vld [vmem:[#allocation51_spill] sm:$0xff] }
 0xc04   :  { %3975 = vmatprep.subr.bf16.mxu1 %v9683_v34  ;;  %4120 = vmatpush2.bf16.msra.mxu0 %v9684_v38  ;;  %v626_v34 = vadd.f32 %v9733_v25, %v6050_v54 }
 0xc05   :  { %4121 = vmatprep.subr.bf16.mxu0 %v9685_v22  ;;  %v9734_v22 = vld [vmem:[#allocation32_spill] sm:$0xff] }
 0xc07   :  { %3976 = vmatpush2.bf16.msra.mxu1 %v9686_v26  ;;  %v9735_v26 = vld [vmem:[#allocation52_spill] sm:$0xff] }
 0xc08   :  { %3977 = vmatprep.subr.bf16.mxu1 %v9687_v57  ;;  %4122 = vmatpush2.bf16.msra.mxu0 %v9688_v36  ;;  %v628_v57 = vadd.f32 %v9735_v26, %v9734_v22 }
 0xc09   :  { %4123 = vmatprep.subr.bf16.mxu0 %v9689_v18  ;;  %v9736_v18 = vld [vmem:[#allocation53_spill] sm:$0xff] }
 0xc0b   :  { %3978 = vmatpush2.bf16.msra.mxu1 %v9690_v53  ;;  %v630_v53 = vadd.f32 %v9736_v18, %v6050_v54 }
 0xc0c   :  { %3979 = vmatprep.subr.bf16.mxu1 %v9691_v51  ;;  %4124 = vmatpush2.bf16.msra.mxu0 %v9692_v60 }
 0xc0d   :  { %4125 = vmatprep.subr.bf16.mxu0 %v9693_v16  ;;  %v9737_v16 = vld [vmem:[#allocation54_spill] sm:$0xff] }
 0xc0f   :  { %3980 = vmatpush2.bf16.msra.mxu1 %v9694_v52  ;;  %v632_v52 = vadd.f32 %v9737_v16, %v9734_v22  ;;  %v9743_v16 = vld [vmem:[#allocation156_spill] sm:$0xff] }
 0xc10   :  { %3981 = vmatprep.subr.bf16.mxu1 %v9695_v46  ;;  %4126 = vmatpush2.bf16.msra.mxu0 %v9696_v47 }
 0xc11   :  { %4127 = vmatprep.subr.bf16.mxu0 %v9697_v55 }
 0xc13   :  { %3982 = vmatpush2.bf16.msra.mxu1 %v9698_v48 }
 0xc14   :  { %4140 = vmatprep.subr.bf16.mxu1 %v9699_v27  ;;  %4128 = vmatpush2.bf16.msra.mxu0 %v9700_v5 }
 0xc15   :  { %4183 = vmatprep.subr.bf16.mxu0 %v9701_v8 }
 0xc16   :  { %3984 = vmatmul.mubr.bf16.vlgmr.msra.gmra.mxu1 %v8269_v19  ;;  %v9721_v19 = vld [vmem:[#allocation174_spill] sm:$0xff] }
 0xc17   :  { %4141 = vmatpush1.bf16.msra.mxu1 %v9702_v35 }
 0xc18   :  { %4142 = vmatprep.subr.bf16.mxu1 %v9703_v45  ;;  %v9738_v45 = vld [vmem:[#allocation143_spill] sm:$0xff] }
 0xc1b   :  { %4143 = vmatpush1.bf16.msra.mxu1 %v9704_v24  ;;  %v779_v24 = vadd.f32 %v9738_v45, %v9061_v12 }
 0xc1c   :  { %4144 = vmatprep.subr.bf16.mxu1 %v9705_v43 }
 0xc1f   :  { %4145 = vmatpush1.bf16.msra.mxu1 %v9706_v63  ;;  %v9739_v63 = vld [vmem:[#allocation145_spill] sm:$0xff] }
 0xc20   :  { %4146 = vmatprep.subr.bf16.mxu1 %v9707_v62  ;;  %v781_v62 = vadd.f32 %v9739_v63, %v9062_v41 }
 0xc23   :  { %4147 = vmatpush1.bf16.msra.mxu1 %v9708_v15 }
 0xc24   :  { %4148 = vmatprep.subr.bf16.mxu1 %v9709_v21  ;;  %v9740_v21 = vld [vmem:[#allocation147_spill] sm:$0xff] }
 0xc27   :  { %4149 = vmatpush1.bf16.msra.mxu1 %v9710_v1  ;;  %v783_v1 = vadd.f32 %v9740_v21, %v9061_v12 }
 0xc28   :  { %4150 = vmatprep.subr.bf16.mxu1 %v9711_v4 }
 0xc2b   :  { %4151 = vmatpush1.bf16.msra.mxu1 %v9712_v31 }
 0xc2c   :  { %4152 = vmatprep.subr.bf16.mxu1 %v9713_v6  ;;  %v9741_v6 = vld [vmem:[#allocation149_spill] sm:$0xff] }
 0xc2f   :  { %4153 = vmatpush1.bf16.msra.mxu1 %v9714_v2  ;;  %v785_v2 = vadd.f32 %v9741_v6, %v9062_v41 }
 0xc30   :  { %4154 = vmatprep.subr.bf16.mxu1 %v9715_v3 }
 0xc33   :  { %4155 = vmatpush1.bf16.msra.mxu1 %v9716_v61 }
 0xc34   :  { %4156 = vmatprep.subr.bf16.mxu1 %v9717_v42 }
 0xc37   :  { %4157 = vmatpush2.bf16.msra.mxu1 %v9718_v17 }
 0xc38   :  { %4158 = vmatprep.subr.bf16.mxu1 %v9719_v0 }
 0xc3b   :  { %4159 = vmatpush2.bf16.msra.mxu1 %v9720_v32 }
 0xc3c   :  { %4160 = vmatprep.subr.bf16.mxu1 %v9721_v19 }
 0xc3f   :  { %4161 = vmatpush2.bf16.msra.mxu1 %v9722_v56 }
 0xc40   :  { %4162 = vmatprep.subr.bf16.mxu1 %v9723_v7 }
 0xc43   :  { %4163 = vmatpush2.bf16.msra.mxu1 %v9724_v59 }
 0xc44   :  { %4164 = vmatprep.subr.bf16.mxu1 %v9725_v20 }
 0xc47   :  { %4165 = vmatpush2.bf16.msra.mxu1 %v9726_v10 }
 0xc48   :  { %4166 = vmatprep.subr.bf16.mxu1 %v9727_v29 }
 0xc4b   :  { %4167 = vmatpush2.bf16.msra.mxu1 %v9728_v37 }
 0xc4c   :  { %4168 = vmatprep.subr.bf16.mxu1 %v9729_v33 }
 0xc4f   :  { %4169 = vmatpush2.bf16.msra.mxu1 %v9730_v23 }
 0xc50   :  { %4170 = vmatprep.subr.bf16.mxu1 %v9731_v11 }
 0xc53   :  { %4171 = vmatpush2.bf16.msra.mxu1 %v9732_v49 }
 0xc96   :  { %v3899_v14 = vpop.f32.mrf.mxu1  ;;  %v3942_v47 = vpop.f32.mrf.mxu0 }
 0xc97   :  { %v3994_v36 = vadd.f32 %v3899_v14, %v626_v34  ;;  %v4022_v15 = vadd.f32 %v3942_v47, %v779_v24 }
 0xc98   :  { %v3901_v30 = vpop.f32.mrf.mxu1  ;;  %v3944_v5 = vpop.f32.mrf.mxu0 }
 0xc99   :  { %v3995_v51 = vadd.f32 %v3901_v30, %v628_v57  ;;  %v4573_v46 = vmul.f32 -1.442695, %v3994_v36  ;;  %v4023_v4 = vadd.f32 %v3944_v5, %v781_v62  ;;  %v4577_v61 = vmul.f32 -1.442695, %v4022_v15  ;;  %v9742_v36 = vld [vmem:[#allocation154_spill] sm:$0xff]  ;;  %v9745_v15 = vld [vmem:[#allocation159_spill] sm:$0xff] }
 0xc9a   :  { %v3903_v38 = vpop.f32.mrf.mxu1  ;;  %v3946_v43 = vpop.f32.mrf.mxu0  ;;  %v932_v18 = vadd.f32 %v9742_v36, %v6117_v40  ;;  %v938_v21 = vadd.f32 %v9745_v15, %v6120_v50  ;;  %v5602_v36 = vld [vmem:[#allocation8 + $0xd4] ss:$24 sps:$4 sm:$0xff]  }
 0xc9b   :  { %v3996_v55 = vadd.f32 %v3903_v38, %v630_v53  ;;  %v4574_v48 = vmul.f32 -1.442695, %v3995_v51  ;;  %5229 = vpow2.f32 %v4573_v46  ;;  %v4024_v3 = vadd.f32 %v3946_v43, %v783_v1  ;;  %v5622_v15 = vld [vmem:[#allocation8 + $0x1f4] ss:$24 sps:$4 sm:$0xff]  }
 0xc9c   :  { %v3905_v60 = vpop.f32.mrf.mxu1  ;;  %v3948_v31 = vpop.f32.mrf.mxu0  ;;  %v4578_v17 = vmul.f32 -1.442695, %v4023_v4 }
 0xc9d   :  { %v3997_v27 = vadd.f32 %v3905_v60, %v632_v52  ;;  %v4575_v8 = vmul.f32 -1.442695, %v3996_v55  ;;  %5231 = vpow2.f32 %v4574_v48  ;;  %v4025_v42 = vadd.f32 %v3948_v31, %v785_v2 }
 0xc9e   :  { %v4579_v32 = vmul.f32 -1.442695, %v4024_v3  ;;  %v934_v52 = vadd.f32 %v9743_v16, %v6120_v50  ;;  %v5607_v16 = vld [vmem:[#allocation8 + $0x70] ss:$24 sps:$4 sm:$0xff]  }
 0xc9f   :  { %v4576_v35 = vmul.f32 -1.442695, %v3997_v27  ;;  %5233 = vpow2.f32 %v4575_v8  ;;  %v4580_v56 = vmul.f32 -1.442695, %v4025_v42  ;;  %v9744_v8 = vld [vmem:[#allocation158_spill] sm:$0xff] }
 0xca1   :  { %5235 = vpow2.f32 %v4576_v35  ;;  %v936_v35 = vadd.f32 %v9744_v8, %v6117_v40  ;;  %v5615_v8 = vld [vmem:[#allocation8 + $0x2b0] ss:$24 sps:$4 sm:$0xff]  }
 0xca2   :  { %5237 = vpow2.f32 %v4577_v61 }
 0xca3   :  { %5239 = vpow2.f32 %v4578_v17 }
 0xca4   :  { %5241 = vpow2.f32 %v4579_v32 }
 0xca5   :  { %5243 = vpow2.f32 %v4580_v56 }
 0xca8   :  { %v5230_v0 = vpop.eup %5229 }
 0xca9   :  { %v4010_v7 = vadd.f32 1.0, %v5230_v0 }
 0xcaa   :  { %v5232_v19 = vpop.eup %5231 }
 0xcab   :  { %v4011_v20 = vadd.f32 1.0, %v5232_v19  ;;  %5245 = vrcp.f32 %v4010_v7 }
 0xcac   :  { %v5234_v59 = vpop.eup %5233 }
 0xcad   :  { %v4012_v29 = vadd.f32 1.0, %v5234_v59  ;;  %5247 = vrcp.f32 %v4011_v20 }
 0xcae   :  { %v5236_v10 = vpop.eup %5235 }
 0xcaf   :  { %v4013_v37 = vadd.f32 1.0, %v5236_v10  ;;  %5249 = vrcp.f32 %v4012_v29  ;;  %v5238_v33 = vpop.eup %5237 }
 0xcb0   :  { %v5240_v23 = vpop.eup %5239  ;;  %v4038_v49 = vadd.f32 1.0, %v5238_v33 }
 0xcb1   :  { %5251 = vrcp.f32 %v4013_v37  ;;  %v5242_v11 = vpop.eup %5241  ;;  %v4039_v25 = vadd.f32 1.0, %v5240_v23 }
 0xcb2   :  { %v5244_v30 = vpop.eup %5243  ;;  %v4040_v26 = vadd.f32 1.0, %v5242_v11  ;;  %5253 = vrcp.f32 %v4038_v49 }
 0xcb3   :  { %v4041_v46 = vadd.f32 1.0, %v5244_v30  ;;  %5255 = vrcp.f32 %v4039_v25 }
 0xcb4   :  { %5257 = vrcp.f32 %v4040_v26  ;;  %v5600_v26 = vld [vmem:[#allocation8 + $0x104] ss:$24 sps:$4 sm:$0xff]  }
 0xcb8   :  { %v5246_v38 = vpop.eup %5245 }
 0xcba   :  { %v5248_v60 = vpop.eup %5247 }
 0xcbc   :  { %v5250_v5 = vpop.eup %5249 }
 0xcbe   :  { %v5252_v62 = vpop.eup %5251 }
 0xcbf   :  { %v5254_v6 = vpop.eup %5253 }
 0xcc0   :  { %v5256_v2 = vpop.eup %5255  ;;  %v4066_v61 = vsub.f32 1.0, %v5254_v6  ;;  %v4074_v19 = vmul.f32 %v5254_v6, %v8255_v44  ;;  %v5627_v6 = vld [vmem:[#allocation8 + $0x190] ss:$24 sps:$4 sm:$0xff]  }
 0xcc1   :  { %v5258_v3 = vpop.eup %5257  ;;  %v4067_v0 = vsub.f32 1.0, %v5256_v2  ;;  %v4075_v59 = vmul.f32 %v5256_v2, %v8257_v9 }
 0xcc2   :  { %v4068_v20 = vsub.f32 1.0, %v5258_v3  ;;  %v4076_v11 = vmul.f32 %v5258_v3, %v8261_v28  ;;  %v5597_v28 = vld [vmem:[#allocation8 + $0x160] ss:$24 sps:$4 sm:$0xff]  }
 0xcd6   :  { %v3985_v14 = vpop.f32.mrf.mxu1 }
 0xcd7   :  { %v4050_v34 = vadd.f32 %v3985_v14, %v6128_v58 }
 0xcd8   :  { %v3987_v57 = vpop.f32.mrf.mxu1 }
 0xcd9   :  { %v4054_v53 = vmul.f32 %v5246_v38, %v4050_v34  ;;  %v4051_v51 = vadd.f32 %v3987_v57, %v6124_v39  ;;  %v5599_v38 = vld [vmem:[#allocation8 + $0x130] ss:$24 sps:$4 sm:$0xff]   ;;  %v5601_v57 = vld [vmem:[#allocation8 + $0x100] ss:$24 sps:$4 sm:$0xff]  }
 0xcda   :  { %v3989_v47 = vpop.f32.mrf.mxu1 }
 0xcdb   :  { %v4058_v55 = vadd.f32 %v4054_v53, %v932_v18  ;;  %v4055_v48 = vmul.f32 %v5248_v60, %v4051_v51  ;;  %v4052_v27 = vadd.f32 %v3989_v47, %v6128_v58  ;;  %v5603_v18 = vld [vmem:[#allocation8 + $0xd0] ss:$24 sps:$4 sm:$0xff]   ;;  %v5604_v53 = vld [vmem:[#allocation8 + $0xa4] ss:$24 sps:$4 sm:$0xff]   ;;  %v5605_v51 = vld [vmem:[#allocation8 + $0xa0] ss:$24 sps:$4 sm:$0xff]  }
 0xcdc   :  { %v3991_v45 = vpop.f32.mrf.mxu1  ;;  %v5606_v60 = vld [vmem:[#allocation8 + $0x74] ss:$24 sps:$4 sm:$0xff]  }
 0xcdd   :  { %5259 = vtanh.f32 %v4058_v55  ;;  %v4059_v24 = vadd.f32 %v4055_v48, %v934_v52  ;;  %v4056_v43 = vmul.f32 %v5250_v5, %v4052_v27  ;;  %v4053_v63 = vadd.f32 %v3991_v45, %v6124_v39  ;;  %v5608_v52 = vld [vmem:[#allocation8 + $0x44] ss:$24 sps:$4 sm:$0xff]   ;;  %v5610_v47 = vld [vmem:[#allocation8 + $0x14] ss:$24 sps:$4 sm:$0xff]   ;;  %v5611_v55 = vld [vmem:[#allocation8 + $0x10] ss:$24 sps:$4 sm:$0xff]  }
 0xcde   :  { %5261 = vrcp.f32 %v4041_v46  ;;  %v5609_v46 = vld [vmem:[#allocation8 + $0x40] ss:$24 sps:$4 sm:$0xff]   ;;  %v5612_v48 = vld [vmem:[#allocation8 + $0x2e4] ss:$24 sps:$4 sm:$0xff]   ;;  %v5614_v5 = vld [vmem:[#allocation8 + $0x2b4] ss:$24 sps:$4 sm:$0xff]  }
 0xcdf   :  { %5263 = vtanh.f32 %v4059_v24  ;;  %v4060_v1 = vadd.f32 %v4056_v43, %v936_v35  ;;  %v4057_v4 = vmul.f32 %v5252_v62, %v4053_v63  ;;  %v5613_v27 = vld [vmem:[#allocation8 + $0x2e0] ss:$24 sps:$4 sm:$0xff]   ;;  %v5616_v35 = vld [vmem:[#allocation8 + $0x284] ss:$24 sps:$4 sm:$0xff]   ;;  %v5618_v24 = vld [vmem:[#allocation8 + $0x254] ss:$24 sps:$4 sm:$0xff]  }
 0xce0   :  { %v5617_v45 = vld [vmem:[#allocation8 + $0x280] ss:$24 sps:$4 sm:$0xff]   ;;  %v5619_v43 = vld [vmem:[#allocation8 + $0x250] ss:$24 sps:$4 sm:$0xff]   ;;  %v5620_v63 = vld [vmem:[#allocation8 + $0x224] ss:$24 sps:$4 sm:$0xff]  }
 0xce1   :  { %5265 = vtanh.f32 %v4060_v1  ;;  %v4061_v31 = vadd.f32 %v4057_v4, %v938_v21  ;;  %v5621_v62 = vld [vmem:[#allocation8 + $0x220] ss:$24 sps:$4 sm:$0xff]   ;;  %v5623_v21 = vld [vmem:[#allocation8 + $0x1f0] ss:$24 sps:$4 sm:$0xff]   ;;  %v5624_v1 = vld [vmem:[#allocation8 + $0x1c4] ss:$24 sps:$4 sm:$0xff]  }
 0xce2   :  { %v5625_v4 = vld [vmem:[#allocation8 + $0x1c0] ss:$24 sps:$4 sm:$0xff]  }
 0xce3   :  { %5267 = vtanh.f32 %v4061_v31  ;;  %v5626_v31 = vld [vmem:[#allocation8 + $0x194] ss:$24 sps:$4 sm:$0xff]  }
 0xcea   :  { %v5260_v42 = vpop.eup %5259 }
 0xceb   :  { %v5262_v17 = vpop.eup %5261  ;;  %v4070_v32 = vmul.f32 %v5260_v42, %v4066_v61  ;;  %v9746_v61 = vld [vmem:[#allocation55_spill] sm:$0xff] }
 0xcec   :  { %v5264_v56 = vpop.eup %5263  ;;  %v4069_v37 = vsub.f32 1.0, %v5262_v17  ;;  %v4077_v30 = vmul.f32 %v5262_v17, %v8263_v13  ;;  %v5598_v13 = vld [vmem:[#allocation8 + $0x134] ss:$24 sps:$4 sm:$0xff]   ;;  %v636_v42 = vadd.f32 %v9746_v61, %v6050_v54 }
 0xced   :  { %v4071_v7 = vmul.f32 %v5264_v56, %v4067_v0  ;;  %v8399_v10 = vadd.f32 %v4074_v19, %v4070_v32  ;;  %v9747_v0 = vld [vmem:[#allocation56_spill] sm:$0xff]  ;;  %v9748_v56 = vld [vmem:[#allocation57_spill] sm:$0xff] }
 0xcee   :  { %v5266_v29 = vpop.eup %5265  ;;  %v638_v32 = vadd.f32 %v9747_v0, %v9734_v22 }
 0xcef   :  { %v8401_v33 = vadd.f32 %v4075_v59, %v4071_v7  ;;  %v4072_v23 = vmul.f32 %v5266_v29, %v4068_v20  ;;  %v640_v7 = vadd.f32 %v9748_v56, %v6050_v54  ;;  %v9749_v29 = vld [vmem:[#allocation58_spill] sm:$0xff]  ;;  %v9755_v56 = vld [vmem:[#allocation161_spill] sm:$0xff] }
 0xcf0   :  { %v5268_v49 = vpop.eup %5267 }
 0xcf1   :  { %v4073_v14 = vmul.f32 %v5268_v49, %v4069_v37  ;;  %v8405_v25 = vadd.f32 %v4076_v11, %v4072_v23  ;;  %v642_v37 = vadd.f32 %v9749_v29, %v9734_v22  ;;  %v9752_v22 = vld [vmem:[#allocation155_spill] sm:$0xff] }
 0xcf3   :  { %v8407_v44 = vadd.f32 %v4077_v30, %v4073_v14  ;;  %v8413_v34 = vpack.c.bf16 %v8405_v25, %v8399_v10 }
 0xcf5   :  { %v4096_v9 = vpack.c.bf16 %v8407_v44, %v8401_v33 }
 0xcf7   :  { %4129 = vmatprep.mubr.bf16.mxu0 %v4096_v9  ;;  %4172 = vmatprep.mubr.bf16.mxu1 %v4096_v9 }
 0xcf8   :  { %4130 = vmatmul.mubr.bf16.vlgmr.msra.gmra.mxu0 %v8413_v34  ;;  %4173 = vmatmul.mubr.bf16.vlgmr.msra.gmra.mxu1 %v8413_v34 }
 0xcf9   :  { %4184 = vmatpush1.bf16.msra.mxu0 %v5597_v28  ;;  %4215 = vmatprep.mubr.bf16.mxu0 %v4096_v9 }
 0xcfa   :  { %4185 = vmatprep.subr.bf16.mxu0 %v5598_v13  ;;  %v9750_v13 = vld [vmem:[#allocation151_spill] sm:$0xff] }
 0xcfd   :  { %4186 = vmatpush1.bf16.msra.mxu0 %v5599_v38  ;;  %v789_v38 = vadd.f32 %v9750_v13, %v9061_v12 }
 0xcfe   :  { %4187 = vmatprep.subr.bf16.mxu0 %v5600_v26  ;;  %v9751_v26 = vld [vmem:[#allocation153_spill] sm:$0xff] }
 0xd01   :  { %4188 = vmatpush1.bf16.msra.mxu0 %v5601_v57  ;;  %v791_v57 = vadd.f32 %v9751_v26, %v9062_v41 }
 0xd02   :  { %4189 = vmatprep.subr.bf16.mxu0 %v5602_v36 }
 0xd05   :  { %4190 = vmatpush1.bf16.msra.mxu0 %v5603_v18  ;;  %v793_v18 = vadd.f32 %v9752_v22, %v9061_v12 }
 0xd06   :  { %4191 = vmatprep.subr.bf16.mxu0 %v5604_v53 }
 0xd09   :  { %4192 = vmatpush1.bf16.msra.mxu0 %v5605_v51 }
 0xd0a   :  { %4193 = vmatprep.subr.bf16.mxu0 %v5606_v60  ;;  %v9753_v60 = vld [vmem:[#allocation157_spill] sm:$0xff] }
 0xd0d   :  { %4194 = vmatpush1.bf16.msra.mxu0 %v5607_v16  ;;  %v795_v16 = vadd.f32 %v9753_v60, %v9062_v41 }
 0xd0e   :  { %4195 = vmatprep.subr.bf16.mxu0 %v5608_v52 }
 0xd11   :  { %4196 = vmatpush1.bf16.msra.mxu0 %v5609_v46 }
 0xd12   :  { %4197 = vmatprep.subr.bf16.mxu0 %v5610_v47 }
 0xd15   :  { %4198 = vmatpush1.bf16.msra.mxu0 %v5611_v55 }
 0xd16   :  { %4199 = vmatprep.subr.bf16.mxu0 %v5612_v48 }
 0xd19   :  { %4200 = vmatpush2.bf16.msra.mxu0 %v5613_v27 }
 0xd1a   :  { %4201 = vmatprep.subr.bf16.mxu0 %v5614_v5 }
 0xd1d   :  { %4202 = vmatpush2.bf16.msra.mxu0 %v5615_v8 }
 0xd1e   :  { %4203 = vmatprep.subr.bf16.mxu0 %v5616_v35 }
 0xd21   :  { %4204 = vmatpush2.bf16.msra.mxu0 %v5617_v45 }
 0xd22   :  { %4205 = vmatprep.subr.bf16.mxu0 %v5618_v24 }
 0xd25   :  { %4206 = vmatpush2.bf16.msra.mxu0 %v5619_v43 }
 0xd26   :  { %4207 = vmatprep.subr.bf16.mxu0 %v5620_v63 }
 0xd29   :  { %4208 = vmatpush2.bf16.msra.mxu0 %v5621_v62 }
 0xd2a   :  { %4209 = vmatprep.subr.bf16.mxu0 %v5622_v15 }
 0xd2d   :  { %4210 = vmatpush2.bf16.msra.mxu0 %v5623_v21 }
 0xd2e   :  { %4211 = vmatprep.subr.bf16.mxu0 %v5624_v1 }
 0xd31   :  { %4212 = vmatpush2.bf16.msra.mxu0 %v5625_v4 }
 0xd32   :  { %4213 = vmatprep.subr.bf16.mxu0 %v5626_v31 }
 0xd35   :  { %4214 = vmatpush2.bf16.msra.mxu0 %v5627_v6 }
 0xd38   :  { %4216 = vmatmul.mubr.bf16.vlgmr.msra.gmra.mxu0 %v8413_v34 }
 0xdb8   :  { %v4131_v2 = vpop.f32.mrf.mxu0  ;;  %v4174_v11 = vpop.f32.mrf.mxu1 }
 0xdb9   :  { %v4226_v19 = vadd.f32 %v4131_v2, %v636_v42  ;;  %v4254_v36 = vadd.f32 %v4174_v11, %v789_v38  ;;  %v9754_v42 = vld [vmem:[#allocation160_spill] sm:$0xff]  ;;  %v9757_v38 = vld [vmem:[#allocation163_spill] sm:$0xff] }
 0xdba   :  { %v4133_v3 = vpop.f32.mrf.mxu0  ;;  %v4176_v9 = vpop.f32.mrf.mxu1 }
 0xdbb   :  { %v4227_v59 = vadd.f32 %v4133_v3, %v638_v32  ;;  %v4581_v23 = vmul.f32 -1.442695, %v4226_v19  ;;  %v4255_v53 = vadd.f32 %v4176_v9, %v791_v57  ;;  %v4585_v46 = vmul.f32 -1.442695, %v4254_v36 }
 0xdbc   :  { %v4135_v17 = vpop.f32.mrf.mxu0  ;;  %v4178_v54 = vpop.f32.mrf.mxu1 }
 0xdbd   :  { %v4228_v49 = vadd.f32 %v4135_v17, %v640_v7  ;;  %v4582_v14 = vmul.f32 -1.442695, %v4227_v59  ;;  %5269 = vpow2.f32 %v4581_v23  ;;  %v4256_v52 = vadd.f32 %v4178_v54, %v793_v18 }
 0xdbe   :  { %v4137_v20 = vpop.f32.mrf.mxu0  ;;  %v4180_v51 = vpop.f32.mrf.mxu1  ;;  %v4586_v55 = vmul.f32 -1.442695, %v4255_v53  ;;  %v942_v17 = vadd.f32 %v9754_v42, %v6117_v40  ;;  %v944_v7 = vadd.f32 %v9755_v56, %v6120_v50  ;;  %v948_v54 = vadd.f32 %v9757_v38, %v6120_v50 }
 0xdbf   :  { %v4229_v30 = vadd.f32 %v4137_v20, %v642_v37  ;;  %v4583_v34 = vmul.f32 -1.442695, %v4228_v49  ;;  %5271 = vpow2.f32 %v4582_v14  ;;  %v4257_v47 = vadd.f32 %v4180_v51, %v795_v16  ;;  %v9756_v49 = vld [vmem:[#allocation162_spill] sm:$0xff] }
 0xdc0   :  { %v4587_v27 = vmul.f32 -1.442695, %v4256_v52  ;;  %v946_v14 = vadd.f32 %v9756_v49, %v6117_v40 }
 0xdc1   :  { %v4584_v28 = vmul.f32 -1.442695, %v4229_v30  ;;  %5273 = vpow2.f32 %v4583_v34  ;;  %v4588_v8 = vmul.f32 -1.442695, %v4257_v47 }
 0xdc3   :  { %5275 = vpow2.f32 %v4584_v28 }
 0xdc4   :  { %5277 = vpow2.f32 %v4585_v46 }
 0xdc5   :  { %5279 = vpow2.f32 %v4586_v55 }
 0xdc6   :  { %5281 = vpow2.f32 %v4587_v27 }
 0xdc7   :  { %5283 = vpow2.f32 %v4588_v8 }
 0xdca   :  { %v5270_v48 = vpop.eup %5269 }
 0xdcb   :  { %v4242_v35 = vadd.f32 1.0, %v5270_v48 }
 0xdcc   :  { %v5272_v5 = vpop.eup %5271 }
 0xdcd   :  { %v4243_v24 = vadd.f32 1.0, %v5272_v5  ;;  %5285 = vrcp.f32 %v4242_v35 }
 0xdce   :  { %v5274_v45 = vpop.eup %5273 }
 0xdcf   :  { %v4244_v43 = vadd.f32 1.0, %v5274_v45  ;;  %5287 = vrcp.f32 %v4243_v24 }
 0xdd0   :  { %v5276_v12 = vpop.eup %5275 }
 0xdd1   :  { %v4245_v41 = vadd.f32 1.0, %v5276_v12  ;;  %5289 = vrcp.f32 %v4244_v43  ;;  %v5278_v63 = vpop.eup %5277 }
 0xdd2   :  { %v5280_v62 = vpop.eup %5279  ;;  %v4270_v21 = vadd.f32 1.0, %v5278_v63 }
 0xdd3   :  { %5291 = vrcp.f32 %v4245_v41  ;;  %v5282_v15 = vpop.eup %5281  ;;  %v4271_v31 = vadd.f32 1.0, %v5280_v62 }
 0xdd4   :  { %v5284_v4 = vpop.eup %5283  ;;  %v4272_v3 = vadd.f32 1.0, %v5282_v15  ;;  %5293 = vrcp.f32 %v4270_v21 }
 0xdd5   :  { %v4273_v59 = vadd.f32 1.0, %v5284_v4  ;;  %5295 = vrcp.f32 %v4271_v31 }
 0xdd6   :  { %5297 = vrcp.f32 %v4272_v3 }
 0xdda   :  { %v5286_v2 = vpop.eup %5285 }
 0xddc   :  { %v5288_v19 = vpop.eup %5287 }
 0xdde   :  { %v5290_v11 = vpop.eup %5289 }
 0xde0   :  { %v5292_v13 = vpop.eup %5291 }
 0xde1   :  { %v5294_v36 = vpop.eup %5293 }
 0xde2   :  { %v5296_v40 = vpop.eup %5295  ;;  %v4298_v18 = vsub.f32 1.0, %v5294_v36 }
 0xde3   :  { %v5298_v22 = vpop.eup %5297  ;;  %v4299_v60 = vsub.f32 1.0, %v5296_v40  ;;  %v4307_v50 = vmul.f32 %v5296_v40, %v8401_v33 }
 0xde4   :  { %v4300_v46 = vsub.f32 1.0, %v5298_v22  ;;  %v4308_v8 = vmul.f32 %v5298_v22, %v8405_v25 }
 0xdf8   :  { %v4217_v1 = vpop.f32.mrf.mxu0 }
 0xdf9   :  { %v4282_v6 = vadd.f32 %v4217_v1, %v6128_v58 }
 0xdfa   :  { %v4219_v61 = vpop.f32.mrf.mxu0 }
 0xdfb   :  { %v4286_v0 = vmul.f32 %v5286_v2, %v4282_v6  ;;  %v4283_v32 = vadd.f32 %v4219_v61, %v6124_v39 }
 0xdfc   :  { %v4221_v20 = vpop.f32.mrf.mxu0 }
 0xdfd   :  { %v4290_v29 = vadd.f32 %v4286_v0, %v942_v17  ;;  %v4287_v37 = vmul.f32 %v5288_v19, %v4283_v32  ;;  %v4284_v23 = vadd.f32 %v4221_v20, %v6128_v58 }
 0xdfe   :  { %v4223_v30 = vpop.f32.mrf.mxu0 }
 0xdff   :  { %5299 = vtanh.f32 %v4290_v29  ;;  %v4291_v9 = vadd.f32 %v4287_v37, %v944_v7  ;;  %v4288_v34 = vmul.f32 %v5290_v11, %v4284_v23  ;;  %v4285_v28 = vadd.f32 %v4223_v30, %v6124_v39 }
 0xe00   :  { %5301 = vrcp.f32 %v4273_v59  ;;  %v4306_v39 = vmul.f32 %v5294_v36, %v8399_v10 }
 0xe01   :  { %5303 = vtanh.f32 %v4291_v9  ;;  %v4292_v26 = vadd.f32 %v4288_v34, %v946_v14  ;;  %v4289_v57 = vmul.f32 %v5292_v13, %v4285_v28 }
 0xe03   :  { %5305 = vtanh.f32 %v4292_v26  ;;  %v4293_v58 = vadd.f32 %v4289_v57, %v948_v54 }
 0xe05   :  { %5307 = vtanh.f32 %v4293_v58 }
 0xe0c   :  { %v5300_v53 = vpop.eup %5299 }
 0xe0d   :  { %v5302_v51 = vpop.eup %5301  ;;  %v4302_v16 = vmul.f32 %v5300_v53, %v4298_v18 }
 0xe0e   :  { %v5304_v52 = vpop.eup %5303  ;;  %v4301_v27 = vsub.f32 1.0, %v5302_v51  ;;  %v4309_v12 = vmul.f32 %v5302_v51, %v8407_v44 }
 0xe0f   :  { %v4303_v47 = vmul.f32 %v5304_v52, %v4299_v60  ;;  %v4310_v55 = vadd.f32 %v4306_v39, %v4302_v16 }
 0xe10   :  { %v5306_v48 = vpop.eup %5305 }
 0xe11   :  { %v4304_v5 = vmul.f32 %v5306_v48, %v4300_v46  ;;  %v4311_v35 = vadd.f32 %v4307_v50, %v4303_v47  ;;  %4314 = vst [vmem:[#allocation11] sm:$0xff] %v4310_v55 }
 0xe12   :  { %v5308_v45 = vpop.eup %5307 }
 0xe13   :  { %v4305_v24 = vmul.f32 %v5308_v45, %v4301_v27  ;;  %v4312_v10 = vadd.f32 %v4308_v8, %v4304_v5  ;;  %4315 = vst [vmem:[#allocation11 + $0x8] sm:$0xff] %v4311_v35 }
 0xe15   :  { %v4313_v43 = vadd.f32 %v4309_v12, %v4305_v24  ;;  %4316 = vst [vmem:[#allocation11 + $0x10] sm:$0xff] %v4312_v10 }
 0xe17   :  { %4317 = vst [vmem:[#allocation11 + $0x18] sm:$0xff] %v4313_v43 }
 0xe18   :  { %5719 = shalt.err (!%p5716_p10)
}
 0xe19   :  { %s5746_s17 = smov 256   ;;  %s5747_s18 = smov 16  }
 0xe1a   :  { %4329 = dma.vmem_to_hbm [thread:$0]  %s4324_s15, 512, %s8458_s5, [#allocation5], %s5746_s17, %s5746_s17, %s5747_s18  }
 0xe1b   :  { %5734 = dma.done.wait [#allocation5], 512  }
 0xe1c   :  { %5735 = vsyncadd [#allocation5], 4294966784 }
 0xe1d   :  { %4333 = vsyncpa [#allocation4], 1 }
 0xe1e   :  { %4334 = vsyncpa [#allocation7], 1 }
 0xe1f   :  { %4335 = vsyncpa [#allocation10], 1 }
 0xe20   :  { %4336 = vsyncpa [#allocation5], 1 }

</bundles_post_ra>
